<compile_context>
chip_gen: v7x
topology: tpu7x:2x2x1
jax: 0.10.0
libtpu: 0.0.40
codegen_flags: <defaults>
</compile_context>

<pallas_src>
import functools
import math

import jax
import jax.numpy as jnp
from jax.experimental import pallas as pl
from jax.experimental.pallas import tpu as pltpu


# ----------------------------------------------------------------------------
# Tiling helpers
# ----------------------------------------------------------------------------
def _pick_tile(m):
    """M tile: >= 2 grid steps once m >= 128 (lets a v7x chip split the
    "parallel" M axis across its two TensorCores); single step below that,
    where the ~0.35 us/step pipeline overhead exceeds the compute."""
    if m < 128:
        return m
    for tm in (m // 2, 512, 256, 128, 64, 32, 16, 8):
        if 8 <= tm <= 1024 and m % tm == 0 and tm % 8 == 0:
            return tm
    return m


_CONV_COMPILER_PARAMS = pltpu.CompilerParams(
    dimension_semantics=("parallel",),
    vmem_limit_bytes=32 * 1024 * 1024,   # explicit budget; v5e default is 16 MiB
)


# ----------------------------------------------------------------------------
# Pallas kernels
# ----------------------------------------------------------------------------
def _fused_group_kernel(*refs, plan, n_addends):
    """acc = relu(P @ W + b) followed by a static per-node column plan.

    refs = (p_ref, w_ref, b_ref, addend_0..addend_{n-1}, out_0..out_{k-1}).
    plan entries are (kind, col_off, width, has_addend):
      * "pair"  : sum two adjacent width-wide column blocks (the two relu'd
                  branches of one node) -> complete node, stored bf16.
      * "single": one column block; with has_addend the partner branch
                  (computed by an earlier pallas_call) is added before the
                  store, so node sums never go back out to XLA.
    """
    p_ref, w_ref, b_ref = refs[0], refs[1], refs[2]
    addend_refs = refs[3:3 + n_addends]
    out_refs = refs[3 + n_addends:]

    acc = jnp.dot(p_ref[...], w_ref[...], preferred_element_type=jnp.float32)
    acc = jnp.maximum(acc + b_ref[...], 0.0)

    ai = 0
    for (kind, off, width, has_addend), o_ref in zip(plan, out_refs):
        val = acc[:, off:off + width]
        if kind == "pair":
            val = val + acc[:, off + width:off + 2 * width]
        if has_addend:
            val = val + addend_refs[ai][...].astype(jnp.float32)
            ai += 1
        o_ref[...] = val.astype(o_ref.dtype)


def pallas_fused_group(patches, w, b, addends, plan, out_dtype=jnp.bfloat16):
    """Run one fused branch-group (or 1x1 conv) as a single pallas_call."""
    m, k = patches.shape
    wtot = w.shape[1]
    tm = _pick_tile(m)
    n_add = len(addends)
    kplan = tuple((seg[0], seg[1], seg[2], seg[3]) for seg in plan)

    in_specs = [
        pl.BlockSpec((tm, k), lambda i: (i, 0)),
        pl.BlockSpec((k, wtot), lambda i: (0, 0)),
        pl.BlockSpec((1, wtot), lambda i: (0, 0)),
    ]
    for a in addends:
        in_specs.append(pl.BlockSpec((tm, a.shape[1]), lambda i: (i, 0)))

    out_shape = tuple(jax.ShapeDtypeStruct((m, seg[2]), out_dtype) for seg in plan)
    out_specs = tuple(pl.BlockSpec((tm, seg[2]), lambda i: (i, 0)) for seg in plan)

    outs = pl.pallas_call(
        functools.partial(_fused_group_kernel, plan=kplan, n_addends=n_add),
        out_shape=out_shape,
        grid=(m // tm,),
        in_specs=in_specs,
        out_specs=out_specs,
        compiler_params=_CONV_COMPILER_PARAMS,
    )(patches, w, b, *addends)
    if not isinstance(outs, (tuple, list)):
        outs = (outs,)
    return outs


def _dual_pre_kernel(x0_ref, x1_ref, w0_ref, w1_ref, b0_ref, b1_ref,
                     o0_ref, o1_ref):
    # Two independent 1x1 convs in one call (two dots, two outputs) --
    # avoids the block-diagonal matmul's 50% wasted MACs and the XLA concat.
    h0 = jnp.dot(x0_ref[...], w0_ref[...], preferred_element_type=jnp.float32)
    o0_ref[...] = jnp.maximum(h0 + b0_ref[...], 0.0).astype(o0_ref.dtype)
    h1 = jnp.dot(x1_ref[...], w1_ref[...], preferred_element_type=jnp.float32)
    o1_ref[...] = jnp.maximum(h1 + b1_ref[...], 0.0).astype(o1_ref.dtype)


def pallas_dual_pre(x0_flat, x1_flat, w0, b0, w1, b1, out_dtype=jnp.bfloat16):
    m, c0 = x0_flat.shape
    _, c1 = x1_flat.shape
    cc = w0.shape[1]
    tm = _pick_tile(m)
    outs = pl.pallas_call(
        _dual_pre_kernel,
        out_shape=(jax.ShapeDtypeStruct((m, cc), out_dtype),
                   jax.ShapeDtypeStruct((m, cc), out_dtype)),
        grid=(m // tm,),
        in_specs=[
            pl.BlockSpec((tm, c0), lambda i: (i, 0)),
            pl.BlockSpec((tm, c1), lambda i: (i, 0)),
            pl.BlockSpec((c0, cc), lambda i: (0, 0)),
            pl.BlockSpec((c1, cc), lambda i: (0, 0)),
            pl.BlockSpec((1, cc), lambda i: (0, 0)),
            pl.BlockSpec((1, cc), lambda i: (0, 0)),
        ],
        out_specs=(pl.BlockSpec((tm, cc), lambda i: (i, 0)),
                   pl.BlockSpec((tm, cc), lambda i: (i, 0))),
        compiler_params=_CONV_COMPILER_PARAMS,
    )(x0_flat, x1_flat, w0, w1, b0.reshape(1, cc), b1.reshape(1, cc))
    return outs


def _head_kernel(x_ref, w_ref, b_ref, o_ref):
    # Adaptive avg-pool to 1x1 (mean over H*W) fused with the FC layer.
    pooled = jnp.mean(x_ref[...].astype(jnp.float32), axis=1)       # (N, C)
    out = jnp.dot(pooled, w_ref[...], preferred_element_type=jnp.float32)
    o_ref[...] = (out + b_ref[...]).astype(o_ref.dtype)


def pallas_head(feat, fc_w, fc_b):
    """feat: (N, H*W, C) -> logits (N, num_classes); no lane padding, no slice."""
    n, _, _ = feat.shape
    ncls = fc_w.shape[1]
    return pl.pallas_call(
        _head_kernel,
        out_shape=jax.ShapeDtypeStruct((n, ncls), jnp.float32),
        in_specs=[pl.BlockSpec(memory_space=pltpu.MemorySpace.VMEM)] * 3,
        out_specs=pl.BlockSpec(memory_space=pltpu.MemorySpace.VMEM),
    )(feat, fc_w, fc_b.reshape(1, ncls))


# ----------------------------------------------------------------------------
# Conv glue (im2col in plain JAX, fused matmuls in Pallas)
# ----------------------------------------------------------------------------
def _im2col(x, ksize, stride, padding):
    """NHWC im2col -> (N*Hout*Wout, ksize*ksize*Cin), tap-major/channel-minor."""
    n, h, w, c = x.shape
    if padding:
        x = jnp.pad(x, ((0, 0), (padding, padding), (padding, padding), (0, 0)))
    hp, wp = h + 2 * padding, w + 2 * padding
    ho = (hp - ksize) // stride + 1
    wo = (wp - ksize) // stride + 1
    if ksize == 1:
        patches = x[:, ::stride, ::stride, :].reshape(n * ho * wo, c)
        return patches, (n, ho, wo)
    cols = []
    for i in range(ksize):
        for j in range(ksize):
            cols.append(x[:, i:i + stride * ho:stride, j:j + stride * wo:stride, :])
    patches = jnp.concatenate(cols, axis=-1).reshape(n * ho * wo, ksize * ksize * c)
    return patches, (n, ho, wo)


def conv1x1(x, w2d, b, stride):
    patches, (n, ho, wo) = _im2col(x, 1, stride, 0)
    cc = w2d.shape[1]
    plan = (("single", 0, cc, False, None, None),)
    (out,) = pallas_fused_group(patches, w2d, b.reshape(1, cc), [], plan)
    return out.reshape(n, ho, wo, cc)


# ----------------------------------------------------------------------------
# Cell construction (deterministic params + static fusion / addend schedule)
# ----------------------------------------------------------------------------
def _conv_init(key, kh, kw, cin, cout):
    fan_in = kh * kw * cin
    w = jax.random.normal(key, (kh, kw, cin, cout), jnp.float32) / math.sqrt(fan_in)
    b = jnp.zeros((cout,), jnp.float32)
    return w, b


def build_schedule(arch, reduction, num_inputs=2):
    """Greedy wave schedule: in each wave, every not-yet-done conv branch whose
    source node is already computed is grouped by (src, stride) so all branches
    in a group share one im2col + one fused Pallas call."""
    branches = []
    for (n0, _op0, n1, _op1) in arch:
        s0 = 2 if (reduction and n0 < num_inputs) else 1
        s1 = 2 if (reduction and n1 < num_inputs) else 1
        branches.append(((n0, s0), (n1, s1)))
    computed = set(range(num_inputs))
    done = [[False, False] for _ in arch]
    waves = []
    for _ in range(len(arch) + num_inputs):
        if len(computed) == num_inputs + len(arch):
            break
        ready = []
        for oi, brs in enumerate(branches):
            for bi, (src, s) in enumerate(brs):
                if not done[oi][bi] and src in computed:
                    ready.append((oi, bi, src, s))
        assert ready, "arch contains a branch reading an uncomputable node"
        groups = {}
        for oi, bi, src, s in ready:
            groups.setdefault((src, s), []).append((oi, bi))
            done[oi][bi] = True
        waves.append([dict(src=src, stride=s, items=items)
                      for (src, s), items in sorted(groups.items())])
        for oi in range(len(arch)):
            if all(done[oi]):
                computed.add(num_inputs + oi)
    return waves


def make_cell(key, arch, output_sizes, c_cell, reduction):
    (cpp, hpp, wpp), (cp, hp, wp) = output_sizes
    keys = jax.random.split(key, 2 + 2 * len(arch))
    pre0_stride = 2 if hpp != hp else 1
    pre0_w, pre0_b = _conv_init(keys[0], 1, 1, cpp, c_cell)
    pre1_w, pre1_b = _conv_init(keys[1], 1, 1, cp, c_cell)
    pre = dict(
        fused=(pre0_stride == 1 and hpp == hp and wpp == wp),
        w0=pre0_w.reshape(cpp, c_cell).astype(jnp.bfloat16), b0=pre0_b,
        s0=pre0_stride,
        w1=pre1_w.reshape(cp, c_cell).astype(jnp.bfloat16), b1=pre1_b,
    )

    # Per-branch 3x3 conv parameters (every arch op realized as 3x3 conv+ReLU).
    branch_w, branch_b = {}, {}
    ki = 2
    for oi in range(len(arch)):
        for bi in range(2):
            w, b = _conv_init(keys[ki], 3, 3, c_cell, c_cell)
            ki += 1
            branch_w[(oi, bi)] = w.reshape(9 * c_cell, c_cell).astype(jnp.bfloat16)
            branch_b[(oi, bi)] = b

    # Static per-group output plan.  Column layout of the fused weight matches
    # the plan: paired branches adjacent (summed in-kernel), unpaired branches
    # either emitted as a partial (for a later group's addend input) or
    # completed in-kernel by adding the earlier partial.
    groups = []
    produced_partials = set()
    for wave in build_schedule(arch, reduction):
        for g in wave:
            by_op = {}
            for (oi, bi) in g["items"]:
                by_op.setdefault(oi, []).append(bi)
            plan, w_cols, b_cols, addend_keys = [], [], [], []
            off = 0
            for oi in sorted(by_op):
                brs = sorted(by_op[oi])
                if len(brs) == 2:
                    plan.append(("pair", off, c_cell, False, 2 + oi, None))
                    w_cols += [branch_w[(oi, 0)], branch_w[(oi, 1)]]
                    b_cols += [branch_b[(oi, 0)], branch_b[(oi, 1)]]
                    off += 2 * c_cell
                else:
                    bi = brs[0]
                    partner = (oi, 1 - bi)
                    if partner in produced_partials:
                        plan.append(("single", off, c_cell, True, 2 + oi, None))
                        addend_keys.append(partner)
                    else:
                        plan.append(("single", off, c_cell, False, None, (oi, bi)))
                        produced_partials.add((oi, bi))
                    w_cols.append(branch_w[(oi, bi)])
                    b_cols.append(branch_b[(oi, bi)])
                    off += c_cell
            groups.append(dict(
                src=g["src"], stride=g["stride"],
                w=jnp.concatenate(w_cols, axis=1),
                b=jnp.concatenate(b_cols).reshape(1, off),
                plan=tuple(plan),
                addend_keys=tuple(addend_keys),
            ))

    h_out = hp // 2 if reduction else hp
    w_out = wp // 2 if reduction else wp
    return dict(pre=pre, groups=groups, num_ops=len(arch),
                output_size=(c_cell, h_out, w_out))


def cell_forward(cell, x0, x1):
    pre = cell["pre"]
    cc = pre["w0"].shape[1]
    if pre["fused"]:
        n, h, w, c0 = x0.shape
        c1 = x1.shape[-1]
        m = n * h * w
        h0f, h1f = pallas_dual_pre(x0.reshape(m, c0), x1.reshape(m, c1),
                                   pre["w0"], pre["b0"], pre["w1"], pre["b1"])
        h0 = h0f.reshape(n, h, w, cc)
        h1 = h1f.reshape(n, h, w, cc)
    else:
        h0 = conv1x1(x0, pre["w0"], pre["b0"], stride=pre["s0"])
        h1 = conv1x1(x1, pre["w1"], pre["b1"], stride=1)

    nodes = {0: h0, 1: h1}
    partials = {}
    for grp in cell["groups"]:
        patches, (n, ho, wo) = _im2col(nodes[grp["src"]], 3, grp["stride"], 1)
        addends = [partials[k] for k in grp["addend_keys"]]
        outs = pallas_fused_group(patches, grp["w"], grp["b"], addends, grp["plan"])
        for seg, o in zip(grp["plan"], outs):
            _kind, _off, width, _hasadd, node, pkey = seg
            if node is not None:
                nodes[node] = o.reshape(n, ho, wo, width)
            else:
                partials[pkey] = o
    return nodes[2 + cell["num_ops"] - 1]


# ----------------------------------------------------------------------------
# Network (mirrors NASNetwork.__init__ / forward)
# ----------------------------------------------------------------------------
class NASNetworkPallas:
    def __init__(self, archs, input_size, num_classes, num_blocks,
                 num_conv_cells, in_channels, dropout, key):
        self.dropout = dropout           # inference-mode identity
        self.num_classes = num_classes
        conv_arch, reduc_arch = archs[0], archs[1]
        output_sizes = [tuple(input_size), tuple(input_size)]
        self.cells = []
        ch = in_channels
        for _block in range(num_blocks):
            for _conv in range(num_conv_cells):
                key, sub = jax.random.split(key)
                cell = make_cell(sub, conv_arch, output_sizes, ch, reduction=False)
                self.cells.append(cell)
                output_sizes = [output_sizes[-1], cell["output_size"]]
            ch *= 2
            key, sub = jax.random.split(key)
            rcell = make_cell(sub, reduc_arch, output_sizes, ch, reduction=True)
            self.cells.append(rcell)
            output_sizes = [output_sizes[-1], rcell["output_size"]]
        c_final = output_sizes[-1][0]
        key, kfc = jax.random.split(key)
        self.fc_w = jax.random.normal(kfc, (c_final, num_classes),
                                      jnp.float32) / math.sqrt(c_final)
        self.fc_b = jnp.zeros((num_classes,), jnp.float32)

    def __call__(self, x_nchw):
        # NCHW -> NHWC, activations in bf16 end-to-end (f32 accumulation
        # happens inside every kernel).
        x = jnp.transpose(x_nchw, (0, 2, 3, 1)).astype(jnp.bfloat16)
        out0 = x          # stem0 = Identity
        out1 = out0       # stem1 = Identity
        for cell in self.cells:
            out0, out1 = out1, cell_forward(cell, out0, out1)
        n, h, w, c = out1.shape
        feat = out1.reshape(n, h * w, c)
        return pallas_head(feat, self.fc_w, self.fc_b)


if __name__ == "__main__":
    key = jax.random.PRNGKey(0)
    conv_arch = [(0, 3, 0, 3), (0, 3, 0, 3), (0, 3, 0, 3), (4, 3, 4, 3), (0, 3, 4, 3)]
    reduc_arch = [(0, 3, 0, 3), (0, 3, 0, 3), (2, 3, 2, 3), (4, 3, 4, 3), (0, 3, 4, 3)]

    key, pkey, xkey = jax.random.split(key, 3)
    net = NASNetworkPallas(
        archs=(conv_arch, reduc_arch),
        input_size=[4, 16, 16],      # (C, H, W) of input images
        num_classes=10,
        num_blocks=2,
        num_conv_cells=1,
        in_channels=8,               # cell channel width (doubles per block)
        dropout=0.0,
        key=pkey,
    )

    x = jax.random.normal(xkey, (2, 4, 16, 16), jnp.float32)  # NCHW input
    logits = jax.jit(net.__call__)(x)
    jax.block_until_ready(logits)
    assert logits.shape == (2, 10), logits.shape
    print("KERNEL_OK")
</pallas_src>

<mosaic_0001>
module attributes {stable_mosaic.version = 11 : i64} {
  func.func @_dual_pre_kernel(%arg0: i32, %arg1: memref<256x4xbf16, #tpu.memory_space<vmem>>, %arg2: memref<256x4xbf16, #tpu.memory_space<vmem>>, %arg3: memref<4x8xbf16, #tpu.memory_space<vmem>>, %arg4: memref<4x8xbf16, #tpu.memory_space<vmem>>, %arg5: memref<1x8xf32, #tpu.memory_space<vmem>>, %arg6: memref<1x8xf32, #tpu.memory_space<vmem>>, %arg7: memref<256x8xbf16, #tpu.memory_space<vmem>>, %arg8: memref<256x8xbf16, #tpu.memory_space<vmem>>) attributes {dimension_semantics = [#tpu.dimension_semantics<parallel>], iteration_bounds = array<i64: 2>, scalar_prefetch = 0 : i64, scratch_operands = 0 : i64, tpu.core_type = #tpu.core_type<tc>, window_params = [{transform_indices = @transform_0, window_bounds = array<i64: 256, 4>}, {transform_indices = @transform_1, window_bounds = array<i64: 256, 4>}, {pipeline_mode = #tpu.pipeline_mode<synchronous>, transform_indices = @transform_2, window_bounds = array<i64: 4, 8>}, {pipeline_mode = #tpu.pipeline_mode<synchronous>, transform_indices = @transform_3, window_bounds = array<i64: 4, 8>}, {pipeline_mode = #tpu.pipeline_mode<synchronous>, transform_indices = @transform_4, window_bounds = array<i64: 1, 8>}, {pipeline_mode = #tpu.pipeline_mode<synchronous>, transform_indices = @transform_5, window_bounds = array<i64: 1, 8>}, {transform_indices = @transform_6, window_bounds = array<i64: 256, 8>}, {transform_indices = @transform_7, window_bounds = array<i64: 256, 8>}]} {
    %c0 = arith.constant 0 : index
    %c0_0 = arith.constant 0 : index
    %0 = vector.load %arg1[%c0, %c0_0] : memref<256x4xbf16, #tpu.memory_space<vmem>>, vector<256x4xbf16>
    %c0_1 = arith.constant 0 : index
    %c0_2 = arith.constant 0 : index
    %1 = vector.load %arg3[%c0_1, %c0_2] : memref<4x8xbf16, #tpu.memory_space<vmem>>, vector<4x8xbf16>
    %cst = arith.constant dense<0.000000e+00> : vector<256x8xf32>
    %2 = tpu.matmul %0, %1, %cst {dimension_numbers = #tpu.dot_dimension_numbers<[1], [0], [0], [1], [0, 0, 1, 1], [], []>} : vector<256x4xbf16>, vector<4x8xbf16>, vector<256x8xf32> -> vector<256x8xf32>
    %c0_3 = arith.constant 0 : index
    %c0_4 = arith.constant 0 : index
    %3 = vector.load %arg5[%c0_3, %c0_4] : memref<1x8xf32, #tpu.memory_space<vmem>>, vector<1x8xf32>
    %4 = vector.broadcast %3 : vector<1x8xf32> to vector<256x8xf32>
    %5 = arith.addf %2, %4 : vector<256x8xf32>
    %cst_5 = arith.constant 0.000000e+00 : f32
    %6 = vector.broadcast %cst_5 : f32 to vector<256x8xf32>
    %7 = arith.maximumf %5, %6 : vector<256x8xf32>
    %8 = arith.truncf %7 : vector<256x8xf32> to vector<256x8xbf16>
    %c0_6 = arith.constant 0 : index
    %c0_7 = arith.constant 0 : index
    %9 = vector.load %arg7[%c0_6, %c0_7] : memref<256x8xbf16, #tpu.memory_space<vmem>>, vector<256x8xbf16>
    tpu.vector_store %arg7[%c0_6, %c0_7], %8 {strides = array<i32>} : memref<256x8xbf16, #tpu.memory_space<vmem>>, vector<256x8xbf16>,
    %c0_8 = arith.constant 0 : index
    %c0_9 = arith.constant 0 : index
    %10 = vector.load %arg2[%c0_8, %c0_9] : memref<256x4xbf16, #tpu.memory_space<vmem>>, vector<256x4xbf16>
    %c0_10 = arith.constant 0 : index
    %c0_11 = arith.constant 0 : index
    %11 = vector.load %arg4[%c0_10, %c0_11] : memref<4x8xbf16, #tpu.memory_space<vmem>>, vector<4x8xbf16>
    %cst_12 = arith.constant dense<0.000000e+00> : vector<256x8xf32>
    %12 = tpu.matmul %10, %11, %cst_12 {dimension_numbers = #tpu.dot_dimension_numbers<[1], [0], [0], [1], [0, 0, 1, 1], [], []>} : vector<256x4xbf16>, vector<4x8xbf16>, vector<256x8xf32> -> vector<256x8xf32>
    %c0_13 = arith.constant 0 : index
    %c0_14 = arith.constant 0 : index
    %13 = vector.load %arg6[%c0_13, %c0_14] : memref<1x8xf32, #tpu.memory_space<vmem>>, vector<1x8xf32>
    %14 = vector.broadcast %13 : vector<1x8xf32> to vector<256x8xf32>
    %15 = arith.addf %12, %14 : vector<256x8xf32>
    %cst_15 = arith.constant 0.000000e+00 : f32
    %16 = vector.broadcast %cst_15 : f32 to vector<256x8xf32>
    %17 = arith.maximumf %15, %16 : vector<256x8xf32>
    %18 = arith.truncf %17 : vector<256x8xf32> to vector<256x8xbf16>
    %c0_16 = arith.constant 0 : index
    %c0_17 = arith.constant 0 : index
    %19 = vector.load %arg8[%c0_16, %c0_17] : memref<256x8xbf16, #tpu.memory_space<vmem>>, vector<256x8xbf16>
    tpu.vector_store %arg8[%c0_16, %c0_17], %18 {strides = array<i32>} : memref<256x8xbf16, #tpu.memory_space<vmem>>, vector<256x8xbf16>,
    return
  }
  func.func @transform_0(%arg0: i32) -> (i32, i32) {
    %c0_i32 = arith.constant 0 : i32
    %c0_i32_0 = arith.constant 0 : i32
    return %arg0, %c0_i32 : i32, i32
  }
  func.func @transform_1(%arg0: i32) -> (i32, i32) {
    %c0_i32 = arith.constant 0 : i32
    %c0_i32_0 = arith.constant 0 : i32
    return %arg0, %c0_i32 : i32, i32
  }
  func.func @transform_2(%arg0: i32) -> (i32, i32) {
    %c0_i32 = arith.constant 0 : i32
    %c0_i32_0 = arith.constant 0 : i32
    %c0_i32_1 = arith.constant 0 : i32
    return %c0_i32, %c0_i32_0 : i32, i32
  }
  func.func @transform_3(%arg0: i32) -> (i32, i32) {
    %c0_i32 = arith.constant 0 : i32
    %c0_i32_0 = arith.constant 0 : i32
    %c0_i32_1 = arith.constant 0 : i32
    return %c0_i32, %c0_i32_0 : i32, i32
  }
  func.func @transform_4(%arg0: i32) -> (i32, i32) {
    %c0_i32 = arith.constant 0 : i32
    %c0_i32_0 = arith.constant 0 : i32
    %c0_i32_1 = arith.constant 0 : i32
    return %c0_i32, %c0_i32_0 : i32, i32
  }
  func.func @transform_5(%arg0: i32) -> (i32, i32) {
    %c0_i32 = arith.constant 0 : i32
    %c0_i32_0 = arith.constant 0 : i32
    %c0_i32_1 = arith.constant 0 : i32
    return %c0_i32, %c0_i32_0 : i32, i32
  }
  func.func @transform_6(%arg0: i32) -> (i32, i32) {
    %c0_i32 = arith.constant 0 : i32
    %c0_i32_0 = arith.constant 0 : i32
    return %arg0, %c0_i32 : i32, i32
  }
  func.func @transform_7(%arg0: i32) -> (i32, i32) {
    %c0_i32 = arith.constant 0 : i32
    %c0_i32_0 = arith.constant 0 : i32
    return %arg0, %c0_i32 : i32, i32
  }
}

module attributes {stable_mosaic.version = 11 : i64} {
  func.func @_fused_group_kernel(%arg0: i32, %arg1: memref<256x72xbf16, #tpu.memory_space<vmem>>, %arg2: memref<72x56xbf16, #tpu.memory_space<vmem>>, %arg3: memref<1x56xf32, #tpu.memory_space<vmem>>, %arg4: memref<256x8xbf16, #tpu.memory_space<vmem>>, %arg5: memref<256x8xbf16, #tpu.memory_space<vmem>>, %arg6: memref<256x8xbf16, #tpu.memory_space<vmem>>, %arg7: memref<256x8xbf16, #tpu.memory_space<vmem>>) attributes {dimension_semantics = [#tpu.dimension_semantics<parallel>], iteration_bounds = array<i64: 2>, scalar_prefetch = 0 : i64, scratch_operands = 0 : i64, tpu.core_type = #tpu.core_type<tc>, window_params = [{transform_indices = @transform_0, window_bounds = array<i64: 256, 72>}, {pipeline_mode = #tpu.pipeline_mode<synchronous>, transform_indices = @transform_1, window_bounds = array<i64: 72, 56>}, {pipeline_mode = #tpu.pipeline_mode<synchronous>, transform_indices = @transform_2, window_bounds = array<i64: 1, 56>}, {transform_indices = @transform_3, window_bounds = array<i64: 256, 8>}, {transform_indices = @transform_4, window_bounds = array<i64: 256, 8>}, {transform_indices = @transform_5, window_bounds = array<i64: 256, 8>}, {transform_indices = @transform_6, window_bounds = array<i64: 256, 8>}]} {
    %c0 = arith.constant 0 : index
    %c0_0 = arith.constant 0 : index
    %0 = vector.load %arg1[%c0, %c0_0] : memref<256x72xbf16, #tpu.memory_space<vmem>>, vector<256x72xbf16>
    %c0_1 = arith.constant 0 : index
    %c0_2 = arith.constant 0 : index
    %1 = vector.load %arg2[%c0_1, %c0_2] : memref<72x56xbf16, #tpu.memory_space<vmem>>, vector<72x56xbf16>
    %cst = arith.constant dense<0.000000e+00> : vector<256x56xf32>
    %2 = tpu.matmul %0, %1, %cst {dimension_numbers = #tpu.dot_dimension_numbers<[1], [0], [0], [1], [0, 0, 1, 1], [], []>} : vector<256x72xbf16>, vector<72x56xbf16>, vector<256x56xf32> -> vector<256x56xf32>
    %c0_3 = arith.constant 0 : index
    %c0_4 = arith.constant 0 : index
    %3 = vector.load %arg3[%c0_3, %c0_4] : memref<1x56xf32, #tpu.memory_space<vmem>>, vector<1x56xf32>
    %4 = vector.broadcast %3 : vector<1x56xf32> to vector<256x56xf32>
    %5 = arith.addf %2, %4 : vector<256x56xf32>
    %cst_5 = arith.constant 0.000000e+00 : f32
    %6 = vector.broadcast %cst_5 : f32 to vector<256x56xf32>
    %7 = arith.maximumf %5, %6 : vector<256x56xf32>
    %8 = vector.extract_strided_slice %7 {offsets = [0, 0], sizes = [256, 8], strides = [1, 1]} : vector<256x56xf32> to vector<256x8xf32>
    %9 = vector.extract_strided_slice %7 {offsets = [0, 8], sizes = [256, 8], strides = [1, 1]} : vector<256x56xf32> to vector<256x8xf32>
    %10 = arith.addf %8, %9 : vector<256x8xf32>
    %11 = arith.truncf %10 : vector<256x8xf32> to vector<256x8xbf16>
    %c0_6 = arith.constant 0 : index
    %c0_7 = arith.constant 0 : index
    %12 = vector.load %arg4[%c0_6, %c0_7] : memref<256x8xbf16, #tpu.memory_space<vmem>>, vector<256x8xbf16>
    tpu.vector_store %arg4[%c0_6, %c0_7], %11 {strides = array<i32>} : memref<256x8xbf16, #tpu.memory_space<vmem>>, vector<256x8xbf16>,
    %13 = vector.extract_strided_slice %7 {offsets = [0, 16], sizes = [256, 8], strides = [1, 1]} : vector<256x56xf32> to vector<256x8xf32>
    %14 = vector.extract_strided_slice %7 {offsets = [0, 24], sizes = [256, 8], strides = [1, 1]} : vector<256x56xf32> to vector<256x8xf32>
    %15 = arith.addf %13, %14 : vector<256x8xf32>
    %16 = arith.truncf %15 : vector<256x8xf32> to vector<256x8xbf16>
    %c0_8 = arith.constant 0 : index
    %c0_9 = arith.constant 0 : index
    %17 = vector.load %arg5[%c0_8, %c0_9] : memref<256x8xbf16, #tpu.memory_space<vmem>>, vector<256x8xbf16>
    tpu.vector_store %arg5[%c0_8, %c0_9], %16 {strides = array<i32>} : memref<256x8xbf16, #tpu.memory_space<vmem>>, vector<256x8xbf16>,
    %18 = vector.extract_strided_slice %7 {offsets = [0, 32], sizes = [256, 8], strides = [1, 1]} : vector<256x56xf32> to vector<256x8xf32>
    %19 = vector.extract_strided_slice %7 {offsets = [0, 40], sizes = [256, 8], strides = [1, 1]} : vector<256x56xf32> to vector<256x8xf32>
    %20 = arith.addf %18, %19 : vector<256x8xf32>
    %21 = arith.truncf %20 : vector<256x8xf32> to vector<256x8xbf16>
    %c0_10 = arith.constant 0 : index
    %c0_11 = arith.constant 0 : index
    %22 = vector.load %arg6[%c0_10, %c0_11] : memref<256x8xbf16, #tpu.memory_space<vmem>>, vector<256x8xbf16>
    tpu.vector_store %arg6[%c0_10, %c0_11], %21 {strides = array<i32>} : memref<256x8xbf16, #tpu.memory_space<vmem>>, vector<256x8xbf16>,
    %23 = vector.extract_strided_slice %7 {offsets = [0, 48], sizes = [256, 8], strides = [1, 1]} : vector<256x56xf32> to vector<256x8xf32>
    %24 = arith.truncf %23 : vector<256x8xf32> to vector<256x8xbf16>
    %c0_12 = arith.constant 0 : index
    %c0_13 = arith.constant 0 : index
    %25 = vector.load %arg7[%c0_12, %c0_13] : memref<256x8xbf16, #tpu.memory_space<vmem>>, vector<256x8xbf16>
    tpu.vector_store %arg7[%c0_12, %c0_13], %24 {strides = array<i32>} : memref<256x8xbf16, #tpu.memory_space<vmem>>, vector<256x8xbf16>,
    return
  }
  func.func @transform_0(%arg0: i32) -> (i32, i32) {
    %c0_i32 = arith.constant 0 : i32
    %c0_i32_0 = arith.constant 0 : i32
    return %arg0, %c0_i32 : i32, i32
  }
  func.func @transform_1(%arg0: i32) -> (i32, i32) {
    %c0_i32 = arith.constant 0 : i32
    %c0_i32_0 = arith.constant 0 : i32
    %c0_i32_1 = arith.constant 0 : i32
    return %c0_i32, %c0_i32_0 : i32, i32
  }
  func.func @transform_2(%arg0: i32) -> (i32, i32) {
    %c0_i32 = arith.constant 0 : i32
    %c0_i32_0 = arith.constant 0 : i32
    %c0_i32_1 = arith.constant 0 : i32
    return %c0_i32, %c0_i32_0 : i32, i32
  }
  func.func @transform_3(%arg0: i32) -> (i32, i32) {
    %c0_i32 = arith.constant 0 : i32
    %c0_i32_0 = arith.constant 0 : i32
    return %arg0, %c0_i32 : i32, i32
  }
  func.func @transform_4(%arg0: i32) -> (i32, i32) {
    %c0_i32 = arith.constant 0 : i32
    %c0_i32_0 = arith.constant 0 : i32
    return %arg0, %c0_i32 : i32, i32
  }
  func.func @transform_5(%arg0: i32) -> (i32, i32) {
    %c0_i32 = arith.constant 0 : i32
    %c0_i32_0 = arith.constant 0 : i32
    return %arg0, %c0_i32 : i32, i32
  }
  func.func @transform_6(%arg0: i32) -> (i32, i32) {
    %c0_i32 = arith.constant 0 : i32
    %c0_i32_0 = arith.constant 0 : i32
    return %arg0, %c0_i32 : i32, i32
  }
}

module attributes {stable_mosaic.version = 11 : i64} {
  func.func @_fused_group_kernel(%arg0: i32, %arg1: memref<256x72xbf16, #tpu.memory_space<vmem>>, %arg2: memref<72x24xbf16, #tpu.memory_space<vmem>>, %arg3: memref<1x24xf32, #tpu.memory_space<vmem>>, %arg4: memref<256x8xbf16, #tpu.memory_space<vmem>>, %arg5: memref<256x8xbf16, #tpu.memory_space<vmem>>, %arg6: memref<256x8xbf16, #tpu.memory_space<vmem>>) attributes {dimension_semantics = [#tpu.dimension_semantics<parallel>], iteration_bounds = array<i64: 2>, scalar_prefetch = 0 : i64, scratch_operands = 0 : i64, tpu.core_type = #tpu.core_type<tc>, window_params = [{transform_indices = @transform_0, window_bounds = array<i64: 256, 72>}, {pipeline_mode = #tpu.pipeline_mode<synchronous>, transform_indices = @transform_1, window_bounds = array<i64: 72, 24>}, {pipeline_mode = #tpu.pipeline_mode<synchronous>, transform_indices = @transform_2, window_bounds = array<i64: 1, 24>}, {transform_indices = @transform_3, window_bounds = array<i64: 256, 8>}, {transform_indices = @transform_4, window_bounds = array<i64: 256, 8>}, {transform_indices = @transform_5, window_bounds = array<i64: 256, 8>}]} {
    %c0 = arith.constant 0 : index
    %c0_0 = arith.constant 0 : index
    %0 = vector.load %arg1[%c0, %c0_0] : memref<256x72xbf16, #tpu.memory_space<vmem>>, vector<256x72xbf16>
    %c0_1 = arith.constant 0 : index
    %c0_2 = arith.constant 0 : index
    %1 = vector.load %arg2[%c0_1, %c0_2] : memref<72x24xbf16, #tpu.memory_space<vmem>>, vector<72x24xbf16>
    %cst = arith.constant dense<0.000000e+00> : vector<256x24xf32>
    %2 = tpu.matmul %0, %1, %cst {dimension_numbers = #tpu.dot_dimension_numbers<[1], [0], [0], [1], [0, 0, 1, 1], [], []>} : vector<256x72xbf16>, vector<72x24xbf16>, vector<256x24xf32> -> vector<256x24xf32>
    %c0_3 = arith.constant 0 : index
    %c0_4 = arith.constant 0 : index
    %3 = vector.load %arg3[%c0_3, %c0_4] : memref<1x24xf32, #tpu.memory_space<vmem>>, vector<1x24xf32>
    %4 = vector.broadcast %3 : vector<1x24xf32> to vector<256x24xf32>
    %5 = arith.addf %2, %4 : vector<256x24xf32>
    %cst_5 = arith.constant 0.000000e+00 : f32
    %6 = vector.broadcast %cst_5 : f32 to vector<256x24xf32>
    %7 = arith.maximumf %5, %6 : vector<256x24xf32>
    %8 = vector.extract_strided_slice %7 {offsets = [0, 0], sizes = [256, 8], strides = [1, 1]} : vector<256x24xf32> to vector<256x8xf32>
    %9 = vector.extract_strided_slice %7 {offsets = [0, 8], sizes = [256, 8], strides = [1, 1]} : vector<256x24xf32> to vector<256x8xf32>
    %10 = arith.addf %8, %9 : vector<256x8xf32>
    %11 = arith.truncf %10 : vector<256x8xf32> to vector<256x8xbf16>
    %c0_6 = arith.constant 0 : index
    %c0_7 = arith.constant 0 : index
    %12 = vector.load %arg5[%c0_6, %c0_7] : memref<256x8xbf16, #tpu.memory_space<vmem>>, vector<256x8xbf16>
    tpu.vector_store %arg5[%c0_6, %c0_7], %11 {strides = array<i32>} : memref<256x8xbf16, #tpu.memory_space<vmem>>, vector<256x8xbf16>,
    %13 = vector.extract_strided_slice %7 {offsets = [0, 16], sizes = [256, 8], strides = [1, 1]} : vector<256x24xf32> to vector<256x8xf32>
    %c0_8 = arith.constant 0 : index
    %c0_9 = arith.constant 0 : index
    %14 = vector.load %arg4[%c0_8, %c0_9] : memref<256x8xbf16, #tpu.memory_space<vmem>>, vector<256x8xbf16>
    %15 = arith.extf %14 : vector<256x8xbf16> to vector<256x8xf32>
    %16 = arith.addf %13, %15 : vector<256x8xf32>
    %17 = arith.truncf %16 : vector<256x8xf32> to vector<256x8xbf16>
    %c0_10 = arith.constant 0 : index
    %c0_11 = arith.constant 0 : index
    %18 = vector.load %arg6[%c0_10, %c0_11] : memref<256x8xbf16, #tpu.memory_space<vmem>>, vector<256x8xbf16>
    tpu.vector_store %arg6[%c0_10, %c0_11], %17 {strides = array<i32>} : memref<256x8xbf16, #tpu.memory_space<vmem>>, vector<256x8xbf16>,
    return
  }
  func.func @transform_0(%arg0: i32) -> (i32, i32) {
    %c0_i32 = arith.constant 0 : i32
    %c0_i32_0 = arith.constant 0 : i32
    return %arg0, %c0_i32 : i32, i32
  }
  func.func @transform_1(%arg0: i32) -> (i32, i32) {
    %c0_i32 = arith.constant 0 : i32
    %c0_i32_0 = arith.constant 0 : i32
    %c0_i32_1 = arith.constant 0 : i32
    return %c0_i32, %c0_i32_0 : i32, i32
  }
  func.func @transform_2(%arg0: i32) -> (i32, i32) {
    %c0_i32 = arith.constant 0 : i32
    %c0_i32_0 = arith.constant 0 : i32
    %c0_i32_1 = arith.constant 0 : i32
    return %c0_i32, %c0_i32_0 : i32, i32
  }
  func.func @transform_3(%arg0: i32) -> (i32, i32) {
    %c0_i32 = arith.constant 0 : i32
    %c0_i32_0 = arith.constant 0 : i32
    return %arg0, %c0_i32 : i32, i32
  }
  func.func @transform_4(%arg0: i32) -> (i32, i32) {
    %c0_i32 = arith.constant 0 : i32
    %c0_i32_0 = arith.constant 0 : i32
    return %arg0, %c0_i32 : i32, i32
  }
  func.func @transform_5(%arg0: i32) -> (i32, i32) {
    %c0_i32 = arith.constant 0 : i32
    %c0_i32_0 = arith.constant 0 : i32
    return %arg0, %c0_i32 : i32, i32
  }
}

module attributes {stable_mosaic.version = 11 : i64} {
  func.func @_fused_group_kernel(%arg0: i32, %arg1: memref<64x8xbf16, #tpu.memory_space<vmem>>, %arg2: memref<8x16xbf16, #tpu.memory_space<vmem>>, %arg3: memref<1x16xf32, #tpu.memory_space<vmem>>, %arg4: memref<64x16xbf16, #tpu.memory_space<vmem>>) attributes {dimension_semantics = [#tpu.dimension_semantics<parallel>], iteration_bounds = array<i64: 2>, scalar_prefetch = 0 : i64, scratch_operands = 0 : i64, tpu.core_type = #tpu.core_type<tc>, window_params = [{transform_indices = @transform_0, window_bounds = array<i64: 64, 8>}, {pipeline_mode = #tpu.pipeline_mode<synchronous>, transform_indices = @transform_1, window_bounds = array<i64: 8, 16>}, {pipeline_mode = #tpu.pipeline_mode<synchronous>, transform_indices = @transform_2, window_bounds = array<i64: 1, 16>}, {transform_indices = @transform_3, window_bounds = array<i64: 64, 16>}]} {
    %c0 = arith.constant 0 : index
    %c0_0 = arith.constant 0 : index
    %0 = vector.load %arg1[%c0, %c0_0] : memref<64x8xbf16, #tpu.memory_space<vmem>>, vector<64x8xbf16>
    %c0_1 = arith.constant 0 : index
    %c0_2 = arith.constant 0 : index
    %1 = vector.load %arg2[%c0_1, %c0_2] : memref<8x16xbf16, #tpu.memory_space<vmem>>, vector<8x16xbf16>
    %cst = arith.constant dense<0.000000e+00> : vector<64x16xf32>
    %2 = tpu.matmul %0, %1, %cst {dimension_numbers = #tpu.dot_dimension_numbers<[1], [0], [0], [1], [0, 0, 1, 1], [], []>} : vector<64x8xbf16>, vector<8x16xbf16>, vector<64x16xf32> -> vector<64x16xf32>
    %c0_3 = arith.constant 0 : index
    %c0_4 = arith.constant 0 : index
    %3 = vector.load %arg3[%c0_3, %c0_4] : memref<1x16xf32, #tpu.memory_space<vmem>>, vector<1x16xf32>
    %4 = vector.broadcast %3 : vector<1x16xf32> to vector<64x16xf32>
    %5 = arith.addf %2, %4 : vector<64x16xf32>
    %cst_5 = arith.constant 0.000000e+00 : f32
    %6 = vector.broadcast %cst_5 : f32 to vector<64x16xf32>
    %7 = arith.maximumf %5, %6 : vector<64x16xf32>
    %8 = arith.truncf %7 : vector<64x16xf32> to vector<64x16xbf16>
    %c0_6 = arith.constant 0 : index
    %c0_7 = arith.constant 0 : index
    %9 = vector.load %arg4[%c0_6, %c0_7] : memref<64x16xbf16, #tpu.memory_space<vmem>>, vector<64x16xbf16>
    tpu.vector_store %arg4[%c0_6, %c0_7], %8 {strides = array<i32>} : memref<64x16xbf16, #tpu.memory_space<vmem>>, vector<64x16xbf16>,
    return
  }
  func.func @transform_0(%arg0: i32) -> (i32, i32) {
    %c0_i32 = arith.constant 0 : i32
    %c0_i32_0 = arith.constant 0 : i32
    return %arg0, %c0_i32 : i32, i32
  }
  func.func @transform_1(%arg0: i32) -> (i32, i32) {
    %c0_i32 = arith.constant 0 : i32
    %c0_i32_0 = arith.constant 0 : i32
    %c0_i32_1 = arith.constant 0 : i32
    return %c0_i32, %c0_i32_0 : i32, i32
  }
  func.func @transform_2(%arg0: i32) -> (i32, i32) {
    %c0_i32 = arith.constant 0 : i32
    %c0_i32_0 = arith.constant 0 : i32
    %c0_i32_1 = arith.constant 0 : i32
    return %c0_i32, %c0_i32_0 : i32, i32
  }
  func.func @transform_3(%arg0: i32) -> (i32, i32) {
    %c0_i32 = arith.constant 0 : i32
    %c0_i32_0 = arith.constant 0 : i32
    return %arg0, %c0_i32 : i32, i32
  }
}

module attributes {stable_mosaic.version = 11 : i64} {
  func.func @_fused_group_kernel(%arg0: i32, %arg1: memref<64x144xbf16, #tpu.memory_space<vmem>>, %arg2: memref<144x112xbf16, #tpu.memory_space<vmem>>, %arg3: memref<1x112xf32, #tpu.memory_space<vmem>>, %arg4: memref<64x16xbf16, #tpu.memory_space<vmem>>, %arg5: memref<64x16xbf16, #tpu.memory_space<vmem>>, %arg6: memref<64x16xbf16, #tpu.memory_space<vmem>>, %arg7: memref<64x16xbf16, #tpu.memory_space<vmem>>) attributes {dimension_semantics = [#tpu.dimension_semantics<parallel>], iteration_bounds = array<i64: 2>, scalar_prefetch = 0 : i64, scratch_operands = 0 : i64, tpu.core_type = #tpu.core_type<tc>, window_params = [{transform_indices = @transform_0, window_bounds = array<i64: 64, 144>}, {pipeline_mode = #tpu.pipeline_mode<synchronous>, transform_indices = @transform_1, window_bounds = array<i64: 144, 112>}, {pipeline_mode = #tpu.pipeline_mode<synchronous>, transform_indices = @transform_2, window_bounds = array<i64: 1, 112>}, {transform_indices = @transform_3, window_bounds = array<i64: 64, 16>}, {transform_indices = @transform_4, window_bounds = array<i64: 64, 16>}, {transform_indices = @transform_5, window_bounds = array<i64: 64, 16>}, {transform_indices = @transform_6, window_bounds = array<i64: 64, 16>}]} {
    %c0 = arith.constant 0 : index
    %c0_0 = arith.constant 0 : index
    %0 = vector.load %arg1[%c0, %c0_0] : memref<64x144xbf16, #tpu.memory_space<vmem>>, vector<64x144xbf16>
    %c0_1 = arith.constant 0 : index
    %c0_2 = arith.constant 0 : index
    %1 = vector.load %arg2[%c0_1, %c0_2] : memref<144x112xbf16, #tpu.memory_space<vmem>>, vector<144x112xbf16>
    %cst = arith.constant dense<0.000000e+00> : vector<64x112xf32>
    %2 = tpu.matmul %0, %1, %cst {dimension_numbers = #tpu.dot_dimension_numbers<[1], [0], [0], [1], [0, 0, 1, 1], [], []>} : vector<64x144xbf16>, vector<144x112xbf16>, vector<64x112xf32> -> vector<64x112xf32>
    %c0_3 = arith.constant 0 : index
    %c0_4 = arith.constant 0 : index
    %3 = vector.load %arg3[%c0_3, %c0_4] : memref<1x112xf32, #tpu.memory_space<vmem>>, vector<1x112xf32>
    %4 = vector.broadcast %3 : vector<1x112xf32> to vector<64x112xf32>
    %5 = arith.addf %2, %4 : vector<64x112xf32>
    %cst_5 = arith.constant 0.000000e+00 : f32
    %6 = vector.broadcast %cst_5 : f32 to vector<64x112xf32>
    %7 = arith.maximumf %5, %6 : vector<64x112xf32>
    %8 = vector.extract_strided_slice %7 {offsets = [0, 0], sizes = [64, 16], strides = [1, 1]} : vector<64x112xf32> to vector<64x16xf32>
    %9 = vector.extract_strided_slice %7 {offsets = [0, 16], sizes = [64, 16], strides = [1, 1]} : vector<64x112xf32> to vector<64x16xf32>
    %10 = arith.addf %8, %9 : vector<64x16xf32>
    %11 = arith.truncf %10 : vector<64x16xf32> to vector<64x16xbf16>
    %c0_6 = arith.constant 0 : index
    %c0_7 = arith.constant 0 : index
    %12 = vector.load %arg4[%c0_6, %c0_7] : memref<64x16xbf16, #tpu.memory_space<vmem>>, vector<64x16xbf16>
    tpu.vector_store %arg4[%c0_6, %c0_7], %11 {strides = array<i32>} : memref<64x16xbf16, #tpu.memory_space<vmem>>, vector<64x16xbf16>,
    %13 = vector.extract_strided_slice %7 {offsets = [0, 32], sizes = [64, 16], strides = [1, 1]} : vector<64x112xf32> to vector<64x16xf32>
    %14 = vector.extract_strided_slice %7 {offsets = [0, 48], sizes = [64, 16], strides = [1, 1]} : vector<64x112xf32> to vector<64x16xf32>
    %15 = arith.addf %13, %14 : vector<64x16xf32>
    %16 = arith.truncf %15 : vector<64x16xf32> to vector<64x16xbf16>
    %c0_8 = arith.constant 0 : index
    %c0_9 = arith.constant 0 : index
    %17 = vector.load %arg5[%c0_8, %c0_9] : memref<64x16xbf16, #tpu.memory_space<vmem>>, vector<64x16xbf16>
    tpu.vector_store %arg5[%c0_8, %c0_9], %16 {strides = array<i32>} : memref<64x16xbf16, #tpu.memory_space<vmem>>, vector<64x16xbf16>,
    %18 = vector.extract_strided_slice %7 {offsets = [0, 64], sizes = [64, 16], strides = [1, 1]} : vector<64x112xf32> to vector<64x16xf32>
    %19 = vector.extract_strided_slice %7 {offsets = [0, 80], sizes = [64, 16], strides = [1, 1]} : vector<64x112xf32> to vector<64x16xf32>
    %20 = arith.addf %18, %19 : vector<64x16xf32>
    %21 = arith.truncf %20 : vector<64x16xf32> to vector<64x16xbf16>
    %c0_10 = arith.constant 0 : index
    %c0_11 = arith.constant 0 : index
    %22 = vector.load %arg6[%c0_10, %c0_11] : memref<64x16xbf16, #tpu.memory_space<vmem>>, vector<64x16xbf16>
    tpu.vector_store %arg6[%c0_10, %c0_11], %21 {strides = array<i32>} : memref<64x16xbf16, #tpu.memory_space<vmem>>, vector<64x16xbf16>,
    %23 = vector.extract_strided_slice %7 {offsets = [0, 96], sizes = [64, 16], strides = [1, 1]} : vector<64x112xf32> to vector<64x16xf32>
    %24 = arith.truncf %23 : vector<64x16xf32> to vector<64x16xbf16>
    %c0_12 = arith.constant 0 : index
    %c0_13 = arith.constant 0 : index
    %25 = vector.load %arg7[%c0_12, %c0_13] : memref<64x16xbf16, #tpu.memory_space<vmem>>, vector<64x16xbf16>
    tpu.vector_store %arg7[%c0_12, %c0_13], %24 {strides = array<i32>} : memref<64x16xbf16, #tpu.memory_space<vmem>>, vector<64x16xbf16>,
    return
  }
  func.func @transform_0(%arg0: i32) -> (i32, i32) {
    %c0_i32 = arith.constant 0 : i32
    %c0_i32_0 = arith.constant 0 : i32
    return %arg0, %c0_i32 : i32, i32
  }
  func.func @transform_1(%arg0: i32) -> (i32, i32) {
    %c0_i32 = arith.constant 0 : i32
    %c0_i32_0 = arith.constant 0 : i32
    %c0_i32_1 = arith.constant 0 : i32
    return %c0_i32, %c0_i32_0 : i32, i32
  }
  func.func @transform_2(%arg0: i32) -> (i32, i32) {
    %c0_i32 = arith.constant 0 : i32
    %c0_i32_0 = arith.constant 0 : i32
    %c0_i32_1 = arith.constant 0 : i32
    return %c0_i32, %c0_i32_0 : i32, i32
  }
  func.func @transform_3(%arg0: i32) -> (i32, i32) {
    %c0_i32 = arith.constant 0 : i32
    %c0_i32_0 = arith.constant 0 : i32
    return %arg0, %c0_i32 : i32, i32
  }
  func.func @transform_4(%arg0: i32) -> (i32, i32) {
    %c0_i32 = arith.constant 0 : i32
    %c0_i32_0 = arith.constant 0 : i32
    return %arg0, %c0_i32 : i32, i32
  }
  func.func @transform_5(%arg0: i32) -> (i32, i32) {
    %c0_i32 = arith.constant 0 : i32
    %c0_i32_0 = arith.constant 0 : i32
    return %arg0, %c0_i32 : i32, i32
  }
  func.func @transform_6(%arg0: i32) -> (i32, i32) {
    %c0_i32 = arith.constant 0 : i32
    %c0_i32_0 = arith.constant 0 : i32
    return %arg0, %c0_i32 : i32, i32
  }
}

module attributes {stable_mosaic.version = 11 : i64} {
  func.func @_fused_group_kernel(%arg0: i32, %arg1: memref<64x144xbf16, #tpu.memory_space<vmem>>, %arg2: memref<144x48xbf16, #tpu.memory_space<vmem>>, %arg3: memref<1x48xf32, #tpu.memory_space<vmem>>, %arg4: memref<64x16xbf16, #tpu.memory_space<vmem>>, %arg5: memref<64x16xbf16, #tpu.memory_space<vmem>>, %arg6: memref<64x16xbf16, #tpu.memory_space<vmem>>) attributes {dimension_semantics = [#tpu.dimension_semantics<parallel>], iteration_bounds = array<i64: 2>, scalar_prefetch = 0 : i64, scratch_operands = 0 : i64, tpu.core_type = #tpu.core_type<tc>, window_params = [{transform_indices = @transform_0, window_bounds = array<i64: 64, 144>}, {pipeline_mode = #tpu.pipeline_mode<synchronous>, transform_indices = @transform_1, window_bounds = array<i64: 144, 48>}, {pipeline_mode = #tpu.pipeline_mode<synchronous>, transform_indices = @transform_2, window_bounds = array<i64: 1, 48>}, {transform_indices = @transform_3, window_bounds = array<i64: 64, 16>}, {transform_indices = @transform_4, window_bounds = array<i64: 64, 16>}, {transform_indices = @transform_5, window_bounds = array<i64: 64, 16>}]} {
    %c0 = arith.constant 0 : index
    %c0_0 = arith.constant 0 : index
    %0 = vector.load %arg1[%c0, %c0_0] : memref<64x144xbf16, #tpu.memory_space<vmem>>, vector<64x144xbf16>
    %c0_1 = arith.constant 0 : index
    %c0_2 = arith.constant 0 : index
    %1 = vector.load %arg2[%c0_1, %c0_2] : memref<144x48xbf16, #tpu.memory_space<vmem>>, vector<144x48xbf16>
    %cst = arith.constant dense<0.000000e+00> : vector<64x48xf32>
    %2 = tpu.matmul %0, %1, %cst {dimension_numbers = #tpu.dot_dimension_numbers<[1], [0], [0], [1], [0, 0, 1, 1], [], []>} : vector<64x144xbf16>, vector<144x48xbf16>, vector<64x48xf32> -> vector<64x48xf32>
    %c0_3 = arith.constant 0 : index
    %c0_4 = arith.constant 0 : index
    %3 = vector.load %arg3[%c0_3, %c0_4] : memref<1x48xf32, #tpu.memory_space<vmem>>, vector<1x48xf32>
    %4 = vector.broadcast %3 : vector<1x48xf32> to vector<64x48xf32>
    %5 = arith.addf %2, %4 : vector<64x48xf32>
    %cst_5 = arith.constant 0.000000e+00 : f32
    %6 = vector.broadcast %cst_5 : f32 to vector<64x48xf32>
    %7 = arith.maximumf %5, %6 : vector<64x48xf32>
    %8 = vector.extract_strided_slice %7 {offsets = [0, 0], sizes = [64, 16], strides = [1, 1]} : vector<64x48xf32> to vector<64x16xf32>
    %9 = vector.extract_strided_slice %7 {offsets = [0, 16], sizes = [64, 16], strides = [1, 1]} : vector<64x48xf32> to vector<64x16xf32>
    %10 = arith.addf %8, %9 : vector<64x16xf32>
    %11 = arith.truncf %10 : vector<64x16xf32> to vector<64x16xbf16>
    %c0_6 = arith.constant 0 : index
    %c0_7 = arith.constant 0 : index
    %12 = vector.load %arg5[%c0_6, %c0_7] : memref<64x16xbf16, #tpu.memory_space<vmem>>, vector<64x16xbf16>
    tpu.vector_store %arg5[%c0_6, %c0_7], %11 {strides = array<i32>} : memref<64x16xbf16, #tpu.memory_space<vmem>>, vector<64x16xbf16>,
    %13 = vector.extract_strided_slice %7 {offsets = [0, 32], sizes = [64, 16], strides = [1, 1]} : vector<64x48xf32> to vector<64x16xf32>
    %c0_8 = arith.constant 0 : index
    %c0_9 = arith.constant 0 : index
    %14 = vector.load %arg4[%c0_8, %c0_9] : memref<64x16xbf16, #tpu.memory_space<vmem>>, vector<64x16xbf16>
    %15 = arith.extf %14 : vector<64x16xbf16> to vector<64x16xf32>
    %16 = arith.addf %13, %15 : vector<64x16xf32>
    %17 = arith.truncf %16 : vector<64x16xf32> to vector<64x16xbf16>
    %c0_10 = arith.constant 0 : index
    %c0_11 = arith.constant 0 : index
    %18 = vector.load %arg6[%c0_10, %c0_11] : memref<64x16xbf16, #tpu.memory_space<vmem>>, vector<64x16xbf16>
    tpu.vector_store %arg6[%c0_10, %c0_11], %17 {strides = array<i32>} : memref<64x16xbf16, #tpu.memory_space<vmem>>, vector<64x16xbf16>,
    return
  }
  func.func @transform_0(%arg0: i32) -> (i32, i32) {
    %c0_i32 = arith.constant 0 : i32
    %c0_i32_0 = arith.constant 0 : i32
    return %arg0, %c0_i32 : i32, i32
  }
  func.func @transform_1(%arg0: i32) -> (i32, i32) {
    %c0_i32 = arith.constant 0 : i32
    %c0_i32_0 = arith.constant 0 : i32
    %c0_i32_1 = arith.constant 0 : i32
    return %c0_i32, %c0_i32_0 : i32, i32
  }
  func.func @transform_2(%arg0: i32) -> (i32, i32) {
    %c0_i32 = arith.constant 0 : i32
    %c0_i32_0 = arith.constant 0 : i32
    %c0_i32_1 = arith.constant 0 : i32
    return %c0_i32, %c0_i32_0 : i32, i32
  }
  func.func @transform_3(%arg0: i32) -> (i32, i32) {
    %c0_i32 = arith.constant 0 : i32
    %c0_i32_0 = arith.constant 0 : i32
    return %arg0, %c0_i32 : i32, i32
  }
  func.func @transform_4(%arg0: i32) -> (i32, i32) {
    %c0_i32 = arith.constant 0 : i32
    %c0_i32_0 = arith.constant 0 : i32
    return %arg0, %c0_i32 : i32, i32
  }
  func.func @transform_5(%arg0: i32) -> (i32, i32) {
    %c0_i32 = arith.constant 0 : i32
    %c0_i32_0 = arith.constant 0 : i32
    return %arg0, %c0_i32 : i32, i32
  }
}

module attributes {stable_mosaic.version = 11 : i64} {
  func.func @_dual_pre_kernel(%arg0: i32, %arg1: memref<256x4xbf16, #tpu.memory_space<vmem>>, %arg2: memref<256x8xbf16, #tpu.memory_space<vmem>>, %arg3: memref<4x16xbf16, #tpu.memory_space<vmem>>, %arg4: memref<8x16xbf16, #tpu.memory_space<vmem>>, %arg5: memref<1x16xf32, #tpu.memory_space<vmem>>, %arg6: memref<1x16xf32, #tpu.memory_space<vmem>>, %arg7: memref<256x16xbf16, #tpu.memory_space<vmem>>, %arg8: memref<256x16xbf16, #tpu.memory_space<vmem>>) attributes {dimension_semantics = [#tpu.dimension_semantics<parallel>], iteration_bounds = array<i64: 2>, scalar_prefetch = 0 : i64, scratch_operands = 0 : i64, tpu.core_type = #tpu.core_type<tc>, window_params = [{transform_indices = @transform_0, window_bounds = array<i64: 256, 4>}, {transform_indices = @transform_1, window_bounds = array<i64: 256, 8>}, {pipeline_mode = #tpu.pipeline_mode<synchronous>, transform_indices = @transform_2, window_bounds = array<i64: 4, 16>}, {pipeline_mode = #tpu.pipeline_mode<synchronous>, transform_indices = @transform_3, window_bounds = array<i64: 8, 16>}, {pipeline_mode = #tpu.pipeline_mode<synchronous>, transform_indices = @transform_4, window_bounds = array<i64: 1, 16>}, {pipeline_mode = #tpu.pipeline_mode<synchronous>, transform_indices = @transform_5, window_bounds = array<i64: 1, 16>}, {transform_indices = @transform_6, window_bounds = array<i64: 256, 16>}, {transform_indices = @transform_7, window_bounds = array<i64: 256, 16>}]} {
    %c0 = arith.constant 0 : index
    %c0_0 = arith.constant 0 : index
    %0 = vector.load %arg1[%c0, %c0_0] : memref<256x4xbf16, #tpu.memory_space<vmem>>, vector<256x4xbf16>
    %c0_1 = arith.constant 0 : index
    %c0_2 = arith.constant 0 : index
    %1 = vector.load %arg3[%c0_1, %c0_2] : memref<4x16xbf16, #tpu.memory_space<vmem>>, vector<4x16xbf16>
    %cst = arith.constant dense<0.000000e+00> : vector<256x16xf32>
    %2 = tpu.matmul %0, %1, %cst {dimension_numbers = #tpu.dot_dimension_numbers<[1], [0], [0], [1], [0, 0, 1, 1], [], []>} : vector<256x4xbf16>, vector<4x16xbf16>, vector<256x16xf32> -> vector<256x16xf32>
    %c0_3 = arith.constant 0 : index
    %c0_4 = arith.constant 0 : index
    %3 = vector.load %arg5[%c0_3, %c0_4] : memref<1x16xf32, #tpu.memory_space<vmem>>, vector<1x16xf32>
    %4 = vector.broadcast %3 : vector<1x16xf32> to vector<256x16xf32>
    %5 = arith.addf %2, %4 : vector<256x16xf32>
    %cst_5 = arith.constant 0.000000e+00 : f32
    %6 = vector.broadcast %cst_5 : f32 to vector<256x16xf32>
    %7 = arith.maximumf %5, %6 : vector<256x16xf32>
    %8 = arith.truncf %7 : vector<256x16xf32> to vector<256x16xbf16>
    %c0_6 = arith.constant 0 : index
    %c0_7 = arith.constant 0 : index
    %9 = vector.load %arg7[%c0_6, %c0_7] : memref<256x16xbf16, #tpu.memory_space<vmem>>, vector<256x16xbf16>
    tpu.vector_store %arg7[%c0_6, %c0_7], %8 {strides = array<i32>} : memref<256x16xbf16, #tpu.memory_space<vmem>>, vector<256x16xbf16>,
    %c0_8 = arith.constant 0 : index
    %c0_9 = arith.constant 0 : index
    %10 = vector.load %arg2[%c0_8, %c0_9] : memref<256x8xbf16, #tpu.memory_space<vmem>>, vector<256x8xbf16>
    %c0_10 = arith.constant 0 : index
    %c0_11 = arith.constant 0 : index
    %11 = vector.load %arg4[%c0_10, %c0_11] : memref<8x16xbf16, #tpu.memory_space<vmem>>, vector<8x16xbf16>
    %cst_12 = arith.constant dense<0.000000e+00> : vector<256x16xf32>
    %12 = tpu.matmul %10, %11, %cst_12 {dimension_numbers = #tpu.dot_dimension_numbers<[1], [0], [0], [1], [0, 0, 1, 1], [], []>} : vector<256x8xbf16>, vector<8x16xbf16>, vector<256x16xf32> -> vector<256x16xf32>
    %c0_13 = arith.constant 0 : index
    %c0_14 = arith.constant 0 : index
    %13 = vector.load %arg6[%c0_13, %c0_14] : memref<1x16xf32, #tpu.memory_space<vmem>>, vector<1x16xf32>
    %14 = vector.broadcast %13 : vector<1x16xf32> to vector<256x16xf32>
    %15 = arith.addf %12, %14 : vector<256x16xf32>
    %cst_15 = arith.constant 0.000000e+00 : f32
    %16 = vector.broadcast %cst_15 : f32 to vector<256x16xf32>
    %17 = arith.maximumf %15, %16 : vector<256x16xf32>
    %18 = arith.truncf %17 : vector<256x16xf32> to vector<256x16xbf16>
    %c0_16 = arith.constant 0 : index
    %c0_17 = arith.constant 0 : index
    %19 = vector.load %arg8[%c0_16, %c0_17] : memref<256x16xbf16, #tpu.memory_space<vmem>>, vector<256x16xbf16>
    tpu.vector_store %arg8[%c0_16, %c0_17], %18 {strides = array<i32>} : memref<256x16xbf16, #tpu.memory_space<vmem>>, vector<256x16xbf16>,
    return
  }
  func.func @transform_0(%arg0: i32) -> (i32, i32) {
    %c0_i32 = arith.constant 0 : i32
    %c0_i32_0 = arith.constant 0 : i32
    return %arg0, %c0_i32 : i32, i32
  }
  func.func @transform_1(%arg0: i32) -> (i32, i32) {
    %c0_i32 = arith.constant 0 : i32
    %c0_i32_0 = arith.constant 0 : i32
    return %arg0, %c0_i32 : i32, i32
  }
  func.func @transform_2(%arg0: i32) -> (i32, i32) {
    %c0_i32 = arith.constant 0 : i32
    %c0_i32_0 = arith.constant 0 : i32
    %c0_i32_1 = arith.constant 0 : i32
    return %c0_i32, %c0_i32_0 : i32, i32
  }
  func.func @transform_3(%arg0: i32) -> (i32, i32) {
    %c0_i32 = arith.constant 0 : i32
    %c0_i32_0 = arith.constant 0 : i32
    %c0_i32_1 = arith.constant 0 : i32
    return %c0_i32, %c0_i32_0 : i32, i32
  }
  func.func @transform_4(%arg0: i32) -> (i32, i32) {
    %c0_i32 = arith.constant 0 : i32
    %c0_i32_0 = arith.constant 0 : i32
    %c0_i32_1 = arith.constant 0 : i32
    return %c0_i32, %c0_i32_0 : i32, i32
  }
  func.func @transform_5(%arg0: i32) -> (i32, i32) {
    %c0_i32 = arith.constant 0 : i32
    %c0_i32_0 = arith.constant 0 : i32
    %c0_i32_1 = arith.constant 0 : i32
    return %c0_i32, %c0_i32_0 : i32, i32
  }
  func.func @transform_6(%arg0: i32) -> (i32, i32) {
    %c0_i32 = arith.constant 0 : i32
    %c0_i32_0 = arith.constant 0 : i32
    return %arg0, %c0_i32 : i32, i32
  }
  func.func @transform_7(%arg0: i32) -> (i32, i32) {
    %c0_i32 = arith.constant 0 : i32
    %c0_i32_0 = arith.constant 0 : i32
    return %arg0, %c0_i32 : i32, i32
  }
}

module attributes {stable_mosaic.version = 11 : i64} {
  func.func @_dual_pre_kernel(%arg0: i32, %arg1: memref<64x16xbf16, #tpu.memory_space<vmem>>, %arg2: memref<64x16xbf16, #tpu.memory_space<vmem>>, %arg3: memref<16x32xbf16, #tpu.memory_space<vmem>>, %arg4: memref<16x32xbf16, #tpu.memory_space<vmem>>, %arg5: memref<1x32xf32, #tpu.memory_space<vmem>>, %arg6: memref<1x32xf32, #tpu.memory_space<vmem>>, %arg7: memref<64x32xbf16, #tpu.memory_space<vmem>>, %arg8: memref<64x32xbf16, #tpu.memory_space<vmem>>) attributes {dimension_semantics = [#tpu.dimension_semantics<parallel>], iteration_bounds = array<i64: 2>, scalar_prefetch = 0 : i64, scratch_operands = 0 : i64, tpu.core_type = #tpu.core_type<tc>, window_params = [{transform_indices = @transform_0, window_bounds = array<i64: 64, 16>}, {transform_indices = @transform_1, window_bounds = array<i64: 64, 16>}, {pipeline_mode = #tpu.pipeline_mode<synchronous>, transform_indices = @transform_2, window_bounds = array<i64: 16, 32>}, {pipeline_mode = #tpu.pipeline_mode<synchronous>, transform_indices = @transform_3, window_bounds = array<i64: 16, 32>}, {pipeline_mode = #tpu.pipeline_mode<synchronous>, transform_indices = @transform_4, window_bounds = array<i64: 1, 32>}, {pipeline_mode = #tpu.pipeline_mode<synchronous>, transform_indices = @transform_5, window_bounds = array<i64: 1, 32>}, {transform_indices = @transform_6, window_bounds = array<i64: 64, 32>}, {transform_indices = @transform_7, window_bounds = array<i64: 64, 32>}]} {
    %c0 = arith.constant 0 : index
    %c0_0 = arith.constant 0 : index
    %0 = vector.load %arg1[%c0, %c0_0] : memref<64x16xbf16, #tpu.memory_space<vmem>>, vector<64x16xbf16>
    %c0_1 = arith.constant 0 : index
    %c0_2 = arith.constant 0 : index
    %1 = vector.load %arg3[%c0_1, %c0_2] : memref<16x32xbf16, #tpu.memory_space<vmem>>, vector<16x32xbf16>
    %cst = arith.constant dense<0.000000e+00> : vector<64x32xf32>
    %2 = tpu.matmul %0, %1, %cst {dimension_numbers = #tpu.dot_dimension_numbers<[1], [0], [0], [1], [0, 0, 1, 1], [], []>} : vector<64x16xbf16>, vector<16x32xbf16>, vector<64x32xf32> -> vector<64x32xf32>
    %c0_3 = arith.constant 0 : index
    %c0_4 = arith.constant 0 : index
    %3 = vector.load %arg5[%c0_3, %c0_4] : memref<1x32xf32, #tpu.memory_space<vmem>>, vector<1x32xf32>
    %4 = vector.broadcast %3 : vector<1x32xf32> to vector<64x32xf32>
    %5 = arith.addf %2, %4 : vector<64x32xf32>
    %cst_5 = arith.constant 0.000000e+00 : f32
    %6 = vector.broadcast %cst_5 : f32 to vector<64x32xf32>
    %7 = arith.maximumf %5, %6 : vector<64x32xf32>
    %8 = arith.truncf %7 : vector<64x32xf32> to vector<64x32xbf16>
    %c0_6 = arith.constant 0 : index
    %c0_7 = arith.constant 0 : index
    %9 = vector.load %arg7[%c0_6, %c0_7] : memref<64x32xbf16, #tpu.memory_space<vmem>>, vector<64x32xbf16>
    tpu.vector_store %arg7[%c0_6, %c0_7], %8 {strides = array<i32>} : memref<64x32xbf16, #tpu.memory_space<vmem>>, vector<64x32xbf16>,
    %c0_8 = arith.constant 0 : index
    %c0_9 = arith.constant 0 : index
    %10 = vector.load %arg2[%c0_8, %c0_9] : memref<64x16xbf16, #tpu.memory_space<vmem>>, vector<64x16xbf16>
    %c0_10 = arith.constant 0 : index
    %c0_11 = arith.constant 0 : index
    %11 = vector.load %arg4[%c0_10, %c0_11] : memref<16x32xbf16, #tpu.memory_space<vmem>>, vector<16x32xbf16>
    %cst_12 = arith.constant dense<0.000000e+00> : vector<64x32xf32>
    %12 = tpu.matmul %10, %11, %cst_12 {dimension_numbers = #tpu.dot_dimension_numbers<[1], [0], [0], [1], [0, 0, 1, 1], [], []>} : vector<64x16xbf16>, vector<16x32xbf16>, vector<64x32xf32> -> vector<64x32xf32>
    %c0_13 = arith.constant 0 : index
    %c0_14 = arith.constant 0 : index
    %13 = vector.load %arg6[%c0_13, %c0_14] : memref<1x32xf32, #tpu.memory_space<vmem>>, vector<1x32xf32>
    %14 = vector.broadcast %13 : vector<1x32xf32> to vector<64x32xf32>
    %15 = arith.addf %12, %14 : vector<64x32xf32>
    %cst_15 = arith.constant 0.000000e+00 : f32
    %16 = vector.broadcast %cst_15 : f32 to vector<64x32xf32>
    %17 = arith.maximumf %15, %16 : vector<64x32xf32>
    %18 = arith.truncf %17 : vector<64x32xf32> to vector<64x32xbf16>
    %c0_16 = arith.constant 0 : index
    %c0_17 = arith.constant 0 : index
    %19 = vector.load %arg8[%c0_16, %c0_17] : memref<64x32xbf16, #tpu.memory_space<vmem>>, vector<64x32xbf16>
    tpu.vector_store %arg8[%c0_16, %c0_17], %18 {strides = array<i32>} : memref<64x32xbf16, #tpu.memory_space<vmem>>, vector<64x32xbf16>,
    return
  }
  func.func @transform_0(%arg0: i32) -> (i32, i32) {
    %c0_i32 = arith.constant 0 : i32
    %c0_i32_0 = arith.constant 0 : i32
    return %arg0, %c0_i32 : i32, i32
  }
  func.func @transform_1(%arg0: i32) -> (i32, i32) {
    %c0_i32 = arith.constant 0 : i32
    %c0_i32_0 = arith.constant 0 : i32
    return %arg0, %c0_i32 : i32, i32
  }
  func.func @transform_2(%arg0: i32) -> (i32, i32) {
    %c0_i32 = arith.constant 0 : i32
    %c0_i32_0 = arith.constant 0 : i32
    %c0_i32_1 = arith.constant 0 : i32
    return %c0_i32, %c0_i32_0 : i32, i32
  }
  func.func @transform_3(%arg0: i32) -> (i32, i32) {
    %c0_i32 = arith.constant 0 : i32
    %c0_i32_0 = arith.constant 0 : i32
    %c0_i32_1 = arith.constant 0 : i32
    return %c0_i32, %c0_i32_0 : i32, i32
  }
  func.func @transform_4(%arg0: i32) -> (i32, i32) {
    %c0_i32 = arith.constant 0 : i32
    %c0_i32_0 = arith.constant 0 : i32
    %c0_i32_1 = arith.constant 0 : i32
    return %c0_i32, %c0_i32_0 : i32, i32
  }
  func.func @transform_5(%arg0: i32) -> (i32, i32) {
    %c0_i32 = arith.constant 0 : i32
    %c0_i32_0 = arith.constant 0 : i32
    %c0_i32_1 = arith.constant 0 : i32
    return %c0_i32, %c0_i32_0 : i32, i32
  }
  func.func @transform_6(%arg0: i32) -> (i32, i32) {
    %c0_i32 = arith.constant 0 : i32
    %c0_i32_0 = arith.constant 0 : i32
    return %arg0, %c0_i32 : i32, i32
  }
  func.func @transform_7(%arg0: i32) -> (i32, i32) {
    %c0_i32 = arith.constant 0 : i32
    %c0_i32_0 = arith.constant 0 : i32
    return %arg0, %c0_i32 : i32, i32
  }
}

module attributes {stable_mosaic.version = 11 : i64} {
  func.func @_fused_group_kernel(%arg0: i32, %arg1: memref<64x144xbf16, #tpu.memory_space<vmem>>, %arg2: memref<144x32xbf16, #tpu.memory_space<vmem>>, %arg3: memref<1x32xf32, #tpu.memory_space<vmem>>, %arg4: memref<64x16xbf16, #tpu.memory_space<vmem>>) attributes {dimension_semantics = [#tpu.dimension_semantics<parallel>], iteration_bounds = array<i64: 2>, scalar_prefetch = 0 : i64, scratch_operands = 0 : i64, tpu.core_type = #tpu.core_type<tc>, window_params = [{transform_indices = @transform_0, window_bounds = array<i64: 64, 144>}, {pipeline_mode = #tpu.pipeline_mode<synchronous>, transform_indices = @transform_1, window_bounds = array<i64: 144, 32>}, {pipeline_mode = #tpu.pipeline_mode<synchronous>, transform_indices = @transform_2, window_bounds = array<i64: 1, 32>}, {transform_indices = @transform_3, window_bounds = array<i64: 64, 16>}]} {
    %c0 = arith.constant 0 : index
    %c0_0 = arith.constant 0 : index
    %0 = vector.load %arg1[%c0, %c0_0] : memref<64x144xbf16, #tpu.memory_space<vmem>>, vector<64x144xbf16>
    %c0_1 = arith.constant 0 : index
    %c0_2 = arith.constant 0 : index
    %1 = vector.load %arg2[%c0_1, %c0_2] : memref<144x32xbf16, #tpu.memory_space<vmem>>, vector<144x32xbf16>
    %cst = arith.constant dense<0.000000e+00> : vector<64x32xf32>
    %2 = tpu.matmul %0, %1, %cst {dimension_numbers = #tpu.dot_dimension_numbers<[1], [0], [0], [1], [0, 0, 1, 1], [], []>} : vector<64x144xbf16>, vector<144x32xbf16>, vector<64x32xf32> -> vector<64x32xf32>
    %c0_3 = arith.constant 0 : index
    %c0_4 = arith.constant 0 : index
    %3 = vector.load %arg3[%c0_3, %c0_4] : memref<1x32xf32, #tpu.memory_space<vmem>>, vector<1x32xf32>
    %4 = vector.broadcast %3 : vector<1x32xf32> to vector<64x32xf32>
    %5 = arith.addf %2, %4 : vector<64x32xf32>
    %cst_5 = arith.constant 0.000000e+00 : f32
    %6 = vector.broadcast %cst_5 : f32 to vector<64x32xf32>
    %7 = arith.maximumf %5, %6 : vector<64x32xf32>
    %8 = vector.extract_strided_slice %7 {offsets = [0, 0], sizes = [64, 16], strides = [1, 1]} : vector<64x32xf32> to vector<64x16xf32>
    %9 = vector.extract_strided_slice %7 {offsets = [0, 16], sizes = [64, 16], strides = [1, 1]} : vector<64x32xf32> to vector<64x16xf32>
    %10 = arith.addf %8, %9 : vector<64x16xf32>
    %11 = arith.truncf %10 : vector<64x16xf32> to vector<64x16xbf16>
    %c0_6 = arith.constant 0 : index
    %c0_7 = arith.constant 0 : index
    %12 = vector.load %arg4[%c0_6, %c0_7] : memref<64x16xbf16, #tpu.memory_space<vmem>>, vector<64x16xbf16>
    tpu.vector_store %arg4[%c0_6, %c0_7], %11 {strides = array<i32>} : memref<64x16xbf16, #tpu.memory_space<vmem>>, vector<64x16xbf16>,
    return
  }
  func.func @transform_0(%arg0: i32) -> (i32, i32) {
    %c0_i32 = arith.constant 0 : i32
    %c0_i32_0 = arith.constant 0 : i32
    return %arg0, %c0_i32 : i32, i32
  }
  func.func @transform_1(%arg0: i32) -> (i32, i32) {
    %c0_i32 = arith.constant 0 : i32
    %c0_i32_0 = arith.constant 0 : i32
    %c0_i32_1 = arith.constant 0 : i32
    return %c0_i32, %c0_i32_0 : i32, i32
  }
  func.func @transform_2(%arg0: i32) -> (i32, i32) {
    %c0_i32 = arith.constant 0 : i32
    %c0_i32_0 = arith.constant 0 : i32
    %c0_i32_1 = arith.constant 0 : i32
    return %c0_i32, %c0_i32_0 : i32, i32
  }
  func.func @transform_3(%arg0: i32) -> (i32, i32) {
    %c0_i32 = arith.constant 0 : i32
    %c0_i32_0 = arith.constant 0 : i32
    return %arg0, %c0_i32 : i32, i32
  }
}

module attributes {stable_mosaic.version = 11 : i64} {
  func.func @_fused_group_kernel(%arg0: i32, %arg1: memref<64x144xbf16, #tpu.memory_space<vmem>>, %arg2: memref<144x80xbf16, #tpu.memory_space<vmem>>, %arg3: memref<1x80xf32, #tpu.memory_space<vmem>>, %arg4: memref<64x16xbf16, #tpu.memory_space<vmem>>, %arg5: memref<64x16xbf16, #tpu.memory_space<vmem>>, %arg6: memref<64x16xbf16, #tpu.memory_space<vmem>>) attributes {dimension_semantics = [#tpu.dimension_semantics<parallel>], iteration_bounds = array<i64: 2>, scalar_prefetch = 0 : i64, scratch_operands = 0 : i64, tpu.core_type = #tpu.core_type<tc>, window_params = [{transform_indices = @transform_0, window_bounds = array<i64: 64, 144>}, {pipeline_mode = #tpu.pipeline_mode<synchronous>, transform_indices = @transform_1, window_bounds = array<i64: 144, 80>}, {pipeline_mode = #tpu.pipeline_mode<synchronous>, transform_indices = @transform_2, window_bounds = array<i64: 1, 80>}, {transform_indices = @transform_3, window_bounds = array<i64: 64, 16>}, {transform_indices = @transform_4, window_bounds = array<i64: 64, 16>}, {transform_indices = @transform_5, window_bounds = array<i64: 64, 16>}]} {
    %c0 = arith.constant 0 : index
    %c0_0 = arith.constant 0 : index
    %0 = vector.load %arg1[%c0, %c0_0] : memref<64x144xbf16, #tpu.memory_space<vmem>>, vector<64x144xbf16>
    %c0_1 = arith.constant 0 : index
    %c0_2 = arith.constant 0 : index
    %1 = vector.load %arg2[%c0_1, %c0_2] : memref<144x80xbf16, #tpu.memory_space<vmem>>, vector<144x80xbf16>
    %cst = arith.constant dense<0.000000e+00> : vector<64x80xf32>
    %2 = tpu.matmul %0, %1, %cst {dimension_numbers = #tpu.dot_dimension_numbers<[1], [0], [0], [1], [0, 0, 1, 1], [], []>} : vector<64x144xbf16>, vector<144x80xbf16>, vector<64x80xf32> -> vector<64x80xf32>
    %c0_3 = arith.constant 0 : index
    %c0_4 = arith.constant 0 : index
    %3 = vector.load %arg3[%c0_3, %c0_4] : memref<1x80xf32, #tpu.memory_space<vmem>>, vector<1x80xf32>
    %4 = vector.broadcast %3 : vector<1x80xf32> to vector<64x80xf32>
    %5 = arith.addf %2, %4 : vector<64x80xf32>
    %cst_5 = arith.constant 0.000000e+00 : f32
    %6 = vector.broadcast %cst_5 : f32 to vector<64x80xf32>
    %7 = arith.maximumf %5, %6 : vector<64x80xf32>
    %8 = vector.extract_strided_slice %7 {offsets = [0, 0], sizes = [64, 16], strides = [1, 1]} : vector<64x80xf32> to vector<64x16xf32>
    %9 = vector.extract_strided_slice %7 {offsets = [0, 16], sizes = [64, 16], strides = [1, 1]} : vector<64x80xf32> to vector<64x16xf32>
    %10 = arith.addf %8, %9 : vector<64x16xf32>
    %11 = arith.truncf %10 : vector<64x16xf32> to vector<64x16xbf16>
    %c0_6 = arith.constant 0 : index
    %c0_7 = arith.constant 0 : index
    %12 = vector.load %arg4[%c0_6, %c0_7] : memref<64x16xbf16, #tpu.memory_space<vmem>>, vector<64x16xbf16>
    tpu.vector_store %arg4[%c0_6, %c0_7], %11 {strides = array<i32>} : memref<64x16xbf16, #tpu.memory_space<vmem>>, vector<64x16xbf16>,
    %13 = vector.extract_strided_slice %7 {offsets = [0, 32], sizes = [64, 16], strides = [1, 1]} : vector<64x80xf32> to vector<64x16xf32>
    %14 = vector.extract_strided_slice %7 {offsets = [0, 48], sizes = [64, 16], strides = [1, 1]} : vector<64x80xf32> to vector<64x16xf32>
    %15 = arith.addf %13, %14 : vector<64x16xf32>
    %16 = arith.truncf %15 : vector<64x16xf32> to vector<64x16xbf16>
    %c0_8 = arith.constant 0 : index
    %c0_9 = arith.constant 0 : index
    %17 = vector.load %arg5[%c0_8, %c0_9] : memref<64x16xbf16, #tpu.memory_space<vmem>>, vector<64x16xbf16>
    tpu.vector_store %arg5[%c0_8, %c0_9], %16 {strides = array<i32>} : memref<64x16xbf16, #tpu.memory_space<vmem>>, vector<64x16xbf16>,
    %18 = vector.extract_strided_slice %7 {offsets = [0, 64], sizes = [64, 16], strides = [1, 1]} : vector<64x80xf32> to vector<64x16xf32>
    %19 = arith.truncf %18 : vector<64x16xf32> to vector<64x16xbf16>
    %c0_10 = arith.constant 0 : index
    %c0_11 = arith.constant 0 : index
    %20 = vector.load %arg6[%c0_10, %c0_11] : memref<64x16xbf16, #tpu.memory_space<vmem>>, vector<64x16xbf16>
    tpu.vector_store %arg6[%c0_10, %c0_11], %19 {strides = array<i32>} : memref<64x16xbf16, #tpu.memory_space<vmem>>, vector<64x16xbf16>,
    return
  }
  func.func @transform_0(%arg0: i32) -> (i32, i32) {
    %c0_i32 = arith.constant 0 : i32
    %c0_i32_0 = arith.constant 0 : i32
    return %arg0, %c0_i32 : i32, i32
  }
  func.func @transform_1(%arg0: i32) -> (i32, i32) {
    %c0_i32 = arith.constant 0 : i32
    %c0_i32_0 = arith.constant 0 : i32
    %c0_i32_1 = arith.constant 0 : i32
    return %c0_i32, %c0_i32_0 : i32, i32
  }
  func.func @transform_2(%arg0: i32) -> (i32, i32) {
    %c0_i32 = arith.constant 0 : i32
    %c0_i32_0 = arith.constant 0 : i32
    %c0_i32_1 = arith.constant 0 : i32
    return %c0_i32, %c0_i32_0 : i32, i32
  }
  func.func @transform_3(%arg0: i32) -> (i32, i32) {
    %c0_i32 = arith.constant 0 : i32
    %c0_i32_0 = arith.constant 0 : i32
    return %arg0, %c0_i32 : i32, i32
  }
  func.func @transform_4(%arg0: i32) -> (i32, i32) {
    %c0_i32 = arith.constant 0 : i32
    %c0_i32_0 = arith.constant 0 : i32
    return %arg0, %c0_i32 : i32, i32
  }
  func.func @transform_5(%arg0: i32) -> (i32, i32) {
    %c0_i32 = arith.constant 0 : i32
    %c0_i32_0 = arith.constant 0 : i32
    return %arg0, %c0_i32 : i32, i32
  }
}

module attributes {stable_mosaic.version = 11 : i64} {
  func.func @_fused_group_kernel(%arg0: i32, %arg1: memref<32x288xbf16, #tpu.memory_space<vmem>>, %arg2: memref<288x160xbf16, #tpu.memory_space<vmem>>, %arg3: memref<1x160xf32, #tpu.memory_space<vmem>>, %arg4: memref<32x32xbf16, #tpu.memory_space<vmem>>, %arg5: memref<32x32xbf16, #tpu.memory_space<vmem>>, %arg6: memref<32x32xbf16, #tpu.memory_space<vmem>>) attributes {dimension_semantics = [#tpu.dimension_semantics<parallel>], iteration_bounds = array<i64: 1>, scalar_prefetch = 0 : i64, scratch_operands = 0 : i64, tpu.core_type = #tpu.core_type<tc>, window_params = [{transform_indices = @transform_0, window_bounds = array<i64: 32, 288>}, {pipeline_mode = #tpu.pipeline_mode<synchronous>, transform_indices = @transform_1, window_bounds = array<i64: 288, 160>}, {pipeline_mode = #tpu.pipeline_mode<synchronous>, transform_indices = @transform_2, window_bounds = array<i64: 1, 160>}, {transform_indices = @transform_3, window_bounds = array<i64: 32, 32>}, {transform_indices = @transform_4, window_bounds = array<i64: 32, 32>}, {transform_indices = @transform_5, window_bounds = array<i64: 32, 32>}]} {
    %c0 = arith.constant 0 : index
    %c0_0 = arith.constant 0 : index
    %0 = vector.load %arg1[%c0, %c0_0] : memref<32x288xbf16, #tpu.memory_space<vmem>>, vector<32x288xbf16>
    %c0_1 = arith.constant 0 : index
    %c0_2 = arith.constant 0 : index
    %1 = vector.load %arg2[%c0_1, %c0_2] : memref<288x160xbf16, #tpu.memory_space<vmem>>, vector<288x160xbf16>
    %cst = arith.constant dense<0.000000e+00> : vector<32x160xf32>
    %2 = tpu.matmul %0, %1, %cst {dimension_numbers = #tpu.dot_dimension_numbers<[1], [0], [0], [1], [0, 0, 1, 1], [], []>} : vector<32x288xbf16>, vector<288x160xbf16>, vector<32x160xf32> -> vector<32x160xf32>
    %c0_3 = arith.constant 0 : index
    %c0_4 = arith.constant 0 : index
    %3 = vector.load %arg3[%c0_3, %c0_4] : memref<1x160xf32, #tpu.memory_space<vmem>>, vector<1x160xf32>
    %4 = vector.broadcast %3 : vector<1x160xf32> to vector<32x160xf32>
    %5 = arith.addf %2, %4 : vector<32x160xf32>
    %cst_5 = arith.constant 0.000000e+00 : f32
    %6 = vector.broadcast %cst_5 : f32 to vector<32x160xf32>
    %7 = arith.maximumf %5, %6 : vector<32x160xf32>
    %8 = vector.extract_strided_slice %7 {offsets = [0, 0], sizes = [32, 32], strides = [1, 1]} : vector<32x160xf32> to vector<32x32xf32>
    %9 = vector.extract_strided_slice %7 {offsets = [0, 32], sizes = [32, 32], strides = [1, 1]} : vector<32x160xf32> to vector<32x32xf32>
    %10 = arith.addf %8, %9 : vector<32x32xf32>
    %11 = arith.truncf %10 : vector<32x32xf32> to vector<32x32xbf16>
    %c0_6 = arith.constant 0 : index
    %c0_7 = arith.constant 0 : index
    %12 = vector.load %arg4[%c0_6, %c0_7] : memref<32x32xbf16, #tpu.memory_space<vmem>>, vector<32x32xbf16>
    tpu.vector_store %arg4[%c0_6, %c0_7], %11 {strides = array<i32>} : memref<32x32xbf16, #tpu.memory_space<vmem>>, vector<32x32xbf16>,
    %13 = vector.extract_strided_slice %7 {offsets = [0, 64], sizes = [32, 32], strides = [1, 1]} : vector<32x160xf32> to vector<32x32xf32>
    %14 = vector.extract_strided_slice %7 {offsets = [0, 96], sizes = [32, 32], strides = [1, 1]} : vector<32x160xf32> to vector<32x32xf32>
    %15 = arith.addf %13, %14 : vector<32x32xf32>
    %16 = arith.truncf %15 : vector<32x32xf32> to vector<32x32xbf16>
    %c0_8 = arith.constant 0 : index
    %c0_9 = arith.constant 0 : index
    %17 = vector.load %arg5[%c0_8, %c0_9] : memref<32x32xbf16, #tpu.memory_space<vmem>>, vector<32x32xbf16>
    tpu.vector_store %arg5[%c0_8, %c0_9], %16 {strides = array<i32>} : memref<32x32xbf16, #tpu.memory_space<vmem>>, vector<32x32xbf16>,
    %18 = vector.extract_strided_slice %7 {offsets = [0, 128], sizes = [32, 32], strides = [1, 1]} : vector<32x160xf32> to vector<32x32xf32>
    %19 = arith.truncf %18 : vector<32x32xf32> to vector<32x32xbf16>
    %c0_10 = arith.constant 0 : index
    %c0_11 = arith.constant 0 : index
    %20 = vector.load %arg6[%c0_10, %c0_11] : memref<32x32xbf16, #tpu.memory_space<vmem>>, vector<32x32xbf16>
    tpu.vector_store %arg6[%c0_10, %c0_11], %19 {strides = array<i32>} : memref<32x32xbf16, #tpu.memory_space<vmem>>, vector<32x32xbf16>,
    return
  }
  func.func @transform_0(%arg0: i32) -> (i32, i32) {
    %c0_i32 = arith.constant 0 : i32
    %c0_i32_0 = arith.constant 0 : i32
    return %arg0, %c0_i32 : i32, i32
  }
  func.func @transform_1(%arg0: i32) -> (i32, i32) {
    %c0_i32 = arith.constant 0 : i32
    %c0_i32_0 = arith.constant 0 : i32
    %c0_i32_1 = arith.constant 0 : i32
    return %c0_i32, %c0_i32_0 : i32, i32
  }
  func.func @transform_2(%arg0: i32) -> (i32, i32) {
    %c0_i32 = arith.constant 0 : i32
    %c0_i32_0 = arith.constant 0 : i32
    %c0_i32_1 = arith.constant 0 : i32
    return %c0_i32, %c0_i32_0 : i32, i32
  }
  func.func @transform_3(%arg0: i32) -> (i32, i32) {
    %c0_i32 = arith.constant 0 : i32
    %c0_i32_0 = arith.constant 0 : i32
    return %arg0, %c0_i32 : i32, i32
  }
  func.func @transform_4(%arg0: i32) -> (i32, i32) {
    %c0_i32 = arith.constant 0 : i32
    %c0_i32_0 = arith.constant 0 : i32
    return %arg0, %c0_i32 : i32, i32
  }
  func.func @transform_5(%arg0: i32) -> (i32, i32) {
    %c0_i32 = arith.constant 0 : i32
    %c0_i32_0 = arith.constant 0 : i32
    return %arg0, %c0_i32 : i32, i32
  }
}

module attributes {stable_mosaic.version = 11 : i64} {
  func.func @_fused_group_kernel(%arg0: i32, %arg1: memref<32x288xbf16, #tpu.memory_space<vmem>>, %arg2: memref<288x64xbf16, #tpu.memory_space<vmem>>, %arg3: memref<1x64xf32, #tpu.memory_space<vmem>>, %arg4: memref<32x32xbf16, #tpu.memory_space<vmem>>) attributes {dimension_semantics = [#tpu.dimension_semantics<parallel>], iteration_bounds = array<i64: 1>, scalar_prefetch = 0 : i64, scratch_operands = 0 : i64, tpu.core_type = #tpu.core_type<tc>, window_params = [{transform_indices = @transform_0, window_bounds = array<i64: 32, 288>}, {pipeline_mode = #tpu.pipeline_mode<synchronous>, transform_indices = @transform_1, window_bounds = array<i64: 288, 64>}, {pipeline_mode = #tpu.pipeline_mode<synchronous>, transform_indices = @transform_2, window_bounds = array<i64: 1, 64>}, {transform_indices = @transform_3, window_bounds = array<i64: 32, 32>}]} {
    %c0 = arith.constant 0 : index
    %c0_0 = arith.constant 0 : index
    %0 = vector.load %arg1[%c0, %c0_0] : memref<32x288xbf16, #tpu.memory_space<vmem>>, vector<32x288xbf16>
    %c0_1 = arith.constant 0 : index
    %c0_2 = arith.constant 0 : index
    %1 = vector.load %arg2[%c0_1, %c0_2] : memref<288x64xbf16, #tpu.memory_space<vmem>>, vector<288x64xbf16>
    %cst = arith.constant dense<0.000000e+00> : vector<32x64xf32>
    %2 = tpu.matmul %0, %1, %cst {dimension_numbers = #tpu.dot_dimension_numbers<[1], [0], [0], [1], [0, 0, 1, 1], [], []>} : vector<32x288xbf16>, vector<288x64xbf16>, vector<32x64xf32> -> vector<32x64xf32>
    %c0_3 = arith.constant 0 : index
    %c0_4 = arith.constant 0 : index
    %3 = vector.load %arg3[%c0_3, %c0_4] : memref<1x64xf32, #tpu.memory_space<vmem>>, vector<1x64xf32>
    %4 = vector.broadcast %3 : vector<1x64xf32> to vector<32x64xf32>
    %5 = arith.addf %2, %4 : vector<32x64xf32>
    %cst_5 = arith.constant 0.000000e+00 : f32
    %6 = vector.broadcast %cst_5 : f32 to vector<32x64xf32>
    %7 = arith.maximumf %5, %6 : vector<32x64xf32>
    %8 = vector.extract_strided_slice %7 {offsets = [0, 0], sizes = [32, 32], strides = [1, 1]} : vector<32x64xf32> to vector<32x32xf32>
    %9 = vector.extract_strided_slice %7 {offsets = [0, 32], sizes = [32, 32], strides = [1, 1]} : vector<32x64xf32> to vector<32x32xf32>
    %10 = arith.addf %8, %9 : vector<32x32xf32>
    %11 = arith.truncf %10 : vector<32x32xf32> to vector<32x32xbf16>
    %c0_6 = arith.constant 0 : index
    %c0_7 = arith.constant 0 : index
    %12 = vector.load %arg4[%c0_6, %c0_7] : memref<32x32xbf16, #tpu.memory_space<vmem>>, vector<32x32xbf16>
    tpu.vector_store %arg4[%c0_6, %c0_7], %11 {strides = array<i32>} : memref<32x32xbf16, #tpu.memory_space<vmem>>, vector<32x32xbf16>,
    return
  }
  func.func @transform_0(%arg0: i32) -> (i32, i32) {
    %c0_i32 = arith.constant 0 : i32
    %c0_i32_0 = arith.constant 0 : i32
    return %arg0, %c0_i32 : i32, i32
  }
  func.func @transform_1(%arg0: i32) -> (i32, i32) {
    %c0_i32 = arith.constant 0 : i32
    %c0_i32_0 = arith.constant 0 : i32
    %c0_i32_1 = arith.constant 0 : i32
    return %c0_i32, %c0_i32_0 : i32, i32
  }
  func.func @transform_2(%arg0: i32) -> (i32, i32) {
    %c0_i32 = arith.constant 0 : i32
    %c0_i32_0 = arith.constant 0 : i32
    %c0_i32_1 = arith.constant 0 : i32
    return %c0_i32, %c0_i32_0 : i32, i32
  }
  func.func @transform_3(%arg0: i32) -> (i32, i32) {
    %c0_i32 = arith.constant 0 : i32
    %c0_i32_0 = arith.constant 0 : i32
    return %arg0, %c0_i32 : i32, i32
  }
}

module attributes {stable_mosaic.version = 11 : i64} {
  func.func @_fused_group_kernel(%arg0: i32, %arg1: memref<32x288xbf16, #tpu.memory_space<vmem>>, %arg2: memref<288x96xbf16, #tpu.memory_space<vmem>>, %arg3: memref<1x96xf32, #tpu.memory_space<vmem>>, %arg4: memref<32x32xbf16, #tpu.memory_space<vmem>>, %arg5: memref<32x32xbf16, #tpu.memory_space<vmem>>, %arg6: memref<32x32xbf16, #tpu.memory_space<vmem>>) attributes {dimension_semantics = [#tpu.dimension_semantics<parallel>], iteration_bounds = array<i64: 1>, scalar_prefetch = 0 : i64, scratch_operands = 0 : i64, tpu.core_type = #tpu.core_type<tc>, window_params = [{transform_indices = @transform_0, window_bounds = array<i64: 32, 288>}, {pipeline_mode = #tpu.pipeline_mode<synchronous>, transform_indices = @transform_1, window_bounds = array<i64: 288, 96>}, {pipeline_mode = #tpu.pipeline_mode<synchronous>, transform_indices = @transform_2, window_bounds = array<i64: 1, 96>}, {transform_indices = @transform_3, window_bounds = array<i64: 32, 32>}, {transform_indices = @transform_4, window_bounds = array<i64: 32, 32>}, {transform_indices = @transform_5, window_bounds = array<i64: 32, 32>}]} {
    %c0 = arith.constant 0 : index
    %c0_0 = arith.constant 0 : index
    %0 = vector.load %arg1[%c0, %c0_0] : memref<32x288xbf16, #tpu.memory_space<vmem>>, vector<32x288xbf16>
    %c0_1 = arith.constant 0 : index
    %c0_2 = arith.constant 0 : index
    %1 = vector.load %arg2[%c0_1, %c0_2] : memref<288x96xbf16, #tpu.memory_space<vmem>>, vector<288x96xbf16>
    %cst = arith.constant dense<0.000000e+00> : vector<32x96xf32>
    %2 = tpu.matmul %0, %1, %cst {dimension_numbers = #tpu.dot_dimension_numbers<[1], [0], [0], [1], [0, 0, 1, 1], [], []>} : vector<32x288xbf16>, vector<288x96xbf16>, vector<32x96xf32> -> vector<32x96xf32>
    %c0_3 = arith.constant 0 : index
    %c0_4 = arith.constant 0 : index
    %3 = vector.load %arg3[%c0_3, %c0_4] : memref<1x96xf32, #tpu.memory_space<vmem>>, vector<1x96xf32>
    %4 = vector.broadcast %3 : vector<1x96xf32> to vector<32x96xf32>
    %5 = arith.addf %2, %4 : vector<32x96xf32>
    %cst_5 = arith.constant 0.000000e+00 : f32
    %6 = vector.broadcast %cst_5 : f32 to vector<32x96xf32>
    %7 = arith.maximumf %5, %6 : vector<32x96xf32>
    %8 = vector.extract_strided_slice %7 {offsets = [0, 0], sizes = [32, 32], strides = [1, 1]} : vector<32x96xf32> to vector<32x32xf32>
    %9 = vector.extract_strided_slice %7 {offsets = [0, 32], sizes = [32, 32], strides = [1, 1]} : vector<32x96xf32> to vector<32x32xf32>
    %10 = arith.addf %8, %9 : vector<32x32xf32>
    %11 = arith.truncf %10 : vector<32x32xf32> to vector<32x32xbf16>
    %c0_6 = arith.constant 0 : index
    %c0_7 = arith.constant 0 : index
    %12 = vector.load %arg5[%c0_6, %c0_7] : memref<32x32xbf16, #tpu.memory_space<vmem>>, vector<32x32xbf16>
    tpu.vector_store %arg5[%c0_6, %c0_7], %11 {strides = array<i32>} : memref<32x32xbf16, #tpu.memory_space<vmem>>, vector<32x32xbf16>,
    %13 = vector.extract_strided_slice %7 {offsets = [0, 64], sizes = [32, 32], strides = [1, 1]} : vector<32x96xf32> to vector<32x32xf32>
    %c0_8 = arith.constant 0 : index
    %c0_9 = arith.constant 0 : index
    %14 = vector.load %arg4[%c0_8, %c0_9] : memref<32x32xbf16, #tpu.memory_space<vmem>>, vector<32x32xbf16>
    %15 = arith.extf %14 : vector<32x32xbf16> to vector<32x32xf32>
    %16 = arith.addf %13, %15 : vector<32x32xf32>
    %17 = arith.truncf %16 : vector<32x32xf32> to vector<32x32xbf16>
    %c0_10 = arith.constant 0 : index
    %c0_11 = arith.constant 0 : index
    %18 = vector.load %arg6[%c0_10, %c0_11] : memref<32x32xbf16, #tpu.memory_space<vmem>>, vector<32x32xbf16>
    tpu.vector_store %arg6[%c0_10, %c0_11], %17 {strides = array<i32>} : memref<32x32xbf16, #tpu.memory_space<vmem>>, vector<32x32xbf16>,
    return
  }
  func.func @transform_0(%arg0: i32) -> (i32, i32) {
    %c0_i32 = arith.constant 0 : i32
    %c0_i32_0 = arith.constant 0 : i32
    return %arg0, %c0_i32 : i32, i32
  }
  func.func @transform_1(%arg0: i32) -> (i32, i32) {
    %c0_i32 = arith.constant 0 : i32
    %c0_i32_0 = arith.constant 0 : i32
    %c0_i32_1 = arith.constant 0 : i32
    return %c0_i32, %c0_i32_0 : i32, i32
  }
  func.func @transform_2(%arg0: i32) -> (i32, i32) {
    %c0_i32 = arith.constant 0 : i32
    %c0_i32_0 = arith.constant 0 : i32
    %c0_i32_1 = arith.constant 0 : i32
    return %c0_i32, %c0_i32_0 : i32, i32
  }
  func.func @transform_3(%arg0: i32) -> (i32, i32) {
    %c0_i32 = arith.constant 0 : i32
    %c0_i32_0 = arith.constant 0 : i32
    return %arg0, %c0_i32 : i32, i32
  }
  func.func @transform_4(%arg0: i32) -> (i32, i32) {
    %c0_i32 = arith.constant 0 : i32
    %c0_i32_0 = arith.constant 0 : i32
    return %arg0, %c0_i32 : i32, i32
  }
  func.func @transform_5(%arg0: i32) -> (i32, i32) {
    %c0_i32 = arith.constant 0 : i32
    %c0_i32_0 = arith.constant 0 : i32
    return %arg0, %c0_i32 : i32, i32
  }
}

module attributes {stable_mosaic.version = 11 : i64} {
  func.func @_head_kernel(%arg0: memref<2x16x32xbf16, #tpu.memory_space<vmem>>, %arg1: memref<32x10xf32, #tpu.memory_space<vmem>>, %arg2: memref<1x10xf32, #tpu.memory_space<vmem>>, %arg3: memref<2x10xf32, #tpu.memory_space<vmem>>) attributes {dimension_semantics = [], scalar_prefetch = 0 : i64, scratch_operands = 0 : i64, tpu.core_type = #tpu.core_type<tc>} {
    %c0 = arith.constant 0 : index
    %c0_0 = arith.constant 0 : index
    %c0_1 = arith.constant 0 : index
    %0 = vector.load %arg0[%c0, %c0_0, %c0_1] : memref<2x16x32xbf16, #tpu.memory_space<vmem>>, vector<2x16x32xbf16>
    %1 = arith.extf %0 : vector<2x16x32xbf16> to vector<2x16x32xf32>
    %cst = arith.constant dense<0.000000e+00> : vector<2x32xf32>
    %2 = vector.multi_reduction <add>, %1, %cst [1] : vector<2x16x32xf32> to vector<2x32xf32>
    %cst_2 = arith.constant 1.600000e+01 : f32
    %3 = vector.broadcast %cst_2 : f32 to vector<2x32xf32>
    %4 = arith.divf %2, %3 : vector<2x32xf32>
    %c0_3 = arith.constant 0 : index
    %c0_4 = arith.constant 0 : index
    %5 = vector.load %arg1[%c0_3, %c0_4] : memref<32x10xf32, #tpu.memory_space<vmem>>, vector<32x10xf32>
    %cst_5 = arith.constant dense<0.000000e+00> : vector<2x10xf32>
    %6 = tpu.matmul %4, %5, %cst_5 {dimension_numbers = #tpu.dot_dimension_numbers<[1], [0], [0], [1], [0, 0, 1, 1], [], []>} : vector<2x32xf32>, vector<32x10xf32>, vector<2x10xf32> -> vector<2x10xf32>
    %c0_6 = arith.constant 0 : index
    %c0_7 = arith.constant 0 : index
    %7 = vector.load %arg2[%c0_6, %c0_7] : memref<1x10xf32, #tpu.memory_space<vmem>>, vector<1x10xf32>
    %8 = vector.broadcast %7 : vector<1x10xf32> to vector<2x10xf32>
    %9 = arith.addf %6, %8 : vector<2x10xf32>
    %c0_8 = arith.constant 0 : index
    %c0_9 = arith.constant 0 : index
    %10 = vector.load %arg3[%c0_8, %c0_9] : memref<2x10xf32, #tpu.memory_space<vmem>>, vector<2x10xf32>
    tpu.vector_store %arg3[%c0_8, %c0_9], %9 {strides = array<i32>} : memref<2x10xf32, #tpu.memory_space<vmem>>, vector<2x10xf32>,
    return
  }
}

</mosaic_0001>

<bundles_post_ra>
// kernel: a_call__.15
= control target key start
LH: loop header
LB: loop body
LE: loop exit
PB: predicated region body
PF: predicated region fallthrough
CT: control target
= control target key end

     0   :  { %13 = vsyncpa [#allocation3], 0  ;;  %s2383_s0 = inlined_call_operand.vmem [shape: bf16[512,4], index: 0, kind: input, shape index: {}, may-alias: {0,1}]   ;;  %s2384_s1 = inlined_call_operand.vmem [shape: bf16[512,4], index: 1, kind: input, shape index: {}, may-alias: {0,1}]   ;;  %s2385_s2 = inlined_call_operand.vmem [shape: bf16[4,8], index: 2, kind: input, shape index: {}]   ;;  %s2386_s3 = inlined_call_operand.vmem [shape: bf16[4,8], index: 3, kind: input, shape index: {}]   ;;  %s2387_s4 = inlined_call_operand.vmem [shape: f32[1,8], index: 4, kind: input, shape index: {}, may-alias: {4,5}]   ;;  %s2388_s5 = inlined_call_operand.vmem [shape: f32[1,8], index: 5, kind: input, shape index: {}, may-alias: {4,5}]   ;;  %s2389_s6 = inlined_call_operand.vmem [shape: bf16[512,8], index: 6, kind: output, shape index: {0}]   ;;  %s2390_s7 = inlined_call_operand.hbm [shape: bf16[512,8], index: 7, kind: output, shape index: {1}]  }
   0x1   :  { %15 = vsyncpa [#allocation3 + $0x1], 0  ;;  %s1985_s24 = smov 0   ;;  %s1987_s25 = smov 0  }
   0x2   :  { %s1989_s26 = smov 0   ;;  %s1991_s27 = smov 0  }
   0x3 LB: > { %s2006_s28 = sadd.s32 4294967295, %s1940_s27   ;;  %s1490_s29 = sadd.s32 4294967294, %s1940_s27   ;;  %s1940_s27 = sphi %s1991_s27, %s2396_s27   ;;  %s1936_s26 = sphi %s1989_s26, %s2395_s26   ;;  %s1932_s25 = sphi %s1987_s25, %s2394_s25   ;;  %s1928_s24 = sphi %s1985_s24, %s2393_s24  }
   0x4   : > { %s2010_s30 = sadd.s32 1, %s1940_s27   ;;  %s190_s8 = sadd.s32 1, %s1936_s26 }
   0x5   : > { %s187_s9 = ssub.s32 %s1940_s27, %s2010_s30  ;;  %p200_p0 = scmp.ne.s32.totalorder %s1936_s26, %s1932_s25 }
   0x6   : > { %p188_p1 = scmp.eq.s32.totalorder %s187_s9, 0  ;;  %p201_p2 = scmp.eq.s32.totalorder %s2006_s28, 1 }
   0x7   : > { %p206_p3 = scmp.ne.s32.totalorder %s1932_s25, %s1928_s24  ;;  %p207_p4 = scmp.eq.s32.totalorder %s1490_s29, 1 }
   0x8   : > { %s2021_s10 = scalar_select %p188_p1, %s1936_s26, %s190_s8  }
   0x9   : > { %p2023_p5 = por %p201_p2, %p200_p0  ;;  %p2027_p6 = por %p207_p4, %p206_p3 }
   0xa   : > { %p1493_p7 = scmp.ge.s32.totalorder %s1940_s27, 1  ;;  %p255_p8 = scmp.lt.s32.totalorder %s1940_s27, 3 }
   0xc   : > { %p256_p9 = pnand %p1493_p7, %p255_p8 }
   0xd   : > { %v349_v0 = vld [vmem:[%s2385_s2] sm:$0x3] (!%p256_p9)  ;;  %vm486_vm0 = vcmask (!%p256_p9), 1041408   ;;  %s1495_s17 = sshll.u32 (!%p256_p9), %s2006_s28, 5  ;;  %vm437_vm1 = vcmask (!%p256_p9), 31744   ;;  %s294_s13 = sand.u32 (!%p256_p9), 1, %s1932_s25  }
   0xe   : > { %259 = sbr.rel (%p256_p9) target bundleno = 319 (0x13f), region = 44  ;;  %v876_v1 = vld [vmem:[%s2386_s3] sm:$0x3] (!%p256_p9)  ;;  %1803 = vmatprep.subr.msk.bf16.mxu0 (!%p256_p9), %vm486_vm0, %v349_v0  ;;  %v488_v2 = vsel (!%p256_p9), %vm486_vm0, %v349_v0, 0  ;;  %p298_p10 = scmp.lt.s32.totalorder (!%p256_p9), %s1495_s17, 63  ;;  %vm811_vm2 = vcmask (!%p256_p9), 60416  }
   0xf   : > { %1804 = vmatprep.subr.msk.bf16.mxu1 (!%p256_p9), %vm486_vm0, %v876_v1  ;;  %v1013_v3 = vsel (!%p256_p9), %vm486_vm0, %v876_v1, 0  ;;  %1736 = vmatpush3.bf16.msra.mxu0 (!%p256_p9), %v488_v2  ;;  %v2121_v36 = vld [vmem:[%s2387_s4] ss:$0 sm:$0xff] (!%p256_p9)  ;;  %s1494_s16 = sshll.u32 (!%p256_p9), %s294_s13, 7  ;;  %s2342_s8 = scalar_lea.sflag (!%p256_p9), [#allocation3], %s294_s13 }
  0x10   : > { %1770 = vmatpush3.bf16.msra.mxu1 (!%p256_p9), %v1013_v3  ;;  %v2127_v37 = vld [vmem:[%s2388_s5] ss:$0 sm:$0xff] (!%p256_p9)  ;;  %s1942_s14 = smov (!%p256_p9), [#allocation2]  }
  0x11   : > { %s1882_s15 = sshll.u32 (!%p256_p9), %s1942_s14, 4  ;;  %s1883_s15 = int_to_ptr.vmem [resolvable:$false] %s1882_s15 }
  0x15   : > { %s2398_s17 = smov (!%p298_p10, %s1495_s17), 63 }
  0x16   : > { %s2040_s18 = sshll.u32 %s2398_s17, 2 }
  0x17   : > { %s2046_s21 = scalar_lea.vmem %s2383_s0, %s2040_s18  ;;  %s2052_s29 = scalar_lea.vmem %s2384_s1, %s2040_s18 }
  0x18   : > { %v1846_v4 = vld [vmem:[%s2046_s21] sm:$0xff]   ;;  %v1848_v6 = vld [vmem:[%s2046_s21 + $0x8] sm:$0xff]   ;;  %v1850_v8 = vld [vmem:[%s2046_s21 + $0x10] sm:$0xff]   ;;  %s2140_s20 = scalar_lea.vmem %s2389_s6, %s2040_s18  ;;  %s2147_s18 = scalar_lea.vmem [#allocation2], %s1494_s16 }
  0x19   : > { %v1847_v5 = vld [vmem:[%s2052_s29] sm:$0xff]   ;;  %1737 = vmatprep.mubr.msk.bf16.mxu0 %vm437_vm1, %v1846_v4  ;;  %v1849_v7 = vld [vmem:[%s2052_s29 + $0x8] sm:$0xff]   ;;  %v1851_v9 = vld [vmem:[%s2052_s29 + $0x10] sm:$0xff]   ;;  %s1391_s22 = sshll.u32 %s2147_s18, 4  ;;  %s1884_s16 = scalar_lea.vmem %s1883_s15, 4096  ;;  %s2328_s22 = int_to_ptr.vmem [resolvable:$true] %s1391_s22 }
  0x1a   : > { %1771 = vmatprep.mubr.msk.bf16.mxu1 %vm437_vm1, %v1847_v5  ;;  %1738 = vmatmul.mubr.msk.bf16.vlgmr.msra.gmra.mrb[0].mxu0 %vm437_vm1, %v1848_v6  ;;  %v1852_v10 = vld [vmem:[%s2046_s21 + $0x18] sm:$0xff]   ;;  %v1854_v12 = vld [vmem:[%s2046_s21 + $0x20] sm:$0xff]   ;;  %v1856_v14 = vld [vmem:[%s2046_s21 + $0x28] sm:$0xff]   ;;  %s1878_s9 = scalar_lea.vmem %s2328_s22, 2048  ;;  %p1885_p0 = scmp.lt.s32.totalorder %s2328_s22, %s1883_s15 }
  0x1b   : > { %1772 = vmatmul.mubr.msk.bf16.vlgmr.msra.gmra.mrb[0].mxu1 %vm437_vm1, %v1849_v7  ;;  %1741 = vmatprep.mubr.msk.bf16.mxu0 %vm437_vm1, %v1850_v8  ;;  %v1853_v11 = vld [vmem:[%s2052_s29 + $0x18] sm:$0xff]   ;;  %v1855_v13 = vld [vmem:[%s2052_s29 + $0x20] sm:$0xff]   ;;  %v1857_v15 = vld [vmem:[%s2052_s29 + $0x28] sm:$0xff]   ;;  %p1879_p11 = scmp.ne.s32.totalorder %s2328_s22, %s1878_s9  ;;  %p1886_p1 = scmp.lt.s32.totalorder %s1884_s16, %s1878_s9 }
  0x1c   : > { %1775 = vmatprep.mubr.msk.bf16.mxu1 %vm437_vm1, %v1851_v9  ;;  %v1858_v16 = vld [vmem:[%s2046_s21 + $0x30] sm:$0xff]   ;;  %v1860_v18 = vld [vmem:[%s2046_s21 + $0x38] sm:$0xff]   ;;  %v1862_v20 = vld [vmem:[%s2046_s21 + $0x40] sm:$0xff]  }
  0x1d   : > { %v1859_v17 = vld [vmem:[%s2052_s29 + $0x30] sm:$0xff]   ;;  %v1861_v19 = vld [vmem:[%s2052_s29 + $0x38] sm:$0xff]   ;;  %v1863_v21 = vld [vmem:[%s2052_s29 + $0x40] sm:$0xff]   ;;  %p1880_p12 = pnand %p1879_p11, %p2023_p5  ;;  %p1887_p2 = por %p1886_p1, %p1885_p0 }
  0x1e   : > { %v1864_v22 = vld [vmem:[%s2046_s21 + $0x48] sm:$0xff]   ;;  %v1866_v24 = vld [vmem:[%s2046_s21 + $0x50] sm:$0xff]   ;;  %v1868_v26 = vld [vmem:[%s2046_s21 + $0x58] sm:$0xff]  }
  0x1f   : > { %v1865_v23 = vld [vmem:[%s2052_s29 + $0x48] sm:$0xff]   ;;  %v1867_v25 = vld [vmem:[%s2052_s29 + $0x50] sm:$0xff]   ;;  %v1869_v27 = vld [vmem:[%s2052_s29 + $0x58] sm:$0xff]   ;;  %p1881_p13 = pneg %p1880_p12 }
  0x20   : > { %v1870_v28 = vld [vmem:[%s2046_s21 + $0x60] sm:$0xff]   ;;  %v1872_v30 = vld [vmem:[%s2046_s21 + $0x68] sm:$0xff]   ;;  %v1874_v32 = vld [vmem:[%s2046_s21 + $0x70] sm:$0xff]  }
  0x21   : > { %v1871_v29 = vld [vmem:[%s2052_s29 + $0x60] sm:$0xff]   ;;  %v1873_v31 = vld [vmem:[%s2052_s29 + $0x68] sm:$0xff]   ;;  %v1875_v33 = vld [vmem:[%s2052_s29 + $0x70] sm:$0xff]   ;;  %p1888_p3 = pnand %p1887_p2, %p1881_p13 }
  0x22   : > { %1742 = vmatmul.mubr.msk.bf16.gmra.mrb[4].mxu0 %vm437_vm1, %v1852_v10  ;;  %v1876_v34 = vld [vmem:[%s2046_s21 + $0x78] sm:$0xff]   ;;  %s1700_s21 = sshll.u32 %s2006_s28, 11 }
  0x23   : > { %1776 = vmatmul.mubr.msk.bf16.gmra.mrb[4].mxu1 %vm437_vm1, %v1853_v11  ;;  %1745 = vmatprep.mubr.msk.bf16.mxu0 %vm437_vm1, %v1854_v12  ;;  %v1877_v35 = vld [vmem:[%s2052_s29 + $0x78] sm:$0xff]   ;;  %s2326_s29 = scalar_lea.hbm %s2390_s7, %s1700_s21 }
  0x24   : > { %1779 = vmatprep.mubr.msk.bf16.mxu1 %vm437_vm1, %v1855_v13 }
  0x2a   : > { %1746 = vmatmul.mubr.msk.bf16.gmra.mrb[8].mxu0 %vm437_vm1, %v1856_v14 }
  0x2b   : > { %1780 = vmatmul.mubr.msk.bf16.gmra.mrb[8].mxu1 %vm437_vm1, %v1857_v15  ;;  %1749 = vmatprep.mubr.msk.bf16.mxu0 %vm437_vm1, %v1858_v16 }
  0x2c   : > { %1783 = vmatprep.mubr.msk.bf16.mxu1 %vm437_vm1, %v1859_v17 }
  0x32   : > { %1750 = vmatmul.mubr.msk.bf16.gmra.mrb[12].mxu0 %vm437_vm1, %v1860_v18 }
  0x33   : > { %1784 = vmatmul.mubr.msk.bf16.gmra.mrb[12].mxu1 %vm437_vm1, %v1861_v19  ;;  %1753 = vmatprep.mubr.msk.bf16.mxu0 %vm437_vm1, %v1862_v20 }
  0x34   : > { %1787 = vmatprep.mubr.msk.bf16.mxu1 %vm437_vm1, %v1863_v21 }
  0x3a   : > { %1754 = vmatmul.mubr.msk.bf16.gmra.mrb[16].mxu0 %vm437_vm1, %v1864_v22 }
  0x3b   : > { %1788 = vmatmul.mubr.msk.bf16.gmra.mrb[16].mxu1 %vm437_vm1, %v1865_v23  ;;  %1757 = vmatprep.mubr.msk.bf16.mxu0 %vm437_vm1, %v1866_v24 }
  0x3c   : > { %1791 = vmatprep.mubr.msk.bf16.mxu1 %vm437_vm1, %v1867_v25 }
  0x42   : > { %1758 = vmatmul.mubr.msk.bf16.gmra.mrb[20].mxu0 %vm437_vm1, %v1868_v26 }
  0x43   : > { %1792 = vmatmul.mubr.msk.bf16.gmra.mrb[20].mxu1 %vm437_vm1, %v1869_v27  ;;  %1761 = vmatprep.mubr.msk.bf16.mxu0 %vm437_vm1, %v1870_v28 }
  0x44   : > { %1795 = vmatprep.mubr.msk.bf16.mxu1 %vm437_vm1, %v1871_v29 }
  0x4a   : > { %1762 = vmatmul.mubr.msk.bf16.gmra.mrb[24].mxu0 %vm437_vm1, %v1872_v30 }
  0x4b   : > { %1796 = vmatmul.mubr.msk.bf16.gmra.mrb[24].mxu1 %vm437_vm1, %v1873_v31  ;;  %1765 = vmatprep.mubr.msk.bf16.mxu0 %vm437_vm1, %v1874_v32 }
  0x4c   : > { %1799 = vmatprep.mubr.msk.bf16.mxu1 %vm437_vm1, %v1875_v33 }
  0x52   : > { %1766 = vmatmul.mubr.msk.bf16.gmra.mrb[28].mxu0 %vm437_vm1, %v1876_v34 }
  0x53   : > { %1800 = vmatmul.mubr.msk.bf16.gmra.mrb[28].mxu1 %vm437_vm1, %v1877_v35 }
  0xed   : > { %v1739_v38 = vpop.f32.mrb[0].mxu0 }
  0xee   : > { %v533_v39 = vadd.f32 %v1739_v38, %v2121_v36  ;;  %v1773_v40 = vpop.f32.mrb[0].mxu1  ;;  %v524_v41 = vpop.f32.mrb[1].mxu0 }
  0xef   : > { %v1058_v42 = vadd.f32 %v1773_v40, %v2127_v37  ;;  %v525_v43 = vadd.f32 %v2121_v36, %v524_v41  ;;  %v1049_v44 = vpop.f32.mrb[1].mxu1  ;;  %v1740_v45 = vpop.f32.mrb[2].mxu0 }
  0xf0   : > { %v653_v46 = vmax.f32 %v533_v39, 0.0  ;;  %v1050_v47 = vadd.f32 %v2127_v37, %v1049_v44  ;;  %v536_v48 = vadd.f32 %v1740_v45, %v2121_v36  ;;  %v1774_v49 = vpop.f32.mrb[2].mxu1  ;;  %v527_v50 = vpop.f32.mrb[3].mxu0 }
  0xf1   : > { %v1178_v51 = vmax.f32 %v1058_v42, 0.0  ;;  %v651_v52 = vmax.f32 %v525_v43, 0.0  ;;  %v1061_v53 = vadd.f32 %v1774_v49, %v2127_v37  ;;  %v528_v54 = vadd.f32 %v2121_v36, %v527_v50  ;;  %v1052_v55 = vpop.f32.mrb[3].mxu1 }
  0xf2   : > { %v1638_v56 = vpack.c.bf16 %v653_v46, %v653_v46  ;;  %v1176_v57 = vmax.f32 %v1050_v47, 0.0  ;;  %v654_v58 = vmax.f32 %v536_v48, 0.0  ;;  %v1053_v59 = vadd.f32 %v2127_v37, %v1052_v55 }
  0xf3   : > { %v1670_v60 = vpack.c.bf16 %v1178_v51, %v1178_v51  ;;  %v1636_v61 = vpack.c.bf16 %v651_v52, %v651_v52  ;;  %v1179_v62 = vmax.f32 %v1061_v53, 0.0  ;;  %v652_v63 = vmax.f32 %v528_v54, 0.0 }
  0xf4   : > { %814 = vst.msk [vmem:[%s2140_s20 + $0x8] sm:$0xf] %vm811_vm2, %v1638_v56  ;;  %v1668_v0 = vpack.c.bf16 %v1176_v57, %v1176_v57  ;;  %v1639_v1 = vpack.c.bf16 %v654_v58, %v654_v58  ;;  %v1177_v2 = vmax.f32 %v1053_v59, 0.0 }
  0xf5   : > { %1338 = vst.msk [vmem:[%s2147_s18 + $0x8] sm:$0xf] %vm811_vm2, %v1670_v60  ;;  %812 = vst.msk [vmem:[%s2140_s20] sm:$0xf] %vm811_vm2, %v1636_v61  ;;  %v1671_v3 = vpack.c.bf16 %v1179_v62, %v1179_v62  ;;  %v1637_v4 = vpack.c.bf16 %v652_v63, %v652_v63  ;;  %v1743_v5 = vpop.f32.mrb[4].mxu0 }
  0xf6   : > { %1336 = vst.msk [vmem:[%s2147_s18] sm:$0xf] %vm811_vm2, %v1668_v0  ;;  %815 = vst.msk [vmem:[%s2140_s20 + $0xc] sm:$0xf] %vm811_vm2, %v1639_v1  ;;  %v1669_v6 = vpack.c.bf16 %v1177_v2, %v1177_v2  ;;  %v549_v7 = vadd.f32 %v1743_v5, %v2121_v36  ;;  %v1777_v8 = vpop.f32.mrb[4].mxu1  ;;  %v540_v9 = vpop.f32.mrb[5].mxu0 }
  0xf7   : > { %1339 = vst.msk [vmem:[%s2147_s18 + $0xc] sm:$0xf] %vm811_vm2, %v1671_v3  ;;  %813 = vst.msk [vmem:[%s2140_s20 + $0x4] sm:$0xf] %vm811_vm2, %v1637_v4  ;;  %v1074_v10 = vadd.f32 %v1777_v8, %v2127_v37  ;;  %v541_v11 = vadd.f32 %v2121_v36, %v540_v9  ;;  %v1065_v12 = vpop.f32.mrb[5].mxu1  ;;  %v1744_v13 = vpop.f32.mrb[6].mxu0 }
  0xf8   : > { %1337 = vst.msk [vmem:[%s2147_s18 + $0x4] sm:$0xf] %vm811_vm2, %v1669_v6  ;;  %v657_v14 = vmax.f32 %v549_v7, 0.0  ;;  %v1066_v15 = vadd.f32 %v2127_v37, %v1065_v12  ;;  %v552_v16 = vadd.f32 %v1744_v13, %v2121_v36  ;;  %v1778_v17 = vpop.f32.mrb[6].mxu1  ;;  %v543_v18 = vpop.f32.mrb[7].mxu0 }
  0xf9   : > { %v1182_v19 = vmax.f32 %v1074_v10, 0.0  ;;  %v655_v20 = vmax.f32 %v541_v11, 0.0  ;;  %v1077_v21 = vadd.f32 %v1778_v17, %v2127_v37  ;;  %v544_v22 = vadd.f32 %v2121_v36, %v543_v18  ;;  %v1068_v23 = vpop.f32.mrb[7].mxu1 }
  0xfa   : > { %v1642_v24 = vpack.c.bf16 %v657_v14, %v657_v14  ;;  %v1180_v25 = vmax.f32 %v1066_v15, 0.0  ;;  %v658_v26 = vmax.f32 %v552_v16, 0.0  ;;  %v1069_v27 = vadd.f32 %v2127_v37, %v1068_v23 }
  0xfb   : > { %v1674_v28 = vpack.c.bf16 %v1182_v19, %v1182_v19  ;;  %v1640_v29 = vpack.c.bf16 %v655_v20, %v655_v20  ;;  %v1183_v30 = vmax.f32 %v1077_v21, 0.0  ;;  %v656_v31 = vmax.f32 %v544_v22, 0.0 }
  0xfc   : > { %818 = vst.msk [vmem:[%s2140_s20 + $0x18] sm:$0xf] %vm811_vm2, %v1642_v24  ;;  %v1672_v32 = vpack.c.bf16 %v1180_v25, %v1180_v25  ;;  %v1643_v33 = vpack.c.bf16 %v658_v26, %v658_v26  ;;  %v1181_v34 = vmax.f32 %v1069_v27, 0.0 }
  0xfd   : > { %1342 = vst.msk [vmem:[%s2147_s18 + $0x18] sm:$0xf] %vm811_vm2, %v1674_v28  ;;  %816 = vst.msk [vmem:[%s2140_s20 + $0x10] sm:$0xf] %vm811_vm2, %v1640_v29  ;;  %v1675_v35 = vpack.c.bf16 %v1183_v30, %v1183_v30  ;;  %v1641_v38 = vpack.c.bf16 %v656_v31, %v656_v31  ;;  %v1747_v39 = vpop.f32.mrb[8].mxu0 }
  0xfe   : > { %1340 = vst.msk [vmem:[%s2147_s18 + $0x10] sm:$0xf] %vm811_vm2, %v1672_v32  ;;  %819 = vst.msk [vmem:[%s2140_s20 + $0x1c] sm:$0xf] %vm811_vm2, %v1643_v33  ;;  %v1673_v40 = vpack.c.bf16 %v1181_v34, %v1181_v34  ;;  %v565_v41 = vadd.f32 %v1747_v39, %v2121_v36  ;;  %v1781_v42 = vpop.f32.mrb[8].mxu1  ;;  %v556_v43 = vpop.f32.mrb[9].mxu0 }
  0xff   : > { %1343 = vst.msk [vmem:[%s2147_s18 + $0x1c] sm:$0xf] %vm811_vm2, %v1675_v35  ;;  %817 = vst.msk [vmem:[%s2140_s20 + $0x14] sm:$0xf] %vm811_vm2, %v1641_v38  ;;  %v1090_v44 = vadd.f32 %v1781_v42, %v2127_v37  ;;  %v557_v45 = vadd.f32 %v2121_v36, %v556_v43  ;;  %v1081_v46 = vpop.f32.mrb[9].mxu1  ;;  %v1748_v47 = vpop.f32.mrb[10].mxu0 }
 0x100   : > { %1341 = vst.msk [vmem:[%s2147_s18 + $0x14] sm:$0xf] %vm811_vm2, %v1673_v40  ;;  %v661_v48 = vmax.f32 %v565_v41, 0.0  ;;  %v1082_v49 = vadd.f32 %v2127_v37, %v1081_v46  ;;  %v568_v50 = vadd.f32 %v1748_v47, %v2121_v36  ;;  %v1782_v51 = vpop.f32.mrb[10].mxu1  ;;  %v559_v52 = vpop.f32.mrb[11].mxu0 }
 0x101   : > { %v1186_v53 = vmax.f32 %v1090_v44, 0.0  ;;  %v659_v54 = vmax.f32 %v557_v45, 0.0  ;;  %v1093_v55 = vadd.f32 %v1782_v51, %v2127_v37  ;;  %v560_v56 = vadd.f32 %v2121_v36, %v559_v52  ;;  %v1084_v57 = vpop.f32.mrb[11].mxu1 }
 0x102   : > { %v1646_v58 = vpack.c.bf16 %v661_v48, %v661_v48  ;;  %v1184_v59 = vmax.f32 %v1082_v49, 0.0  ;;  %v662_v60 = vmax.f32 %v568_v50, 0.0  ;;  %v1085_v61 = vadd.f32 %v2127_v37, %v1084_v57 }
 0x103   : > { %v1678_v62 = vpack.c.bf16 %v1186_v53, %v1186_v53  ;;  %v1644_v63 = vpack.c.bf16 %v659_v54, %v659_v54  ;;  %v1187_v0 = vmax.f32 %v1093_v55, 0.0  ;;  %v660_v1 = vmax.f32 %v560_v56, 0.0 }
 0x104   : > { %822 = vst.msk [vmem:[%s2140_s20 + $0x28] sm:$0xf] %vm811_vm2, %v1646_v58  ;;  %v1676_v2 = vpack.c.bf16 %v1184_v59, %v1184_v59  ;;  %v1647_v3 = vpack.c.bf16 %v662_v60, %v662_v60  ;;  %v1185_v4 = vmax.f32 %v1085_v61, 0.0 }
 0x105   : > { %1346 = vst.msk [vmem:[%s2147_s18 + $0x28] sm:$0xf] %vm811_vm2, %v1678_v62  ;;  %820 = vst.msk [vmem:[%s2140_s20 + $0x20] sm:$0xf] %vm811_vm2, %v1644_v63  ;;  %v1679_v5 = vpack.c.bf16 %v1187_v0, %v1187_v0  ;;  %v1645_v6 = vpack.c.bf16 %v660_v1, %v660_v1  ;;  %v1751_v7 = vpop.f32.mrb[12].mxu0 }
 0x106   : > { %1344 = vst.msk [vmem:[%s2147_s18 + $0x20] sm:$0xf] %vm811_vm2, %v1676_v2  ;;  %823 = vst.msk [vmem:[%s2140_s20 + $0x2c] sm:$0xf] %vm811_vm2, %v1647_v3  ;;  %v1677_v8 = vpack.c.bf16 %v1185_v4, %v1185_v4  ;;  %v581_v9 = vadd.f32 %v1751_v7, %v2121_v36  ;;  %v1785_v10 = vpop.f32.mrb[12].mxu1  ;;  %v572_v11 = vpop.f32.mrb[13].mxu0 }
 0x107   : > { %1347 = vst.msk [vmem:[%s2147_s18 + $0x2c] sm:$0xf] %vm811_vm2, %v1679_v5  ;;  %821 = vst.msk [vmem:[%s2140_s20 + $0x24] sm:$0xf] %vm811_vm2, %v1645_v6  ;;  %v1106_v12 = vadd.f32 %v1785_v10, %v2127_v37  ;;  %v573_v13 = vadd.f32 %v2121_v36, %v572_v11  ;;  %v1097_v14 = vpop.f32.mrb[13].mxu1  ;;  %v1752_v15 = vpop.f32.mrb[14].mxu0 }
 0x108   : > { %1345 = vst.msk [vmem:[%s2147_s18 + $0x24] sm:$0xf] %vm811_vm2, %v1677_v8  ;;  %v665_v16 = vmax.f32 %v581_v9, 0.0  ;;  %v1098_v17 = vadd.f32 %v2127_v37, %v1097_v14  ;;  %v584_v18 = vadd.f32 %v1752_v15, %v2121_v36  ;;  %v1786_v19 = vpop.f32.mrb[14].mxu1  ;;  %v575_v20 = vpop.f32.mrb[15].mxu0 }
 0x109   : > { %v1190_v21 = vmax.f32 %v1106_v12, 0.0  ;;  %v663_v22 = vmax.f32 %v573_v13, 0.0  ;;  %v1109_v23 = vadd.f32 %v1786_v19, %v2127_v37  ;;  %v576_v24 = vadd.f32 %v2121_v36, %v575_v20  ;;  %v1100_v25 = vpop.f32.mrb[15].mxu1 }
 0x10a   : > { %v1650_v26 = vpack.c.bf16 %v665_v16, %v665_v16  ;;  %v1188_v27 = vmax.f32 %v1098_v17, 0.0  ;;  %v666_v28 = vmax.f32 %v584_v18, 0.0  ;;  %v1101_v29 = vadd.f32 %v2127_v37, %v1100_v25 }
 0x10b   : > { %v1682_v30 = vpack.c.bf16 %v1190_v21, %v1190_v21  ;;  %v1648_v31 = vpack.c.bf16 %v663_v22, %v663_v22  ;;  %v1191_v32 = vmax.f32 %v1109_v23, 0.0  ;;  %v664_v33 = vmax.f32 %v576_v24, 0.0 }
 0x10c   : > { %826 = vst.msk [vmem:[%s2140_s20 + $0x38] sm:$0xf] %vm811_vm2, %v1650_v26  ;;  %v1680_v34 = vpack.c.bf16 %v1188_v27, %v1188_v27  ;;  %v1651_v35 = vpack.c.bf16 %v666_v28, %v666_v28  ;;  %v1189_v38 = vmax.f32 %v1101_v29, 0.0 }
 0x10d   : > { %1350 = vst.msk [vmem:[%s2147_s18 + $0x38] sm:$0xf] %vm811_vm2, %v1682_v30  ;;  %824 = vst.msk [vmem:[%s2140_s20 + $0x30] sm:$0xf] %vm811_vm2, %v1648_v31  ;;  %v1683_v39 = vpack.c.bf16 %v1191_v32, %v1191_v32  ;;  %v1649_v40 = vpack.c.bf16 %v664_v33, %v664_v33  ;;  %v1755_v41 = vpop.f32.mrb[16].mxu0 }
 0x10e   : > { %1348 = vst.msk [vmem:[%s2147_s18 + $0x30] sm:$0xf] %vm811_vm2, %v1680_v34  ;;  %827 = vst.msk [vmem:[%s2140_s20 + $0x3c] sm:$0xf] %vm811_vm2, %v1651_v35  ;;  %v1681_v42 = vpack.c.bf16 %v1189_v38, %v1189_v38  ;;  %v597_v43 = vadd.f32 %v1755_v41, %v2121_v36  ;;  %v1789_v44 = vpop.f32.mrb[16].mxu1  ;;  %v588_v45 = vpop.f32.mrb[17].mxu0 }
 0x10f   : > { %1351 = vst.msk [vmem:[%s2147_s18 + $0x3c] sm:$0xf] %vm811_vm2, %v1683_v39  ;;  %825 = vst.msk [vmem:[%s2140_s20 + $0x34] sm:$0xf] %vm811_vm2, %v1649_v40  ;;  %v1122_v46 = vadd.f32 %v1789_v44, %v2127_v37  ;;  %v589_v47 = vadd.f32 %v2121_v36, %v588_v45  ;;  %v1113_v48 = vpop.f32.mrb[17].mxu1  ;;  %v1756_v49 = vpop.f32.mrb[18].mxu0 }
 0x110   : > { %1349 = vst.msk [vmem:[%s2147_s18 + $0x34] sm:$0xf] %vm811_vm2, %v1681_v42  ;;  %v669_v50 = vmax.f32 %v597_v43, 0.0  ;;  %v1114_v51 = vadd.f32 %v2127_v37, %v1113_v48  ;;  %v600_v52 = vadd.f32 %v1756_v49, %v2121_v36  ;;  %v1790_v53 = vpop.f32.mrb[18].mxu1  ;;  %v591_v54 = vpop.f32.mrb[19].mxu0 }
 0x111   : > { %v1194_v55 = vmax.f32 %v1122_v46, 0.0  ;;  %v667_v56 = vmax.f32 %v589_v47, 0.0  ;;  %v1125_v57 = vadd.f32 %v1790_v53, %v2127_v37  ;;  %v592_v58 = vadd.f32 %v2121_v36, %v591_v54  ;;  %v1116_v59 = vpop.f32.mrb[19].mxu1 }
 0x112   : > { %v1654_v60 = vpack.c.bf16 %v669_v50, %v669_v50  ;;  %v1192_v61 = vmax.f32 %v1114_v51, 0.0  ;;  %v670_v62 = vmax.f32 %v600_v52, 0.0  ;;  %v1117_v63 = vadd.f32 %v2127_v37, %v1116_v59 }
 0x113   : > { %v1686_v0 = vpack.c.bf16 %v1194_v55, %v1194_v55  ;;  %v1652_v1 = vpack.c.bf16 %v667_v56, %v667_v56  ;;  %v1195_v2 = vmax.f32 %v1125_v57, 0.0  ;;  %v668_v3 = vmax.f32 %v592_v58, 0.0 }
 0x114   : > { %830 = vst.msk [vmem:[%s2140_s20 + $0x48] sm:$0xf] %vm811_vm2, %v1654_v60  ;;  %v1684_v4 = vpack.c.bf16 %v1192_v61, %v1192_v61  ;;  %v1655_v5 = vpack.c.bf16 %v670_v62, %v670_v62  ;;  %v1193_v6 = vmax.f32 %v1117_v63, 0.0 }
 0x115   : > { %1354 = vst.msk [vmem:[%s2147_s18 + $0x48] sm:$0xf] %vm811_vm2, %v1686_v0  ;;  %828 = vst.msk [vmem:[%s2140_s20 + $0x40] sm:$0xf] %vm811_vm2, %v1652_v1  ;;  %v1687_v7 = vpack.c.bf16 %v1195_v2, %v1195_v2  ;;  %v1653_v8 = vpack.c.bf16 %v668_v3, %v668_v3  ;;  %v1759_v9 = vpop.f32.mrb[20].mxu0 }
 0x116   : > { %1352 = vst.msk [vmem:[%s2147_s18 + $0x40] sm:$0xf] %vm811_vm2, %v1684_v4  ;;  %831 = vst.msk [vmem:[%s2140_s20 + $0x4c] sm:$0xf] %vm811_vm2, %v1655_v5  ;;  %v1685_v10 = vpack.c.bf16 %v1193_v6, %v1193_v6  ;;  %v613_v11 = vadd.f32 %v1759_v9, %v2121_v36  ;;  %v1793_v12 = vpop.f32.mrb[20].mxu1  ;;  %v604_v13 = vpop.f32.mrb[21].mxu0 }
 0x117   : > { %1355 = vst.msk [vmem:[%s2147_s18 + $0x4c] sm:$0xf] %vm811_vm2, %v1687_v7  ;;  %829 = vst.msk [vmem:[%s2140_s20 + $0x44] sm:$0xf] %vm811_vm2, %v1653_v8  ;;  %v1138_v14 = vadd.f32 %v1793_v12, %v2127_v37  ;;  %v605_v15 = vadd.f32 %v2121_v36, %v604_v13  ;;  %v1129_v16 = vpop.f32.mrb[21].mxu1  ;;  %v1760_v17 = vpop.f32.mrb[22].mxu0 }
 0x118   : > { %1353 = vst.msk [vmem:[%s2147_s18 + $0x44] sm:$0xf] %vm811_vm2, %v1685_v10  ;;  %v673_v18 = vmax.f32 %v613_v11, 0.0  ;;  %v1130_v19 = vadd.f32 %v2127_v37, %v1129_v16  ;;  %v616_v20 = vadd.f32 %v1760_v17, %v2121_v36  ;;  %v1794_v21 = vpop.f32.mrb[22].mxu1  ;;  %v607_v22 = vpop.f32.mrb[23].mxu0 }
 0x119   : > { %v1198_v23 = vmax.f32 %v1138_v14, 0.0  ;;  %v671_v24 = vmax.f32 %v605_v15, 0.0  ;;  %v1141_v25 = vadd.f32 %v1794_v21, %v2127_v37  ;;  %v608_v26 = vadd.f32 %v2121_v36, %v607_v22  ;;  %v1132_v27 = vpop.f32.mrb[23].mxu1 }
 0x11a   : > { %v1658_v28 = vpack.c.bf16 %v673_v18, %v673_v18  ;;  %v1196_v29 = vmax.f32 %v1130_v19, 0.0  ;;  %v674_v30 = vmax.f32 %v616_v20, 0.0  ;;  %v1133_v31 = vadd.f32 %v2127_v37, %v1132_v27 }
 0x11b   : > { %v1690_v32 = vpack.c.bf16 %v1198_v23, %v1198_v23  ;;  %v1656_v33 = vpack.c.bf16 %v671_v24, %v671_v24  ;;  %v1199_v34 = vmax.f32 %v1141_v25, 0.0  ;;  %v672_v35 = vmax.f32 %v608_v26, 0.0 }
 0x11c   : > { %834 = vst.msk [vmem:[%s2140_s20 + $0x58] sm:$0xf] %vm811_vm2, %v1658_v28  ;;  %v1688_v38 = vpack.c.bf16 %v1196_v29, %v1196_v29  ;;  %v1659_v39 = vpack.c.bf16 %v674_v30, %v674_v30  ;;  %v1197_v40 = vmax.f32 %v1133_v31, 0.0 }
 0x11d   : > { %1358 = vst.msk [vmem:[%s2147_s18 + $0x58] sm:$0xf] %vm811_vm2, %v1690_v32  ;;  %832 = vst.msk [vmem:[%s2140_s20 + $0x50] sm:$0xf] %vm811_vm2, %v1656_v33  ;;  %v1691_v41 = vpack.c.bf16 %v1199_v34, %v1199_v34  ;;  %v1657_v42 = vpack.c.bf16 %v672_v35, %v672_v35  ;;  %v1763_v43 = vpop.f32.mrb[24].mxu0 }
 0x11e   : > { %1356 = vst.msk [vmem:[%s2147_s18 + $0x50] sm:$0xf] %vm811_vm2, %v1688_v38  ;;  %835 = vst.msk [vmem:[%s2140_s20 + $0x5c] sm:$0xf] %vm811_vm2, %v1659_v39  ;;  %v1689_v44 = vpack.c.bf16 %v1197_v40, %v1197_v40  ;;  %v629_v45 = vadd.f32 %v1763_v43, %v2121_v36  ;;  %v1797_v46 = vpop.f32.mrb[24].mxu1  ;;  %v620_v47 = vpop.f32.mrb[25].mxu0 }
 0x11f   : > { %1359 = vst.msk [vmem:[%s2147_s18 + $0x5c] sm:$0xf] %vm811_vm2, %v1691_v41  ;;  %833 = vst.msk [vmem:[%s2140_s20 + $0x54] sm:$0xf] %vm811_vm2, %v1657_v42  ;;  %v1154_v48 = vadd.f32 %v1797_v46, %v2127_v37  ;;  %v621_v49 = vadd.f32 %v2121_v36, %v620_v47  ;;  %v1145_v50 = vpop.f32.mrb[25].mxu1  ;;  %v1764_v51 = vpop.f32.mrb[26].mxu0 }
 0x120   : > { %1357 = vst.msk [vmem:[%s2147_s18 + $0x54] sm:$0xf] %vm811_vm2, %v1689_v44  ;;  %v677_v52 = vmax.f32 %v629_v45, 0.0  ;;  %v1146_v53 = vadd.f32 %v2127_v37, %v1145_v50  ;;  %v632_v54 = vadd.f32 %v1764_v51, %v2121_v36  ;;  %v1798_v55 = vpop.f32.mrb[26].mxu1  ;;  %v623_v56 = vpop.f32.mrb[27].mxu0 }
 0x121   : > { %v1202_v57 = vmax.f32 %v1154_v48, 0.0  ;;  %v675_v58 = vmax.f32 %v621_v49, 0.0  ;;  %v1157_v59 = vadd.f32 %v1798_v55, %v2127_v37  ;;  %v624_v60 = vadd.f32 %v2121_v36, %v623_v56  ;;  %v1148_v61 = vpop.f32.mrb[27].mxu1 }
 0x122   : > { %v1662_v62 = vpack.c.bf16 %v677_v52, %v677_v52  ;;  %v1200_v63 = vmax.f32 %v1146_v53, 0.0  ;;  %v678_v0 = vmax.f32 %v632_v54, 0.0  ;;  %v1149_v1 = vadd.f32 %v2127_v37, %v1148_v61 }
 0x123   : > { %v1694_v2 = vpack.c.bf16 %v1202_v57, %v1202_v57  ;;  %v1660_v3 = vpack.c.bf16 %v675_v58, %v675_v58  ;;  %v1203_v4 = vmax.f32 %v1157_v59, 0.0  ;;  %v676_v5 = vmax.f32 %v624_v60, 0.0 }
 0x124   : > { %838 = vst.msk [vmem:[%s2140_s20 + $0x68] sm:$0xf] %vm811_vm2, %v1662_v62  ;;  %v1692_v6 = vpack.c.bf16 %v1200_v63, %v1200_v63  ;;  %v1663_v7 = vpack.c.bf16 %v678_v0, %v678_v0  ;;  %v1201_v8 = vmax.f32 %v1149_v1, 0.0 }
 0x125   : > { %1362 = vst.msk [vmem:[%s2147_s18 + $0x68] sm:$0xf] %vm811_vm2, %v1694_v2  ;;  %836 = vst.msk [vmem:[%s2140_s20 + $0x60] sm:$0xf] %vm811_vm2, %v1660_v3  ;;  %v1695_v9 = vpack.c.bf16 %v1203_v4, %v1203_v4  ;;  %v1661_v10 = vpack.c.bf16 %v676_v5, %v676_v5  ;;  %v1767_v11 = vpop.f32.mrb[28].mxu0 }
 0x126   : > { %1360 = vst.msk [vmem:[%s2147_s18 + $0x60] sm:$0xf] %vm811_vm2, %v1692_v6  ;;  %839 = vst.msk [vmem:[%s2140_s20 + $0x6c] sm:$0xf] %vm811_vm2, %v1663_v7  ;;  %v1693_v12 = vpack.c.bf16 %v1201_v8, %v1201_v8  ;;  %v645_v13 = vadd.f32 %v1767_v11, %v2121_v36  ;;  %v1801_v14 = vpop.f32.mrb[28].mxu1  ;;  %v636_v15 = vpop.f32.mrb[29].mxu0 }
 0x127   : > { %1363 = vst.msk [vmem:[%s2147_s18 + $0x6c] sm:$0xf] %vm811_vm2, %v1695_v9  ;;  %837 = vst.msk [vmem:[%s2140_s20 + $0x64] sm:$0xf] %vm811_vm2, %v1661_v10  ;;  %v1170_v16 = vadd.f32 %v1801_v14, %v2127_v37  ;;  %v637_v17 = vadd.f32 %v2121_v36, %v636_v15  ;;  %v1161_v18 = vpop.f32.mrb[29].mxu1  ;;  %v1768_v19 = vpop.f32.mrb[30].mxu0 }
 0x128   : > { %1361 = vst.msk [vmem:[%s2147_s18 + $0x64] sm:$0xf] %vm811_vm2, %v1693_v12  ;;  %v681_v20 = vmax.f32 %v645_v13, 0.0  ;;  %v1162_v21 = vadd.f32 %v2127_v37, %v1161_v18  ;;  %v648_v22 = vadd.f32 %v1768_v19, %v2121_v36  ;;  %v1802_v23 = vpop.f32.mrb[30].mxu1  ;;  %v639_v24 = vpop.f32.mrb[31].mxu0 }
 0x129   : > { %v1206_v25 = vmax.f32 %v1170_v16, 0.0  ;;  %v679_v26 = vmax.f32 %v637_v17, 0.0  ;;  %v1173_v27 = vadd.f32 %v1802_v23, %v2127_v37  ;;  %v640_v28 = vadd.f32 %v2121_v36, %v639_v24  ;;  %v1164_v29 = vpop.f32.mrb[31].mxu1 }
 0x12a   : > { %v1666_v30 = vpack.c.bf16 %v681_v20, %v681_v20  ;;  %v1204_v31 = vmax.f32 %v1162_v21, 0.0  ;;  %v682_v32 = vmax.f32 %v648_v22, 0.0  ;;  %v1165_v33 = vadd.f32 %v2127_v37, %v1164_v29 }
 0x12b   : > { %v1698_v34 = vpack.c.bf16 %v1206_v25, %v1206_v25  ;;  %v1664_v35 = vpack.c.bf16 %v679_v26, %v679_v26  ;;  %v1207_v38 = vmax.f32 %v1173_v27, 0.0  ;;  %v680_v39 = vmax.f32 %v640_v28, 0.0 }
 0x12c   : > { %842 = vst.msk [vmem:[%s2140_s20 + $0x78] sm:$0xf] %vm811_vm2, %v1666_v30  ;;  %v1696_v36 = vpack.c.bf16 %v1204_v31, %v1204_v31  ;;  %v1667_v40 = vpack.c.bf16 %v682_v32, %v682_v32  ;;  %v1205_v41 = vmax.f32 %v1165_v33, 0.0 }
 0x12d   : > { %1366 = vst.msk [vmem:[%s2147_s18 + $0x78] sm:$0xf] %vm811_vm2, %v1698_v34  ;;  %840 = vst.msk [vmem:[%s2140_s20 + $0x70] sm:$0xf] %vm811_vm2, %v1664_v35  ;;  %v1699_v37 = vpack.c.bf16 %v1207_v38, %v1207_v38  ;;  %v1665_v42 = vpack.c.bf16 %v680_v39, %v680_v39 }
 0x12e   : > { %1364 = vst.msk [vmem:[%s2147_s18 + $0x70] sm:$0xf] %vm811_vm2, %v1696_v36  ;;  %843 = vst.msk [vmem:[%s2140_s20 + $0x7c] sm:$0xf] %vm811_vm2, %v1667_v40  ;;  %v1697_v43 = vpack.c.bf16 %v1205_v41, %v1205_v41 }
 0x12f   : > { %1367 = vst.msk [vmem:[%s2147_s18 + $0x7c] sm:$0xf] %vm811_vm2, %v1699_v37  ;;  %841 = vst.msk [vmem:[%s2140_s20 + $0x74] sm:$0xf] %vm811_vm2, %v1665_v42 }
 0x130   : > { %1365 = vst.msk [vmem:[%s2147_s18 + $0x74] sm:$0xf] %vm811_vm2, %v1697_v43 }
 0x131   : > { %1891 = shalt.err (!%p1888_p3)
}
 0x132   : > { %s1892_s13 = scalar_lea.hbm %s2326_s29, 2048  ;;  %s1896_s20 = scalar_lea.hbm %s2390_s7, 4096 }
 0x133   : > { %p1893_p4 = scmp.ne.s32.totalorder %s2326_s29, %s1892_s13  ;;  %p1897_p9 = scmp.lt.u32.totalorder %s2326_s29, %s2390_s7 }
 0x134   : > { %p1898_p10 = scmp.lt.u32.totalorder %s1896_s20, %s1892_s13  ;;  %p1900_p12 = scmp.lt.u32.totalorder %s1892_s13, %s2326_s29 }
 0x135   : > { %p1894_p7 = pnand %p1893_p4, %p2023_p5 }
 0x136   : > { %p1899_p11 = por %p1898_p10, %p1897_p9 }
 0x137   : > { %p1895_p8 = pneg %p1894_p7 }
 0x138   : > { %p1901_p13 = por %p1900_p12, %p1899_p11 }
 0x13a   : > { %p1902_p0 = pnand %p1901_p13, %p1895_p8 }
 0x13c   : > { %1905 = shalt.err (!%p1902_p0)
}
 0x13d   : > { %s1943_s28 = smov 64   ;;  %s1944_s23 = smov 4  }
 0x13e   : > { %1805 = dma.vmem_to_hbm [thread:$0]  (%p2023_p5), %s2328_s22, 2048, %s2326_s29, %s2342_s8, %s1943_s28, %s1943_s28, %s1944_s23  }
 0x13f PF: > { %p1811_p1 = scmp.ge.s32.totalorder %s1940_s27, 2  ;;  %s1414_s9 = sand.u32 1, %s1928_s24  }
 0x140   : > { %s1415_s14 = scalar_lea.sflag [#allocation3], %s1414_s9 }
 0x141   : > { %p1808_p2 = pnand %p1811_p1, %p2027_p6 }
 0x143   : > { %1923 = dma.done.wait (!%p1808_p2), %s1415_s14, 2048  }
 0x144   : > { %1925 = vsyncadd (!%p1808_p2), %s1415_s14, 4294965248  ;;  %p18_p3 = scmp.ge.s32.totalorder %s2010_s30, 4   ;;  %s2393_s24 = smov %s1932_s25 }
 0x145   : > { %s2394_s25 = smov %s1936_s26  ;;  %s2395_s26 = smov %s2021_s10 }
 0x146   : > { %s2396_s27 = smov %s2010_s30  ;;  %20 = sbr.rel (!%p18_p3) target bundleno = 3 (0x3), region = 94 }
 0x14d   :  { %1420 = vsyncpa [#allocation3], 1 }
 0x14e   :  { %1422 = vsyncpa [#allocation3 + $0x1], 1 }

// kernel: a_call__.16
= control target key start
LH: loop header
LB: loop body
LE: loop exit
PB: predicated region body
PF: predicated region fallthrough
CT: control target
= control target key end

     0   :  { %12 = vsyncpa [#allocation3], 0  ;;  %s3086_s0 = inlined_call_operand.vmem [shape: bf16[512,72], index: 0, kind: input, shape index: {}]   ;;  %s3087_s1 = inlined_call_operand.vmem [shape: bf16[72,56], index: 1, kind: input, shape index: {}]   ;;  %s3088_s2 = inlined_call_operand.vmem [shape: f32[1,56], index: 2, kind: input, shape index: {}]   ;;  %s3089_s3 = inlined_call_operand.hbm [shape: bf16[512,8], index: 3, kind: output, shape index: {0}]   ;;  %s3090_s4 = inlined_call_operand.hbm [shape: bf16[512,8], index: 4, kind: output, shape index: {1}]   ;;  %s3091_s5 = inlined_call_operand.vmem [shape: bf16[512,8], index: 5, kind: output, shape index: {2}]   ;;  %s3092_s6 = inlined_call_operand.vmem [shape: bf16[512,8], index: 6, kind: output, shape index: {3}]  }
   0x1   :  { %14 = vsyncpa [#allocation3 + $0x1], 0 }
   0x2   :  { %15 = vsyncpa [#allocation5], 0 }
   0x3   :  { %17 = vsyncpa [#allocation5 + $0x1], 0  ;;  %s2164_s21 = smov 0   ;;  %s2166_s22 = smov 0  }
   0x4   :  { %s2168_s23 = smov 0   ;;  %s2170_s24 = smov 0  }
   0x5 LB: > { %s2185_s25 = sadd.s32 4294967295, %s2119_s24   ;;  %s1691_s26 = sadd.s32 4294967294, %s2119_s24   ;;  %s2119_s24 = sphi %s2170_s24, %s3106_s24   ;;  %s2115_s23 = sphi %s2168_s23, %s3105_s23   ;;  %s2111_s22 = sphi %s2166_s22, %s3104_s22   ;;  %s2107_s21 = sphi %s2164_s21, %s3103_s21  }
   0x6   : > { %s2189_s27 = sadd.s32 1, %s2119_s24   ;;  %s98_s28 = sadd.s32 1, %s2115_s23 }
   0x7   : > { %s95_s29 = ssub.s32 %s2119_s24, %s2189_s27  ;;  %p108_p0 = scmp.ne.s32.totalorder %s2115_s23, %s2111_s22 }
   0x8   : > { %p96_p1 = scmp.eq.s32.totalorder %s95_s29, 0  ;;  %p109_p2 = scmp.eq.s32.totalorder %s2185_s25, 1 }
   0x9   : > { %p114_p3 = scmp.ne.s32.totalorder %s2111_s22, %s2107_s21  ;;  %p115_p4 = scmp.eq.s32.totalorder %s1691_s26, 1 }
   0xa   : > { %s2200_s30 = scalar_select %p96_p1, %s2115_s23, %s98_s28  }
   0xb   : > { %p2202_p5 = por %p109_p2, %p108_p0  ;;  %p2206_p6 = por %p115_p4, %p114_p3 }
   0xc   : > { %p1694_p7 = scmp.ge.s32.totalorder %s2119_s24, 1  ;;  %p226_p8 = scmp.lt.s32.totalorder %s2119_s24, 3 }
   0xe   : > { %p227_p9 = pnand %p1694_p7, %p226_p8 }
   0xf   : > { %v2004_v0 = vld [vmem:[%s3087_s1] sm:$0xff] (!%p227_p9)   ;;  %v2005_v1 = vld [vmem:[%s3087_s1 + $0x8] sm:$0xff] (!%p227_p9)   ;;  %s1697_s13 = sshll.u32 (!%p227_p9), %s2185_s25, 5  ;;  %v2006_v2 = vld [vmem:[%s3087_s1 + $0x10] sm:$0xff] (!%p227_p9)   ;;  %vm447_vm0 = vcmask (!%p227_p9), 588800   ;;  %vm496_vm1 = vcmask (!%p227_p9), 1043456  }
  0x10   : > { %230 = sbr.rel (%p227_p9) target bundleno = 641 (0x281), region = 32  ;;  %1900 = vmatprep.subr.bf16.mxu0 (!%p227_p9), %v2004_v0  ;;  %1942 = vmatprep.subr.bf16.mxu1 (!%p227_p9), %v2004_v0  ;;  %p272_p10 = scmp.lt.s32.totalorder (!%p227_p9), %s1697_s13, 63  ;;  %v2007_v3 = vld [vmem:[%s3087_s1 + $0x18] sm:$0xff] (!%p227_p9)   ;;  %v2008_v6 = vld [vmem:[%s3087_s1 + $0x20] ss:$0 sps:$4 sm:$0xff] (!%p227_p9)   ;;  %vm981_vm2 = vcmask (!%p227_p9), 60416  }
  0x11   : > { %1901 = vmatpush3.bf16.msra.mxu0 (!%p227_p9), %v2004_v0  ;;  %1947 = vmatpush3.bf16.msra.mxu1 (!%p227_p9), %v2004_v0  ;;  %v498_v7 = vsel (!%p227_p9), %vm496_vm1, %v2008_v6, 0  ;;  %v2271_v22 = vld [vmem:[%s3088_s2] ss:$0 sm:$0xff] (!%p227_p9)  ;;  %s2121_s11 = smov (!%p227_p9), 120   ;;  %s3094_s12 = smov (!%p227_p9), 80  }
  0x12   : > { %1902 = vmatprep.subr.bf16.mxu0 (!%p227_p9), %v2005_v1  ;;  %1943 = vmatprep.subr.bf16.mxu1 (!%p227_p9), %v2005_v1  ;;  %s2123_s17 = smov (!%p227_p9), 112   ;;  %s3093_s28 = sshll.u32 (!%p227_p9), %s2185_s25, 11 }
  0x13   : > { %s2125_s19 = smov (!%p227_p9), [#allocation2]  }
  0x14   : > { %s2029_s9 = sshll.u32 (!%p227_p9), %s2125_s19, 4  ;;  %s2030_s9 = int_to_ptr.vmem [resolvable:$false] %s2029_s9 }
  0x15   : > { %1903 = vmatpush3.bf16.msra.mxu0 (!%p227_p9), %v2005_v1  ;;  %1948 = vmatpush3.bf16.msra.mxu1 (!%p227_p9), %v2005_v1  ;;  %s2031_s10 = scalar_lea.vmem (!%p227_p9), %s2030_s9, 4096 }
  0x16   : > { %1904 = vmatprep.subr.bf16.mxu0 (!%p227_p9), %v2006_v2  ;;  %1944 = vmatprep.subr.bf16.mxu1 (!%p227_p9), %v2006_v2 }
  0x17   : > { %s3108_s13 = smov (!%p272_p10, %s1697_s13), 63 }
  0x18   : > { %s2222_s16 = sshll.u32 %s3108_s13, 2  ;;  %s2579_s13 = sand.u32 1, %s2111_s22  }
  0x19   : > { %s2231_s26 = scalar_lea.vmem %s3086_s0, %s2222_s16  ;;  %1905 = vmatpush3.bf16.msra.mxu0 %v2006_v2  ;;  %1949 = vmatpush3.bf16.msra.mxu1 %v2006_v2  ;;  %s1695_s14 = sshll.u32 %s2579_s13, 7 }
  0x1a   : > { %v2009_v4 = vld [vmem:[%s2231_s26] sm:$0xff]   ;;  %1906 = vmatprep.subr.bf16.mxu0 %v2007_v3  ;;  %1945 = vmatprep.subr.bf16.mxu1 %v2007_v3  ;;  %v2011_v8 = vld [vmem:[%s2231_s26 + $0x8] sm:$0xff]   ;;  %v2013_v10 = vld [vmem:[%s2231_s26 + $0x10] sm:$0xff]   ;;  %s2598_s15 = scalar_lea.vmem [#allocation2], %s1695_s14  ;;  %s2620_s20 = scalar_lea.vmem %s3092_s6, %s2222_s16 }
  0x1b   : > { %v2010_v5 = vld [vmem:[%s2231_s26 + $0x40] sm:$0xff]   ;;  %1910 = vmatprep.mubr.msk.bf16.mxu0 %vm447_vm0, %v2009_v4  ;;  %v2012_v9 = vld [vmem:[%s2231_s26 + $0x48] sm:$0xff]   ;;  %v2015_v11 = vld [vmem:[%s2231_s26 + $0x50] sm:$0xff]   ;;  %s1523_s29 = sshll.u32 %s2598_s15, 4  ;;  %s2845_s18 = scalar_lea.vmem [#allocation4], %s1695_s14  ;;  %s2851_s29 = int_to_ptr.vmem [resolvable:$true] %s1523_s29 }
  0x1c   : > { %1926 = vmatprep.mubr.msk.bf16.mxu1 %vm447_vm0, %v2010_v5  ;;  %v2014_v12 = vld [vmem:[%s2231_s26 + $0x18] sm:$0xff]   ;;  %v2017_v14 = vld [vmem:[%s2231_s26 + $0x20] sm:$0xff]   ;;  %v2018_v16 = vld [vmem:[%s2231_s26 + $0x28] sm:$0xff]   ;;  %s2025_s14 = scalar_lea.vmem %s2851_s29, 2048  ;;  %p2032_p0 = scmp.lt.s32.totalorder %s2851_s29, %s2030_s9 }
  0x1d   : > { %1907 = vmatpush3.bf16.msra.mxu0 %v2007_v3  ;;  %1950 = vmatpush3.bf16.msra.mxu1 %v2007_v3  ;;  %v2016_v13 = vld [vmem:[%s2231_s26 + $0x58] sm:$0xff]   ;;  %v2019_v15 = vld [vmem:[%s2231_s26 + $0x60] sm:$0xff]   ;;  %v2020_v17 = vld [vmem:[%s2231_s26 + $0x68] sm:$0xff]   ;;  %p2026_p11 = scmp.ne.s32.totalorder %s2851_s29, %s2025_s14  ;;  %p2033_p1 = scmp.lt.s32.totalorder %s2031_s10, %s2025_s14 }
  0x1e   : > { %1952 = vmatprep.subr.msk.bf16.mxu0 %vm496_vm1, %v2008_v6  ;;  %1953 = vmatprep.subr.msk.bf16.mxu1 %vm496_vm1, %v2008_v6  ;;  %v2021_v18 = vld [vmem:[%s2231_s26 + $0x30] sm:$0xff]   ;;  %v2022_v20 = vld [vmem:[%s2231_s26 + $0x38] sm:$0xff]  }
  0x1f   : > { %v2023_v19 = vld [vmem:[%s2231_s26 + $0x70] sm:$0xff]   ;;  %v2024_v21 = vld [vmem:[%s2231_s26 + $0x78] sm:$0xff]   ;;  %s3096_s26 = smov 96   ;;  %p2027_p12 = pnand %p2026_p11, %p2202_p5 }
  0x20   : > { %p2034_p2 = por %p2033_p1, %p2032_p0 }
  0x21   : > { %1909 = vmatpush3.bf16.msra.mxu0 %v498_v7  ;;  %1951 = vmatpush3.bf16.msra.mxu1 %v498_v7  ;;  %p2028_p13 = pneg %p2027_p12 }
  0x23   : > { %p2035_p3 = pnand %p2034_p2, %p2028_p13 }
  0x24   : > { %1911 = vmatmul.mubr.msk.bf16.vlgmr.msra.gmra.mrb[0].mxu0 %vm447_vm0, %v2011_v8  ;;  %1927 = vmatmul.mubr.msk.bf16.vlgmr.msra.gmra.mrb[0].mxu1 %vm447_vm0, %v2012_v9 }
  0x25   : > { %1914 = vmatprep.mubr.msk.bf16.mxu0 %vm447_vm0, %v2013_v10  ;;  %1930 = vmatprep.mubr.msk.bf16.mxu1 %vm447_vm0, %v2015_v11 }
  0x2c   : > { %1915 = vmatmul.mubr.msk.bf16.gmra.mrb[4].mxu0 %vm447_vm0, %v2014_v12  ;;  %1931 = vmatmul.mubr.msk.bf16.gmra.mrb[4].mxu1 %vm447_vm0, %v2016_v13 }
  0x2d   : > { %1918 = vmatprep.mubr.msk.bf16.mxu0 %vm447_vm0, %v2017_v14  ;;  %1934 = vmatprep.mubr.msk.bf16.mxu1 %vm447_vm0, %v2019_v15 }
  0x34   : > { %1919 = vmatmul.mubr.msk.bf16.gmra.mrb[8].mxu0 %vm447_vm0, %v2018_v16  ;;  %1935 = vmatmul.mubr.msk.bf16.gmra.mrb[8].mxu1 %vm447_vm0, %v2020_v17 }
  0x35   : > { %1922 = vmatprep.mubr.msk.bf16.mxu0 %vm447_vm0, %v2021_v18  ;;  %1938 = vmatprep.mubr.msk.bf16.mxu1 %vm447_vm0, %v2023_v19 }
  0x3c   : > { %1923 = vmatmul.mubr.msk.bf16.gmra.mrb[12].mxu0 %vm447_vm0, %v2022_v20  ;;  %1939 = vmatmul.mubr.msk.bf16.gmra.mrb[12].mxu1 %vm447_vm0, %v2024_v21 }
  0xf7   : > { %v1912_v23 = vpop.f32.mrb[0].mxu0  ;;  %v1928_v24 = vpop.f32.mrb[0].mxu1 }
  0xf8   : > { %v543_v25 = vadd.f32 %v1912_v23, %v2271_v22  ;;  %v607_v26 = vadd.f32 %v1928_v24, %v2271_v22  ;;  %v534_v27 = vpop.f32.mrb[1].mxu0  ;;  %v598_v28 = vpop.f32.mrb[1].mxu1 }
  0xf9   : > { %v1913_v29 = vpop.f32.mrb[2].mxu0  ;;  %v1929_v30 = vpop.f32.mrb[2].mxu1  ;;  %v535_v33 = vadd.f32 %v2271_v22, %v534_v27  ;;  %v599_v38 = vadd.f32 %v2271_v22, %v598_v28 }
  0xfa   : > { %v2275_v31 = vmax.f32 %v543_v25, 0.0  ;;  %v2277_v32 = vmax.f32 %v607_v26, 0.0  ;;  %v546_v34 = vadd.f32 %v1913_v29, %v2271_v22  ;;  %v537_v35 = vpop.f32.mrb[3].mxu0  ;;  %v601_v36 = vpop.f32.mrb[3].mxu1  ;;  %v610_v40 = vadd.f32 %v1929_v30, %v2271_v22 }
  0xfb   : > { %v2285_v37 = vmax.f32 %v535_v33, 0.0  ;;  %v2305_v47 = vmax.f32 %v599_v38, 0.0  ;;  %v602_v49 = vadd.f32 %v2271_v22, %v601_v36  ;;  %v538_v60 = vadd.f32 %v2271_v22, %v537_v35 }
  0xfc   : > { %761 = vrot.lane.b32.xlu0 %v2277_v32, %s2121_s11  ;;  %729 = vrot.lane.b32.xlu1 %v2275_v31, %s2121_s11  ;;  %v2288_v39 = vmax.f32 %v546_v34, 0.0  ;;  %v2307_v48 = vmax.f32 %v610_v40, 0.0  ;;  %v1847_v53 = vpack.c.bf16 %v2275_v31, %v2275_v31  ;;  %v1863_v2 = vpack.c.bf16 %v2277_v32, %v2277_v32 }
  0xfd   : > { %v2318_v52 = vmax.f32 %v602_v49, 0.0  ;;  %v2356_v9 = vmax.f32 %v538_v60, 0.0  ;;  %v1845_v23 = vpack.c.bf16 %v2285_v37, %v2285_v37  ;;  %v1861_v35 = vpack.c.bf16 %v2305_v47, %v2305_v47 }
  0xfe   : > { %v1848_v1 = vpack.c.bf16 %v2288_v39, %v2288_v39  ;;  %v1864_v10 = vpack.c.bf16 %v2307_v48, %v2307_v48 }
  0xff   : > { %v2291_v41 = vpop.f32.mrb[4].mxu0  ;;  %v2293_v42 = vpop.f32.mrb[4].mxu1  ;;  %v1846_v21 = vpack.c.bf16 %v2356_v9, %v2356_v9  ;;  %v1862_v34 = vpack.c.bf16 %v2318_v52, %v2318_v52 }
 0x100   : > { %731 = vrot.lane.b32.xlu1 %v2288_v39, %s2121_s11  ;;  %725 = vrot.lane.b32.xlu0 %v2285_v37, %s2121_s11  ;;  %v2299_v43 = vpop.f32.mrb[5].mxu0  ;;  %v2301_v44 = vpop.f32.mrb[5].mxu1  ;;  %v559_v30 = vadd.f32 %v2291_v41, %v2271_v22  ;;  %v623_v40 = vadd.f32 %v2293_v42, %v2271_v22 }
 0x101   : > { %v1917_v45 = vpop.f32.mrb[6].mxu0  ;;  %v2303_v46 = vpop.f32.mrb[6].mxu1 }
 0x102   : > { %v2310_v50 = vpop.f32.mrb[7].mxu0  ;;  %v2312_v51 = vpop.f32.mrb[7].mxu1  ;;  %v562_v33 = vadd.f32 %v1917_v45, %v2271_v22  ;;  %v2402_v36 = vmax.f32 %v559_v30, 0.0  ;;  %v626_v41 = vadd.f32 %v2303_v46, %v2271_v22  ;;  %v551_v45 = vadd.f32 %v2271_v22, %v2299_v43 }
 0x103   : > { %v554_v49 = vadd.f32 %v2271_v22, %v2310_v50  ;;  %v615_v43 = vadd.f32 %v2271_v22, %v2301_v44  ;;  %v618_v50 = vadd.f32 %v2271_v22, %v2312_v51 }
 0x104   : > { %763 = vrot.lane.b32.xlu1 %v2307_v48, %s2121_s11  ;;  %757 = vrot.lane.b32.xlu0 %v2305_v47, %s2121_s11  ;;  %v2404_v38 = vmax.f32 %v562_v33, 0.0  ;;  %v2426_v42 = vmax.f32 %v551_v45, 0.0 }
 0x105   : > { %v2428_v46 = vmax.f32 %v554_v49, 0.0 }
 0x106   : > { %v1852_v44 = vpack.c.bf16 %v2404_v38, %v2404_v38 }
 0x107   : > { %v1920_v54 = vpop.f32.mrb[8].mxu0  ;;  %v1936_v55 = vpop.f32.mrb[8].mxu1  ;;  %v1850_v60 = vpack.c.bf16 %v2428_v46, %v2428_v46 }
 0x108   : > { %759 = vrot.lane.b32.xlu1 %v2318_v52, %s2121_s11  ;;  %1370 = vrot.lane.b32.xlu0 %v1847_v53, %s3094_s12  ;;  %v2326_v56 = vadd.f32 %v1920_v54, %v2271_v22  ;;  %v566_v57 = vpop.f32.mrb[9].mxu0  ;;  %v2329_v58 = vadd.f32 %v1936_v55, %v2271_v22  ;;  %v630_v59 = vpop.f32.mrb[9].mxu1  ;;  %v2418_v53 = vmax.f32 %v623_v40, 0.0  ;;  %v2420_v54 = vmax.f32 %v626_v41, 0.0 }
 0x109   : > { %v2333_v61 = vadd.f32 %v2271_v22, %v566_v57  ;;  %v1921_v62 = vpop.f32.mrb[10].mxu0  ;;  %v2336_v63 = vadd.f32 %v2271_v22, %v630_v59  ;;  %v1937_v0 = vpop.f32.mrb[10].mxu1  ;;  %v2438_v55 = vmax.f32 %v615_v43, 0.0  ;;  %v2440_v57 = vmax.f32 %v618_v50, 0.0 }
 0x10a   : > { %v2343_v3 = vadd.f32 %v1921_v62, %v2271_v22  ;;  %v569_v4 = vpop.f32.mrb[11].mxu0  ;;  %v2346_v5 = vadd.f32 %v1937_v0, %v2271_v22  ;;  %v633_v6 = vpop.f32.mrb[11].mxu1  ;;  %v1868_v51 = vpack.c.bf16 %v2420_v54, %v2420_v54  ;;  %v1867_v59 = vpack.c.bf16 %v2418_v53, %v2418_v53 }
 0x10b   : > { %v2349_v7 = vadd.f32 %v2271_v22, %v569_v4  ;;  %v2352_v8 = vadd.f32 %v2271_v22, %v633_v6  ;;  %v1849_v62 = vpack.c.bf16 %v2426_v42, %v2426_v42  ;;  %v1866_v0 = vpack.c.bf16 %v2440_v57, %v2440_v57 }
 0x10c   : > { %1372 = vrot.lane.b32.xlu1 %v1848_v1, %s3094_s12  ;;  %1402 = vrot.lane.b32.xlu0 %v1863_v2, %s3094_s12  ;;  %v1865_v1 = vpack.c.bf16 %v2438_v55, %v2438_v55  ;;  %v2471_v2 = vmax.f32 %v2326_v56, 0.0  ;;  %v2474_v4 = vmax.f32 %v2343_v3, 0.0  ;;  %v2481_v6 = vmax.f32 %v2329_v58, 0.0 }
 0x10d   : > { %v2491_v56 = vmax.f32 %v2333_v61, 0.0  ;;  %v2494_v3 = vmax.f32 %v2349_v7, 0.0  ;;  %v2501_v58 = vmax.f32 %v2336_v63, 0.0 }
 0x10e   : > { %v1856_v61 = vpack.c.bf16 %v2474_v4, %v2474_v4  ;;  %v1855_v7 = vpack.c.bf16 %v2471_v2, %v2471_v2 }
 0x10f   : > { %v1924_v11 = vpop.f32.mrb[12].mxu0  ;;  %v1940_v12 = vpop.f32.mrb[12].mxu1 }
 0x110   : > { %1404 = vrot.lane.b32.xlu1 %v1864_v10, %s3094_s12  ;;  %727 = vrot.lane.b32.xlu0 %v2356_v9, %s2121_s11  ;;  %v2364_v13 = vadd.f32 %v1924_v11, %v2271_v22  ;;  %v582_v14 = vpop.f32.mrb[13].mxu0  ;;  %v2367_v15 = vadd.f32 %v1940_v12, %v2271_v22  ;;  %v646_v16 = vpop.f32.mrb[13].mxu1  ;;  %v2484_v10 = vmax.f32 %v2346_v5, 0.0  ;;  %v2504_v5 = vmax.f32 %v2352_v8, 0.0 }
 0x111   : > { %v2370_v17 = vadd.f32 %v2271_v22, %v582_v14  ;;  %v1925_v18 = vpop.f32.mrb[14].mxu0  ;;  %v2373_v19 = vadd.f32 %v2271_v22, %v646_v16  ;;  %v1941_v20 = vpop.f32.mrb[14].mxu1  ;;  %v1871_v8 = vpack.c.bf16 %v2481_v6, %v2481_v6  ;;  %v1854_v11 = vpack.c.bf16 %v2494_v3, %v2494_v3 }
 0x112   : > { %v2380_v24 = vadd.f32 %v1925_v18, %v2271_v22  ;;  %v585_v25 = vpop.f32.mrb[15].mxu0  ;;  %v2383_v26 = vadd.f32 %v1941_v20, %v2271_v22  ;;  %v649_v27 = vpop.f32.mrb[15].mxu1  ;;  %v1872_v63 = vpack.c.bf16 %v2484_v10, %v2484_v10  ;;  %v1853_v12 = vpack.c.bf16 %v2491_v56, %v2491_v56 }
 0x113   : > { %v2386_v28 = vadd.f32 %v2271_v22, %v585_v25  ;;  %v2389_v29 = vadd.f32 %v2271_v22, %v649_v27  ;;  %v1851_v22 = vpack.c.bf16 %v2402_v36, %v2402_v36  ;;  %v1870_v14 = vpack.c.bf16 %v2504_v5, %v2504_v5 }
 0x114   : > { %1368 = vrot.lane.b32.xlu1 %v1846_v21, %s3094_s12  ;;  %1366 = vrot.lane.b32.xlu0 %v1845_v23, %s3094_s12  ;;  %v1869_v16 = vpack.c.bf16 %v2501_v58, %v2501_v58  ;;  %v2535_v18 = vmax.f32 %v2364_v13, 0.0  ;;  %v2538_v20 = vmax.f32 %v2380_v24, 0.0  ;;  %v2545_v21 = vmax.f32 %v2367_v15, 0.0 }
 0x115   : > { %v2548_v23 = vmax.f32 %v2383_v26, 0.0  ;;  %v2555_v13 = vmax.f32 %v2370_v17, 0.0  ;;  %v2558_v24 = vmax.f32 %v2386_v28, 0.0  ;;  %v2565_v15 = vmax.f32 %v2373_v19, 0.0 }
 0x116   : > { %v2568_v25 = vmax.f32 %v2389_v29, 0.0  ;;  %v1860_v17 = vpack.c.bf16 %v2538_v20, %v2538_v20  ;;  %v1859_v26 = vpack.c.bf16 %v2535_v18, %v2535_v18 }
 0x117   : > { %v1858_v28 = vpack.c.bf16 %v2558_v24, %v2558_v24  ;;  %v1857_v29 = vpack.c.bf16 %v2555_v13, %v2555_v13  ;;  %v1873_v49 = vpack.c.bf16 %v2565_v15, %v2565_v15 }
 0x118   : > { %1400 = vrot.lane.b32.xlu1 %v1862_v34, %s3094_s12  ;;  %1398 = vrot.lane.b32.xlu0 %v1861_v35, %s3094_s12  ;;  %v1874_v45 = vpack.c.bf16 %v2568_v25, %v2568_v25 }
 0x11c   : > { %739 = vrot.lane.b32.xlu1 %v2404_v38, %s2121_s11  ;;  %737 = vrot.lane.b32.xlu0 %v2402_v36, %s2121_s11 }
 0x120   : > { %771 = vrot.lane.b32.xlu1 %v2420_v54, %s2121_s11  ;;  %769 = vrot.lane.b32.xlu0 %v2418_v53, %s2121_s11 }
 0x124   : > { %735 = vrot.lane.b32.xlu1 %v2428_v46, %s2121_s11  ;;  %733 = vrot.lane.b32.xlu0 %v2426_v42, %s2121_s11 }
 0x128   : > { %767 = vrot.lane.b32.xlu1 %v2440_v57, %s2121_s11  ;;  %765 = vrot.lane.b32.xlu0 %v2438_v55, %s2121_s11 }
 0x12c   : > { %1380 = vrot.lane.b32.xlu1 %v1852_v44, %s3094_s12  ;;  %1378 = vrot.lane.b32.xlu0 %v1851_v22, %s3094_s12 }
 0x130   : > { %1412 = vrot.lane.b32.xlu1 %v1868_v51, %s3094_s12  ;;  %1410 = vrot.lane.b32.xlu0 %v1867_v59, %s3094_s12 }
 0x134   : > { %1376 = vrot.lane.b32.xlu1 %v1850_v60, %s3094_s12  ;;  %1374 = vrot.lane.b32.xlu0 %v1849_v62, %s3094_s12 }
 0x138   : > { %1408 = vrot.lane.b32.xlu1 %v1866_v0, %s3094_s12  ;;  %1406 = vrot.lane.b32.xlu0 %v1865_v1, %s3094_s12 }
 0x13c   : > { %747 = vrot.lane.b32.xlu1 %v2474_v4, %s2121_s11  ;;  %745 = vrot.lane.b32.xlu0 %v2471_v2, %s2121_s11 }
 0x140   : > { %779 = vrot.lane.b32.xlu1 %v2484_v10, %s2121_s11  ;;  %777 = vrot.lane.b32.xlu0 %v2481_v6, %s2121_s11 }
 0x144   : > { %743 = vrot.lane.b32.xlu1 %v2494_v3, %s2121_s11  ;;  %741 = vrot.lane.b32.xlu0 %v2491_v56, %s2121_s11 }
 0x148   : > { %775 = vrot.lane.b32.xlu1 %v2504_v5, %s2121_s11  ;;  %773 = vrot.lane.b32.xlu0 %v2501_v58, %s2121_s11 }
 0x14c   : > { %1388 = vrot.lane.b32.xlu1 %v1856_v61, %s3094_s12  ;;  %1386 = vrot.lane.b32.xlu0 %v1855_v7, %s3094_s12 }
 0x150   : > { %1420 = vrot.lane.b32.xlu1 %v1872_v63, %s3094_s12  ;;  %1418 = vrot.lane.b32.xlu0 %v1871_v8, %s3094_s12 }
 0x154   : > { %1384 = vrot.lane.b32.xlu1 %v1854_v11, %s3094_s12  ;;  %1382 = vrot.lane.b32.xlu0 %v1853_v12, %s3094_s12 }
 0x158   : > { %1416 = vrot.lane.b32.xlu1 %v1870_v14, %s3094_s12  ;;  %1414 = vrot.lane.b32.xlu0 %v1869_v16, %s3094_s12 }
 0x15c   : > { %755 = vrot.lane.b32.xlu1 %v2538_v20, %s2121_s11  ;;  %753 = vrot.lane.b32.xlu0 %v2535_v18, %s2121_s11 }
 0x160   : > { %787 = vrot.lane.b32.xlu1 %v2548_v23, %s2121_s11  ;;  %785 = vrot.lane.b32.xlu0 %v2545_v21, %s2121_s11 }
 0x164   : > { %751 = vrot.lane.b32.xlu1 %v2558_v24, %s2121_s11  ;;  %749 = vrot.lane.b32.xlu0 %v2555_v13, %s2121_s11 }
 0x168   : > { %783 = vrot.lane.b32.xlu1 %v2568_v25, %s2121_s11  ;;  %781 = vrot.lane.b32.xlu0 %v2565_v15, %s2121_s11  ;;  %s2841_s11 = scalar_lea.hbm %s3089_s3, %s3093_s28 }
 0x16c   : > { %1396 = vrot.lane.b32.xlu1 %v1860_v17, %s3094_s12  ;;  %1394 = vrot.lane.b32.xlu0 %v1859_v26, %s3094_s12 }
 0x16e   : > { %v762_v19 = vpop.permute.xlu0 %761  ;;  %v730_v27 = vpop.permute.xlu1 %729 }
 0x16f   : > { %v839_v30 = vadd.f32 %v762_v19, %v2277_v32  ;;  %v823_v33 = vadd.f32 %v730_v27, %v2275_v31 }
 0x170   : > { %1392 = vrot.lane.b32.xlu1 %v1858_v28, %s3094_s12  ;;  %1390 = vrot.lane.b32.xlu0 %v1857_v29, %s3094_s12 }
 0x171   : > { %v1831_v34 = vpack.c.bf16 %v839_v30, %v839_v30  ;;  %v1815_v35 = vpack.c.bf16 %v823_v33, %v823_v33 }
 0x172   : > { %v732_v40 = vpop.permute.xlu1 %731  ;;  %v726_v41 = vpop.permute.xlu0 %725 }
 0x173   : > { %1000 = vst.msk [vmem:[%s2598_s15 + $0x48] sm:$0xf] %vm981_vm2, %v1831_v34  ;;  %984 = vst.msk [vmem:[%s2598_s15 + $0x8] sm:$0xf] %vm981_vm2, %v1815_v35  ;;  %v824_v31 = vadd.f32 %v732_v40, %v2288_v39  ;;  %v821_v32 = vadd.f32 %v726_v41, %v2285_v37 }
 0x174   : > { %1424 = vrot.lane.b32.xlu1 %v1874_v45, %s3094_s12  ;;  %1422 = vrot.lane.b32.xlu0 %v1873_v49, %s3094_s12 }
 0x175   : > { %v1816_v43 = vpack.c.bf16 %v824_v31, %v824_v31  ;;  %v1813_v50 = vpack.c.bf16 %v821_v32, %v821_v32 }
 0x176   : > { %v764_v44 = vpop.permute.xlu1 %763  ;;  %v758_v22 = vpop.permute.xlu0 %757 }
 0x177   : > { %985 = vst.msk [vmem:[%s2598_s15 + $0xc] sm:$0xf] %vm981_vm2, %v1816_v43  ;;  %982 = vst.msk [vmem:[%s2598_s15] sm:$0xf] %vm981_vm2, %v1813_v50  ;;  %v840_v51 = vadd.f32 %v764_v44, %v2307_v48  ;;  %v837_v39 = vadd.f32 %v758_v22, %v2305_v47 }
 0x178   : > { %1020 = vrot.lane.b32.xlu1 %v1816_v43, %s2123_s17  ;;  %1018 = vrot.lane.b32.xlu0 %v1815_v35, %s2123_s17 }
 0x179   : > { %v1832_v37 = vpack.c.bf16 %v840_v51, %v840_v51  ;;  %v1829_v59 = vpack.c.bf16 %v837_v39, %v837_v39 }
 0x17a   : > { %v760_v60 = vpop.permute.xlu1 %759  ;;  %v1371_v48 = vpop.permute.xlu0 %1370 }
 0x17b   : > { %1001 = vst.msk [vmem:[%s2598_s15 + $0x4c] sm:$0xf] %vm981_vm2, %v1832_v37  ;;  %998 = vst.msk [vmem:[%s2598_s15 + $0x40] sm:$0xf] %vm981_vm2, %v1829_v59  ;;  %v838_v47 = vadd.f32 %v760_v60, %v2318_v52 }
 0x17c   : > { %1464 = vst.msk [vmem:[%s2620_s20 + $0x8] sm:$0xf] %vm981_vm2, %v1371_v48  ;;  %1052 = vrot.lane.b32.xlu1 %v1832_v37, %s2123_s17  ;;  %1050 = vrot.lane.b32.xlu0 %v1831_v34, %s2123_s17 }
 0x17d   : > { %v1830_v62 = vpack.c.bf16 %v838_v47, %v838_v47 }
 0x17e   : > { %v1373_v0 = vpop.permute.xlu1 %1372  ;;  %v1403_v1 = vpop.permute.xlu0 %1402 }
 0x17f   : > { %999 = vst.msk [vmem:[%s2598_s15 + $0x44] sm:$0xf] %vm981_vm2, %v1830_v62  ;;  %1465 = vst.msk [vmem:[%s2620_s20 + $0xc] sm:$0xf] %vm981_vm2, %v1373_v0 }
 0x180   : > { %1480 = vst.msk [vmem:[%s2620_s20 + $0x48] sm:$0xf] %vm981_vm2, %v1403_v1  ;;  %1148 = vrot.lane.b32.xlu1 %v1816_v43, %s3096_s26  ;;  %1146 = vrot.lane.b32.xlu0 %v1815_v35, %s3096_s26 }
 0x182   : > { %v1405_v52 = vpop.permute.xlu1 %1404  ;;  %v728_v61 = vpop.permute.xlu0 %727 }
 0x183   : > { %1481 = vst.msk [vmem:[%s2620_s20 + $0x4c] sm:$0xf] %vm981_vm2, %v1405_v52  ;;  %v822_v7 = vadd.f32 %v728_v61, %v2356_v9 }
 0x184   : > { %1180 = vrot.lane.b32.xlu1 %v1832_v37, %s3096_s26  ;;  %1178 = vrot.lane.b32.xlu0 %v1831_v34, %s3096_s26 }
 0x185   : > { %v1814_v63 = vpack.c.bf16 %v822_v7, %v822_v7 }
 0x186   : > { %v1369_v8 = vpop.permute.xlu1 %1368  ;;  %v1367_v11 = vpop.permute.xlu0 %1366 }
 0x187   : > { %983 = vst.msk [vmem:[%s2598_s15 + $0x4] sm:$0xf] %vm981_vm2, %v1814_v63  ;;  %1463 = vst.msk [vmem:[%s2620_s20 + $0x4] sm:$0xf] %vm981_vm2, %v1369_v8 }
 0x188   : > { %1462 = vst.msk [vmem:[%s2620_s20] sm:$0xf] %vm981_vm2, %v1367_v11  ;;  %1016 = vrot.lane.b32.xlu1 %v1814_v63, %s2123_s17  ;;  %1014 = vrot.lane.b32.xlu0 %v1813_v50, %s2123_s17 }
 0x18a   : > { %v1401_v12 = vpop.permute.xlu1 %1400  ;;  %v1399_v9 = vpop.permute.xlu0 %1398 }
 0x18b   : > { %1479 = vst.msk [vmem:[%s2620_s20 + $0x44] sm:$0xf] %vm981_vm2, %v1401_v12  ;;  %1478 = vst.msk [vmem:[%s2620_s20 + $0x40] sm:$0xf] %vm981_vm2, %v1399_v9 }
 0x18c   : > { %1048 = vrot.lane.b32.xlu1 %v1830_v62, %s2123_s17  ;;  %1046 = vrot.lane.b32.xlu0 %v1829_v59, %s2123_s17 }
 0x18e   : > { %v740_v14 = vpop.permute.xlu1 %739  ;;  %v738_v16 = vpop.permute.xlu0 %737 }
 0x18f   : > { %v828_v17 = vadd.f32 %v740_v14, %v2404_v38  ;;  %v827_v26 = vadd.f32 %v738_v16, %v2402_v36 }
 0x190   : > { %1144 = vrot.lane.b32.xlu1 %v1814_v63, %s3096_s26  ;;  %1142 = vrot.lane.b32.xlu0 %v1813_v50, %s3096_s26 }
 0x191   : > { %v1820_v19 = vpack.c.bf16 %v828_v17, %v828_v17  ;;  %v1819_v27 = vpack.c.bf16 %v827_v26, %v827_v26 }
 0x192   : > { %v772_v28 = vpop.permute.xlu1 %771  ;;  %v770_v29 = vpop.permute.xlu0 %769 }
 0x193   : > { %989 = vst.msk [vmem:[%s2598_s15 + $0x1c] sm:$0xf] %vm981_vm2, %v1820_v19  ;;  %988 = vst.msk [vmem:[%s2598_s15 + $0x18] sm:$0xf] %vm981_vm2, %v1819_v27  ;;  %v844_v30 = vadd.f32 %v772_v28, %v2420_v54  ;;  %v843_v38 = vadd.f32 %v770_v29, %v2418_v53 }
 0x194   : > { %1176 = vrot.lane.b32.xlu1 %v1830_v62, %s3096_s26  ;;  %1174 = vrot.lane.b32.xlu0 %v1829_v59, %s3096_s26 }
 0x195   : > { %v1836_v36 = vpack.c.bf16 %v844_v30, %v844_v30  ;;  %v1835_v33 = vpack.c.bf16 %v843_v38, %v843_v38 }
 0x196   : > { %v736_v34 = vpop.permute.xlu1 %735  ;;  %v734_v35 = vpop.permute.xlu0 %733 }
 0x197   : > { %1005 = vst.msk [vmem:[%s2598_s15 + $0x5c] sm:$0xf] %vm981_vm2, %v1836_v36  ;;  %1004 = vst.msk [vmem:[%s2598_s15 + $0x58] sm:$0xf] %vm981_vm2, %v1835_v33  ;;  %v826_v40 = vadd.f32 %v736_v34, %v2428_v46  ;;  %v825_v54 = vadd.f32 %v734_v35, %v2426_v42 }
 0x198   : > { %1028 = vrot.lane.b32.xlu1 %v1820_v19, %s2123_s17  ;;  %1026 = vrot.lane.b32.xlu0 %v1819_v27, %s2123_s17 }
 0x199   : > { %v1818_v53 = vpack.c.bf16 %v826_v40, %v826_v40  ;;  %v1817_v41 = vpack.c.bf16 %v825_v54, %v825_v54 }
 0x19a   : > { %v768_v45 = vpop.permute.xlu1 %767  ;;  %v766_v49 = vpop.permute.xlu0 %765 }
 0x19b   : > { %987 = vst.msk [vmem:[%s2598_s15 + $0x14] sm:$0xf] %vm981_vm2, %v1818_v53  ;;  %986 = vst.msk [vmem:[%s2598_s15 + $0x10] sm:$0xf] %vm981_vm2, %v1817_v41  ;;  %v842_v46 = vadd.f32 %v768_v45, %v2440_v57  ;;  %v841_v42 = vadd.f32 %v766_v49, %v2438_v55 }
 0x19c   : > { %1060 = vrot.lane.b32.xlu1 %v1836_v36, %s2123_s17  ;;  %1058 = vrot.lane.b32.xlu0 %v1835_v33, %s2123_s17 }
 0x19d   : > { %v1834_v31 = vpack.c.bf16 %v842_v46, %v842_v46  ;;  %v1833_v32 = vpack.c.bf16 %v841_v42, %v841_v42 }
 0x19e   : > { %v1381_v43 = vpop.permute.xlu1 %1380  ;;  %v1379_v50 = vpop.permute.xlu0 %1378 }
 0x19f   : > { %1003 = vst.msk [vmem:[%s2598_s15 + $0x54] sm:$0xf] %vm981_vm2, %v1834_v31  ;;  %1002 = vst.msk [vmem:[%s2598_s15 + $0x50] sm:$0xf] %vm981_vm2, %v1833_v32 }
 0x1a0   : > { %1469 = vst.msk [vmem:[%s2620_s20 + $0x1c] sm:$0xf] %vm981_vm2, %v1381_v43  ;;  %1468 = vst.msk [vmem:[%s2620_s20 + $0x18] sm:$0xf] %vm981_vm2, %v1379_v50  ;;  %1156 = vrot.lane.b32.xlu1 %v1820_v19, %s3096_s26  ;;  %1154 = vrot.lane.b32.xlu0 %v1819_v27, %s3096_s26 }
 0x1a2   : > { %v1413_v55 = vpop.permute.xlu1 %1412  ;;  %v1411_v57 = vpop.permute.xlu0 %1410 }
 0x1a3   : > { %1485 = vst.msk [vmem:[%s2620_s20 + $0x5c] sm:$0xf] %vm981_vm2, %v1413_v55  ;;  %1484 = vst.msk [vmem:[%s2620_s20 + $0x58] sm:$0xf] %vm981_vm2, %v1411_v57 }
 0x1a4   : > { %1188 = vrot.lane.b32.xlu1 %v1836_v36, %s3096_s26  ;;  %1186 = vrot.lane.b32.xlu0 %v1835_v33, %s3096_s26 }
 0x1a6   : > { %v1377_v44 = vpop.permute.xlu1 %1376  ;;  %v1375_v22 = vpop.permute.xlu0 %1374 }
 0x1a7   : > { %1467 = vst.msk [vmem:[%s2620_s20 + $0x14] sm:$0xf] %vm981_vm2, %v1377_v44  ;;  %1466 = vst.msk [vmem:[%s2620_s20 + $0x10] sm:$0xf] %vm981_vm2, %v1375_v22 }
 0x1a8   : > { %1024 = vrot.lane.b32.xlu1 %v1818_v53, %s2123_s17  ;;  %1022 = vrot.lane.b32.xlu0 %v1817_v41, %s2123_s17 }
 0x1aa   : > { %v1409_v51 = vpop.permute.xlu1 %1408  ;;  %v1407_v39 = vpop.permute.xlu0 %1406 }
 0x1ab   : > { %1483 = vst.msk [vmem:[%s2620_s20 + $0x54] sm:$0xf] %vm981_vm2, %v1409_v51  ;;  %1482 = vst.msk [vmem:[%s2620_s20 + $0x50] sm:$0xf] %vm981_vm2, %v1407_v39 }
 0x1ac   : > { %1056 = vrot.lane.b32.xlu1 %v1834_v31, %s2123_s17  ;;  %1054 = vrot.lane.b32.xlu0 %v1833_v32, %s2123_s17 }
 0x1ae   : > { %v748_v37 = vpop.permute.xlu1 %747  ;;  %v746_v59 = vpop.permute.xlu0 %745 }
 0x1af   : > { %v832_v60 = vadd.f32 %v748_v37, %v2474_v4  ;;  %v831_v48 = vadd.f32 %v746_v59, %v2471_v2 }
 0x1b0   : > { %1152 = vrot.lane.b32.xlu1 %v1818_v53, %s3096_s26  ;;  %1150 = vrot.lane.b32.xlu0 %v1817_v41, %s3096_s26 }
 0x1b1   : > { %v1824_v47 = vpack.c.bf16 %v832_v60, %v832_v60  ;;  %v1823_v62 = vpack.c.bf16 %v831_v48, %v831_v48 }
 0x1b2   : > { %v780_v0 = vpop.permute.xlu1 %779  ;;  %v778_v1 = vpop.permute.xlu0 %777 }
 0x1b3   : > { %993 = vst.msk [vmem:[%s2598_s15 + $0x2c] sm:$0xf] %vm981_vm2, %v1824_v47  ;;  %992 = vst.msk [vmem:[%s2598_s15 + $0x28] sm:$0xf] %vm981_vm2, %v1823_v62  ;;  %v848_v52 = vadd.f32 %v780_v0, %v2484_v10  ;;  %v847_v4 = vadd.f32 %v778_v1, %v2481_v6 }
 0x1b4   : > { %1184 = vrot.lane.b32.xlu1 %v1834_v31, %s3096_s26  ;;  %1182 = vrot.lane.b32.xlu0 %v1833_v32, %s3096_s26 }
 0x1b5   : > { %v1840_v2 = vpack.c.bf16 %v848_v52, %v848_v52  ;;  %v1839_v61 = vpack.c.bf16 %v847_v4, %v847_v4 }
 0x1b6   : > { %v744_v7 = vpop.permute.xlu1 %743  ;;  %v742_v63 = vpop.permute.xlu0 %741 }
 0x1b7   : > { %1009 = vst.msk [vmem:[%s2598_s15 + $0x6c] sm:$0xf] %vm981_vm2, %v1840_v2  ;;  %1008 = vst.msk [vmem:[%s2598_s15 + $0x68] sm:$0xf] %vm981_vm2, %v1839_v61  ;;  %v830_v8 = vadd.f32 %v744_v7, %v2494_v3  ;;  %v829_v10 = vadd.f32 %v742_v63, %v2491_v56 }
 0x1b8   : > { %1036 = vrot.lane.b32.xlu1 %v1824_v47, %s2123_s17  ;;  %1034 = vrot.lane.b32.xlu0 %v1823_v62, %s2123_s17 }
 0x1b9   : > { %v1822_v6 = vpack.c.bf16 %v830_v8, %v830_v8  ;;  %v1821_v11 = vpack.c.bf16 %v829_v10, %v829_v10 }
 0x1ba   : > { %v776_v12 = vpop.permute.xlu1 %775  ;;  %v774_v9 = vpop.permute.xlu0 %773 }
 0x1bb   : > { %991 = vst.msk [vmem:[%s2598_s15 + $0x24] sm:$0xf] %vm981_vm2, %v1822_v6  ;;  %990 = vst.msk [vmem:[%s2598_s15 + $0x20] sm:$0xf] %vm981_vm2, %v1821_v11  ;;  %v846_v3 = vadd.f32 %v776_v12, %v2504_v5  ;;  %v845_v56 = vadd.f32 %v774_v9, %v2501_v58 }
 0x1bc   : > { %1068 = vrot.lane.b32.xlu1 %v1840_v2, %s2123_s17  ;;  %1066 = vrot.lane.b32.xlu0 %v1839_v61, %s2123_s17 }
 0x1bd   : > { %v1838_v14 = vpack.c.bf16 %v846_v3, %v846_v3  ;;  %v1837_v16 = vpack.c.bf16 %v845_v56, %v845_v56 }
 0x1be   : > { %v1389_v17 = vpop.permute.xlu1 %1388  ;;  %v1387_v26 = vpop.permute.xlu0 %1386 }
 0x1bf   : > { %1007 = vst.msk [vmem:[%s2598_s15 + $0x64] sm:$0xf] %vm981_vm2, %v1838_v14  ;;  %1006 = vst.msk [vmem:[%s2598_s15 + $0x60] sm:$0xf] %vm981_vm2, %v1837_v16 }
 0x1c0   : > { %1473 = vst.msk [vmem:[%s2620_s20 + $0x2c] sm:$0xf] %vm981_vm2, %v1389_v17  ;;  %1472 = vst.msk [vmem:[%s2620_s20 + $0x28] sm:$0xf] %vm981_vm2, %v1387_v26  ;;  %1164 = vrot.lane.b32.xlu1 %v1824_v47, %s3096_s26  ;;  %1162 = vrot.lane.b32.xlu0 %v1823_v62, %s3096_s26 }
 0x1c2   : > { %v1421_v58 = vpop.permute.xlu1 %1420  ;;  %v1419_v5 = vpop.permute.xlu0 %1418 }
 0x1c3   : > { %1489 = vst.msk [vmem:[%s2620_s20 + $0x6c] sm:$0xf] %vm981_vm2, %v1421_v58  ;;  %1488 = vst.msk [vmem:[%s2620_s20 + $0x68] sm:$0xf] %vm981_vm2, %v1419_v5 }
 0x1c4   : > { %1196 = vrot.lane.b32.xlu1 %v1840_v2, %s3096_s26  ;;  %1194 = vrot.lane.b32.xlu0 %v1839_v61, %s3096_s26 }
 0x1c6   : > { %v1385_v19 = vpop.permute.xlu1 %1384  ;;  %v1383_v27 = vpop.permute.xlu0 %1382 }
 0x1c7   : > { %1471 = vst.msk [vmem:[%s2620_s20 + $0x24] sm:$0xf] %vm981_vm2, %v1385_v19  ;;  %1470 = vst.msk [vmem:[%s2620_s20 + $0x20] sm:$0xf] %vm981_vm2, %v1383_v27 }
 0x1c8   : > { %1032 = vrot.lane.b32.xlu1 %v1822_v6, %s2123_s17  ;;  %1030 = vrot.lane.b32.xlu0 %v1821_v11, %s2123_s17 }
 0x1ca   : > { %v1417_v28 = vpop.permute.xlu1 %1416  ;;  %v1415_v29 = vpop.permute.xlu0 %1414 }
 0x1cb   : > { %1487 = vst.msk [vmem:[%s2620_s20 + $0x64] sm:$0xf] %vm981_vm2, %v1417_v28  ;;  %1486 = vst.msk [vmem:[%s2620_s20 + $0x60] sm:$0xf] %vm981_vm2, %v1415_v29 }
 0x1cc   : > { %1064 = vrot.lane.b32.xlu1 %v1838_v14, %s2123_s17  ;;  %1062 = vrot.lane.b32.xlu0 %v1837_v16, %s2123_s17 }
 0x1ce   : > { %v756_v30 = vpop.permute.xlu1 %755  ;;  %v754_v38 = vpop.permute.xlu0 %753 }
 0x1cf   : > { %v836_v36 = vadd.f32 %v756_v30, %v2538_v20  ;;  %v835_v33 = vadd.f32 %v754_v38, %v2535_v18 }
 0x1d0   : > { %1160 = vrot.lane.b32.xlu1 %v1822_v6, %s3096_s26  ;;  %1158 = vrot.lane.b32.xlu0 %v1821_v11, %s3096_s26 }
 0x1d1   : > { %v1828_v34 = vpack.c.bf16 %v836_v36, %v836_v36  ;;  %v1827_v35 = vpack.c.bf16 %v835_v33, %v835_v33 }
 0x1d2   : > { %v788_v40 = vpop.permute.xlu1 %787  ;;  %v786_v54 = vpop.permute.xlu0 %785 }
 0x1d3   : > { %997 = vst.msk [vmem:[%s2598_s15 + $0x3c] sm:$0xf] %vm981_vm2, %v1828_v34  ;;  %996 = vst.msk [vmem:[%s2598_s15 + $0x38] sm:$0xf] %vm981_vm2, %v1827_v35  ;;  %v852_v53 = vadd.f32 %v788_v40, %v2548_v23  ;;  %v851_v20 = vadd.f32 %v786_v54, %v2545_v21 }
 0x1d4   : > { %1192 = vrot.lane.b32.xlu1 %v1838_v14, %s3096_s26  ;;  %1190 = vrot.lane.b32.xlu0 %v1837_v16, %s3096_s26 }
 0x1d5   : > { %v1844_v18 = vpack.c.bf16 %v852_v53, %v852_v53  ;;  %v1843_v41 = vpack.c.bf16 %v851_v20, %v851_v20 }
 0x1d6   : > { %v752_v45 = vpop.permute.xlu1 %751  ;;  %v750_v49 = vpop.permute.xlu0 %749 }
 0x1d7   : > { %1013 = vst.msk [vmem:[%s2598_s15 + $0x7c] sm:$0xf] %vm981_vm2, %v1844_v18  ;;  %1012 = vst.msk [vmem:[%s2598_s15 + $0x78] sm:$0xf] %vm981_vm2, %v1843_v41  ;;  %v834_v46 = vadd.f32 %v752_v45, %v2558_v24  ;;  %v833_v42 = vadd.f32 %v750_v49, %v2555_v13 }
 0x1d8   : > { %1044 = vrot.lane.b32.xlu1 %v1828_v34, %s2123_s17  ;;  %1042 = vrot.lane.b32.xlu0 %v1827_v35, %s2123_s17 }
 0x1d9   : > { %v2790_v31 = vpack.c.bf16 %v834_v46, %v834_v46  ;;  %v2792_v32 = vpack.c.bf16 %v833_v42, %v833_v42 }
 0x1da   : > { %v784_v43 = vpop.permute.xlu1 %783  ;;  %v782_v50 = vpop.permute.xlu0 %781 }
 0x1db   : > { %995 = vst.msk [vmem:[%s2598_s15 + $0x34] sm:$0xf] %vm981_vm2, %v2790_v31  ;;  %994 = vst.msk [vmem:[%s2598_s15 + $0x30] sm:$0xf] %vm981_vm2, %v2792_v32  ;;  %v850_v13 = vadd.f32 %v784_v43, %v2568_v25  ;;  %v849_v24 = vadd.f32 %v782_v50, %v2565_v15 }
 0x1dc   : > { %1076 = vrot.lane.b32.xlu1 %v1844_v18, %s2123_s17  ;;  %1074 = vrot.lane.b32.xlu0 %v1843_v41, %s2123_s17 }
 0x1dd   : > { %v2804_v55 = vpack.c.bf16 %v850_v13, %v850_v13  ;;  %v2806_v57 = vpack.c.bf16 %v849_v24, %v849_v24 }
 0x1de   : > { %v1397_v44 = vpop.permute.xlu1 %1396  ;;  %v1395_v22 = vpop.permute.xlu0 %1394 }
 0x1df   : > { %1011 = vst.msk [vmem:[%s2598_s15 + $0x74] sm:$0xf] %vm981_vm2, %v2804_v55  ;;  %1010 = vst.msk [vmem:[%s2598_s15 + $0x70] sm:$0xf] %vm981_vm2, %v2806_v57  ;;  %s1495_s15 = scalar_lea.sflag [#allocation3], %s2579_s13 }
 0x1e0   : > { %1477 = vst.msk [vmem:[%s2620_s20 + $0x3c] sm:$0xf] %vm981_vm2, %v1397_v44  ;;  %1476 = vst.msk [vmem:[%s2620_s20 + $0x38] sm:$0xf] %vm981_vm2, %v1395_v22  ;;  %1172 = vrot.lane.b32.xlu1 %v1828_v34, %s3096_s26  ;;  %1170 = vrot.lane.b32.xlu0 %v1827_v35, %s3096_s26 }
 0x1e2   : > { %v1393_v15 = vpop.permute.xlu1 %1392  ;;  %v1391_v25 = vpop.permute.xlu0 %1390 }
 0x1e3   : > { %1475 = vst.msk [vmem:[%s2620_s20 + $0x34] sm:$0xf] %vm981_vm2, %v1393_v15  ;;  %1474 = vst.msk [vmem:[%s2620_s20 + $0x30] sm:$0xf] %vm981_vm2, %v1391_v25 }
 0x1e4   : > { %1204 = vrot.lane.b32.xlu1 %v1844_v18, %s3096_s26  ;;  %1202 = vrot.lane.b32.xlu0 %v1843_v41, %s3096_s26 }
 0x1e6   : > { %v1425_v51 = vpop.permute.xlu1 %1424  ;;  %v1423_v39 = vpop.permute.xlu0 %1422 }
 0x1e7   : > { %1491 = vst.msk [vmem:[%s2620_s20 + $0x74] sm:$0xf] %vm981_vm2, %v1425_v51  ;;  %1490 = vst.msk [vmem:[%s2620_s20 + $0x70] sm:$0xf] %vm981_vm2, %v1423_v39 }
 0x1e8   : > { %1040 = vrot.lane.b32.xlu1 %v2790_v31, %s2123_s17  ;;  %1038 = vrot.lane.b32.xlu0 %v2792_v32, %s2123_s17 }
 0x1ea   : > { %v1021_v37 = vpop.permute.xlu1 %1020  ;;  %v1019_v59 = vpop.permute.xlu0 %1018 }
 0x1eb   : > { %1113 = vst.msk [vmem:[%s2845_s18 + $0xc] sm:$0xf] %vm981_vm2, %v1021_v37  ;;  %1112 = vst.msk [vmem:[%s2845_s18 + $0x8] sm:$0xf] %vm981_vm2, %v1019_v59 }
 0x1ec   : > { %1072 = vrot.lane.b32.xlu1 %v2804_v55, %s2123_s17  ;;  %1070 = vrot.lane.b32.xlu0 %v2806_v57, %s2123_s17 }
 0x1ed   : > { %2038 = shalt.err (!%p2035_p3)
}
 0x1ee   : > { %s2039_s17 = scalar_lea.hbm %s2841_s11, 2048  ;;  %s2043_s19 = scalar_lea.hbm %s3089_s3, 4096 }
 0x1ef   : > { %p2040_p4 = scmp.ne.s32.totalorder %s2841_s11, %s2039_s17  ;;  %p2044_p9 = scmp.lt.u32.totalorder %s2841_s11, %s3089_s3 }
 0x1f0   : > { %p2045_p10 = scmp.lt.u32.totalorder %s2043_s19, %s2039_s17  ;;  %p2047_p12 = scmp.lt.u32.totalorder %s2039_s17, %s2841_s11 }
 0x1f1   : > { %p2041_p7 = pnand %p2040_p4, %p2202_p5 }
 0x1f2   : > { %p2046_p11 = por %p2045_p10, %p2044_p9 }
 0x1f3   : > { %p2042_p8 = pneg %p2041_p7 }
 0x1f4   : > { %p2048_p13 = por %p2047_p12, %p2046_p11 }
 0x1f6   : > { %p2049_p0 = pnand %p2048_p13, %p2042_p8 }
 0x1f8   : > { %2052 = shalt.err (!%p2049_p0)
}
 0x1f9   : > { %s2126_s14 = smov 64   ;;  %s2127_s12 = smov 4   ;;  %v1053_v60 = vpop.permute.xlu1 %1052  ;;  %v1051_v48 = vpop.permute.xlu0 %1050  ;;  %v1875_v0 = vpack.c.bf16 %v2545_v21, %v2545_v21  ;;  %v1876_v1 = vpack.c.bf16 %v2548_v23, %v2548_v23 }
 0x1fa   : > { %1954 = dma.vmem_to_hbm [thread:$0]  (%p2202_p5), %s2851_s29, 2048, %s2841_s11, %s1495_s15, %s2126_s14, %s2126_s14, %s2127_s12  }
 0x1fb   : > { %1129 = vst.msk [vmem:[%s2845_s18 + $0x4c] sm:$0xf] %vm981_vm2, %v1053_v60  ;;  %1128 = vst.msk [vmem:[%s2845_s18 + $0x48] sm:$0xf] %vm981_vm2, %v1051_v48  ;;  %s3100_s26 = smov 96   ;;  %s2896_s17 = scalar_lea.vmem %s3091_s5, %s2222_s16 }
 0x1fc   : > { %1168 = vrot.lane.b32.xlu1 %v2790_v31, %s3100_s26  ;;  %1166 = vrot.lane.b32.xlu0 %v2792_v32, %s3100_s26  ;;  %s3101_s16 = smov 80   ;;  %s1539_s29 = sshll.u32 %s2845_s18, 4  ;;  %s3024_s29 = int_to_ptr.vmem [resolvable:$true] %s1539_s29 }
 0x1fd   : > { %v1149_v47 = vpop.permute.xlu1 %1148  ;;  %v1147_v62 = vpop.permute.xlu0 %1146  ;;  %s3102_s11 = sshll.u32 %s2185_s25, 11  ;;  %s2053_s28 = scalar_lea.vmem %s3024_s29, 2048 }
 0x1fe   : > { %1241 = vst.msk [vmem:[%s2896_s17 + $0xc] sm:$0xf] %vm981_vm2, %v1149_v47  ;;  %1240 = vst.msk [vmem:[%s2896_s17 + $0x8] sm:$0xf] %vm981_vm2, %v1147_v62  ;;  %s3022_s9 = scalar_lea.hbm %s3090_s4, %s3102_s11  ;;  %p2054_p1 = scmp.ne.s32.totalorder %s3024_s29, %s2053_s28 }
 0x1ff   : > { %s2128_s25 = smov [#allocation4]  }
 0x200   : > { %1200 = vrot.lane.b32.xlu1 %v2804_v55, %s3100_s26  ;;  %1198 = vrot.lane.b32.xlu0 %v2806_v57, %s3100_s26  ;;  %s1500_s26 = scalar_lea.sflag [#allocation5], %s2579_s13  ;;  %p2055_p2 = pnand %p2054_p1, %p2202_p5 }
 0x201   : > { %v1181_v52 = vpop.permute.xlu1 %1180  ;;  %v1179_v4 = vpop.permute.xlu0 %1178  ;;  %s2057_s10 = sshll.u32 %s2128_s25, 4  ;;  %s2058_s10 = int_to_ptr.vmem [resolvable:$false] %s2057_s10 }
 0x202   : > { %1257 = vst.msk [vmem:[%s2896_s17 + $0x4c] sm:$0xf] %vm981_vm2, %v1181_v52  ;;  %1256 = vst.msk [vmem:[%s2896_s17 + $0x48] sm:$0xf] %vm981_vm2, %v1179_v4  ;;  %p2056_p3 = pneg %p2055_p2  ;;  %p2060_p4 = scmp.lt.s32.totalorder %s3024_s29, %s2058_s10 }
 0x204   : > { %1428 = vrot.lane.b32.xlu1 %v1876_v1, %s3101_s16  ;;  %1426 = vrot.lane.b32.xlu0 %v1875_v0, %s3101_s16  ;;  %s2059_s16 = scalar_lea.vmem %s2058_s10, 4096 }
 0x205   : > { %v1017_v2 = vpop.permute.xlu1 %1016  ;;  %v1015_v61 = vpop.permute.xlu0 %1014  ;;  %p2061_p7 = scmp.lt.s32.totalorder %s2059_s16, %s2053_s28 }
 0x206   : > { %1111 = vst.msk [vmem:[%s2845_s18 + $0x4] sm:$0xf] %vm981_vm2, %v1017_v2  ;;  %1110 = vst.msk [vmem:[%s2845_s18] sm:$0xf] %vm981_vm2, %v1015_v61 }
 0x207   : > { %p2062_p8 = por %p2061_p7, %p2060_p4 }
 0x209   : > { %v1049_v21 = vpop.permute.xlu1 %1048  ;;  %v1047_v23 = vpop.permute.xlu0 %1046  ;;  %p2063_p9 = pnand %p2062_p8, %p2056_p3 }
 0x20a   : > { %1127 = vst.msk [vmem:[%s2845_s18 + $0x44] sm:$0xf] %vm981_vm2, %v1049_v21  ;;  %1126 = vst.msk [vmem:[%s2845_s18 + $0x40] sm:$0xf] %vm981_vm2, %v1047_v23 }
 0x20d   : > { %v1145_v7 = vpop.permute.xlu1 %1144  ;;  %v1143_v63 = vpop.permute.xlu0 %1142 }
 0x20e   : > { %1239 = vst.msk [vmem:[%s2896_s17 + $0x4] sm:$0xf] %vm981_vm2, %v1145_v7  ;;  %1238 = vst.msk [vmem:[%s2896_s17] sm:$0xf] %vm981_vm2, %v1143_v63 }
 0x211   : > { %v1177_v8 = vpop.permute.xlu1 %1176  ;;  %v1175_v10 = vpop.permute.xlu0 %1174 }
 0x212   : > { %1255 = vst.msk [vmem:[%s2896_s17 + $0x44] sm:$0xf] %vm981_vm2, %v1177_v8  ;;  %1254 = vst.msk [vmem:[%s2896_s17 + $0x40] sm:$0xf] %vm981_vm2, %v1175_v10 }
 0x215   : > { %v1029_v6 = vpop.permute.xlu1 %1028  ;;  %v1027_v11 = vpop.permute.xlu0 %1026 }
 0x216   : > { %1117 = vst.msk [vmem:[%s2845_s18 + $0x1c] sm:$0xf] %vm981_vm2, %v1029_v6  ;;  %1116 = vst.msk [vmem:[%s2845_s18 + $0x18] sm:$0xf] %vm981_vm2, %v1027_v11 }
 0x219   : > { %v1061_v12 = vpop.permute.xlu1 %1060  ;;  %v1059_v9 = vpop.permute.xlu0 %1058 }
 0x21a   : > { %1133 = vst.msk [vmem:[%s2845_s18 + $0x5c] sm:$0xf] %vm981_vm2, %v1061_v12  ;;  %1132 = vst.msk [vmem:[%s2845_s18 + $0x58] sm:$0xf] %vm981_vm2, %v1059_v9 }
 0x21d   : > { %v1157_v3 = vpop.permute.xlu1 %1156  ;;  %v1155_v56 = vpop.permute.xlu0 %1154 }
 0x21e   : > { %1245 = vst.msk [vmem:[%s2896_s17 + $0x1c] sm:$0xf] %vm981_vm2, %v1157_v3  ;;  %1244 = vst.msk [vmem:[%s2896_s17 + $0x18] sm:$0xf] %vm981_vm2, %v1155_v56 }
 0x221   : > { %v1189_v14 = vpop.permute.xlu1 %1188  ;;  %v1187_v16 = vpop.permute.xlu0 %1186 }
 0x222   : > { %1261 = vst.msk [vmem:[%s2896_s17 + $0x5c] sm:$0xf] %vm981_vm2, %v1189_v14  ;;  %1260 = vst.msk [vmem:[%s2896_s17 + $0x58] sm:$0xf] %vm981_vm2, %v1187_v16 }
 0x225   : > { %v1025_v17 = vpop.permute.xlu1 %1024  ;;  %v1023_v26 = vpop.permute.xlu0 %1022 }
 0x226   : > { %1115 = vst.msk [vmem:[%s2845_s18 + $0x14] sm:$0xf] %vm981_vm2, %v1025_v17  ;;  %1114 = vst.msk [vmem:[%s2845_s18 + $0x10] sm:$0xf] %vm981_vm2, %v1023_v26 }
 0x229   : > { %v1057_v58 = vpop.permute.xlu1 %1056  ;;  %v1055_v5 = vpop.permute.xlu0 %1054 }
 0x22a   : > { %1131 = vst.msk [vmem:[%s2845_s18 + $0x54] sm:$0xf] %vm981_vm2, %v1057_v58  ;;  %1130 = vst.msk [vmem:[%s2845_s18 + $0x50] sm:$0xf] %vm981_vm2, %v1055_v5 }
 0x22d   : > { %v1153_v19 = vpop.permute.xlu1 %1152  ;;  %v1151_v27 = vpop.permute.xlu0 %1150 }
 0x22e   : > { %1243 = vst.msk [vmem:[%s2896_s17 + $0x14] sm:$0xf] %vm981_vm2, %v1153_v19  ;;  %1242 = vst.msk [vmem:[%s2896_s17 + $0x10] sm:$0xf] %vm981_vm2, %v1151_v27 }
 0x231   : > { %v1185_v28 = vpop.permute.xlu1 %1184  ;;  %v1183_v29 = vpop.permute.xlu0 %1182 }
 0x232   : > { %1259 = vst.msk [vmem:[%s2896_s17 + $0x54] sm:$0xf] %vm981_vm2, %v1185_v28  ;;  %1258 = vst.msk [vmem:[%s2896_s17 + $0x50] sm:$0xf] %vm981_vm2, %v1183_v29 }
 0x235   : > { %v1037_v30 = vpop.permute.xlu1 %1036  ;;  %v1035_v38 = vpop.permute.xlu0 %1034 }
 0x236   : > { %1121 = vst.msk [vmem:[%s2845_s18 + $0x2c] sm:$0xf] %vm981_vm2, %v1037_v30  ;;  %1120 = vst.msk [vmem:[%s2845_s18 + $0x28] sm:$0xf] %vm981_vm2, %v1035_v38 }
 0x239   : > { %v1069_v36 = vpop.permute.xlu1 %1068  ;;  %v1067_v33 = vpop.permute.xlu0 %1066 }
 0x23a   : > { %1137 = vst.msk [vmem:[%s2845_s18 + $0x6c] sm:$0xf] %vm981_vm2, %v1069_v36  ;;  %1136 = vst.msk [vmem:[%s2845_s18 + $0x68] sm:$0xf] %vm981_vm2, %v1067_v33 }
 0x23d   : > { %v1165_v34 = vpop.permute.xlu1 %1164  ;;  %v1163_v35 = vpop.permute.xlu0 %1162 }
 0x23e   : > { %1249 = vst.msk [vmem:[%s2896_s17 + $0x2c] sm:$0xf] %vm981_vm2, %v1165_v34  ;;  %1248 = vst.msk [vmem:[%s2896_s17 + $0x28] sm:$0xf] %vm981_vm2, %v1163_v35 }
 0x241   : > { %v1197_v40 = vpop.permute.xlu1 %1196  ;;  %v1195_v54 = vpop.permute.xlu0 %1194 }
 0x242   : > { %1265 = vst.msk [vmem:[%s2896_s17 + $0x6c] sm:$0xf] %vm981_vm2, %v1197_v40  ;;  %1264 = vst.msk [vmem:[%s2896_s17 + $0x68] sm:$0xf] %vm981_vm2, %v1195_v54 }
 0x245   : > { %v1033_v53 = vpop.permute.xlu1 %1032  ;;  %v1031_v20 = vpop.permute.xlu0 %1030 }
 0x246   : > { %1119 = vst.msk [vmem:[%s2845_s18 + $0x24] sm:$0xf] %vm981_vm2, %v1033_v53  ;;  %1118 = vst.msk [vmem:[%s2845_s18 + $0x20] sm:$0xf] %vm981_vm2, %v1031_v20 }
 0x249   : > { %v1065_v18 = vpop.permute.xlu1 %1064  ;;  %v1063_v41 = vpop.permute.xlu0 %1062 }
 0x24a   : > { %1135 = vst.msk [vmem:[%s2845_s18 + $0x64] sm:$0xf] %vm981_vm2, %v1065_v18  ;;  %1134 = vst.msk [vmem:[%s2845_s18 + $0x60] sm:$0xf] %vm981_vm2, %v1063_v41 }
 0x24d   : > { %v1161_v45 = vpop.permute.xlu1 %1160  ;;  %v1159_v49 = vpop.permute.xlu0 %1158 }
 0x24e   : > { %1247 = vst.msk [vmem:[%s2896_s17 + $0x24] sm:$0xf] %vm981_vm2, %v1161_v45  ;;  %1246 = vst.msk [vmem:[%s2896_s17 + $0x20] sm:$0xf] %vm981_vm2, %v1159_v49 }
 0x251   : > { %v1193_v46 = vpop.permute.xlu1 %1192  ;;  %v1191_v42 = vpop.permute.xlu0 %1190 }
 0x252   : > { %1263 = vst.msk [vmem:[%s2896_s17 + $0x64] sm:$0xf] %vm981_vm2, %v1193_v46  ;;  %1262 = vst.msk [vmem:[%s2896_s17 + $0x60] sm:$0xf] %vm981_vm2, %v1191_v42 }
 0x255   : > { %v1045_v31 = vpop.permute.xlu1 %1044  ;;  %v1043_v32 = vpop.permute.xlu0 %1042 }
 0x256   : > { %1125 = vst.msk [vmem:[%s2845_s18 + $0x3c] sm:$0xf] %vm981_vm2, %v1045_v31  ;;  %1124 = vst.msk [vmem:[%s2845_s18 + $0x38] sm:$0xf] %vm981_vm2, %v1043_v32 }
 0x259   : > { %v1077_v43 = vpop.permute.xlu1 %1076  ;;  %v1075_v50 = vpop.permute.xlu0 %1074 }
 0x25a   : > { %1141 = vst.msk [vmem:[%s2845_s18 + $0x7c] sm:$0xf] %vm981_vm2, %v1077_v43  ;;  %1140 = vst.msk [vmem:[%s2845_s18 + $0x78] sm:$0xf] %vm981_vm2, %v1075_v50 }
 0x25d   : > { %v1173_v13 = vpop.permute.xlu1 %1172  ;;  %v1171_v24 = vpop.permute.xlu0 %1170 }
 0x25e   : > { %1253 = vst.msk [vmem:[%s2896_s17 + $0x3c] sm:$0xf] %vm981_vm2, %v1173_v13  ;;  %1252 = vst.msk [vmem:[%s2896_s17 + $0x38] sm:$0xf] %vm981_vm2, %v1171_v24 }
 0x261   : > { %v1205_v55 = vpop.permute.xlu1 %1204  ;;  %v1203_v57 = vpop.permute.xlu0 %1202 }
 0x262   : > { %1269 = vst.msk [vmem:[%s2896_s17 + $0x7c] sm:$0xf] %vm981_vm2, %v1205_v55  ;;  %1268 = vst.msk [vmem:[%s2896_s17 + $0x78] sm:$0xf] %vm981_vm2, %v1203_v57 }
 0x265   : > { %v1041_v44 = vpop.permute.xlu1 %1040  ;;  %v1039_v22 = vpop.permute.xlu0 %1038 }
 0x266   : > { %1123 = vst.msk [vmem:[%s2845_s18 + $0x34] sm:$0xf] %vm981_vm2, %v1041_v44  ;;  %1122 = vst.msk [vmem:[%s2845_s18 + $0x30] sm:$0xf] %vm981_vm2, %v1039_v22 }
 0x269   : > { %v1073_v15 = vpop.permute.xlu1 %1072  ;;  %v1071_v25 = vpop.permute.xlu0 %1070 }
 0x26a   : > { %1139 = vst.msk [vmem:[%s2845_s18 + $0x74] sm:$0xf] %vm981_vm2, %v1073_v15  ;;  %1138 = vst.msk [vmem:[%s2845_s18 + $0x70] sm:$0xf] %vm981_vm2, %v1071_v25 }
 0x26b   : > { %2066 = shalt.err (!%p2063_p9)
}
 0x26c   : > { %s2067_s18 = scalar_lea.hbm %s3022_s9, 2048  ;;  %s2071_s19 = scalar_lea.hbm %s3090_s4, 4096 }
 0x26d   : > { %p2068_p10 = scmp.ne.s32.totalorder %s3022_s9, %s2067_s18  ;;  %p2072_p13 = scmp.lt.u32.totalorder %s3022_s9, %s3090_s4 }
 0x26e   : > { %p2073_p0 = scmp.lt.u32.totalorder %s2071_s19, %s2067_s18  ;;  %p2075_p2 = scmp.lt.u32.totalorder %s2067_s18, %s3022_s9 }
 0x26f   : > { %p2069_p11 = pnand %p2068_p10, %p2202_p5 }
 0x270   : > { %p2074_p1 = por %p2073_p0, %p2072_p13 }
 0x271   : > { %p2070_p12 = pneg %p2069_p11 }
 0x272   : > { %p2076_p3 = por %p2075_p2, %p2074_p1 }
 0x274   : > { %p2077_p4 = pnand %p2076_p3, %p2070_p12 }
 0x276   : > { %2080 = shalt.err (!%p2077_p4)
}
 0x277   : > { %1955 = dma.vmem_to_hbm [thread:$0]  (%p2202_p5), %s3024_s29, 2048, %s3022_s9, %s1500_s26, %s2126_s14, %s2126_s14, %s2127_s12   ;;  %v1169_v51 = vpop.permute.xlu1 %1168  ;;  %v1167_v39 = vpop.permute.xlu0 %1166 }
 0x278   : > { %1251 = vst.msk [vmem:[%s2896_s17 + $0x34] sm:$0xf] %vm981_vm2, %v1169_v51  ;;  %1250 = vst.msk [vmem:[%s2896_s17 + $0x30] sm:$0xf] %vm981_vm2, %v1167_v39 }
 0x27b   : > { %v1201_v37 = vpop.permute.xlu1 %1200  ;;  %v1199_v59 = vpop.permute.xlu0 %1198 }
 0x27c   : > { %1267 = vst.msk [vmem:[%s2896_s17 + $0x74] sm:$0xf] %vm981_vm2, %v1201_v37  ;;  %1266 = vst.msk [vmem:[%s2896_s17 + $0x70] sm:$0xf] %vm981_vm2, %v1199_v59 }
 0x27f   : > { %v1429_v60 = vpop.permute.xlu1 %1428  ;;  %v1427_v48 = vpop.permute.xlu0 %1426 }
 0x280   : > { %1493 = vst.msk [vmem:[%s2620_s20 + $0x7c] sm:$0xf] %vm981_vm2, %v1429_v60  ;;  %1492 = vst.msk [vmem:[%s2620_s20 + $0x78] sm:$0xf] %vm981_vm2, %v1427_v48 }
 0x281 PF: > { %p1965_p5 = scmp.ge.s32.totalorder %s2119_s24, 2  ;;  %s1562_s7 = sand.u32 1, %s2107_s21  }
 0x282   : > { %s1563_s13 = scalar_lea.sflag [#allocation3], %s1562_s7 }
 0x283   : > { %p1959_p7 = pnand %p1965_p5, %p2206_p6 }
 0x285   : > { %2098 = dma.done.wait (!%p1959_p7), %s1563_s13, 2048  }
 0x286   : > { %2100 = vsyncadd (!%p1959_p7), %s1563_s13, 4294965248  ;;  %s1572_s14 = scalar_lea.sflag [#allocation5], %s1562_s7 }
 0x287   : > { %2102 = dma.done.wait (!%p1959_p7), %s1572_s14, 2048  }
 0x288   : > { %2104 = vsyncadd (!%p1959_p7), %s1572_s14, 4294965248  ;;  %p20_p8 = scmp.ge.s32.totalorder %s2189_s27, 4   ;;  %s3103_s21 = smov %s2111_s22 }
 0x289   : > { %s3104_s22 = smov %s2115_s23  ;;  %s3105_s23 = smov %s2200_s30 }
 0x28a   : > { %s3106_s24 = smov %s2189_s27  ;;  %22 = sbr.rel (!%p20_p8) target bundleno = 5 (0x5), region = 108 }
 0x291   :  { %1593 = vsyncpa [#allocation3], 1 }
 0x292   :  { %1595 = vsyncpa [#allocation3 + $0x1], 1 }
 0x293   :  { %1596 = vsyncpa [#allocation5], 1 }
 0x294   :  { %1598 = vsyncpa [#allocation5 + $0x1], 1 }

// kernel: a_call__.17
= control target key start
LH: loop header
LB: loop body
LE: loop exit
PB: predicated region body
PF: predicated region fallthrough
CT: control target
= control target key end

     0   :  { %11 = vsyncpa [#allocation3], 0  ;;  %s2863_s0 = inlined_call_operand.vmem [shape: bf16[512,72], index: 0, kind: input, shape index: {}]   ;;  %s2864_s1 = inlined_call_operand.vmem [shape: bf16[72,24], index: 1, kind: input, shape index: {}]   ;;  %s2865_s2 = inlined_call_operand.vmem [shape: f32[1,24], index: 2, kind: input, shape index: {}]   ;;  %s2866_s3 = inlined_call_operand.vmem [shape: bf16[512,8], index: 3, kind: input, shape index: {}]   ;;  %s2867_s4 = inlined_call_operand.hbm [shape: bf16[512,8], index: 4, kind: output, shape index: {0}]   ;;  %s2868_s5 = inlined_call_operand.vmem [shape: bf16[512,8], index: 5, kind: output, shape index: {1}]  }
   0x1   :  { %13 = vsyncpa [#allocation3 + $0x1], 0  ;;  %s2169_s18 = smov 0   ;;  %s2171_s19 = smov 0  }
   0x2   :  { %s2173_s20 = smov 0   ;;  %s2175_s21 = smov 0  }
   0x3 LB: > { %s2190_s22 = sadd.s32 4294967295, %s2131_s21   ;;  %s1555_s23 = sadd.s32 4294967294, %s2131_s21   ;;  %s2131_s21 = sphi %s2175_s21, %s2874_s21   ;;  %s2127_s20 = sphi %s2173_s20, %s2873_s20   ;;  %s2123_s19 = sphi %s2171_s19, %s2872_s19   ;;  %s2119_s18 = sphi %s2169_s18, %s2871_s18  }
   0x4   : > { %s2194_s24 = sadd.s32 1, %s2131_s21   ;;  %s120_s25 = sadd.s32 1, %s2127_s20 }
   0x5   : > { %s117_s26 = ssub.s32 %s2131_s21, %s2194_s24  ;;  %p130_p0 = scmp.ne.s32.totalorder %s2127_s20, %s2123_s19 }
   0x6   : > { %p118_p1 = scmp.eq.s32.totalorder %s117_s26, 0  ;;  %p131_p2 = scmp.eq.s32.totalorder %s2190_s22, 1 }
   0x7   : > { %p136_p3 = scmp.ne.s32.totalorder %s2123_s19, %s2119_s18  ;;  %p137_p4 = scmp.eq.s32.totalorder %s1555_s23, 1 }
   0x8   : > { %s2205_s27 = scalar_select %p118_p1, %s2127_s20, %s120_s25  }
   0x9   : > { %p2207_p5 = por %p131_p2, %p130_p0  ;;  %p2211_p6 = por %p137_p4, %p136_p3 }
   0xa   : > { %p1558_p7 = scmp.ge.s32.totalorder %s2131_s21, 1  ;;  %p205_p8 = scmp.lt.s32.totalorder %s2131_s21, 3 }
   0xc   : > { %p206_p9 = pnand %p1558_p7, %p205_p8 }
   0xd   : > { %v2016_v0 = vld [vmem:[%s2864_s1] sm:$0xff] (!%p206_p9)   ;;  %v2017_v1 = vld [vmem:[%s2864_s1 + $0x8] sm:$0xff] (!%p206_p9)   ;;  %s1560_s9 = sshll.u32 (!%p206_p9), %s2190_s22, 5  ;;  %v2018_v2 = vld [vmem:[%s2864_s1 + $0x10] sm:$0xff] (!%p206_p9)   ;;  %vm418_vm0 = vcmask (!%p206_p9), 588800   ;;  %vm467_vm1 = vcmask (!%p206_p9), 1043456  }
   0xe   : > { %209 = sbr.rel (%p206_p9) target bundleno = 501 (0x1f5), region = 36  ;;  %1838 = vmatprep.subr.bf16.mxu0 (!%p206_p9), %v2016_v0  ;;  %1880 = vmatprep.subr.bf16.mxu1 (!%p206_p9), %v2016_v0  ;;  %p244_p10 = scmp.lt.s32.totalorder (!%p206_p9), %s1560_s9, 63  ;;  %v2019_v3 = vld [vmem:[%s2864_s1 + $0x18] sm:$0xff] (!%p206_p9)   ;;  %v2020_v6 = vld [vmem:[%s2864_s1 + $0x20] ss:$0 sps:$4 sm:$0xff] (!%p206_p9)   ;;  %vm952_vm2 = vcmask (!%p206_p9), 60416  }
   0xf   : > { %1839 = vmatpush3.bf16.msra.mxu0 (!%p206_p9), %v2016_v0  ;;  %1885 = vmatpush3.bf16.msra.mxu1 (!%p206_p9), %v2016_v0  ;;  %v469_v7 = vsel (!%p206_p9), %vm467_vm1, %v2020_v6, 0  ;;  %s2133_s7 = smov (!%p206_p9), 16   ;;  %s2134_s10 = smov (!%p206_p9), 120  }
  0x10   : > { %1840 = vmatprep.subr.bf16.mxu0 (!%p206_p9), %v2017_v1  ;;  %1881 = vmatprep.subr.bf16.mxu1 (!%p206_p9), %v2017_v1  ;;  %s2135_s11 = smov (!%p206_p9), 112   ;;  %s233_s13 = sand.u32 (!%p206_p9), 1, %s2123_s19  }
  0x11   : > { %s1559_s14 = sshll.u32 (!%p206_p9), %s233_s13, 7  ;;  %s2136_s8 = smov (!%p206_p9), [#allocation2]  }
  0x12   : > { %s2641_s15 = scalar_lea.vmem (!%p206_p9), [#allocation2], %s1559_s14 }
  0x13   : > { %1841 = vmatpush3.bf16.msra.mxu0 (!%p206_p9), %v2017_v1  ;;  %1886 = vmatpush3.bf16.msra.mxu1 (!%p206_p9), %v2017_v1  ;;  %s1452_s25 = sshll.u32 (!%p206_p9), %s2641_s15, 4  ;;  %s2798_s25 = int_to_ptr.vmem [resolvable:$true] %s1452_s25 }
  0x14   : > { %1842 = vmatprep.subr.bf16.mxu0 (!%p206_p9), %v2018_v2  ;;  %1882 = vmatprep.subr.bf16.mxu1 (!%p206_p9), %v2018_v2 }
  0x15   : > { %s2876_s9 = smov (!%p244_p10, %s1560_s9), 63 }
  0x16   : > { %s2227_s12 = sshll.u32 %s2876_s9, 2  ;;  %s2073_s9 = sshll.u32 %s2136_s8, 4  ;;  %s2074_s9 = int_to_ptr.vmem [resolvable:$false] %s2073_s9 }
  0x17   : > { %s2236_s17 = scalar_lea.vmem %s2863_s0, %s2227_s12  ;;  %1843 = vmatpush3.bf16.msra.mxu0 %v2018_v2  ;;  %1887 = vmatpush3.bf16.msra.mxu1 %v2018_v2  ;;  %s2253_s6 = scalar_lea.vmem %s2866_s3, %s2227_s12 }
  0x18   : > { %v2021_v4 = vld [vmem:[%s2236_s17] sm:$0xff]   ;;  %1844 = vmatprep.subr.bf16.mxu0 %v2019_v3  ;;  %1883 = vmatprep.subr.bf16.mxu1 %v2019_v3  ;;  %v2023_v8 = vld [vmem:[%s2236_s17 + $0x8] sm:$0xff]   ;;  %v2025_v10 = vld [vmem:[%s2236_s17 + $0x10] sm:$0xff]   ;;  %s2669_s23 = scalar_lea.vmem %s2868_s5, %s2227_s12  ;;  %s1737_s12 = sshll.u32 %s2190_s22, 11 }
  0x19   : > { %v2022_v5 = vld [vmem:[%s2236_s17 + $0x40] sm:$0xff]   ;;  %1848 = vmatprep.mubr.msk.bf16.mxu0 %vm418_vm0, %v2021_v4  ;;  %v2024_v9 = vld [vmem:[%s2236_s17 + $0x48] sm:$0xff]   ;;  %v2031_v11 = vld [vmem:[%s2236_s17 + $0x50] sm:$0xff]   ;;  %s2810_s22 = scalar_lea.sflag [#allocation3], %s233_s13  ;;  %p2076_p0 = scmp.lt.s32.totalorder %s2798_s25, %s2074_s9 }
  0x1a   : > { %1864 = vmatprep.mubr.msk.bf16.mxu1 %vm418_vm0, %v2022_v5  ;;  %v1802_v12 = vld [vmem:[%s2253_s6 + $0x8] sm:$0xff]   ;;  %v1739_v13 = vld [vmem:[%s2253_s6] sm:$0xff]   ;;  %v1804_v14 = vld [vmem:[%s2253_s6 + $0x18] sm:$0xff]  }
  0x1b   : > { %1845 = vmatpush3.bf16.msra.mxu0 %v2019_v3  ;;  %1888 = vmatpush3.bf16.msra.mxu1 %v2019_v3  ;;  %v1744_v15 = vunpack.c.l.bf16 %v1802_v12  ;;  %v1745_v16 = vunpack.c.h.bf16 %v1802_v12  ;;  %v1740_v17 = vunpack.c.l.bf16 %v1739_v13  ;;  %v1741_v18 = vunpack.c.h.bf16 %v1739_v13  ;;  %v1803_v19 = vld [vmem:[%s2253_s6 + $0x10] sm:$0xff]   ;;  %v1806_v24 = vld [vmem:[%s2253_s6 + $0x28] sm:$0xff]   ;;  %v1805_v27 = vld [vmem:[%s2253_s6 + $0x20] sm:$0xff]  }
  0x1c   : > { %1890 = vmatprep.subr.msk.bf16.mxu0 %vm467_vm1, %v2020_v6  ;;  %1891 = vmatprep.subr.msk.bf16.mxu1 %vm467_vm1, %v2020_v6  ;;  %v1752_v20 = vunpack.c.l.bf16 %v1804_v14  ;;  %v1753_v21 = vunpack.c.h.bf16 %v1804_v14  ;;  %v1748_v22 = vunpack.c.l.bf16 %v1803_v19  ;;  %v1749_v23 = vunpack.c.h.bf16 %v1803_v19  ;;  %v2026_v28 = vld [vmem:[%s2236_s17 + $0x18] sm:$0xff]   ;;  %v2027_v30 = vld [vmem:[%s2236_s17 + $0x20] sm:$0xff]   ;;  %v1807_v39 = vld [vmem:[%s2253_s6 + $0x30] sm:$0xff]  }
  0x1d   : > { %v1941_v25 = vpack.i.bf16 %v1745_v16, %v1744_v15  ;;  %v1936_v26 = vpack.i.bf16 %v1741_v18, %v1740_v17  ;;  %v2032_v29 = vld [vmem:[%s2236_s17 + $0x58] sm:$0xff]   ;;  %v2033_v31 = vld [vmem:[%s2236_s17 + $0x60] sm:$0xff]   ;;  %v1760_v32 = vunpack.c.l.bf16 %v1806_v24  ;;  %v1761_v33 = vunpack.c.h.bf16 %v1806_v24  ;;  %v1810_v46 = vld [vmem:[%s2253_s6 + $0x48] sm:$0xff]  }
  0x1e   : > { %v1951_v34 = vpack.i.bf16 %v1753_v21, %v1752_v20  ;;  %v1946_v35 = vpack.i.bf16 %v1749_v23, %v1748_v22  ;;  %v1756_v36 = vunpack.c.l.bf16 %v1805_v27  ;;  %v1757_v37 = vunpack.c.h.bf16 %v1805_v27  ;;  %v1808_v38 = vld [vmem:[%s2253_s6 + $0x38] sm:$0xff]   ;;  %v1809_v47 = vld [vmem:[%s2253_s6 + $0x40] sm:$0xff]   ;;  %v2028_v48 = vld [vmem:[%s2236_s17 + $0x28] sm:$0xff]  }
  0x1f   : > { %1847 = vmatpush3.bf16.msra.mxu0 %v469_v7  ;;  %1889 = vmatpush3.bf16.msra.mxu1 %v469_v7  ;;  %v1961_v40 = vpack.i.bf16 %v1761_v33, %v1760_v32  ;;  %v1768_v41 = vunpack.c.l.bf16 %v1808_v38  ;;  %v1769_v43 = vunpack.c.h.bf16 %v1808_v38  ;;  %v1764_v44 = vunpack.c.l.bf16 %v1807_v39  ;;  %v2034_v49 = vld [vmem:[%s2236_s17 + $0x68] sm:$0xff]   ;;  %v2029_v50 = vld [vmem:[%s2236_s17 + $0x30] sm:$0xff]   ;;  %v1812_v58 = vld [vmem:[%s2253_s6 + $0x58] sm:$0xff]  }
  0x20   : > { %1942 = vrot.lane.b32.xlu1 %v1941_v25, %s2133_s7  ;;  %1937 = vrot.lane.b32.xlu0 %v1936_v26, %s2133_s7  ;;  %v1956_v42 = vpack.i.bf16 %v1757_v37, %v1756_v36  ;;  %v1765_v45 = vunpack.c.h.bf16 %v1807_v39  ;;  %v2035_v51 = vld [vmem:[%s2236_s17 + $0x70] sm:$0xff]   ;;  %v1776_v52 = vunpack.c.l.bf16 %v1810_v46  ;;  %v1777_v53 = vunpack.c.h.bf16 %v1810_v46  ;;  %v1814_v2 = vld [vmem:[%s2253_s6 + $0x68] sm:$0xff]  }
  0x21   : > { %v1971_v54 = vpack.i.bf16 %v1769_v43, %v1768_v41  ;;  %v1772_v56 = vunpack.c.l.bf16 %v1809_v47  ;;  %v1773_v57 = vunpack.c.h.bf16 %v1809_v47  ;;  %v1811_v59 = vld [vmem:[%s2253_s6 + $0x50] sm:$0xff]   ;;  %v1784_v61 = vunpack.c.l.bf16 %v1812_v58  ;;  %v1813_v3 = vld [vmem:[%s2253_s6 + $0x60] sm:$0xff]   ;;  %v2030_v4 = vld [vmem:[%s2236_s17 + $0x38] sm:$0xff]  }
  0x22   : > { %1849 = vmatmul.mubr.msk.bf16.vlgmr.msra.gmra.mrb[0].mxu0 %vm418_vm0, %v2023_v8  ;;  %1865 = vmatmul.mubr.msk.bf16.vlgmr.msra.gmra.mrb[0].mxu1 %vm418_vm0, %v2024_v9  ;;  %v1966_v55 = vpack.i.bf16 %v1765_v45, %v1764_v44  ;;  %v1981_v60 = vpack.i.bf16 %v1777_v53, %v1776_v52  ;;  %v1785_v63 = vunpack.c.h.bf16 %v1812_v58  ;;  %v1780_v0 = vunpack.c.l.bf16 %v1811_v59  ;;  %v2036_v5 = vld [vmem:[%s2236_s17 + $0x78] sm:$0xff]   ;;  %v1815_v13 = vld [vmem:[%s2253_s6 + $0x70] sm:$0xff]   ;;  %v2322_v27 = vld [vmem:[%s2865_s2] ss:$0 sm:$0xff] }
  0x23   : > { %1852 = vmatprep.mubr.msk.bf16.mxu0 %vm418_vm0, %v2025_v10  ;;  %1868 = vmatprep.mubr.msk.bf16.mxu1 %vm418_vm0, %v2031_v11  ;;  %v1976_v62 = vpack.i.bf16 %v1773_v57, %v1772_v56  ;;  %v1781_v1 = vunpack.c.h.bf16 %v1811_v59  ;;  %v1792_v6 = vunpack.c.l.bf16 %v1814_v2  ;;  %v1793_v7 = vunpack.c.h.bf16 %v1814_v2  ;;  %v1816_v12 = vld [vmem:[%s2253_s6 + $0x78] sm:$0xff]   ;;  %s2796_s6 = scalar_lea.hbm %s2867_s4, %s1737_s12 }
  0x24   : > { %1952 = vrot.lane.b32.xlu1 %v1951_v34, %s2133_s7  ;;  %1947 = vrot.lane.b32.xlu0 %v1946_v35, %s2133_s7  ;;  %v1991_v8 = vpack.i.bf16 %v1785_v63, %v1784_v61  ;;  %v1788_v10 = vunpack.c.l.bf16 %v1813_v3  ;;  %v1789_v11 = vunpack.c.h.bf16 %v1813_v3  ;;  %v1800_v15 = vunpack.c.l.bf16 %v1816_v12 }
  0x25   : > { %v1986_v9 = vpack.i.bf16 %v1781_v1, %v1780_v0  ;;  %v2001_v14 = vpack.i.bf16 %v1793_v7, %v1792_v6  ;;  %v1801_v17 = vunpack.c.h.bf16 %v1816_v12  ;;  %v1796_v18 = vunpack.c.l.bf16 %v1815_v13 }
  0x26   : > { %v1996_v16 = vpack.i.bf16 %v1789_v11, %v1788_v10  ;;  %v1797_v19 = vunpack.c.h.bf16 %v1815_v13 }
  0x27   : > { %v2011_v20 = vpack.i.bf16 %v1801_v17, %v1800_v15 }
  0x28   : > { %1962 = vrot.lane.b32.xlu1 %v1961_v40, %s2133_s7  ;;  %1957 = vrot.lane.b32.xlu0 %v1956_v42, %s2133_s7  ;;  %v2006_v21 = vpack.i.bf16 %v1797_v19, %v1796_v18 }
  0x2a   : > { %1853 = vmatmul.mubr.msk.bf16.gmra.mrb[4].mxu0 %vm418_vm0, %v2026_v28  ;;  %1869 = vmatmul.mubr.msk.bf16.gmra.mrb[4].mxu1 %vm418_vm0, %v2032_v29 }
  0x2b   : > { %1856 = vmatprep.mubr.msk.bf16.mxu0 %vm418_vm0, %v2027_v30  ;;  %1872 = vmatprep.mubr.msk.bf16.mxu1 %vm418_vm0, %v2033_v31 }
  0x2c   : > { %1972 = vrot.lane.b32.xlu1 %v1971_v54, %s2133_s7  ;;  %1967 = vrot.lane.b32.xlu0 %v1966_v55, %s2133_s7 }
  0x30   : > { %1982 = vrot.lane.b32.xlu1 %v1981_v60, %s2133_s7  ;;  %1977 = vrot.lane.b32.xlu0 %v1976_v62, %s2133_s7 }
  0x32   : > { %1857 = vmatmul.mubr.msk.bf16.gmra.mrb[8].mxu0 %vm418_vm0, %v2028_v48  ;;  %1873 = vmatmul.mubr.msk.bf16.gmra.mrb[8].mxu1 %vm418_vm0, %v2034_v49 }
  0x33   : > { %1860 = vmatprep.mubr.msk.bf16.mxu0 %vm418_vm0, %v2029_v50  ;;  %1876 = vmatprep.mubr.msk.bf16.mxu1 %vm418_vm0, %v2035_v51 }
  0x34   : > { %1992 = vrot.lane.b32.xlu1 %v1991_v8, %s2133_s7  ;;  %1987 = vrot.lane.b32.xlu0 %v1986_v9, %s2133_s7 }
  0x38   : > { %2002 = vrot.lane.b32.xlu1 %v2001_v14, %s2133_s7  ;;  %1997 = vrot.lane.b32.xlu0 %v1996_v16, %s2133_s7 }
  0x3a   : > { %1861 = vmatmul.mubr.msk.bf16.gmra.mrb[12].mxu0 %vm418_vm0, %v2030_v4  ;;  %1877 = vmatmul.mubr.msk.bf16.gmra.mrb[12].mxu1 %vm418_vm0, %v2036_v5 }
  0x3c   : > { %2012 = vrot.lane.b32.xlu1 %v2011_v20, %s2133_s7  ;;  %2007 = vrot.lane.b32.xlu0 %v2006_v21, %s2133_s7  ;;  %s2069_s7 = scalar_lea.vmem %s2798_s25, 2048 }
  0x3d   : > { %p2070_p11 = scmp.ne.s32.totalorder %s2798_s25, %s2069_s7 }
  0x3f   : > { %p2071_p12 = pnand %p2070_p11, %p2207_p5 }
  0x41   : > { %p2072_p13 = pneg %p2071_p12 }
  0x92   : > { %v1943_v22 = vpop.permute.xlu1 %1942  ;;  %v2311_v23 = vpop.permute.xlu0 %1937 }
  0x96   : > { %v2313_v24 = vpop.permute.xlu1 %1952  ;;  %v2315_v25 = vpop.permute.xlu0 %1947 }
  0x9a   : > { %v2317_v26 = vpop.permute.xlu1 %1962  ;;  %v2324_v28 = vpop.permute.xlu0 %1957 }
  0x9e   : > { %v2326_v29 = vpop.permute.xlu1 %1972  ;;  %v2340_v44 = vpop.permute.xlu0 %1967 }
  0xa2   : > { %v1983_v47 = vpop.permute.xlu1 %1982  ;;  %v1978_v63 = vpop.permute.xlu0 %1977 }
  0xf5   : > { %v1850_v30 = vpop.f32.mrb[0].mxu0  ;;  %v1866_v31 = vpop.f32.mrb[0].mxu1 }
  0xf6   : > { %v514_v32 = vadd.f32 %v1850_v30, %v2322_v27  ;;  %v578_v33 = vadd.f32 %v1866_v31, %v2322_v27  ;;  %v505_v34 = vpop.f32.mrb[1].mxu0  ;;  %v569_v35 = vpop.f32.mrb[1].mxu1 }
  0xf7   : > { %v1851_v36 = vpop.f32.mrb[2].mxu0  ;;  %v1867_v37 = vpop.f32.mrb[2].mxu1  ;;  %v506_v40 = vadd.f32 %v2322_v27, %v505_v34  ;;  %v570_v46 = vadd.f32 %v2322_v27, %v569_v35 }
  0xf8   : > { %v2330_v38 = vmax.f32 %v514_v32, 0.0  ;;  %v2332_v39 = vmax.f32 %v578_v33, 0.0  ;;  %v517_v41 = vadd.f32 %v1851_v36, %v2322_v27  ;;  %v508_v42 = vpop.f32.mrb[3].mxu0  ;;  %v572_v43 = vpop.f32.mrb[3].mxu1  ;;  %v581_v49 = vadd.f32 %v1867_v37, %v2322_v27 }
  0xf9   : > { %v2342_v45 = vmax.f32 %v506_v40, 0.0  ;;  %v2364_v56 = vmax.f32 %v570_v46, 0.0  ;;  %v509_v58 = vadd.f32 %v2322_v27, %v508_v42  ;;  %v573_v59 = vadd.f32 %v2322_v27, %v572_v43 }
  0xfa   : > { %732 = vrot.lane.b32.xlu0 %v2332_v39, %s2134_s10  ;;  %700 = vrot.lane.b32.xlu1 %v2330_v38, %s2134_s10  ;;  %v2345_v48 = vmax.f32 %v517_v41, 0.0  ;;  %v2366_v57 = vmax.f32 %v581_v49, 0.0  ;;  %v2037_v62 = vadd.low.f32.bf16 %v2330_v38, %v1943_v22  ;;  %v2039_v5 = vadd.low.f32.bf16 %v2332_v39, %v1983_v47 }
  0xfb   : > { %v2379_v0 = vmax.f32 %v509_v58, 0.0  ;;  %v2381_v1 = vmax.f32 %v573_v59, 0.0  ;;  %v2041_v30 = vadd.low.f32.bf16 %v2342_v45, %v2311_v23  ;;  %v2043_v36 = vadd.low.f32.bf16 %v2364_v56, %v1978_v63 }
  0xfc   : > { %v2038_v2 = vadd.high.f32.bf16 %v2345_v48, %v1943_v22  ;;  %v1707_v11 = vpack.c.bf16 %v2037_v62, %v2037_v62  ;;  %v2040_v12 = vadd.high.f32.bf16 %v2366_v57, %v1983_v47  ;;  %v1723_v32 = vpack.c.bf16 %v2039_v5, %v2039_v5 }
  0xfd   : > { %v2348_v50 = vpop.f32.mrb[4].mxu0  ;;  %v2350_v51 = vpop.f32.mrb[4].mxu1  ;;  %v2042_v33 = vadd.high.f32.bf16 %v2379_v0, %v2311_v23  ;;  %v1705_v46 = vpack.c.bf16 %v2041_v30, %v2041_v30  ;;  %v2044_v23 = vadd.high.f32.bf16 %v2381_v1, %v1978_v63 }
  0xfe   : > { %702 = vrot.lane.b32.xlu1 %v2345_v48, %s2134_s10  ;;  %v2354_v52 = vpop.f32.mrb[5].mxu0  ;;  %696 = vrot.lane.b32.xlu0 %v2342_v45, %s2134_s10  ;;  %v2358_v53 = vpop.f32.mrb[5].mxu1  ;;  %v1708_v17 = vpack.c.bf16 %v2038_v2, %v2038_v2  ;;  %v1724_v31 = vpack.c.bf16 %v2040_v12, %v2040_v12 }
  0xff   : > { %v2360_v54 = vpop.f32.mrb[6].mxu0  ;;  %v2362_v55 = vpop.f32.mrb[6].mxu1  ;;  %v1706_v62 = vpack.c.bf16 %v2042_v33, %v2042_v33 }
 0x100   : > { %v2370_v60 = vpop.f32.mrb[7].mxu0  ;;  %v2372_v61 = vpop.f32.mrb[7].mxu1 }
 0x102   : > { %734 = vrot.lane.b32.xlu1 %v2366_v57, %s2134_s10  ;;  %728 = vrot.lane.b32.xlu0 %v2364_v56, %s2134_s10 }
 0x105   : > { %v1858_v3 = vpop.f32.mrb[8].mxu0  ;;  %v1874_v4 = vpop.f32.mrb[8].mxu1 }
 0x106   : > { %v2386_v6 = vadd.f32 %v1858_v3, %v2322_v27  ;;  %730 = vrot.lane.b32.xlu1 %v2381_v1, %s2134_s10  ;;  %v537_v7 = vpop.f32.mrb[9].mxu0  ;;  %698 = vrot.lane.b32.xlu0 %v2379_v0, %s2134_s10  ;;  %v601_v8 = vpop.f32.mrb[9].mxu1  ;;  %v2397_v13 = vadd.f32 %v1874_v4, %v2322_v27 }
 0x107   : > { %v2393_v9 = vadd.f32 %v2322_v27, %v537_v7  ;;  %v1859_v10 = vpop.f32.mrb[10].mxu0  ;;  %v1875_v14 = vpop.f32.mrb[10].mxu1  ;;  %v2403_v18 = vadd.f32 %v2322_v27, %v601_v8  ;;  %v530_v7 = vadd.f32 %v2348_v50, %v2322_v27  ;;  %v533_v8 = vadd.f32 %v2360_v54, %v2322_v27 }
 0x108   : > { %v2400_v15 = vadd.f32 %v1859_v10, %v2322_v27  ;;  %v540_v16 = vpop.f32.mrb[11].mxu0  ;;  %v2406_v19 = vadd.f32 %v1875_v14, %v2322_v27  ;;  %v604_v20 = vpop.f32.mrb[11].mxu1  ;;  %v1722_v10 = vpack.c.bf16 %v2044_v23, %v2044_v23  ;;  %v522_v50 = vadd.f32 %v2322_v27, %v2354_v52 }
 0x109   : > { %v2409_v21 = vadd.f32 %v2322_v27, %v540_v16  ;;  %v2414_v22 = vadd.f32 %v2322_v27, %v604_v20  ;;  %v2456_v12 = vmax.f32 %v530_v7, 0.0  ;;  %v2458_v14 = vmax.f32 %v533_v8, 0.0 }
 0x10a   : > { %1311 = vrot.lane.b32.xlu1 %v1708_v17, %s2135_s11  ;;  %1309 = vrot.lane.b32.xlu0 %v1707_v11, %s2135_s11  ;;  %v1721_v11 = vpack.c.bf16 %v2043_v36, %v2043_v36  ;;  %v594_v16 = vadd.f32 %v2350_v51, %v2322_v27  ;;  %v597_v17 = vadd.f32 %v2362_v55, %v2322_v27  ;;  %v2480_v51 = vmax.f32 %v522_v50, 0.0 }
 0x10b   : > { %v525_v54 = vadd.f32 %v2322_v27, %v2370_v60  ;;  %v586_v52 = vadd.f32 %v2322_v27, %v2358_v53  ;;  %v589_v60 = vadd.f32 %v2322_v27, %v2372_v61  ;;  %v2046_v53 = vadd.low.f32.bf16 %v2456_v12, %v2313_v24 }
 0x10c   : > { %v2472_v20 = vmax.f32 %v594_v16, 0.0  ;;  %v2474_v30 = vmax.f32 %v597_v17, 0.0  ;;  %v2524_v8 = vmax.f32 %v2400_v15, 0.0  ;;  %v2544_v15 = vmax.f32 %v2409_v21, 0.0 }
 0x10d   : > { %v1862_v34 = vpop.f32.mrb[12].mxu0  ;;  %v1878_v35 = vpop.f32.mrb[12].mxu1  ;;  %v2482_v55 = vmax.f32 %v525_v54, 0.0  ;;  %v2494_v33 = vmax.f32 %v589_v60, 0.0 }
 0x10e   : > { %v2422_v37 = vadd.f32 %v1862_v34, %v2322_v27  ;;  %1343 = vrot.lane.b32.xlu1 %v1724_v31, %s2135_s11  ;;  %v553_v40 = vpop.f32.mrb[13].mxu0  ;;  %1341 = vrot.lane.b32.xlu0 %v1723_v32, %s2135_s11  ;;  %v617_v41 = vpop.f32.mrb[13].mxu1  ;;  %v2431_v47 = vadd.f32 %v1878_v35, %v2322_v27  ;;  %v2492_v32 = vmax.f32 %v586_v52, 0.0  ;;  %v2045_v34 = vadd.high.f32.bf16 %v2458_v14, %v2313_v24 }
 0x10f   : > { %v2427_v42 = vadd.f32 %v2322_v27, %v553_v40  ;;  %v1863_v43 = vpop.f32.mrb[14].mxu0  ;;  %v1879_v49 = vpop.f32.mrb[14].mxu1  ;;  %v2437_v2 = vadd.f32 %v2322_v27, %v617_v41  ;;  %v1711_v40 = vpack.c.bf16 %v2046_v53, %v2046_v53  ;;  %v2049_v24 = vadd.high.f32.bf16 %v2482_v55, %v2315_v25 }
 0x110   : > { %v2434_v58 = vadd.f32 %v1863_v43, %v2322_v27  ;;  %v556_v59 = vpop.f32.mrb[15].mxu0  ;;  %v2440_v3 = vadd.f32 %v1879_v49, %v2322_v27  ;;  %v620_v4 = vpop.f32.mrb[15].mxu1  ;;  %v1712_v36 = vpack.c.bf16 %v2045_v34, %v2045_v34 }
 0x111   : > { %v2443_v5 = vadd.f32 %v2322_v27, %v556_v59  ;;  %v2448_v63 = vadd.f32 %v2322_v27, %v620_v4  ;;  %v1993_v31 = vpop.permute.xlu1 %1992  ;;  %v1988_v35 = vpop.permute.xlu0 %1987  ;;  %v1710_v59 = vpack.c.bf16 %v2049_v24, %v2049_v24 }
 0x112   : > { %1307 = vrot.lane.b32.xlu1 %v1706_v62, %s2135_s11  ;;  %1305 = vrot.lane.b32.xlu0 %v1705_v46, %s2135_s11  ;;  %v2047_v27 = vadd.low.f32.bf16 %v2472_v20, %v1993_v31  ;;  %v2048_v61 = vadd.high.f32.bf16 %v2474_v30, %v1993_v31  ;;  %v2050_v46 = vadd.low.f32.bf16 %v2480_v51, %v2315_v25  ;;  %v2521_v25 = vmax.f32 %v2386_v6, 0.0 }
 0x113   : > { %v2051_v23 = vadd.low.f32.bf16 %v2492_v32, %v1988_v35  ;;  %v2052_v49 = vadd.high.f32.bf16 %v2494_v33, %v1988_v35  ;;  %v2541_v6 = vmax.f32 %v2393_v9, 0.0  ;;  %v2053_v9 = vadd.high.f32.bf16 %v2524_v8, %v2317_v26 }
 0x114   : > { %v1728_v41 = vpack.c.bf16 %v2048_v61, %v2048_v61  ;;  %v1727_v43 = vpack.c.bf16 %v2047_v27, %v2047_v27  ;;  %v1709_v62 = vpack.c.bf16 %v2050_v46, %v2050_v46  ;;  %v2054_v21 = vadd.low.f32.bf16 %v2521_v25, %v2317_v26 }
 0x115   : > { %v1726_v4 = vpack.c.bf16 %v2052_v49, %v2052_v49  ;;  %v1725_v7 = vpack.c.bf16 %v2051_v23, %v2051_v23  ;;  %v2003_v16 = vpop.permute.xlu1 %2002  ;;  %v1998_v50 = vpop.permute.xlu0 %1997  ;;  %v1716_v54 = vpack.c.bf16 %v2053_v9, %v2053_v9  ;;  %v2057_v26 = vadd.high.f32.bf16 %v2544_v15, %v2324_v28 }
 0x116   : > { %1339 = vrot.lane.b32.xlu1 %v1722_v10, %s2135_s11  ;;  %1337 = vrot.lane.b32.xlu0 %v1721_v11, %s2135_s11  ;;  %v2531_v10 = vmax.f32 %v2397_v13, 0.0  ;;  %v2534_v11 = vmax.f32 %v2406_v19, 0.0  ;;  %v2551_v13 = vmax.f32 %v2403_v18, 0.0  ;;  %v2554_v19 = vmax.f32 %v2414_v22, 0.0 }
 0x117   : > { %v1715_v22 = vpack.c.bf16 %v2054_v21, %v2054_v21  ;;  %v2058_v31 = vadd.low.f32.bf16 %v2541_v6, %v2324_v28  ;;  %v1714_v27 = vpack.c.bf16 %v2057_v26, %v2057_v26  ;;  %v2581_v28 = vmax.f32 %v2422_v37, 0.0 }
 0x118   : > { %v2055_v17 = vadd.low.f32.bf16 %v2531_v10, %v2003_v16  ;;  %v2056_v18 = vadd.high.f32.bf16 %v2534_v11, %v2003_v16  ;;  %v2059_v34 = vadd.low.f32.bf16 %v2551_v13, %v1998_v50  ;;  %v2060_v53 = vadd.high.f32.bf16 %v2554_v19, %v1998_v50 }
 0x119   : > { %v1713_v61 = vpack.c.bf16 %v2058_v31, %v2058_v31  ;;  %v2601_v37 = vmax.f32 %v2427_v42, 0.0  ;;  %v2008_v24 = vpop.permute.xlu0 %2007  ;;  %v2013_v46 = vpop.permute.xlu1 %2012 }
 0x11a   : > { %710 = vrot.lane.b32.xlu1 %v2458_v14, %s2134_s10  ;;  %708 = vrot.lane.b32.xlu0 %v2456_v12, %s2134_s10  ;;  %v1732_v52 = vpack.c.bf16 %v2056_v18, %v2056_v18  ;;  %v1731_v60 = vpack.c.bf16 %v2055_v17, %v2055_v17  ;;  %v1730_v35 = vpack.c.bf16 %v2060_v53, %v2060_v53 }
 0x11b   : > { %v2064_v49 = vadd.low.f32.bf16 %v2601_v37, %v2340_v44 }
 0x11d   : > { %v1717_v16 = vpack.c.bf16 %v2064_v49, %v2064_v49 }
 0x11e   : > { %742 = vrot.lane.b32.xlu1 %v2474_v30, %s2134_s10  ;;  %740 = vrot.lane.b32.xlu0 %v2472_v20, %s2134_s10 }
 0x122   : > { %706 = vrot.lane.b32.xlu1 %v2482_v55, %s2134_s10  ;;  %704 = vrot.lane.b32.xlu0 %v2480_v51, %s2134_s10 }
 0x126   : > { %738 = vrot.lane.b32.xlu1 %v2494_v33, %s2134_s10  ;;  %736 = vrot.lane.b32.xlu0 %v2492_v32, %s2134_s10 }
 0x12a   : > { %1319 = vrot.lane.b32.xlu1 %v1712_v36, %s2135_s11  ;;  %1317 = vrot.lane.b32.xlu0 %v1711_v40, %s2135_s11  ;;  %v1729_v36 = vpack.c.bf16 %v2059_v34, %v2059_v34  ;;  %v2584_v40 = vmax.f32 %v2434_v58, 0.0  ;;  %v2604_v58 = vmax.f32 %v2443_v5, 0.0  ;;  %v2062_v5 = vadd.low.f32.bf16 %v2581_v28, %v2326_v29 }
 0x12c   : > { %v2061_v42 = vadd.high.f32.bf16 %v2584_v40, %v2326_v29 }
 0x12e   : > { %1351 = vrot.lane.b32.xlu1 %v1728_v41, %s2135_s11  ;;  %1349 = vrot.lane.b32.xlu0 %v1727_v43, %s2135_s11  ;;  %v2591_v41 = vmax.f32 %v2431_v47, 0.0  ;;  %v2594_v43 = vmax.f32 %v2440_v3, 0.0  ;;  %v2611_v47 = vmax.f32 %v2437_v2, 0.0  ;;  %v2614_v3 = vmax.f32 %v2448_v63, 0.0 }
 0x12f   : > { %v1720_v23 = vpack.c.bf16 %v2061_v42, %v2061_v42  ;;  %v1719_v2 = vpack.c.bf16 %v2062_v5, %v2062_v5  ;;  %v2063_v63 = vadd.high.f32.bf16 %v2604_v58, %v2340_v44 }
 0x130   : > { %v2065_v29 = vadd.low.f32.bf16 %v2611_v47, %v2008_v24  ;;  %v2067_v18 = vadd.low.f32.bf16 %v2591_v41, %v2013_v46  ;;  %v2068_v50 = vadd.high.f32.bf16 %v2594_v43, %v2013_v46 }
 0x132   : > { %1315 = vrot.lane.b32.xlu1 %v1710_v59, %s2135_s11  ;;  %1313 = vrot.lane.b32.xlu0 %v1709_v62, %s2135_s11  ;;  %v2066_v59 = vadd.high.f32.bf16 %v2614_v3, %v2008_v24 }
 0x136   : > { %1347 = vrot.lane.b32.xlu1 %v1726_v4, %s2135_s11  ;;  %1345 = vrot.lane.b32.xlu0 %v1725_v7, %s2135_s11  ;;  %v1718_v7 = vpack.c.bf16 %v2063_v63, %v2063_v63 }
 0x13a   : > { %718 = vrot.lane.b32.xlu1 %v2524_v8, %s2134_s10  ;;  %716 = vrot.lane.b32.xlu0 %v2521_v25, %s2134_s10 }
 0x13e   : > { %750 = vrot.lane.b32.xlu1 %v2534_v11, %s2134_s10  ;;  %748 = vrot.lane.b32.xlu0 %v2531_v10, %s2134_s10 }
 0x142   : > { %714 = vrot.lane.b32.xlu1 %v2544_v15, %s2134_s10  ;;  %712 = vrot.lane.b32.xlu0 %v2541_v6, %s2134_s10 }
 0x146   : > { %746 = vrot.lane.b32.xlu1 %v2554_v19, %s2134_s10  ;;  %744 = vrot.lane.b32.xlu0 %v2551_v13, %s2134_s10 }
 0x14a   : > { %1327 = vrot.lane.b32.xlu1 %v1716_v54, %s2135_s11  ;;  %1325 = vrot.lane.b32.xlu0 %v1715_v22, %s2135_s11 }
 0x14e   : > { %1359 = vrot.lane.b32.xlu1 %v1732_v52, %s2135_s11  ;;  %1357 = vrot.lane.b32.xlu0 %v1731_v60, %s2135_s11  ;;  %v1734_v52 = vpack.c.bf16 %v2066_v59, %v2066_v59  ;;  %v1733_v60 = vpack.c.bf16 %v2065_v29, %v2065_v29 }
 0x152   : > { %1323 = vrot.lane.b32.xlu1 %v1714_v27, %s2135_s11  ;;  %1321 = vrot.lane.b32.xlu0 %v1713_v61, %s2135_s11  ;;  %v1736_v27 = vpack.c.bf16 %v2068_v50, %v2068_v50  ;;  %v1735_v61 = vpack.c.bf16 %v2067_v18, %v2067_v18 }
 0x156   : > { %1355 = vrot.lane.b32.xlu1 %v1730_v35, %s2135_s11  ;;  %1353 = vrot.lane.b32.xlu0 %v1729_v36, %s2135_s11 }
 0x15a   : > { %726 = vrot.lane.b32.xlu1 %v2584_v40, %s2134_s10  ;;  %724 = vrot.lane.b32.xlu0 %v2581_v28, %s2134_s10 }
 0x15e   : > { %758 = vrot.lane.b32.xlu1 %v2594_v43, %s2134_s10  ;;  %756 = vrot.lane.b32.xlu0 %v2591_v41, %s2134_s10 }
 0x162   : > { %722 = vrot.lane.b32.xlu1 %v2604_v58, %s2134_s10  ;;  %720 = vrot.lane.b32.xlu0 %v2601_v37, %s2134_s10 }
 0x166   : > { %754 = vrot.lane.b32.xlu1 %v2614_v3, %s2134_s10  ;;  %752 = vrot.lane.b32.xlu0 %v2611_v47, %s2134_s10  ;;  %s2075_s10 = scalar_lea.vmem %s2074_s9, 4096 }
 0x167   : > { %p2077_p1 = scmp.lt.s32.totalorder %s2075_s10, %s2069_s7 }
 0x169   : > { %p2078_p2 = por %p2077_p1, %p2076_p0 }
 0x16a   : > { %1335 = vrot.lane.b32.xlu1 %v1720_v23, %s2135_s11  ;;  %1333 = vrot.lane.b32.xlu0 %v1719_v2, %s2135_s11 }
 0x16b   : > { %p2079_p3 = pnand %p2078_p2, %p2072_p13 }
 0x16c   : > { %v733_v62 = vpop.permute.xlu0 %732  ;;  %v701_v4 = vpop.permute.xlu1 %700 }
 0x16d   : > { %v810_v9 = vadd.f32 %v733_v62, %v2332_v39  ;;  %v794_v21 = vadd.f32 %v701_v4, %v2330_v38 }
 0x16e   : > { %1331 = vrot.lane.b32.xlu1 %v1718_v7, %s2135_s11  ;;  %1329 = vrot.lane.b32.xlu0 %v1717_v16, %s2135_s11 }
 0x16f   : > { %v1691_v44 = vpack.c.bf16 %v810_v9, %v810_v9  ;;  %v1675_v17 = vpack.c.bf16 %v794_v21, %v794_v21 }
 0x170   : > { %v703_v54 = vpop.permute.xlu1 %702  ;;  %v697_v22 = vpop.permute.xlu0 %696 }
 0x171   : > { %971 = vst.msk [vmem:[%s2641_s15 + $0x48] sm:$0xf] %vm952_vm2, %v1691_v44  ;;  %955 = vst.msk [vmem:[%s2641_s15 + $0x8] sm:$0xf] %vm952_vm2, %v1675_v17  ;;  %v795_v38 = vadd.f32 %v703_v54, %v2345_v48  ;;  %v792_v39 = vadd.f32 %v697_v22, %v2342_v45 }
 0x172   : > { %1363 = vrot.lane.b32.xlu1 %v1734_v52, %s2135_s11  ;;  %1361 = vrot.lane.b32.xlu0 %v1733_v60, %s2135_s11 }
 0x173   : > { %v1676_v26 = vpack.c.bf16 %v795_v38, %v795_v38  ;;  %v1673_v31 = vpack.c.bf16 %v792_v39, %v792_v39 }
 0x174   : > { %v735_v34 = vpop.permute.xlu1 %734  ;;  %v729_v53 = vpop.permute.xlu0 %728 }
 0x175   : > { %956 = vst.msk [vmem:[%s2641_s15 + $0xc] sm:$0xf] %vm952_vm2, %v1676_v26  ;;  %953 = vst.msk [vmem:[%s2641_s15] sm:$0xf] %vm952_vm2, %v1673_v31  ;;  %v811_v48 = vadd.f32 %v735_v34, %v2366_v57  ;;  %v808_v45 = vadd.f32 %v729_v53, %v2364_v56 }
 0x176   : > { %1367 = vrot.lane.b32.xlu1 %v1736_v27, %s2135_s11  ;;  %1365 = vrot.lane.b32.xlu0 %v1735_v61, %s2135_s11 }
 0x177   : > { %v1692_v35 = vpack.c.bf16 %v811_v48, %v811_v48  ;;  %v1689_v36 = vpack.c.bf16 %v808_v45, %v808_v45 }
 0x178   : > { %v731_v24 = vpop.permute.xlu1 %730  ;;  %v699_v42 = vpop.permute.xlu0 %698 }
 0x179   : > { %972 = vst.msk [vmem:[%s2641_s15 + $0x4c] sm:$0xf] %vm952_vm2, %v1692_v35  ;;  %969 = vst.msk [vmem:[%s2641_s15 + $0x40] sm:$0xf] %vm952_vm2, %v1689_v36  ;;  %v809_v5 = vadd.f32 %v731_v24, %v2381_v1  ;;  %v793_v57 = vadd.f32 %v699_v42, %v2379_v0 }
 0x17b   : > { %v1690_v56 = vpack.c.bf16 %v809_v5, %v809_v5  ;;  %v1674_v46 = vpack.c.bf16 %v793_v57, %v793_v57 }
 0x17c   : > { %v1312_v23 = vpop.permute.xlu1 %1311  ;;  %v1310_v2 = vpop.permute.xlu0 %1309 }
 0x17d   : > { %970 = vst.msk [vmem:[%s2641_s15 + $0x44] sm:$0xf] %vm952_vm2, %v1690_v56  ;;  %954 = vst.msk [vmem:[%s2641_s15 + $0x4] sm:$0xf] %vm952_vm2, %v1674_v46 }
 0x17e   : > { %1404 = vst.msk [vmem:[%s2669_s23 + $0xc] sm:$0xf] %vm952_vm2, %v1312_v23  ;;  %1403 = vst.msk [vmem:[%s2669_s23 + $0x8] sm:$0xf] %vm952_vm2, %v1310_v2 }
 0x180   : > { %v1344_v0 = vpop.permute.xlu1 %1343  ;;  %v1342_v1 = vpop.permute.xlu0 %1341 }
 0x181   : > { %1420 = vst.msk [vmem:[%s2669_s23 + $0x4c] sm:$0xf] %vm952_vm2, %v1344_v0  ;;  %1419 = vst.msk [vmem:[%s2669_s23 + $0x48] sm:$0xf] %vm952_vm2, %v1342_v1 }
 0x184   : > { %v1308_v63 = vpop.permute.xlu1 %1307  ;;  %v1306_v49 = vpop.permute.xlu0 %1305 }
 0x185   : > { %1402 = vst.msk [vmem:[%s2669_s23 + $0x4] sm:$0xf] %vm952_vm2, %v1308_v63  ;;  %1401 = vst.msk [vmem:[%s2669_s23] sm:$0xf] %vm952_vm2, %v1306_v49 }
 0x188   : > { %v1340_v29 = vpop.permute.xlu1 %1339  ;;  %v1338_v59 = vpop.permute.xlu0 %1337 }
 0x189   : > { %1418 = vst.msk [vmem:[%s2669_s23 + $0x44] sm:$0xf] %vm952_vm2, %v1340_v29  ;;  %1417 = vst.msk [vmem:[%s2669_s23 + $0x40] sm:$0xf] %vm952_vm2, %v1338_v59 }
 0x18c   : > { %v711_v62 = vpop.permute.xlu1 %710  ;;  %v709_v4 = vpop.permute.xlu0 %708 }
 0x18d   : > { %v799_v7 = vadd.f32 %v711_v62, %v2458_v14  ;;  %v798_v16 = vadd.f32 %v709_v4, %v2456_v12 }
 0x18f   : > { %v1680_v9 = vpack.c.bf16 %v799_v7, %v799_v7  ;;  %v1679_v21 = vpack.c.bf16 %v798_v16, %v798_v16 }
 0x190   : > { %v743_v44 = vpop.permute.xlu1 %742  ;;  %v741_v17 = vpop.permute.xlu0 %740 }
 0x191   : > { %960 = vst.msk [vmem:[%s2641_s15 + $0x1c] sm:$0xf] %vm952_vm2, %v1680_v9  ;;  %959 = vst.msk [vmem:[%s2641_s15 + $0x18] sm:$0xf] %vm952_vm2, %v1679_v21  ;;  %v815_v18 = vadd.f32 %v743_v44, %v2474_v30  ;;  %v814_v50 = vadd.f32 %v741_v17, %v2472_v20 }
 0x193   : > { %v1696_v54 = vpack.c.bf16 %v815_v18, %v815_v18  ;;  %v1695_v22 = vpack.c.bf16 %v814_v50, %v814_v50 }
 0x194   : > { %v707_v52 = vpop.permute.xlu1 %706  ;;  %v705_v14 = vpop.permute.xlu0 %704 }
 0x195   : > { %976 = vst.msk [vmem:[%s2641_s15 + $0x5c] sm:$0xf] %vm952_vm2, %v1696_v54  ;;  %975 = vst.msk [vmem:[%s2641_s15 + $0x58] sm:$0xf] %vm952_vm2, %v1695_v22  ;;  %v797_v12 = vadd.f32 %v707_v52, %v2482_v55  ;;  %v796_v60 = vadd.f32 %v705_v14, %v2480_v51 }
 0x197   : > { %v1678_v38 = vpack.c.bf16 %v797_v12, %v797_v12  ;;  %v1677_v30 = vpack.c.bf16 %v796_v60, %v796_v60 }
 0x198   : > { %v739_v39 = vpop.permute.xlu1 %738  ;;  %v737_v20 = vpop.permute.xlu0 %736 }
 0x199   : > { %958 = vst.msk [vmem:[%s2641_s15 + $0x14] sm:$0xf] %vm952_vm2, %v1678_v38  ;;  %957 = vst.msk [vmem:[%s2641_s15 + $0x10] sm:$0xf] %vm952_vm2, %v1677_v30  ;;  %v813_v26 = vadd.f32 %v739_v39, %v2494_v33  ;;  %v812_v31 = vadd.f32 %v737_v20, %v2492_v32 }
 0x19b   : > { %v1694_v55 = vpack.c.bf16 %v813_v26, %v813_v26  ;;  %v1693_v34 = vpack.c.bf16 %v812_v31, %v812_v31 }
 0x19c   : > { %v1320_v51 = vpop.permute.xlu1 %1319  ;;  %v1318_v53 = vpop.permute.xlu0 %1317 }
 0x19d   : > { %974 = vst.msk [vmem:[%s2641_s15 + $0x54] sm:$0xf] %vm952_vm2, %v1694_v55  ;;  %973 = vst.msk [vmem:[%s2641_s15 + $0x50] sm:$0xf] %vm952_vm2, %v1693_v34 }
 0x19e   : > { %1408 = vst.msk [vmem:[%s2669_s23 + $0x1c] sm:$0xf] %vm952_vm2, %v1320_v51  ;;  %1407 = vst.msk [vmem:[%s2669_s23 + $0x18] sm:$0xf] %vm952_vm2, %v1318_v53 }
 0x1a0   : > { %v1352_v27 = vpop.permute.xlu1 %1351  ;;  %v1350_v33 = vpop.permute.xlu0 %1349 }
 0x1a1   : > { %1424 = vst.msk [vmem:[%s2669_s23 + $0x5c] sm:$0xf] %vm952_vm2, %v1352_v27  ;;  %1423 = vst.msk [vmem:[%s2669_s23 + $0x58] sm:$0xf] %vm952_vm2, %v1350_v33 }
 0x1a4   : > { %v1316_v32 = vpop.permute.xlu1 %1315  ;;  %v1314_v61 = vpop.permute.xlu0 %1313 }
 0x1a5   : > { %1406 = vst.msk [vmem:[%s2669_s23 + $0x14] sm:$0xf] %vm952_vm2, %v1316_v32  ;;  %1405 = vst.msk [vmem:[%s2669_s23 + $0x10] sm:$0xf] %vm952_vm2, %v1314_v61 }
 0x1a8   : > { %v1348_v48 = vpop.permute.xlu1 %1347  ;;  %v1346_v45 = vpop.permute.xlu0 %1345 }
 0x1a9   : > { %1422 = vst.msk [vmem:[%s2669_s23 + $0x54] sm:$0xf] %vm952_vm2, %v1348_v48  ;;  %1421 = vst.msk [vmem:[%s2669_s23 + $0x50] sm:$0xf] %vm952_vm2, %v1346_v45 }
 0x1ac   : > { %v719_v35 = vpop.permute.xlu1 %718  ;;  %v717_v36 = vpop.permute.xlu0 %716 }
 0x1ad   : > { %v803_v24 = vadd.f32 %v719_v35, %v2524_v8  ;;  %v802_v42 = vadd.f32 %v717_v36, %v2521_v25 }
 0x1af   : > { %v1684_v5 = vpack.c.bf16 %v803_v24, %v803_v24  ;;  %v1683_v57 = vpack.c.bf16 %v802_v42, %v802_v42 }
 0x1b0   : > { %v751_v56 = vpop.permute.xlu1 %750  ;;  %v749_v46 = vpop.permute.xlu0 %748 }
 0x1b1   : > { %964 = vst.msk [vmem:[%s2641_s15 + $0x2c] sm:$0xf] %vm952_vm2, %v1684_v5  ;;  %963 = vst.msk [vmem:[%s2641_s15 + $0x28] sm:$0xf] %vm952_vm2, %v1683_v57  ;;  %v819_v23 = vadd.f32 %v751_v56, %v2534_v11  ;;  %v818_v2 = vadd.f32 %v749_v46, %v2531_v10 }
 0x1b3   : > { %v1700_v0 = vpack.c.bf16 %v819_v23, %v819_v23  ;;  %v1699_v1 = vpack.c.bf16 %v818_v2, %v818_v2 }
 0x1b4   : > { %v715_v63 = vpop.permute.xlu1 %714  ;;  %v713_v8 = vpop.permute.xlu0 %712 }
 0x1b5   : > { %980 = vst.msk [vmem:[%s2641_s15 + $0x6c] sm:$0xf] %vm952_vm2, %v1700_v0  ;;  %979 = vst.msk [vmem:[%s2641_s15 + $0x68] sm:$0xf] %vm952_vm2, %v1699_v1  ;;  %v801_v25 = vadd.f32 %v715_v63, %v2544_v15  ;;  %v800_v49 = vadd.f32 %v713_v8, %v2541_v6 }
 0x1b7   : > { %v1682_v29 = vpack.c.bf16 %v801_v25, %v801_v25  ;;  %v1681_v11 = vpack.c.bf16 %v800_v49, %v800_v49 }
 0x1b8   : > { %v747_v59 = vpop.permute.xlu1 %746  ;;  %v745_v10 = vpop.permute.xlu0 %744 }
 0x1b9   : > { %962 = vst.msk [vmem:[%s2641_s15 + $0x24] sm:$0xf] %vm952_vm2, %v1682_v29  ;;  %961 = vst.msk [vmem:[%s2641_s15 + $0x20] sm:$0xf] %vm952_vm2, %v1681_v11  ;;  %v817_v62 = vadd.f32 %v747_v59, %v2554_v19  ;;  %v816_v4 = vadd.f32 %v745_v10, %v2551_v13 }
 0x1bb   : > { %v1698_v15 = vpack.c.bf16 %v817_v62, %v817_v62  ;;  %v1697_v7 = vpack.c.bf16 %v816_v4, %v816_v4 }
 0x1bc   : > { %v1328_v6 = vpop.permute.xlu1 %1327  ;;  %v1326_v16 = vpop.permute.xlu0 %1325 }
 0x1bd   : > { %978 = vst.msk [vmem:[%s2641_s15 + $0x64] sm:$0xf] %vm952_vm2, %v1698_v15  ;;  %977 = vst.msk [vmem:[%s2641_s15 + $0x60] sm:$0xf] %vm952_vm2, %v1697_v7 }
 0x1be   : > { %1412 = vst.msk [vmem:[%s2669_s23 + $0x2c] sm:$0xf] %vm952_vm2, %v1328_v6  ;;  %1411 = vst.msk [vmem:[%s2669_s23 + $0x28] sm:$0xf] %vm952_vm2, %v1326_v16 }
 0x1c0   : > { %v1360_v9 = vpop.permute.xlu1 %1359  ;;  %v1358_v19 = vpop.permute.xlu0 %1357 }
 0x1c1   : > { %1428 = vst.msk [vmem:[%s2669_s23 + $0x6c] sm:$0xf] %vm952_vm2, %v1360_v9  ;;  %1427 = vst.msk [vmem:[%s2669_s23 + $0x68] sm:$0xf] %vm952_vm2, %v1358_v19 }
 0x1c4   : > { %v1324_v13 = vpop.permute.xlu1 %1323  ;;  %v1322_v21 = vpop.permute.xlu0 %1321 }
 0x1c5   : > { %1410 = vst.msk [vmem:[%s2669_s23 + $0x24] sm:$0xf] %vm952_vm2, %v1324_v13  ;;  %1409 = vst.msk [vmem:[%s2669_s23 + $0x20] sm:$0xf] %vm952_vm2, %v1322_v21 }
 0x1c8   : > { %v1356_v44 = vpop.permute.xlu1 %1355  ;;  %v1354_v17 = vpop.permute.xlu0 %1353 }
 0x1c9   : > { %1426 = vst.msk [vmem:[%s2669_s23 + $0x64] sm:$0xf] %vm952_vm2, %v1356_v44  ;;  %1425 = vst.msk [vmem:[%s2669_s23 + $0x60] sm:$0xf] %vm952_vm2, %v1354_v17 }
 0x1cc   : > { %v727_v18 = vpop.permute.xlu1 %726  ;;  %v725_v50 = vpop.permute.xlu0 %724 }
 0x1cd   : > { %v807_v54 = vadd.f32 %v727_v18, %v2584_v40  ;;  %v806_v22 = vadd.f32 %v725_v50, %v2581_v28 }
 0x1cf   : > { %v1688_v52 = vpack.c.bf16 %v807_v54, %v807_v54  ;;  %v1687_v14 = vpack.c.bf16 %v806_v22, %v806_v22 }
 0x1d0   : > { %v759_v12 = vpop.permute.xlu1 %758  ;;  %v757_v60 = vpop.permute.xlu0 %756 }
 0x1d1   : > { %968 = vst.msk [vmem:[%s2641_s15 + $0x3c] sm:$0xf] %vm952_vm2, %v1688_v52  ;;  %967 = vst.msk [vmem:[%s2641_s15 + $0x38] sm:$0xf] %vm952_vm2, %v1687_v14  ;;  %v823_v38 = vadd.f32 %v759_v12, %v2594_v43  ;;  %v822_v30 = vadd.f32 %v757_v60, %v2591_v41 }
 0x1d3   : > { %v1704_v39 = vpack.c.bf16 %v823_v38, %v823_v38  ;;  %v1703_v40 = vpack.c.bf16 %v822_v30, %v822_v30 }
 0x1d4   : > { %v723_v20 = vpop.permute.xlu1 %722  ;;  %v721_v28 = vpop.permute.xlu0 %720 }
 0x1d5   : > { %984 = vst.msk [vmem:[%s2641_s15 + $0x7c] sm:$0xf] %vm952_vm2, %v1704_v39  ;;  %983 = vst.msk [vmem:[%s2641_s15 + $0x78] sm:$0xf] %vm952_vm2, %v1703_v40  ;;  %v805_v26 = vadd.f32 %v723_v20, %v2604_v58  ;;  %v804_v31 = vadd.f32 %v721_v28, %v2601_v37 }
 0x1d7   : > { %v1686_v55 = vpack.c.bf16 %v805_v26, %v805_v26  ;;  %v1685_v34 = vpack.c.bf16 %v804_v31, %v804_v31 }
 0x1d8   : > { %v755_v41 = vpop.permute.xlu1 %754  ;;  %v753_v43 = vpop.permute.xlu0 %752 }
 0x1d9   : > { %966 = vst.msk [vmem:[%s2641_s15 + $0x34] sm:$0xf] %vm952_vm2, %v1686_v55  ;;  %965 = vst.msk [vmem:[%s2641_s15 + $0x30] sm:$0xf] %vm952_vm2, %v1685_v34  ;;  %v821_v58 = vadd.f32 %v755_v41, %v2614_v3  ;;  %v820_v37 = vadd.f32 %v753_v43, %v2611_v47 }
 0x1db   : > { %v1702_v51 = vpack.c.bf16 %v821_v58, %v821_v58  ;;  %v1701_v53 = vpack.c.bf16 %v820_v37, %v820_v37 }
 0x1dc   : > { %v1336_v27 = vpop.permute.xlu1 %1335  ;;  %v1334_v33 = vpop.permute.xlu0 %1333 }
 0x1dd   : > { %982 = vst.msk [vmem:[%s2641_s15 + $0x74] sm:$0xf] %vm952_vm2, %v1702_v51  ;;  %981 = vst.msk [vmem:[%s2641_s15 + $0x70] sm:$0xf] %vm952_vm2, %v1701_v53 }
 0x1de   : > { %1416 = vst.msk [vmem:[%s2669_s23 + $0x3c] sm:$0xf] %vm952_vm2, %v1336_v27  ;;  %1415 = vst.msk [vmem:[%s2669_s23 + $0x38] sm:$0xf] %vm952_vm2, %v1334_v33 }
 0x1df   : > { %2082 = shalt.err (!%p2079_p3)
}
 0x1e0   : > { %s2083_s11 = scalar_lea.hbm %s2796_s6, 2048  ;;  %s2087_s15 = scalar_lea.hbm %s2867_s4, 4096 }
 0x1e1   : > { %p2084_p4 = scmp.ne.s32.totalorder %s2796_s6, %s2083_s11  ;;  %p2088_p9 = scmp.lt.u32.totalorder %s2796_s6, %s2867_s4 }
 0x1e2   : > { %p2089_p10 = scmp.lt.u32.totalorder %s2087_s15, %s2083_s11  ;;  %p2091_p12 = scmp.lt.u32.totalorder %s2083_s11, %s2796_s6 }
 0x1e3   : > { %p2085_p7 = pnand %p2084_p4, %p2207_p5 }
 0x1e4   : > { %p2090_p11 = por %p2089_p10, %p2088_p9 }
 0x1e5   : > { %p2086_p8 = pneg %p2085_p7 }
 0x1e6   : > { %p2092_p13 = por %p2091_p12, %p2090_p11 }
 0x1e8   : > { %p2093_p0 = pnand %p2092_p13, %p2086_p8 }
 0x1ea   : > { %2096 = shalt.err (!%p2093_p0)
}
 0x1eb   : > { %s2137_s12 = smov 64   ;;  %s2138_s26 = smov 4   ;;  %v1332_v47 = vpop.permute.xlu1 %1331  ;;  %v1330_v3 = vpop.permute.xlu0 %1329 }
 0x1ec   : > { %1892 = dma.vmem_to_hbm [thread:$0]  (%p2207_p5), %s2798_s25, 2048, %s2796_s6, %s2810_s22, %s2137_s12, %s2137_s12, %s2138_s26  }
 0x1ed   : > { %1414 = vst.msk [vmem:[%s2669_s23 + $0x34] sm:$0xf] %vm952_vm2, %v1332_v47  ;;  %1413 = vst.msk [vmem:[%s2669_s23 + $0x30] sm:$0xf] %vm952_vm2, %v1330_v3 }
 0x1ef   : > { %v1364_v32 = vpop.permute.xlu1 %1363  ;;  %v1362_v61 = vpop.permute.xlu0 %1361 }
 0x1f0   : > { %1430 = vst.msk [vmem:[%s2669_s23 + $0x74] sm:$0xf] %vm952_vm2, %v1364_v32  ;;  %1429 = vst.msk [vmem:[%s2669_s23 + $0x70] sm:$0xf] %vm952_vm2, %v1362_v61 }
 0x1f3   : > { %v1368_v48 = vpop.permute.xlu1 %1367  ;;  %v1366_v45 = vpop.permute.xlu0 %1365 }
 0x1f4   : > { %1432 = vst.msk [vmem:[%s2669_s23 + $0x7c] sm:$0xf] %vm952_vm2, %v1368_v48  ;;  %1431 = vst.msk [vmem:[%s2669_s23 + $0x78] sm:$0xf] %vm952_vm2, %v1366_v45 }
 0x1f5 PF: > { %p1898_p5 = scmp.ge.s32.totalorder %s2131_s21, 2  ;;  %s1471_s28 = sand.u32 1, %s2119_s18  }
 0x1f6   : > { %s1472_s25 = scalar_lea.sflag [#allocation3], %s1471_s28 }
 0x1f7   : > { %p1895_p1 = pnand %p1898_p5, %p2211_p6 }
 0x1f9   : > { %2114 = dma.done.wait (!%p1895_p1), %s1472_s25, 2048  }
 0x1fa   : > { %2116 = vsyncadd (!%p1895_p1), %s1472_s25, 4294965248  ;;  %p16_p2 = scmp.ge.s32.totalorder %s2194_s24, 4   ;;  %s2871_s18 = smov %s2123_s19 }
 0x1fb   : > { %s2872_s19 = smov %s2127_s20  ;;  %s2873_s20 = smov %s2205_s27 }
 0x1fc   : > { %s2874_s21 = smov %s2194_s24  ;;  %18 = sbr.rel (!%p16_p2) target bundleno = 3 (0x3), region = 86 }
 0x203   :  { %1485 = vsyncpa [#allocation3], 1 }
 0x204   :  { %1487 = vsyncpa [#allocation3 + $0x1], 1 }

// kernel: a_call__.22
= control target key start
LH: loop header
LB: loop body
LE: loop exit
PB: predicated region body
PF: predicated region fallthrough
CT: control target
= control target key end

     0   :  { %s493_s12 = smov 0   ;;  %s524_s0 = inlined_call_operand.vmem [shape: bf16[128,8], index: 0, kind: input, shape index: {}]   ;;  %s525_s1 = inlined_call_operand.vmem [shape: bf16[8,16], index: 1, kind: input, shape index: {}]   ;;  %s526_s2 = inlined_call_operand.vmem [shape: f32[1,16], index: 2, kind: input, shape index: {}]   ;;  %s527_s3 = inlined_call_operand.vmem [shape: bf16[128,16], index: 3, kind: output, shape index: {}]  }
   0x1 LB: > { %s398_s13 = sadd.s32 4294967295, %s471_s12   ;;  %p402_p0 = scmp.ge.s32.totalorder %s471_s12, 1  ;;  %s471_s12 = sphi %s493_s12, %s13_s12  }
   0x2   : > { %p138_p1 = scmp.lt.s32.totalorder %s471_s12, 3 }
   0x4   : > { %p139_p2 = pnand %p402_p0, %p138_p1 }
   0x5   : > { %v183_v0 = vld [vmem:[%s525_s1] sm:$0xf] (!%p139_p2)  ;;  %vm224_vm0 = vcmask (!%p139_p2), 1043456   ;;  %s403_s16 = sshll.u32 (!%p139_p2), %s398_s13, 3  ;;  %vm211_vm1 = vcmask (!%p139_p2), 64512   ;;  %vm333_vm2 = vcmask (!%p139_p2), 125952  }
   0x6   : > { %142 = sbr.rel (%p139_p2) target bundleno = 240 (0xf0), region = 32  ;;  %451 = vmatprep.subr.msk.bf16.mxu0 (!%p139_p2), %vm224_vm0, %v183_v0  ;;  %452 = vmatprep.subr.msk.bf16.mxu1 (!%p139_p2), %vm224_vm0, %v183_v0  ;;  %v226_v1 = vsel (!%p139_p2), %vm224_vm0, %v183_v0, 0  ;;  %p163_p3 = scmp.lt.s32.totalorder (!%p139_p2), %s403_s16, 15  ;;  %v407_v6 = vld [vmem:[%s526_s2] ss:$0 sm:$0xff] (!%p139_p2) }
   0x7   : > { %440 = vmatpush3.bf16.msra.mxu0 (!%p139_p2), %v226_v1  ;;  %450 = vmatpush3.bf16.msra.mxu1 (!%p139_p2), %v226_v1 }
   0xd   : > { %s529_s16 = smov (!%p163_p3, %s403_s16), 15 }
   0xe   : > { %s404_s17 = sshll.u32 %s529_s16, 2 }
   0xf   : > { %s166_s20 = scalar_lea.vmem %s524_s0, %s404_s17  ;;  %s172_s25 = scalar_lea.vmem %s527_s3, %s404_s17 }
  0x10   : > { %v461_v2 = vld [vmem:[%s166_s20] sm:$0xff]   ;;  %v462_v3 = vld [vmem:[%s166_s20 + $0x10] sm:$0xff]   ;;  %v463_v4 = vld [vmem:[%s166_s20 + $0x8] sm:$0xff]  }
  0x11   : > { %441 = vmatprep.mubr.msk.bf16.mxu0 %vm211_vm1, %v461_v2  ;;  %445 = vmatprep.mubr.msk.bf16.mxu1 %vm211_vm1, %v462_v3  ;;  %v464_v5 = vld [vmem:[%s166_s20 + $0x18] sm:$0xff]  }
  0x12   : > { %442 = vmatmul.mubr.msk.bf16.vlgmr.msra.gmra.mrb[0].mxu0 %vm211_vm1, %v463_v4  ;;  %446 = vmatmul.mubr.msk.bf16.vlgmr.msra.gmra.mrb[0].mxu1 %vm211_vm1, %v464_v5 }
  0xe5   : > { %v443_v7 = vpop.f32.mrb[0].mxu0  ;;  %v447_v9 = vpop.f32.mrb[0].mxu1 }
  0xe6   : > { %v271_v8 = vadd.f32 %v443_v7, %v407_v6  ;;  %v262_v10 = vpop.f32.mrb[1].mxu0  ;;  %v287_v11 = vadd.f32 %v447_v9, %v407_v6  ;;  %v278_v13 = vpop.f32.mrb[1].mxu1 }
  0xe7   : > { %v263_v12 = vadd.f32 %v407_v6, %v262_v10  ;;  %v444_v14 = vpop.f32.mrb[2].mxu0  ;;  %v279_v16 = vadd.f32 %v407_v6, %v278_v13  ;;  %v448_v18 = vpop.f32.mrb[2].mxu1 }
  0xe8   : > { %v295_v15 = vmax.f32 %v271_v8, 0.0  ;;  %v274_v17 = vadd.f32 %v444_v14, %v407_v6  ;;  %v265_v19 = vpop.f32.mrb[3].mxu0  ;;  %v299_v20 = vmax.f32 %v287_v11, 0.0  ;;  %v290_v22 = vadd.f32 %v448_v18, %v407_v6  ;;  %v281_v24 = vpop.f32.mrb[3].mxu1 }
  0xe9   : > { %v293_v21 = vmax.f32 %v263_v12, 0.0  ;;  %v266_v23 = vadd.f32 %v407_v6, %v265_v19  ;;  %v297_v26 = vmax.f32 %v279_v16, 0.0  ;;  %v282_v28 = vadd.f32 %v407_v6, %v281_v24 }
  0xea   : > { %v428_v25 = vpack.c.bf16 %v295_v15, %v295_v15  ;;  %v296_v27 = vmax.f32 %v274_v17, 0.0  ;;  %v432_v29 = vpack.c.bf16 %v299_v20, %v299_v20  ;;  %v300_v31 = vmax.f32 %v290_v22, 0.0 }
  0xeb   : > { %v426_v30 = vpack.c.bf16 %v293_v21, %v293_v21  ;;  %v294_v32 = vmax.f32 %v266_v23, 0.0  ;;  %v430_v33 = vpack.c.bf16 %v297_v26, %v297_v26  ;;  %v298_v35 = vmax.f32 %v282_v28, 0.0 }
  0xec   : > { %336 = vst.msk [vmem:[%s172_s25 + $0x8] sm:$0xf] %vm333_vm2, %v428_v25  ;;  %v429_v34 = vpack.c.bf16 %v296_v27, %v296_v27  ;;  %340 = vst.msk [vmem:[%s172_s25 + $0x18] sm:$0xf] %vm333_vm2, %v432_v29  ;;  %v433_v36 = vpack.c.bf16 %v300_v31, %v300_v31 }
  0xed   : > { %334 = vst.msk [vmem:[%s172_s25] sm:$0xf] %vm333_vm2, %v426_v30  ;;  %v427_v37 = vpack.c.bf16 %v294_v32, %v294_v32  ;;  %338 = vst.msk [vmem:[%s172_s25 + $0x10] sm:$0xf] %vm333_vm2, %v430_v33  ;;  %v431_v38 = vpack.c.bf16 %v298_v35, %v298_v35 }
  0xee   : > { %337 = vst.msk [vmem:[%s172_s25 + $0xc] sm:$0xf] %vm333_vm2, %v429_v34  ;;  %341 = vst.msk [vmem:[%s172_s25 + $0x1c] sm:$0xf] %vm333_vm2, %v433_v36 }
  0xef   : > { %335 = vst.msk [vmem:[%s172_s25 + $0x4] sm:$0xf] %vm333_vm2, %v427_v37  ;;  %339 = vst.msk [vmem:[%s172_s25 + $0x14] sm:$0xf] %vm333_vm2, %v431_v38 }
  0xf0 PF: > { %s13_s12 = sadd.s32 1, %s471_s12  }
  0xf1   : > { %p10_p4 = scmp.ge.s32.totalorder %s13_s12, 4  }
  0xf3   :  { %12 = sbr.rel (!%p10_p4) target bundleno = 1 (0x1), region = 62 }

// kernel: a_call__.23
= control target key start
LH: loop header
LB: loop body
LE: loop exit
PB: predicated region body
PF: predicated region fallthrough
CT: control target
= control target key end

     0   :  { %12 = vsyncpa [#allocation3], 0  ;;  %s1520_s0 = inlined_call_operand.vmem [shape: bf16[128,144], index: 0, kind: input, shape index: {}]   ;;  %s1521_s1 = inlined_call_operand.vmem [shape: bf16[144,112], index: 1, kind: input, shape index: {}]   ;;  %s1522_s2 = inlined_call_operand.vmem [shape: f32[1,112], index: 2, kind: input, shape index: {}]   ;;  %s1523_s3 = inlined_call_operand.hbm [shape: bf16[128,16], index: 3, kind: output, shape index: {0}]   ;;  %s1524_s4 = inlined_call_operand.hbm [shape: bf16[128,16], index: 4, kind: output, shape index: {1}]   ;;  %s1525_s5 = inlined_call_operand.vmem [shape: bf16[128,16], index: 5, kind: output, shape index: {2}]   ;;  %s1526_s6 = inlined_call_operand.vmem [shape: bf16[128,16], index: 6, kind: output, shape index: {3}]  }
   0x1   :  { %14 = vsyncpa [#allocation3 + $0x1], 0 }
   0x2   :  { %15 = vsyncpa [#allocation5], 0 }
   0x3   :  { %17 = vsyncpa [#allocation5 + $0x1], 0  ;;  %s1208_s21 = smov 0   ;;  %s1210_s22 = smov 0  }
   0x4   :  { %s1212_s23 = smov 0   ;;  %s1214_s24 = smov 0  }
   0x5 LB: > { %s1229_s25 = sadd.s32 4294967295, %s1163_s24   ;;  %s902_s26 = sadd.s32 4294967294, %s1163_s24   ;;  %s1163_s24 = sphi %s1214_s24, %s1541_s24   ;;  %s1159_s23 = sphi %s1212_s23, %s1540_s23   ;;  %s1155_s22 = sphi %s1210_s22, %s1539_s22   ;;  %s1151_s21 = sphi %s1208_s21, %s1538_s21  }
   0x6   : > { %s1233_s27 = sadd.s32 1, %s1163_s24   ;;  %s98_s28 = sadd.s32 1, %s1159_s23 }
   0x7   : > { %s95_s29 = ssub.s32 %s1163_s24, %s1233_s27  ;;  %p108_p0 = scmp.ne.s32.totalorder %s1159_s23, %s1155_s22 }
   0x8   : > { %p96_p1 = scmp.eq.s32.totalorder %s95_s29, 0  ;;  %p109_p2 = scmp.eq.s32.totalorder %s1229_s25, 1 }
   0x9   : > { %p114_p3 = scmp.ne.s32.totalorder %s1155_s22, %s1151_s21  ;;  %p115_p4 = scmp.eq.s32.totalorder %s902_s26, 1 }
   0xa   : > { %s1244_s30 = scalar_select %p96_p1, %s1159_s23, %s98_s28  }
   0xb   : > { %p1246_p5 = por %p109_p2, %p108_p0  ;;  %p1250_p6 = por %p115_p4, %p114_p3 }
   0xc   : > { %p905_p7 = scmp.ge.s32.totalorder %s1163_s24, 1  ;;  %p227_p8 = scmp.lt.s32.totalorder %s1163_s24, 3 }
   0xe   : > { %p228_p9 = pnand %p905_p7, %p227_p8 }
   0xf   : > { %v1048_v0 = vld [vmem:[%s1521_s1] sm:$0xff] (!%p228_p9)   ;;  %v1165_v1 = vmov (!%p228_p9), 0   ;;  %s908_s11 = sshll.u32 (!%p228_p9), %s1229_s25, 3  ;;  %v1049_v2 = vld [vmem:[%s1521_s1 + $0x8] sm:$0xff] (!%p228_p9)   ;;  %v1050_v3 = vld [vmem:[%s1521_s1 + $0x10] sm:$0xff] (!%p228_p9)   ;;  %vm418_vm0 = vcmask (!%p228_p9), 130048  }
  0x10   : > { %231 = sbr.rel (%p228_p9) target bundleno = 553 (0x229), region = 32  ;;  %431 = vmatprep.subr.bf16.mxu0 (!%p228_p9), %v1165_v1  ;;  %980 = vmatprep.subr.bf16.mxu1 (!%p228_p9), %v1165_v1  ;;  %p274_p10 = scmp.lt.s32.totalorder (!%p228_p9), %s908_s11, 15  ;;  %v1051_v4 = vld [vmem:[%s1521_s1 + $0x18] sm:$0xff] (!%p228_p9)   ;;  %v1052_v7 = vld [vmem:[%s1521_s1 + $0x20] sm:$0xff] (!%p228_p9)   ;;  %v1053_v8 = vld [vmem:[%s1521_s1 + $0x28] sm:$0xff] (!%p228_p9)   ;;  %vm576_vm1 = vcmask (!%p228_p9), 125952  }
  0x11   : > { %432 = vmatpush1.bf16.msra.mxu0 (!%p228_p9), %v1048_v0  ;;  %989 = vmatpush1.bf16.msra.mxu1 (!%p228_p9), %v1048_v0  ;;  %v1054_v9 = vld [vmem:[%s1521_s1 + $0x30] sm:$0xff] (!%p228_p9)   ;;  %v1055_v10 = vld [vmem:[%s1521_s1 + $0x38] sm:$0xff] (!%p228_p9)   ;;  %v1056_v11 = vld [vmem:[%s1521_s1 + $0x40] sm:$0xff] (!%p228_p9)   ;;  %s1530_s26 = smov (!%p228_p9), 32   ;;  %s1320_s28 = sand.u32 (!%p228_p9), 1, %s1155_s22  }
  0x12   : > { %433 = vmatprep.subr.bf16.mxu0 (!%p228_p9), %v1165_v1  ;;  %981 = vmatprep.subr.bf16.mxu1 (!%p228_p9), %v1165_v1  ;;  %v915_v18 = vld [vmem:[%s1522_s2] ss:$0 sm:$0xff] (!%p228_p9)  ;;  %s1528_s29 = sshll.u32 (!%p228_p9), %s1320_s28, 5  ;;  %s1168_s10 = smov (!%p228_p9), 96  }
  0x13   : > { %s1325_s9 = scalar_lea.vmem (!%p228_p9), [#allocation2], %s1528_s29  ;;  %s1169_s13 = smov (!%p228_p9), 64  }
  0x14   : > { %s1529_s17 = sshll.u32 (!%p228_p9), %s1229_s25, 9  ;;  %s734_s18 = sshll.u32 (!%p228_p9), %s1325_s9, 4  ;;  %s1390_s18 = int_to_ptr.vmem [resolvable:$true] %s734_s18 }
  0x15   : > { %434 = vmatpush1.bf16.msra.mxu0 (!%p228_p9), %v1049_v2  ;;  %990 = vmatpush1.bf16.msra.mxu1 (!%p228_p9), %v1049_v2  ;;  %s1388_s14 = scalar_lea.hbm (!%p228_p9), %s1523_s3, %s1529_s17  ;;  %s706_s15 = scalar_lea.sflag (!%p228_p9), [#allocation3], %s1320_s28 }
  0x16   : > { %435 = vmatprep.subr.bf16.mxu0 (!%p228_p9), %v1165_v1  ;;  %982 = vmatprep.subr.bf16.mxu1 (!%p228_p9), %v1165_v1 }
  0x17   : > { %s1543_s11 = smov (!%p274_p10, %s908_s11), 15 }
  0x18   : > { %s961_s16 = sshll.u32 %s1543_s11, 3  ;;  %s1527_s12 = sshll.u32 %s1543_s11, 2 }
  0x19   : > { %s1272_s19 = scalar_lea.vmem %s1520_s0, %s961_s16  ;;  %436 = vmatpush1.bf16.msra.mxu0 %v1050_v3  ;;  %991 = vmatpush1.bf16.msra.mxu1 %v1050_v3  ;;  %s1348_s16 = scalar_lea.vmem %s1526_s6, %s1527_s12 }
  0x1a   : > { %v1059_v5 = vld [vmem:[%s1272_s19 + $0x4] ss:$8 sps:$4 sm:$0xff]   ;;  %437 = vmatprep.subr.bf16.mxu0 %v1165_v1  ;;  %983 = vmatprep.subr.bf16.mxu1 %v1165_v1  ;;  %v1057_v12 = vld [vmem:[%s1272_s19] ss:$8 sps:$4 sm:$0xff]   ;;  %v1063_v14 = vld [vmem:[%s1272_s19 + $0x14] ss:$8 sps:$4 sm:$0xff]  }
  0x1b   : > { %v1062_v6 = vld [vmem:[%s1272_s19 + $0x24] ss:$8 sps:$4 sm:$0xff]   ;;  %933 = vmatprep.mubr.msk.bf16.mxu0 %vm418_vm0, %v1059_v5  ;;  %v1060_v13 = vld [vmem:[%s1272_s19 + $0x20] ss:$8 sps:$4 sm:$0xff]   ;;  %v1066_v15 = vld [vmem:[%s1272_s19 + $0x34] ss:$8 sps:$4 sm:$0xff]  }
  0x1c   : > { %935 = vmatprep.mubr.msk.bf16.mxu1 %vm418_vm0, %v1062_v6  ;;  %v1065_v16 = vld [vmem:[%s1272_s19 + $0x10] ss:$8 sps:$4 sm:$0xff]   ;;  %s1069_s12 = scalar_lea.vmem %s1390_s18, 512 }
  0x1d   : > { %438 = vmatpush1.bf16.msra.mxu0 %v1051_v4  ;;  %992 = vmatpush1.bf16.msra.mxu1 %v1051_v4  ;;  %v1068_v17 = vld [vmem:[%s1272_s19 + $0x30] ss:$8 sps:$4 sm:$0xff]   ;;  %s1166_s19 = smov 112   ;;  %p1070_p11 = scmp.ne.s32.totalorder %s1390_s18, %s1069_s12 }
  0x1e   : > { %439 = vmatprep.subr.bf16.mxu0 %v1165_v1  ;;  %984 = vmatprep.subr.bf16.mxu1 %v1165_v1 }
  0x1f   : > { %p1071_p12 = pnand %p1070_p11, %p1246_p5 }
  0x21   : > { %440 = vmatpush1.bf16.msra.mxu0 %v1052_v7  ;;  %993 = vmatpush1.bf16.msra.mxu1 %v1052_v7  ;;  %p1072_p13 = pneg %p1071_p12 }
  0x22   : > { %441 = vmatprep.subr.bf16.mxu0 %v1165_v1  ;;  %985 = vmatprep.subr.bf16.mxu1 %v1165_v1 }
  0x25   : > { %442 = vmatpush1.bf16.msra.mxu0 %v1053_v8  ;;  %994 = vmatpush1.bf16.msra.mxu1 %v1053_v8 }
  0x26   : > { %443 = vmatprep.subr.bf16.mxu0 %v1165_v1  ;;  %986 = vmatprep.subr.bf16.mxu1 %v1165_v1 }
  0x29   : > { %444 = vmatpush1.bf16.msra.mxu0 %v1054_v9  ;;  %995 = vmatpush1.bf16.msra.mxu1 %v1054_v9 }
  0x2a   : > { %445 = vmatprep.subr.bf16.mxu0 %v1165_v1  ;;  %987 = vmatprep.subr.bf16.mxu1 %v1165_v1 }
  0x2d   : > { %446 = vmatpush1.bf16.msra.mxu0 %v1055_v10  ;;  %996 = vmatpush1.bf16.msra.mxu1 %v1055_v10 }
  0x2e   : > { %447 = vmatprep.subr.bf16.mxu0 %v1165_v1  ;;  %988 = vmatprep.subr.bf16.mxu1 %v1165_v1 }
  0x31   : > { %448 = vmatpush1.bf16.msra.mxu0 %v1056_v11  ;;  %997 = vmatpush1.bf16.msra.mxu1 %v1056_v11 }
  0x34   : > { %464 = vmatmul.mubr.bf16.vlgmr.msra.gmra.mrb[0].mxu0 %v1057_v12  ;;  %480 = vmatmul.mubr.bf16.vlgmr.msra.gmra.mrb[0].mxu1 %v1060_v13 }
  0x35   : > { %934 = vmatprep.mubr.msk.bf16.mxu0 %vm418_vm0, %v1063_v14  ;;  %936 = vmatprep.mubr.msk.bf16.mxu1 %vm418_vm0, %v1066_v15 }
  0x3c   : > { %472 = vmatmul.mubr.bf16.gmra.mrb[4].mxu0 %v1065_v16  ;;  %488 = vmatmul.mubr.bf16.gmra.mrb[4].mxu1 %v1068_v17 }
 0x107   : > { %v465_v19 = vpop.f32.mrb[0].mxu0  ;;  %v481_v20 = vpop.f32.mrb[0].mxu1 }
 0x108   : > { %v466_v21 = vadd.f32 %v915_v18, %v465_v19  ;;  %v482_v22 = vadd.f32 %v915_v18, %v481_v20  ;;  %v467_v23 = vpop.f32.mrb[1].mxu0  ;;  %v483_v24 = vpop.f32.mrb[1].mxu1 }
 0x109   : > { %v468_v25 = vpop.f32.mrb[2].mxu0  ;;  %v484_v26 = vpop.f32.mrb[2].mxu1 }
 0x10a   : > { %v496_v27 = vmax.f32 %v466_v21, 0.0  ;;  %v485_v28 = vadd.f32 %v915_v18, %v484_v26  ;;  %v470_v29 = vpop.f32.mrb[3].mxu0  ;;  %v486_v30 = vpop.f32.mrb[3].mxu1  ;;  %v500_v31 = vmax.f32 %v482_v22, 0.0  ;;  %v469_v33 = vadd.f32 %v915_v18, %v468_v25 }
 0x10c   : > { %v501_v32 = vmax.f32 %v485_v28, 0.0  ;;  %512 = vrot.lane.b32.xlu0 %v496_v27, %s1166_s19  ;;  %v497_v42 = vmax.f32 %v469_v33, 0.0  ;;  %v970_v51 = vpack.c.bf16 %v496_v27, %v496_v27  ;;  %v974_v53 = vpack.c.bf16 %v500_v31, %v500_v31 }
 0x10e   : > { %522 = vrot.lane.b32.xlu1 %v501_v32, %s1166_s19  ;;  %v971_v52 = vpack.c.bf16 %v497_v42, %v497_v42  ;;  %v975_v54 = vpack.c.bf16 %v501_v32, %v501_v32 }
 0x10f   : > { %v473_v34 = vpop.f32.mrb[4].mxu0  ;;  %v489_v35 = vpop.f32.mrb[4].mxu1 }
 0x110   : > { %v474_v36 = vadd.f32 %v915_v18, %v473_v34  ;;  %520 = vrot.lane.b32.xlu0 %v500_v31, %s1166_s19  ;;  %v475_v37 = vpop.f32.mrb[5].mxu0  ;;  %v490_v38 = vadd.f32 %v915_v18, %v489_v35  ;;  %v491_v39 = vpop.f32.mrb[5].mxu1 }
 0x111   : > { %v476_v40 = vpop.f32.mrb[6].mxu0  ;;  %v492_v41 = vpop.f32.mrb[6].mxu1 }
 0x112   : > { %v498_v43 = vmax.f32 %v474_v36, 0.0  ;;  %v477_v44 = vadd.f32 %v915_v18, %v476_v40  ;;  %v478_v45 = vpop.f32.mrb[7].mxu0  ;;  %v494_v46 = vpop.f32.mrb[7].mxu1  ;;  %v1307_v48 = vmax.f32 %v490_v38, 0.0  ;;  %v493_v49 = vadd.f32 %v915_v18, %v492_v41 }
 0x114   : > { %v499_v47 = vmax.f32 %v477_v44, 0.0  ;;  %516 = vrot.lane.b32.xlu1 %v498_v43, %s1166_s19  ;;  %514 = vrot.lane.b32.xlu0 %v497_v42, %s1166_s19  ;;  %v1309_v50 = vmax.f32 %v493_v49, 0.0  ;;  %v972_v55 = vpack.c.bf16 %v498_v43, %v498_v43 }
 0x116   : > { %v973_v56 = vpack.c.bf16 %v499_v47, %v499_v47 }
 0x118   : > { %518 = vrot.lane.b32.xlu1 %v499_v47, %s1166_s19  ;;  %524 = vrot.lane.b32.xlu0 %v1307_v48, %s1166_s19 }
 0x11c   : > { %526 = vrot.lane.b32.xlu1 %v1309_v50, %s1166_s19  ;;  %673 = vrot.lane.b32.xlu0 %v970_v51, %s1530_s26 }
 0x120   : > { %675 = vrot.lane.b32.xlu1 %v971_v52, %s1530_s26  ;;  %681 = vrot.lane.b32.xlu0 %v974_v53, %s1530_s26 }
 0x124   : > { %683 = vrot.lane.b32.xlu1 %v975_v54, %s1530_s26  ;;  %677 = vrot.lane.b32.xlu0 %v972_v55, %s1530_s26 }
 0x128   : > { %679 = vrot.lane.b32.xlu1 %v973_v56, %s1530_s26 }
 0x17e   : > { %v513_v57 = vpop.permute.xlu0 %512 }
 0x17f   : > { %v536_v58 = vadd.f32 %v513_v57, %v496_v27 }
 0x180   : > { %v523_v59 = vpop.permute.xlu1 %522 }
 0x181   : > { %v962_v60 = vpack.c.bf16 %v536_v58, %v536_v58  ;;  %v541_v61 = vadd.f32 %v523_v59, %v501_v32 }
 0x182   : > { %v521_v62 = vpop.permute.xlu0 %520 }
 0x183   : > { %577 = vst.msk [vmem:[%s1325_s9] sm:$0xf] %vm576_vm1, %v962_v60  ;;  %v967_v63 = vpack.c.bf16 %v541_v61, %v541_v61  ;;  %v540_v0 = vadd.f32 %v521_v62, %v500_v31  ;;  %585 = vrot.lane.b32.xlu0 %v962_v60, %s1168_s10 }
 0x185   : > { %582 = vst.msk [vmem:[%s1325_s9 + $0x14] sm:$0xf] %vm576_vm1, %v967_v63  ;;  %v966_v1 = vpack.c.bf16 %v540_v0, %v540_v0 }
 0x186   : > { %v517_v2 = vpop.permute.xlu1 %516  ;;  %v515_v3 = vpop.permute.xlu0 %514 }
 0x187   : > { %581 = vst.msk [vmem:[%s1325_s9 + $0x10] sm:$0xf] %vm576_vm1, %v966_v1  ;;  %v538_v4 = vadd.f32 %v517_v2, %v498_v43  ;;  %v537_v5 = vadd.f32 %v515_v3, %v497_v42  ;;  %593 = vrot.lane.b32.xlu0 %v966_v1, %s1168_s10 }
 0x189   : > { %v964_v6 = vpack.c.bf16 %v538_v4, %v538_v4  ;;  %v963_v7 = vpack.c.bf16 %v537_v5, %v537_v5 }
 0x18a   : > { %v519_v8 = vpop.permute.xlu1 %518  ;;  %v525_v9 = vpop.permute.xlu0 %524 }
 0x18b   : > { %579 = vst.msk [vmem:[%s1325_s9 + $0x8] sm:$0xf] %vm576_vm1, %v964_v6  ;;  %578 = vst.msk [vmem:[%s1325_s9 + $0x4] sm:$0xf] %vm576_vm1, %v963_v7  ;;  %v539_v10 = vadd.f32 %v519_v8, %v499_v47  ;;  %v542_v11 = vadd.f32 %v525_v9, %v1307_v48  ;;  %587 = vrot.lane.b32.xlu1 %v963_v7, %s1168_s10  ;;  %617 = vrot.lane.b32.xlu0 %v962_v60, %s1169_s13 }
 0x18d   : > { %v1350_v12 = vpack.c.bf16 %v539_v10, %v539_v10  ;;  %v968_v13 = vpack.c.bf16 %v542_v11, %v542_v11 }
 0x18e   : > { %v527_v14 = vpop.permute.xlu1 %526  ;;  %v674_v15 = vpop.permute.xlu0 %673 }
 0x18f   : > { %580 = vst.msk [vmem:[%s1325_s9 + $0xc] sm:$0xf] %vm576_vm1, %v1350_v12  ;;  %583 = vst.msk [vmem:[%s1325_s9 + $0x18] sm:$0xf] %vm576_vm1, %v968_v13  ;;  %v543_v16 = vadd.f32 %v527_v14, %v1309_v50  ;;  %595 = vrot.lane.b32.xlu1 %v967_v63, %s1168_s10  ;;  %625 = vrot.lane.b32.xlu0 %v966_v1, %s1169_s13 }
 0x190   : > { %697 = vst.msk [vmem:[%s1348_s16] sm:$0xf] %vm576_vm1, %v674_v15 }
 0x191   : > { %v969_v17 = vpack.c.bf16 %v543_v16, %v543_v16 }
 0x192   : > { %v676_v18 = vpop.permute.xlu1 %675  ;;  %v682_v19 = vpop.permute.xlu0 %681 }
 0x193   : > { %584 = vst.msk [vmem:[%s1325_s9 + $0x1c] sm:$0xf] %vm576_vm1, %v969_v17  ;;  %698 = vst.msk [vmem:[%s1348_s16 + $0x4] sm:$0xf] %vm576_vm1, %v676_v18  ;;  %619 = vrot.lane.b32.xlu1 %v963_v7, %s1169_s13  ;;  %589 = vrot.lane.b32.xlu0 %v964_v6, %s1168_s10  ;;  %s1170_s9 = smov [#allocation2]  }
 0x194   : > { %701 = vst.msk [vmem:[%s1348_s16 + $0x10] sm:$0xf] %vm576_vm1, %v682_v19  ;;  %s1073_s29 = sshll.u32 %s1170_s9, 4  ;;  %s1074_s29 = int_to_ptr.vmem [resolvable:$false] %s1073_s29 }
 0x195   : > { %s1075_s20 = scalar_lea.vmem %s1074_s29, 1024  ;;  %p1076_p0 = scmp.lt.s32.totalorder %s1390_s18, %s1074_s29 }
 0x196   : > { %v684_v20 = vpop.permute.xlu1 %683  ;;  %v678_v21 = vpop.permute.xlu0 %677  ;;  %p1077_p1 = scmp.lt.s32.totalorder %s1075_s20, %s1069_s12 }
 0x197   : > { %702 = vst.msk [vmem:[%s1348_s16 + $0x14] sm:$0xf] %vm576_vm1, %v684_v20  ;;  %699 = vst.msk [vmem:[%s1348_s16 + $0x8] sm:$0xf] %vm576_vm1, %v678_v21  ;;  %627 = vrot.lane.b32.xlu1 %v967_v63, %s1169_s13  ;;  %597 = vrot.lane.b32.xlu0 %v968_v13, %s1168_s10 }
 0x198   : > { %p1078_p2 = por %p1077_p1, %p1076_p0 }
 0x19a   : > { %v680_v22 = vpop.permute.xlu1 %679  ;;  %p1079_p3 = pnand %p1078_p2, %p1072_p13 }
 0x19b   : > { %700 = vst.msk [vmem:[%s1348_s16 + $0xc] sm:$0xf] %vm576_vm1, %v680_v22  ;;  %591 = vrot.lane.b32.xlu1 %v1350_v12, %s1168_s10  ;;  %621 = vrot.lane.b32.xlu0 %v964_v6, %s1169_s13 }
 0x19f   : > { %599 = vrot.lane.b32.xlu1 %v969_v17, %s1168_s10  ;;  %629 = vrot.lane.b32.xlu0 %v968_v13, %s1169_s13 }
 0x1a0   : > { %1082 = shalt.err (!%p1079_p3)
}
 0x1a1   : > { %s1083_s10 = scalar_lea.hbm %s1388_s14, 512  ;;  %s1087_s9 = scalar_lea.hbm %s1523_s3, 1024 }
 0x1a2   : > { %p1084_p4 = scmp.ne.s32.totalorder %s1388_s14, %s1083_s10  ;;  %p1088_p9 = scmp.lt.u32.totalorder %s1388_s14, %s1523_s3 }
 0x1a3   : > { %p1089_p10 = scmp.lt.u32.totalorder %s1087_s9, %s1083_s10  ;;  %p1091_p12 = scmp.lt.u32.totalorder %s1083_s10, %s1388_s14 }
 0x1a4   : > { %p1085_p7 = pnand %p1084_p4, %p1246_p5 }
 0x1a5   : > { %p1090_p11 = por %p1089_p10, %p1088_p9 }
 0x1a6   : > { %p1086_p8 = pneg %p1085_p7 }
 0x1a7   : > { %p1092_p13 = por %p1091_p12, %p1090_p11 }
 0x1a9   : > { %p1093_p0 = pnand %p1092_p13, %p1086_p8 }
 0x1ab   : > { %1096 = shalt.err (!%p1093_p0)
}
 0x1ac   : > { %s1171_s12 = smov 4   ;;  %v976_v23 = vpack.c.bf16 %v1307_v48, %v1307_v48  ;;  %623 = vrot.lane.b32.xlu1 %v1350_v12, %s1169_s13  ;;  %s1534_s26 = smov 32   ;;  %v977_v24 = vpack.c.bf16 %v1309_v50, %v1309_v50 }
 0x1ad   : > { %998 = dma.vmem_to_hbm [thread:$0]  (%p1246_p5), %s1390_s18, 512, %s1388_s14, %s706_s15, %s1169_s13, %s1169_s13, %s1171_s12  }
 0x1ae   : > { %685 = vrot.lane.b32.xlu0 %v976_v23, %s1534_s26  ;;  %s1535_s17 = sshll.u32 %s1320_s28, 5  ;;  %s1536_s18 = sshll.u32 %s1543_s11, 2 }
 0x1af   : > { %s258_s20 = scalar_lea.vmem [#allocation4], %s1535_s17  ;;  %s1439_s10 = scalar_lea.vmem %s1525_s5, %s1536_s18 }
 0x1b0   : > { %631 = vrot.lane.b32.xlu1 %v969_v17, %s1169_s13  ;;  %s750_s11 = sshll.u32 %s258_s20, 4  ;;  %s1537_s19 = sshll.u32 %s1229_s25, 9  ;;  %s1463_s11 = int_to_ptr.vmem [resolvable:$true] %s750_s11 }
 0x1b1   : > { %s711_s17 = scalar_lea.sflag [#allocation5], %s1320_s28  ;;  %s1097_s18 = scalar_lea.vmem %s1463_s11, 512 }
 0x1b2   : > { %p1098_p1 = scmp.ne.s32.totalorder %s1463_s11, %s1097_s18  ;;  %s1172_s25 = smov [#allocation4]  }
 0x1b3   : > { %s1101_s14 = sshll.u32 %s1172_s25, 4  ;;  %s1102_s14 = int_to_ptr.vmem [resolvable:$false] %s1101_s14 }
 0x1b4   : > { %687 = vrot.lane.b32.xlu1 %v977_v24, %s1534_s26  ;;  %s1461_s26 = scalar_lea.hbm %s1524_s4, %s1537_s19  ;;  %p1099_p2 = pnand %p1098_p1, %p1246_p5 }
 0x1b5   : > { %s1103_s15 = scalar_lea.vmem %s1102_s14, 1024  ;;  %p1104_p4 = scmp.lt.s32.totalorder %s1463_s11, %s1102_s14 }
 0x1b6   : > { %p1100_p3 = pneg %p1099_p2  ;;  %p1105_p7 = scmp.lt.s32.totalorder %s1103_s15, %s1097_s18 }
 0x1b8   : > { %p1106_p8 = por %p1105_p7, %p1104_p4 }
 0x1ba   : > { %p1107_p9 = pnand %p1106_p8, %p1100_p3 }
 0x1f5   : > { %v586_v25 = vpop.permute.xlu0 %585 }
 0x1f6   : > { %609 = vst.msk [vmem:[%s258_s20] sm:$0xf] %vm576_vm1, %v586_v25 }
 0x1f9   : > { %v594_v26 = vpop.permute.xlu0 %593 }
 0x1fa   : > { %613 = vst.msk [vmem:[%s258_s20 + $0x10] sm:$0xf] %vm576_vm1, %v594_v26 }
 0x1fd   : > { %v588_v27 = vpop.permute.xlu1 %587  ;;  %v618_v28 = vpop.permute.xlu0 %617 }
 0x1fe   : > { %610 = vst.msk [vmem:[%s258_s20 + $0x4] sm:$0xf] %vm576_vm1, %v588_v27  ;;  %641 = vst.msk [vmem:[%s1439_s10] sm:$0xf] %vm576_vm1, %v618_v28 }
 0x201   : > { %v596_v29 = vpop.permute.xlu1 %595  ;;  %v626_v30 = vpop.permute.xlu0 %625 }
 0x202   : > { %614 = vst.msk [vmem:[%s258_s20 + $0x14] sm:$0xf] %vm576_vm1, %v596_v29  ;;  %645 = vst.msk [vmem:[%s1439_s10 + $0x10] sm:$0xf] %vm576_vm1, %v626_v30 }
 0x205   : > { %v620_v31 = vpop.permute.xlu1 %619  ;;  %v590_v32 = vpop.permute.xlu0 %589 }
 0x206   : > { %642 = vst.msk [vmem:[%s1439_s10 + $0x4] sm:$0xf] %vm576_vm1, %v620_v31  ;;  %611 = vst.msk [vmem:[%s258_s20 + $0x8] sm:$0xf] %vm576_vm1, %v590_v32 }
 0x209   : > { %v628_v33 = vpop.permute.xlu1 %627  ;;  %v598_v34 = vpop.permute.xlu0 %597 }
 0x20a   : > { %646 = vst.msk [vmem:[%s1439_s10 + $0x14] sm:$0xf] %vm576_vm1, %v628_v33  ;;  %615 = vst.msk [vmem:[%s258_s20 + $0x18] sm:$0xf] %vm576_vm1, %v598_v34 }
 0x20d   : > { %v592_v35 = vpop.permute.xlu1 %591  ;;  %v622_v36 = vpop.permute.xlu0 %621 }
 0x20e   : > { %612 = vst.msk [vmem:[%s258_s20 + $0xc] sm:$0xf] %vm576_vm1, %v592_v35  ;;  %643 = vst.msk [vmem:[%s1439_s10 + $0x8] sm:$0xf] %vm576_vm1, %v622_v36 }
 0x211   : > { %v600_v37 = vpop.permute.xlu1 %599  ;;  %v630_v38 = vpop.permute.xlu0 %629 }
 0x212   : > { %616 = vst.msk [vmem:[%s258_s20 + $0x1c] sm:$0xf] %vm576_vm1, %v600_v37  ;;  %647 = vst.msk [vmem:[%s1439_s10 + $0x18] sm:$0xf] %vm576_vm1, %v630_v38 }
 0x213   : > { %1110 = shalt.err (!%p1107_p9)
}
 0x214   : > { %s1111_s20 = scalar_lea.hbm %s1461_s26, 512  ;;  %s1115_s29 = scalar_lea.hbm %s1524_s4, 1024 }
 0x215   : > { %p1112_p10 = scmp.ne.s32.totalorder %s1461_s26, %s1111_s20  ;;  %p1116_p13 = scmp.lt.u32.totalorder %s1461_s26, %s1524_s4 }
 0x216   : > { %p1117_p0 = scmp.lt.u32.totalorder %s1115_s29, %s1111_s20  ;;  %p1119_p2 = scmp.lt.u32.totalorder %s1111_s20, %s1461_s26 }
 0x217   : > { %p1113_p11 = pnand %p1112_p10, %p1246_p5 }
 0x218   : > { %p1118_p1 = por %p1117_p0, %p1116_p13 }
 0x219   : > { %p1114_p12 = pneg %p1113_p11 }
 0x21a   : > { %p1120_p3 = por %p1119_p2, %p1118_p1 }
 0x21c   : > { %p1121_p4 = pnand %p1120_p3, %p1114_p12 }
 0x21e   : > { %1124 = shalt.err (!%p1121_p4)
}
 0x21f   : > { %999 = dma.vmem_to_hbm [thread:$0]  (%p1246_p5), %s1463_s11, 512, %s1461_s26, %s711_s17, %s1169_s13, %s1169_s13, %s1171_s12   ;;  %v624_v39 = vpop.permute.xlu1 %623 }
 0x220   : > { %v686_v40 = vpop.permute.xlu0 %685  ;;  %644 = vst.msk [vmem:[%s1439_s10 + $0xc] sm:$0xf] %vm576_vm1, %v624_v39 }
 0x221   : > { %703 = vst.msk [vmem:[%s1348_s16 + $0x18] sm:$0xf] %vm576_vm1, %v686_v40 }
 0x223   : > { %v632_v41 = vpop.permute.xlu1 %631 }
 0x224   : > { %648 = vst.msk [vmem:[%s1439_s10 + $0x1c] sm:$0xf] %vm576_vm1, %v632_v41 }
 0x227   : > { %v688_v42 = vpop.permute.xlu1 %687 }
 0x228   : > { %704 = vst.msk [vmem:[%s1348_s16 + $0x1c] sm:$0xf] %vm576_vm1, %v688_v42 }
 0x229 PF: > { %p1009_p7 = scmp.ge.s32.totalorder %s1163_s24, 2  ;;  %s773_s7 = sand.u32 1, %s1151_s21  }
 0x22a   : > { %s774_s28 = scalar_lea.sflag [#allocation3], %s773_s7 }
 0x22b   : > { %p1003_p5 = pnand %p1009_p7, %p1250_p6 }
 0x22d   : > { %1142 = dma.done.wait (!%p1003_p5), %s774_s28, 512  }
 0x22e   : > { %1144 = vsyncadd (!%p1003_p5), %s774_s28, 4294966784  ;;  %s783_s13 = scalar_lea.sflag [#allocation5], %s773_s7 }
 0x22f   : > { %1146 = dma.done.wait (!%p1003_p5), %s783_s13, 512  }
 0x230   : > { %1148 = vsyncadd (!%p1003_p5), %s783_s13, 4294966784  ;;  %p20_p8 = scmp.ge.s32.totalorder %s1233_s27, 4   ;;  %s1538_s21 = smov %s1155_s22 }
 0x231   : > { %s1539_s22 = smov %s1159_s23  ;;  %s1540_s23 = smov %s1244_s30 }
 0x232   : > { %s1541_s24 = smov %s1233_s27  ;;  %22 = sbr.rel (!%p20_p8) target bundleno = 5 (0x5), region = 108 }
 0x239   :  { %804 = vsyncpa [#allocation3], 1 }
 0x23a   :  { %806 = vsyncpa [#allocation3 + $0x1], 1 }
 0x23b   :  { %807 = vsyncpa [#allocation5], 1 }
 0x23c   :  { %809 = vsyncpa [#allocation5 + $0x1], 1 }

// kernel: a_call__.24
= control target key start
LH: loop header
LB: loop body
LE: loop exit
PB: predicated region body
PF: predicated region fallthrough
CT: control target
= control target key end

     0   :  { %11 = vsyncpa [#allocation3], 0  ;;  %s1345_s0 = inlined_call_operand.vmem [shape: bf16[128,144], index: 0, kind: input, shape index: {}]   ;;  %s1346_s1 = inlined_call_operand.vmem [shape: bf16[144,48], index: 1, kind: input, shape index: {}]   ;;  %s1347_s2 = inlined_call_operand.vmem [shape: f32[1,48], index: 2, kind: input, shape index: {}]   ;;  %s1348_s3 = inlined_call_operand.vmem [shape: bf16[128,16], index: 3, kind: input, shape index: {}]   ;;  %s1349_s4 = inlined_call_operand.hbm [shape: bf16[128,16], index: 4, kind: output, shape index: {0}]   ;;  %s1350_s5 = inlined_call_operand.vmem [shape: bf16[128,16], index: 5, kind: output, shape index: {1}]  }
   0x1   :  { %13 = vsyncpa [#allocation3 + $0x1], 0  ;;  %s1095_s18 = smov 0   ;;  %s1097_s19 = smov 0  }
   0x2   :  { %s1099_s20 = smov 0   ;;  %s1101_s21 = smov 0  }
   0x3 LB: > { %s1116_s22 = sadd.s32 4294967295, %s1056_s21   ;;  %s790_s23 = sadd.s32 4294967294, %s1056_s21   ;;  %s1056_s21 = sphi %s1101_s21, %s1356_s21   ;;  %s1052_s20 = sphi %s1099_s20, %s1355_s20   ;;  %s1048_s19 = sphi %s1097_s19, %s1354_s19   ;;  %s1044_s18 = sphi %s1095_s18, %s1353_s18  }
   0x4   : > { %s1120_s24 = sadd.s32 1, %s1056_s21   ;;  %s120_s25 = sadd.s32 1, %s1052_s20 }
   0x5   : > { %s117_s26 = ssub.s32 %s1056_s21, %s1120_s24  ;;  %p130_p0 = scmp.ne.s32.totalorder %s1052_s20, %s1048_s19 }
   0x6   : > { %p118_p1 = scmp.eq.s32.totalorder %s117_s26, 0  ;;  %p131_p2 = scmp.eq.s32.totalorder %s1116_s22, 1 }
   0x7   : > { %p136_p3 = scmp.ne.s32.totalorder %s1048_s19, %s1044_s18  ;;  %p137_p4 = scmp.eq.s32.totalorder %s790_s23, 1 }
   0x8   : > { %s1131_s27 = scalar_select %p118_p1, %s1052_s20, %s120_s25  }
   0x9   : > { %p1133_p5 = por %p131_p2, %p130_p0  ;;  %p1137_p6 = por %p137_p4, %p136_p3 }
   0xa   : > { %p793_p7 = scmp.ge.s32.totalorder %s1056_s21, 1  ;;  %p206_p8 = scmp.lt.s32.totalorder %s1056_s21, 3 }
   0xc   : > { %p207_p9 = pnand %p793_p7, %p206_p8 }
   0xd   : > { %v965_v0 = vld [vmem:[%s1346_s1] sm:$0xff] (!%p207_p9)   ;;  %v1058_v1 = vmov (!%p207_p9), 0   ;;  %s795_s7 = sshll.u32 (!%p207_p9), %s1116_s22, 3  ;;  %v966_v2 = vld [vmem:[%s1346_s1 + $0x8] sm:$0xff] (!%p207_p9)   ;;  %v967_v3 = vld [vmem:[%s1346_s1 + $0x10] sm:$0xff] (!%p207_p9)   ;;  %vm389_vm0 = vcmask (!%p207_p9), 130048  }
   0xe   : > { %210 = sbr.rel (%p207_p9) target bundleno = 424 (0x1a8), region = 36  ;;  %402 = vmatprep.subr.bf16.mxu0 (!%p207_p9), %v1058_v1  ;;  %882 = vmatprep.subr.bf16.mxu1 (!%p207_p9), %v1058_v1  ;;  %p246_p10 = scmp.lt.s32.totalorder (!%p207_p9), %s795_s7, 15  ;;  %v968_v4 = vld [vmem:[%s1346_s1 + $0x18] sm:$0xff] (!%p207_p9)   ;;  %v969_v7 = vld [vmem:[%s1346_s1 + $0x20] sm:$0xff] (!%p207_p9)   ;;  %v970_v22 = vld [vmem:[%s1346_s1 + $0x28] sm:$0xff] (!%p207_p9)   ;;  %vm547_vm1 = vcmask (!%p207_p9), 125952  }
   0xf   : > { %403 = vmatpush1.bf16.msra.mxu0 (!%p207_p9), %v965_v0  ;;  %891 = vmatpush1.bf16.msra.mxu1 (!%p207_p9), %v965_v0  ;;  %s1059_s11 = smov (!%p207_p9), 32   ;;  %v971_v25 = vld [vmem:[%s1346_s1 + $0x30] sm:$0xff] (!%p207_p9)   ;;  %v972_v26 = vld [vmem:[%s1346_s1 + $0x38] sm:$0xff] (!%p207_p9)   ;;  %v973_v27 = vld [vmem:[%s1346_s1 + $0x40] sm:$0xff] (!%p207_p9)   ;;  %s1061_s6 = smov (!%p207_p9), 96  }
  0x10   : > { %404 = vmatprep.subr.bf16.mxu0 (!%p207_p9), %v1058_v1  ;;  %883 = vmatprep.subr.bf16.mxu1 (!%p207_p9), %v1058_v1  ;;  %v802_v34 = vld [vmem:[%s1347_s2] ss:$0 sm:$0xff] (!%p207_p9)  ;;  %s235_s8 = sand.u32 (!%p207_p9), 1, %s1048_s19   ;;  %s1062_s26 = smov (!%p207_p9), [#allocation2]  }
  0x11   : > { %s794_s9 = sshll.u32 (!%p207_p9), %s235_s8, 5 }
  0x12   : > { %s1250_s10 = scalar_lea.vmem (!%p207_p9), [#allocation2], %s794_s9 }
  0x13   : > { %405 = vmatpush1.bf16.msra.mxu0 (!%p207_p9), %v966_v2  ;;  %892 = vmatpush1.bf16.msra.mxu1 (!%p207_p9), %v966_v2 }
  0x14   : > { %406 = vmatprep.subr.bf16.mxu0 (!%p207_p9), %v1058_v1  ;;  %884 = vmatprep.subr.bf16.mxu1 (!%p207_p9), %v1058_v1 }
  0x15   : > { %s1358_s7 = smov (!%p246_p10, %s795_s7), 15 }
  0x16   : > { %s845_s12 = sshll.u32 %s1358_s7, 3  ;;  %s799_s16 = sshll.u32 %s1358_s7, 2 }
  0x17   : > { %s1165_s15 = scalar_lea.vmem %s1345_s0, %s845_s12  ;;  %407 = vmatpush1.bf16.msra.mxu0 %v967_v3  ;;  %893 = vmatpush1.bf16.msra.mxu1 %v967_v3  ;;  %s256_s30 = scalar_lea.vmem %s1348_s3, %s799_s16 }
  0x18   : > { %v976_v5 = vld [vmem:[%s1165_s15 + $0x4] ss:$8 sps:$4 sm:$0xff]   ;;  %408 = vmatprep.subr.bf16.mxu0 %v1058_v1  ;;  %885 = vmatprep.subr.bf16.mxu1 %v1058_v1  ;;  %v880_v9 = vld [vmem:[%s256_s30 + $0x10] sm:$0xff]   ;;  %v881_v15 = vld [vmem:[%s256_s30 + $0x18] sm:$0xff]   ;;  %s1260_s13 = scalar_lea.vmem %s1350_s5, %s799_s16  ;;  %s862_s7 = sshll.u32 %s1116_s22, 9 }
  0x19   : > { %v979_v6 = vld [vmem:[%s1165_s15 + $0x24] ss:$8 sps:$4 sm:$0xff]   ;;  %820 = vmatprep.mubr.msk.bf16.mxu0 %vm389_vm0, %v976_v5  ;;  %v873_v12 = vunpack.c.l.bf16 %v880_v9  ;;  %v874_v13 = vunpack.c.h.bf16 %v880_v9  ;;  %v877_v18 = vunpack.c.l.bf16 %v881_v15  ;;  %v878_v19 = vunpack.c.h.bf16 %v881_v15  ;;  %v974_v28 = vld [vmem:[%s1165_s15] ss:$8 sps:$4 sm:$0xff]   ;;  %v980_v30 = vld [vmem:[%s1165_s15 + $0x14] ss:$8 sps:$4 sm:$0xff]   ;;  %s1286_s23 = scalar_lea.hbm %s1349_s4, %s862_s7 }
  0x1a   : > { %822 = vmatprep.mubr.msk.bf16.mxu1 %vm389_vm0, %v979_v6  ;;  %v864_v8 = vld [vmem:[%s256_s30] sm:$0xff]   ;;  %v879_v14 = vld [vmem:[%s256_s30 + $0x8] sm:$0xff]   ;;  %v983_v31 = vld [vmem:[%s1165_s15 + $0x34] ss:$8 sps:$4 sm:$0xff]   ;;  %s687_s16 = sshll.u32 %s1250_s10, 4  ;;  %s1300_s22 = scalar_lea.sflag [#allocation3], %s235_s8  ;;  %s1288_s16 = int_to_ptr.vmem [resolvable:$true] %s687_s16 }
  0x1b   : > { %409 = vmatpush1.bf16.msra.mxu0 %v968_v4  ;;  %894 = vmatpush1.bf16.msra.mxu1 %v968_v4  ;;  %v865_v10 = vunpack.c.l.bf16 %v864_v8  ;;  %v866_v11 = vunpack.c.h.bf16 %v864_v8  ;;  %v869_v16 = vunpack.c.l.bf16 %v879_v14  ;;  %v870_v17 = vunpack.c.h.bf16 %v879_v14  ;;  %v977_v29 = vld [vmem:[%s1165_s15 + $0x20] ss:$8 sps:$4 sm:$0xff]   ;;  %v982_v32 = vld [vmem:[%s1165_s15 + $0x10] ss:$8 sps:$4 sm:$0xff]   ;;  %s994_s25 = scalar_lea.vmem %s1288_s16, 512  ;;  %s998_s30 = sshll.u32 %s1062_s26, 4  ;;  %s999_s30 = int_to_ptr.vmem [resolvable:$false] %s998_s30 }
  0x1c   : > { %410 = vmatprep.subr.bf16.mxu0 %v1058_v1  ;;  %886 = vmatprep.subr.bf16.mxu1 %v1058_v1  ;;  %v955_v21 = vpack.i.bf16 %v874_v13, %v873_v12  ;;  %v960_v24 = vpack.i.bf16 %v878_v19, %v877_v18  ;;  %v985_v33 = vld [vmem:[%s1165_s15 + $0x30] ss:$8 sps:$4 sm:$0xff]   ;;  %s1060_s15 = smov 112   ;;  %p995_p11 = scmp.ne.s32.totalorder %s1288_s16, %s994_s25 }
  0x1d   : > { %v945_v20 = vpack.i.bf16 %v866_v11, %v865_v10  ;;  %v950_v23 = vpack.i.bf16 %v870_v17, %v869_v16  ;;  %p1001_p0 = scmp.lt.s32.totalorder %s1288_s16, %s999_s30 }
  0x1e   : > { %956 = vrot.lane.b32.xlu1 %v955_v21, %s1059_s11  ;;  %p996_p12 = pnand %p995_p11, %p1133_p5 }
  0x1f   : > { %411 = vmatpush1.bf16.msra.mxu0 %v969_v7  ;;  %895 = vmatpush1.bf16.msra.mxu1 %v969_v7 }
  0x20   : > { %412 = vmatprep.subr.bf16.mxu0 %v1058_v1  ;;  %887 = vmatprep.subr.bf16.mxu1 %v1058_v1  ;;  %p997_p13 = pneg %p996_p12 }
  0x21   : > { %946 = vrot.lane.b32.xlu0 %v945_v20, %s1059_s11 }
  0x22   : > { %961 = vrot.lane.b32.xlu1 %v960_v24, %s1059_s11 }
  0x23   : > { %413 = vmatpush1.bf16.msra.mxu0 %v970_v22  ;;  %896 = vmatpush1.bf16.msra.mxu1 %v970_v22 }
  0x24   : > { %414 = vmatprep.subr.bf16.mxu0 %v1058_v1  ;;  %888 = vmatprep.subr.bf16.mxu1 %v1058_v1 }
  0x25   : > { %951 = vrot.lane.b32.xlu0 %v950_v23, %s1059_s11 }
  0x27   : > { %415 = vmatpush1.bf16.msra.mxu0 %v971_v25  ;;  %897 = vmatpush1.bf16.msra.mxu1 %v971_v25 }
  0x28   : > { %416 = vmatprep.subr.bf16.mxu0 %v1058_v1  ;;  %889 = vmatprep.subr.bf16.mxu1 %v1058_v1 }
  0x2b   : > { %417 = vmatpush1.bf16.msra.mxu0 %v972_v26  ;;  %898 = vmatpush1.bf16.msra.mxu1 %v972_v26 }
  0x2c   : > { %418 = vmatprep.subr.bf16.mxu0 %v1058_v1  ;;  %890 = vmatprep.subr.bf16.mxu1 %v1058_v1 }
  0x2f   : > { %419 = vmatpush1.bf16.msra.mxu0 %v973_v27  ;;  %899 = vmatpush1.bf16.msra.mxu1 %v973_v27 }
  0x32   : > { %435 = vmatmul.mubr.bf16.vlgmr.msra.gmra.mrb[0].mxu0 %v974_v28  ;;  %451 = vmatmul.mubr.bf16.vlgmr.msra.gmra.mrb[0].mxu1 %v977_v29 }
  0x33   : > { %821 = vmatprep.mubr.msk.bf16.mxu0 %vm389_vm0, %v980_v30  ;;  %823 = vmatprep.mubr.msk.bf16.mxu1 %vm389_vm0, %v983_v31 }
  0x3a   : > { %443 = vmatmul.mubr.bf16.gmra.mrb[4].mxu0 %v982_v32  ;;  %459 = vmatmul.mubr.bf16.gmra.mrb[4].mxu1 %v985_v33 }
  0x90   : > { %v957_v48 = vpop.permute.xlu1 %956 }
  0x93   : > { %v947_v35 = vpop.permute.xlu0 %946 }
  0x94   : > { %v962_v10 = vpop.permute.xlu1 %961 }
  0x97   : > { %v952_v5 = vpop.permute.xlu0 %951 }
 0x105   : > { %v436_v36 = vpop.f32.mrb[0].mxu0  ;;  %v452_v37 = vpop.f32.mrb[0].mxu1 }
 0x106   : > { %v437_v38 = vadd.f32 %v802_v34, %v436_v36  ;;  %v438_v39 = vpop.f32.mrb[1].mxu0  ;;  %v453_v40 = vadd.f32 %v802_v34, %v452_v37  ;;  %v454_v41 = vpop.f32.mrb[1].mxu1 }
 0x107   : > { %v439_v42 = vpop.f32.mrb[2].mxu0  ;;  %v455_v43 = vpop.f32.mrb[2].mxu1 }
 0x108   : > { %v1218_v44 = vmax.f32 %v437_v38, 0.0  ;;  %v440_v45 = vadd.f32 %v802_v34, %v439_v42  ;;  %v441_v46 = vpop.f32.mrb[3].mxu0  ;;  %v457_v47 = vpop.f32.mrb[3].mxu1  ;;  %v1220_v49 = vmax.f32 %v453_v40, 0.0  ;;  %v456_v51 = vadd.f32 %v802_v34, %v455_v43 }
 0x10a   : > { %v468_v50 = vmax.f32 %v440_v45, 0.0  ;;  %483 = vrot.lane.b32.xlu0 %v1218_v44, %s1060_s15  ;;  %v986_v52 = vadd.low.f32.bf16 %v1218_v44, %v947_v35  ;;  %v1226_v55 = vmax.f32 %v456_v51, 0.0  ;;  %v988_v61 = vadd.low.f32.bf16 %v1220_v49, %v957_v48 }
 0x10c   : > { %485 = vrot.lane.b32.xlu1 %v468_v50, %s1060_s15  ;;  %v987_v57 = vadd.high.f32.bf16 %v468_v50, %v947_v35  ;;  %v854_v62 = vpack.c.bf16 %v986_v52, %v986_v52  ;;  %v989_v1 = vadd.high.f32.bf16 %v1226_v55, %v957_v48  ;;  %v858_v4 = vpack.c.bf16 %v988_v61, %v988_v61 }
 0x10d   : > { %v444_v53 = vpop.f32.mrb[4].mxu0  ;;  %v460_v54 = vpop.f32.mrb[4].mxu1 }
 0x10e   : > { %491 = vrot.lane.b32.xlu0 %v1220_v49, %s1060_s15  ;;  %v446_v56 = vpop.f32.mrb[5].mxu0  ;;  %v462_v58 = vpop.f32.mrb[5].mxu1  ;;  %v445_v2 = vadd.f32 %v802_v34, %v444_v53  ;;  %v855_v3 = vpack.c.bf16 %v987_v57, %v987_v57  ;;  %v461_v8 = vadd.f32 %v802_v34, %v460_v54  ;;  %v859_v9 = vpack.c.bf16 %v989_v1, %v989_v1 }
 0x10f   : > { %v447_v59 = vpop.f32.mrb[6].mxu0  ;;  %v463_v60 = vpop.f32.mrb[6].mxu1 }
 0x110   : > { %493 = vrot.lane.b32.xlu1 %v1226_v55, %s1060_s15  ;;  %v449_v63 = vpop.f32.mrb[7].mxu0  ;;  %v465_v0 = vpop.f32.mrb[7].mxu1  ;;  %v469_v6 = vmax.f32 %v445_v2, 0.0  ;;  %v448_v7 = vadd.f32 %v802_v34, %v447_v59  ;;  %v473_v12 = vmax.f32 %v461_v8, 0.0  ;;  %v464_v13 = vadd.f32 %v802_v34, %v463_v60 }
 0x112   : > { %636 = vrot.lane.b32.xlu0 %v854_v62, %s1061_s6  ;;  %v470_v11 = vmax.f32 %v448_v7, 0.0  ;;  %v990_v14 = vadd.low.f32.bf16 %v469_v6, %v952_v5  ;;  %v474_v16 = vmax.f32 %v464_v13, 0.0  ;;  %v992_v17 = vadd.low.f32.bf16 %v473_v12, %v962_v10 }
 0x114   : > { %638 = vrot.lane.b32.xlu1 %v855_v3, %s1061_s6  ;;  %v991_v15 = vadd.high.f32.bf16 %v470_v11, %v952_v5  ;;  %v856_v18 = vpack.c.bf16 %v990_v14, %v990_v14  ;;  %v993_v19 = vadd.high.f32.bf16 %v474_v16, %v962_v10  ;;  %v860_v21 = vpack.c.bf16 %v992_v17, %v992_v17 }
 0x116   : > { %644 = vrot.lane.b32.xlu0 %v858_v4, %s1061_s6  ;;  %v857_v20 = vpack.c.bf16 %v991_v15, %v991_v15  ;;  %v861_v22 = vpack.c.bf16 %v993_v19, %v993_v19 }
 0x118   : > { %646 = vrot.lane.b32.xlu1 %v859_v9, %s1061_s6 }
 0x11a   : > { %487 = vrot.lane.b32.xlu0 %v469_v6, %s1060_s15 }
 0x11c   : > { %489 = vrot.lane.b32.xlu1 %v470_v11, %s1060_s15 }
 0x11e   : > { %495 = vrot.lane.b32.xlu0 %v473_v12, %s1060_s15 }
 0x120   : > { %497 = vrot.lane.b32.xlu1 %v474_v16, %s1060_s15  ;;  %s1000_s15 = scalar_lea.vmem %s999_s30, 1024 }
 0x121   : > { %p1002_p1 = scmp.lt.s32.totalorder %s1000_s15, %s994_s25 }
 0x122   : > { %640 = vrot.lane.b32.xlu0 %v856_v18, %s1061_s6 }
 0x123   : > { %p1003_p2 = por %p1002_p1, %p1001_p0 }
 0x124   : > { %642 = vrot.lane.b32.xlu1 %v857_v20, %s1061_s6 }
 0x125   : > { %p1004_p3 = pnand %p1003_p2, %p997_p13 }
 0x126   : > { %648 = vrot.lane.b32.xlu0 %v860_v21, %s1061_s6 }
 0x128   : > { %650 = vrot.lane.b32.xlu1 %v861_v22, %s1061_s6 }
 0x17c   : > { %v484_v23 = vpop.permute.xlu0 %483 }
 0x17d   : > { %v507_v24 = vadd.f32 %v484_v23, %v1218_v44 }
 0x17e   : > { %v486_v25 = vpop.permute.xlu1 %485 }
 0x17f   : > { %v846_v26 = vpack.c.bf16 %v507_v24, %v507_v24  ;;  %v508_v27 = vadd.f32 %v486_v25, %v468_v50 }
 0x180   : > { %v492_v28 = vpop.permute.xlu0 %491 }
 0x181   : > { %548 = vst.msk [vmem:[%s1250_s10] sm:$0xf] %vm547_vm1, %v846_v26  ;;  %v847_v29 = vpack.c.bf16 %v508_v27, %v508_v27  ;;  %v511_v30 = vadd.f32 %v492_v28, %v1220_v49 }
 0x182   : > { %v494_v31 = vpop.permute.xlu1 %493 }
 0x183   : > { %549 = vst.msk [vmem:[%s1250_s10 + $0x4] sm:$0xf] %vm547_vm1, %v847_v29  ;;  %v850_v32 = vpack.c.bf16 %v511_v30, %v511_v30  ;;  %v512_v33 = vadd.f32 %v494_v31, %v1226_v55 }
 0x184   : > { %v637_v34 = vpop.permute.xlu0 %636 }
 0x185   : > { %552 = vst.msk [vmem:[%s1250_s10 + $0x10] sm:$0xf] %vm547_vm1, %v850_v32  ;;  %v851_v35 = vpack.c.bf16 %v512_v33, %v512_v33  ;;  %660 = vst.msk [vmem:[%s1260_s13] sm:$0xf] %vm547_vm1, %v637_v34 }
 0x186   : > { %v639_v36 = vpop.permute.xlu1 %638 }
 0x187   : > { %553 = vst.msk [vmem:[%s1250_s10 + $0x14] sm:$0xf] %vm547_vm1, %v851_v35  ;;  %661 = vst.msk [vmem:[%s1260_s13 + $0x4] sm:$0xf] %vm547_vm1, %v639_v36 }
 0x188   : > { %v645_v37 = vpop.permute.xlu0 %644 }
 0x189   : > { %664 = vst.msk [vmem:[%s1260_s13 + $0x10] sm:$0xf] %vm547_vm1, %v645_v37 }
 0x18a   : > { %v647_v38 = vpop.permute.xlu1 %646 }
 0x18b   : > { %665 = vst.msk [vmem:[%s1260_s13 + $0x14] sm:$0xf] %vm547_vm1, %v647_v38 }
 0x18c   : > { %v488_v39 = vpop.permute.xlu0 %487 }
 0x18d   : > { %v509_v40 = vadd.f32 %v488_v39, %v469_v6 }
 0x18e   : > { %v490_v41 = vpop.permute.xlu1 %489 }
 0x18f   : > { %v848_v42 = vpack.c.bf16 %v509_v40, %v509_v40  ;;  %v510_v43 = vadd.f32 %v490_v41, %v470_v11 }
 0x190   : > { %v496_v44 = vpop.permute.xlu0 %495 }
 0x191   : > { %550 = vst.msk [vmem:[%s1250_s10 + $0x8] sm:$0xf] %vm547_vm1, %v848_v42  ;;  %v849_v45 = vpack.c.bf16 %v510_v43, %v510_v43  ;;  %v513_v46 = vadd.f32 %v496_v44, %v473_v12 }
 0x192   : > { %v498_v47 = vpop.permute.xlu1 %497 }
 0x193   : > { %551 = vst.msk [vmem:[%s1250_s10 + $0xc] sm:$0xf] %vm547_vm1, %v849_v45  ;;  %v852_v48 = vpack.c.bf16 %v513_v46, %v513_v46  ;;  %v514_v49 = vadd.f32 %v498_v47, %v474_v16 }
 0x194   : > { %v641_v50 = vpop.permute.xlu0 %640 }
 0x195   : > { %554 = vst.msk [vmem:[%s1250_s10 + $0x18] sm:$0xf] %vm547_vm1, %v852_v48  ;;  %v853_v51 = vpack.c.bf16 %v514_v49, %v514_v49  ;;  %662 = vst.msk [vmem:[%s1260_s13 + $0x8] sm:$0xf] %vm547_vm1, %v641_v50 }
 0x196   : > { %v643_v52 = vpop.permute.xlu1 %642 }
 0x197   : > { %555 = vst.msk [vmem:[%s1250_s10 + $0x1c] sm:$0xf] %vm547_vm1, %v853_v51  ;;  %663 = vst.msk [vmem:[%s1260_s13 + $0xc] sm:$0xf] %vm547_vm1, %v643_v52 }
 0x198   : > { %v649_v53 = vpop.permute.xlu0 %648 }
 0x199   : > { %1007 = shalt.err (!%p1004_p3)
}
 0x19a   : > { %s1008_s6 = scalar_lea.hbm %s1286_s23, 512  ;;  %s1012_s10 = scalar_lea.hbm %s1349_s4, 1024 }
 0x19b   : > { %p1009_p4 = scmp.ne.s32.totalorder %s1286_s23, %s1008_s6  ;;  %p1013_p9 = scmp.lt.u32.totalorder %s1286_s23, %s1349_s4 }
 0x19c   : > { %p1014_p10 = scmp.lt.u32.totalorder %s1012_s10, %s1008_s6  ;;  %p1016_p12 = scmp.lt.u32.totalorder %s1008_s6, %s1286_s23 }
 0x19d   : > { %p1010_p7 = pnand %p1009_p4, %p1133_p5 }
 0x19e   : > { %p1015_p11 = por %p1014_p10, %p1013_p9 }
 0x19f   : > { %p1011_p8 = pneg %p1010_p7 }
 0x1a0   : > { %p1017_p13 = por %p1016_p12, %p1015_p11 }
 0x1a2   : > { %p1018_p0 = pnand %p1017_p13, %p1011_p8 }
 0x1a4   : > { %1021 = shalt.err (!%p1018_p0)
}
 0x1a5   : > { %s1063_s7 = smov 64   ;;  %s1064_s14 = smov 4   ;;  %666 = vst.msk [vmem:[%s1260_s13 + $0x18] sm:$0xf] %vm547_vm1, %v649_v53  ;;  %v651_v54 = vpop.permute.xlu1 %650 }
 0x1a6   : > { %900 = dma.vmem_to_hbm [thread:$0]  (%p1133_p5), %s1288_s16, 512, %s1286_s23, %s1300_s22, %s1063_s7, %s1063_s7, %s1064_s14  }
 0x1a7   : > { %667 = vst.msk [vmem:[%s1260_s13 + $0x1c] sm:$0xf] %vm547_vm1, %v651_v54 }
 0x1a8 PF: > { %p906_p1 = scmp.ge.s32.totalorder %s1056_s21, 2  ;;  %s706_s17 = sand.u32 1, %s1044_s18  }
 0x1a9   : > { %s707_s25 = scalar_lea.sflag [#allocation3], %s706_s17 }
 0x1aa   : > { %p903_p2 = pnand %p906_p1, %p1137_p6 }
 0x1ac   : > { %1039 = dma.done.wait (!%p903_p2), %s707_s25, 512  }
 0x1ad   : > { %1041 = vsyncadd (!%p903_p2), %s707_s25, 4294966784  ;;  %p16_p5 = scmp.ge.s32.totalorder %s1120_s24, 4   ;;  %s1353_s18 = smov %s1048_s19 }
 0x1ae   : > { %s1354_s19 = smov %s1052_s20  ;;  %s1355_s20 = smov %s1131_s27 }
 0x1af   : > { %s1356_s21 = smov %s1120_s24  ;;  %18 = sbr.rel (!%p16_p5) target bundleno = 3 (0x3), region = 86 }
 0x1b6   :  { %720 = vsyncpa [#allocation3], 1 }
 0x1b7   :  { %722 = vsyncpa [#allocation3 + $0x1], 1 }

// kernel: a_call__.18
= control target key start
LH: loop header
LB: loop body
LE: loop exit
PB: predicated region body
PF: predicated region fallthrough
CT: control target
= control target key end

     0   :  { %13 = vsyncpa [#allocation3], 0  ;;  %s2385_s0 = inlined_call_operand.vmem [shape: bf16[512,4], index: 0, kind: input, shape index: {}]   ;;  %s2386_s1 = inlined_call_operand.vmem [shape: bf16[512,8], index: 1, kind: input, shape index: {}]   ;;  %s2387_s2 = inlined_call_operand.vmem [shape: bf16[4,16], index: 2, kind: input, shape index: {}]   ;;  %s2388_s3 = inlined_call_operand.vmem [shape: bf16[8,16], index: 3, kind: input, shape index: {}]   ;;  %s2389_s4 = inlined_call_operand.vmem [shape: f32[1,16], index: 4, kind: input, shape index: {}, may-alias: {4,5}]   ;;  %s2390_s5 = inlined_call_operand.vmem [shape: f32[1,16], index: 5, kind: input, shape index: {}, may-alias: {4,5}]   ;;  %s2391_s6 = inlined_call_operand.vmem [shape: bf16[512,16], index: 6, kind: output, shape index: {0}]   ;;  %s2392_s7 = inlined_call_operand.hbm [shape: bf16[512,16], index: 7, kind: output, shape index: {1}]  }
   0x1   :  { %15 = vsyncpa [#allocation3 + $0x1], 0  ;;  %s1987_s24 = smov 0   ;;  %s1989_s25 = smov 0  }
   0x2   :  { %s1991_s26 = smov 0   ;;  %s1993_s27 = smov 0  }
   0x3 LB: > { %s2008_s28 = sadd.s32 4294967295, %s1942_s27   ;;  %s1492_s29 = sadd.s32 4294967294, %s1942_s27   ;;  %s1942_s27 = sphi %s1993_s27, %s2398_s27   ;;  %s1938_s26 = sphi %s1991_s26, %s2397_s26   ;;  %s1934_s25 = sphi %s1989_s25, %s2396_s25   ;;  %s1930_s24 = sphi %s1987_s24, %s2395_s24  }
   0x4   : > { %s2012_s30 = sadd.s32 1, %s1942_s27   ;;  %s190_s8 = sadd.s32 1, %s1938_s26 }
   0x5   : > { %s187_s9 = ssub.s32 %s1942_s27, %s2012_s30  ;;  %p200_p0 = scmp.ne.s32.totalorder %s1938_s26, %s1934_s25 }
   0x6   : > { %p188_p1 = scmp.eq.s32.totalorder %s187_s9, 0  ;;  %p201_p2 = scmp.eq.s32.totalorder %s2008_s28, 1 }
   0x7   : > { %p206_p3 = scmp.ne.s32.totalorder %s1934_s25, %s1930_s24  ;;  %p207_p4 = scmp.eq.s32.totalorder %s1492_s29, 1 }
   0x8   : > { %s2023_s10 = scalar_select %p188_p1, %s1938_s26, %s190_s8  }
   0x9   : > { %p2025_p5 = por %p201_p2, %p200_p0  ;;  %p2029_p6 = por %p207_p4, %p206_p3 }
   0xa   : > { %p1495_p7 = scmp.ge.s32.totalorder %s1942_s27, 1  ;;  %p255_p8 = scmp.lt.s32.totalorder %s1942_s27, 3 }
   0xc   : > { %p256_p9 = pnand %p1495_p7, %p255_p8 }
   0xd   : > { %v349_v0 = vld [vmem:[%s2387_s2] sm:$0x3] (!%p256_p9)  ;;  %vm486_vm0 = vcmask (!%p256_p9), 1041408   ;;  %vm1013_vm1 = vcmask (!%p256_p9), 1043456   ;;  %s1497_s17 = sshll.u32 (!%p256_p9), %s2008_s28, 5  ;;  %vm437_vm2 = vcmask (!%p256_p9), 31744  }
   0xe   : > { %259 = sbr.rel (%p256_p9) target bundleno = 319 (0x13f), region = 44  ;;  %v876_v1 = vld [vmem:[%s2388_s3] sm:$0xf] (!%p256_p9)  ;;  %1805 = vmatprep.subr.msk.bf16.mxu0 (!%p256_p9), %vm486_vm0, %v349_v0  ;;  %v488_v2 = vsel (!%p256_p9), %vm486_vm0, %v349_v0, 0  ;;  %p298_p10 = scmp.lt.s32.totalorder (!%p256_p9), %s1497_s17, 63  ;;  %vm964_vm3 = vcmask (!%p256_p9), 64512  }
   0xf   : > { %1806 = vmatprep.subr.msk.bf16.mxu1 (!%p256_p9), %vm1013_vm1, %v876_v1  ;;  %v1015_v3 = vsel (!%p256_p9), %vm1013_vm1, %v876_v1, 0  ;;  %1738 = vmatpush3.bf16.msra.mxu0 (!%p256_p9), %v488_v2  ;;  %v2123_v36 = vld [vmem:[%s2389_s4] ss:$0 sm:$0xff] (!%p256_p9)  ;;  %s294_s13 = sand.u32 (!%p256_p9), 1, %s1934_s25   ;;  %vm811_vm4 = vcmask (!%p256_p9), 125952   ;;  %s1944_s14 = smov (!%p256_p9), [#allocation2]  }
  0x10   : > { %1772 = vmatpush3.bf16.msra.mxu1 (!%p256_p9), %v1015_v3  ;;  %v2129_v37 = vld [vmem:[%s2390_s5] ss:$0 sm:$0xff] (!%p256_p9)  ;;  %s1496_s16 = sshll.u32 (!%p256_p9), %s294_s13, 7  ;;  %s2344_s8 = scalar_lea.sflag (!%p256_p9), [#allocation3], %s294_s13 }
  0x11   : > { %s1884_s15 = sshll.u32 (!%p256_p9), %s1944_s14, 4  ;;  %s1885_s15 = int_to_ptr.vmem [resolvable:$false] %s1884_s15 }
  0x15   : > { %s2400_s17 = smov (!%p298_p10, %s1497_s17), 63 }
  0x16   : > { %s2042_s18 = sshll.u32 %s2400_s17, 2 }
  0x17   : > { %s2048_s21 = scalar_lea.vmem %s2385_s0, %s2042_s18  ;;  %s2054_s29 = scalar_lea.vmem %s2386_s1, %s2042_s18 }
  0x18   : > { %v1848_v4 = vld [vmem:[%s2048_s21] sm:$0xff]   ;;  %v1850_v6 = vld [vmem:[%s2048_s21 + $0x8] sm:$0xff]   ;;  %v1852_v8 = vld [vmem:[%s2048_s21 + $0x10] sm:$0xff]   ;;  %s2142_s20 = scalar_lea.vmem %s2391_s6, %s2042_s18  ;;  %s2149_s18 = scalar_lea.vmem [#allocation2], %s1496_s16 }
  0x19   : > { %v1849_v5 = vld [vmem:[%s2054_s29] sm:$0xff]   ;;  %1739 = vmatprep.mubr.msk.bf16.mxu0 %vm437_vm2, %v1848_v4  ;;  %v1851_v7 = vld [vmem:[%s2054_s29 + $0x8] sm:$0xff]   ;;  %v1853_v9 = vld [vmem:[%s2054_s29 + $0x10] sm:$0xff]   ;;  %s1393_s22 = sshll.u32 %s2149_s18, 4  ;;  %s1886_s16 = scalar_lea.vmem %s1885_s15, 4096  ;;  %s2330_s22 = int_to_ptr.vmem [resolvable:$true] %s1393_s22 }
  0x1a   : > { %1773 = vmatprep.mubr.msk.bf16.mxu1 %vm964_vm3, %v1849_v5  ;;  %1740 = vmatmul.mubr.msk.bf16.vlgmr.msra.gmra.mrb[0].mxu0 %vm437_vm2, %v1850_v6  ;;  %v1854_v10 = vld [vmem:[%s2048_s21 + $0x18] sm:$0xff]   ;;  %v1856_v12 = vld [vmem:[%s2048_s21 + $0x20] sm:$0xff]   ;;  %v1858_v14 = vld [vmem:[%s2048_s21 + $0x28] sm:$0xff]   ;;  %s1880_s9 = scalar_lea.vmem %s2330_s22, 2048  ;;  %p1887_p0 = scmp.lt.s32.totalorder %s2330_s22, %s1885_s15 }
  0x1b   : > { %1774 = vmatmul.mubr.msk.bf16.vlgmr.msra.gmra.mrb[0].mxu1 %vm964_vm3, %v1851_v7  ;;  %1743 = vmatprep.mubr.msk.bf16.mxu0 %vm437_vm2, %v1852_v8  ;;  %v1855_v11 = vld [vmem:[%s2054_s29 + $0x18] sm:$0xff]   ;;  %v1857_v13 = vld [vmem:[%s2054_s29 + $0x20] sm:$0xff]   ;;  %v1859_v15 = vld [vmem:[%s2054_s29 + $0x28] sm:$0xff]   ;;  %p1881_p11 = scmp.ne.s32.totalorder %s2330_s22, %s1880_s9  ;;  %p1888_p1 = scmp.lt.s32.totalorder %s1886_s16, %s1880_s9 }
  0x1c   : > { %1777 = vmatprep.mubr.msk.bf16.mxu1 %vm964_vm3, %v1853_v9  ;;  %v1860_v16 = vld [vmem:[%s2048_s21 + $0x30] sm:$0xff]   ;;  %v1862_v18 = vld [vmem:[%s2048_s21 + $0x38] sm:$0xff]   ;;  %v1864_v20 = vld [vmem:[%s2048_s21 + $0x40] sm:$0xff]  }
  0x1d   : > { %v1861_v17 = vld [vmem:[%s2054_s29 + $0x30] sm:$0xff]   ;;  %v1863_v19 = vld [vmem:[%s2054_s29 + $0x38] sm:$0xff]   ;;  %v1865_v21 = vld [vmem:[%s2054_s29 + $0x40] sm:$0xff]   ;;  %p1882_p12 = pnand %p1881_p11, %p2025_p5  ;;  %p1889_p2 = por %p1888_p1, %p1887_p0 }
  0x1e   : > { %v1866_v22 = vld [vmem:[%s2048_s21 + $0x48] sm:$0xff]   ;;  %v1868_v24 = vld [vmem:[%s2048_s21 + $0x50] sm:$0xff]   ;;  %v1870_v26 = vld [vmem:[%s2048_s21 + $0x58] sm:$0xff]  }
  0x1f   : > { %v1867_v23 = vld [vmem:[%s2054_s29 + $0x48] sm:$0xff]   ;;  %v1869_v25 = vld [vmem:[%s2054_s29 + $0x50] sm:$0xff]   ;;  %v1871_v27 = vld [vmem:[%s2054_s29 + $0x58] sm:$0xff]   ;;  %p1883_p13 = pneg %p1882_p12 }
  0x20   : > { %v1872_v28 = vld [vmem:[%s2048_s21 + $0x60] sm:$0xff]   ;;  %v1874_v30 = vld [vmem:[%s2048_s21 + $0x68] sm:$0xff]   ;;  %v1876_v32 = vld [vmem:[%s2048_s21 + $0x70] sm:$0xff]  }
  0x21   : > { %v1873_v29 = vld [vmem:[%s2054_s29 + $0x60] sm:$0xff]   ;;  %v1875_v31 = vld [vmem:[%s2054_s29 + $0x68] sm:$0xff]   ;;  %v1877_v33 = vld [vmem:[%s2054_s29 + $0x70] sm:$0xff]   ;;  %p1890_p3 = pnand %p1889_p2, %p1883_p13 }
  0x22   : > { %1744 = vmatmul.mubr.msk.bf16.gmra.mrb[4].mxu0 %vm437_vm2, %v1854_v10  ;;  %v1878_v34 = vld [vmem:[%s2048_s21 + $0x78] sm:$0xff]   ;;  %s1702_s21 = sshll.u32 %s2008_s28, 11 }
  0x23   : > { %1778 = vmatmul.mubr.msk.bf16.gmra.mrb[4].mxu1 %vm964_vm3, %v1855_v11  ;;  %1747 = vmatprep.mubr.msk.bf16.mxu0 %vm437_vm2, %v1856_v12  ;;  %v1879_v35 = vld [vmem:[%s2054_s29 + $0x78] sm:$0xff]   ;;  %s2328_s29 = scalar_lea.hbm %s2392_s7, %s1702_s21 }
  0x24   : > { %1781 = vmatprep.mubr.msk.bf16.mxu1 %vm964_vm3, %v1857_v13 }
  0x2a   : > { %1748 = vmatmul.mubr.msk.bf16.gmra.mrb[8].mxu0 %vm437_vm2, %v1858_v14 }
  0x2b   : > { %1782 = vmatmul.mubr.msk.bf16.gmra.mrb[8].mxu1 %vm964_vm3, %v1859_v15  ;;  %1751 = vmatprep.mubr.msk.bf16.mxu0 %vm437_vm2, %v1860_v16 }
  0x2c   : > { %1785 = vmatprep.mubr.msk.bf16.mxu1 %vm964_vm3, %v1861_v17 }
  0x32   : > { %1752 = vmatmul.mubr.msk.bf16.gmra.mrb[12].mxu0 %vm437_vm2, %v1862_v18 }
  0x33   : > { %1786 = vmatmul.mubr.msk.bf16.gmra.mrb[12].mxu1 %vm964_vm3, %v1863_v19  ;;  %1755 = vmatprep.mubr.msk.bf16.mxu0 %vm437_vm2, %v1864_v20 }
  0x34   : > { %1789 = vmatprep.mubr.msk.bf16.mxu1 %vm964_vm3, %v1865_v21 }
  0x3a   : > { %1756 = vmatmul.mubr.msk.bf16.gmra.mrb[16].mxu0 %vm437_vm2, %v1866_v22 }
  0x3b   : > { %1790 = vmatmul.mubr.msk.bf16.gmra.mrb[16].mxu1 %vm964_vm3, %v1867_v23  ;;  %1759 = vmatprep.mubr.msk.bf16.mxu0 %vm437_vm2, %v1868_v24 }
  0x3c   : > { %1793 = vmatprep.mubr.msk.bf16.mxu1 %vm964_vm3, %v1869_v25 }
  0x42   : > { %1760 = vmatmul.mubr.msk.bf16.gmra.mrb[20].mxu0 %vm437_vm2, %v1870_v26 }
  0x43   : > { %1794 = vmatmul.mubr.msk.bf16.gmra.mrb[20].mxu1 %vm964_vm3, %v1871_v27  ;;  %1763 = vmatprep.mubr.msk.bf16.mxu0 %vm437_vm2, %v1872_v28 }
  0x44   : > { %1797 = vmatprep.mubr.msk.bf16.mxu1 %vm964_vm3, %v1873_v29 }
  0x4a   : > { %1764 = vmatmul.mubr.msk.bf16.gmra.mrb[24].mxu0 %vm437_vm2, %v1874_v30 }
  0x4b   : > { %1798 = vmatmul.mubr.msk.bf16.gmra.mrb[24].mxu1 %vm964_vm3, %v1875_v31  ;;  %1767 = vmatprep.mubr.msk.bf16.mxu0 %vm437_vm2, %v1876_v32 }
  0x4c   : > { %1801 = vmatprep.mubr.msk.bf16.mxu1 %vm964_vm3, %v1877_v33 }
  0x52   : > { %1768 = vmatmul.mubr.msk.bf16.gmra.mrb[28].mxu0 %vm437_vm2, %v1878_v34 }
  0x53   : > { %1802 = vmatmul.mubr.msk.bf16.gmra.mrb[28].mxu1 %vm964_vm3, %v1879_v35 }
  0xed   : > { %v1741_v38 = vpop.f32.mrb[0].mxu0 }
  0xee   : > { %v533_v39 = vadd.f32 %v1741_v38, %v2123_v36  ;;  %v1775_v40 = vpop.f32.mrb[0].mxu1  ;;  %v524_v41 = vpop.f32.mrb[1].mxu0 }
  0xef   : > { %v1060_v42 = vadd.f32 %v1775_v40, %v2129_v37  ;;  %v525_v43 = vadd.f32 %v2123_v36, %v524_v41  ;;  %v1051_v44 = vpop.f32.mrb[1].mxu1  ;;  %v1742_v45 = vpop.f32.mrb[2].mxu0 }
  0xf0   : > { %v653_v46 = vmax.f32 %v533_v39, 0.0  ;;  %v1052_v47 = vadd.f32 %v2129_v37, %v1051_v44  ;;  %v536_v48 = vadd.f32 %v1742_v45, %v2123_v36  ;;  %v1776_v49 = vpop.f32.mrb[2].mxu1  ;;  %v527_v50 = vpop.f32.mrb[3].mxu0 }
  0xf1   : > { %v1180_v51 = vmax.f32 %v1060_v42, 0.0  ;;  %v651_v52 = vmax.f32 %v525_v43, 0.0  ;;  %v1063_v53 = vadd.f32 %v1776_v49, %v2129_v37  ;;  %v528_v54 = vadd.f32 %v2123_v36, %v527_v50  ;;  %v1054_v55 = vpop.f32.mrb[3].mxu1 }
  0xf2   : > { %v1640_v56 = vpack.c.bf16 %v653_v46, %v653_v46  ;;  %v1178_v57 = vmax.f32 %v1052_v47, 0.0  ;;  %v654_v58 = vmax.f32 %v536_v48, 0.0  ;;  %v1055_v59 = vadd.f32 %v2129_v37, %v1054_v55 }
  0xf3   : > { %v1672_v60 = vpack.c.bf16 %v1180_v51, %v1180_v51  ;;  %v1638_v61 = vpack.c.bf16 %v651_v52, %v651_v52  ;;  %v1181_v62 = vmax.f32 %v1063_v53, 0.0  ;;  %v652_v63 = vmax.f32 %v528_v54, 0.0 }
  0xf4   : > { %814 = vst.msk [vmem:[%s2142_s20 + $0x8] sm:$0xf] %vm811_vm4, %v1640_v56  ;;  %v1670_v0 = vpack.c.bf16 %v1178_v57, %v1178_v57  ;;  %v1641_v1 = vpack.c.bf16 %v654_v58, %v654_v58  ;;  %v1179_v2 = vmax.f32 %v1055_v59, 0.0 }
  0xf5   : > { %1340 = vst.msk [vmem:[%s2149_s18 + $0x8] sm:$0xf] %vm811_vm4, %v1672_v60  ;;  %812 = vst.msk [vmem:[%s2142_s20] sm:$0xf] %vm811_vm4, %v1638_v61  ;;  %v1673_v3 = vpack.c.bf16 %v1181_v62, %v1181_v62  ;;  %v1639_v4 = vpack.c.bf16 %v652_v63, %v652_v63  ;;  %v1745_v5 = vpop.f32.mrb[4].mxu0 }
  0xf6   : > { %1338 = vst.msk [vmem:[%s2149_s18] sm:$0xf] %vm811_vm4, %v1670_v0  ;;  %815 = vst.msk [vmem:[%s2142_s20 + $0xc] sm:$0xf] %vm811_vm4, %v1641_v1  ;;  %v1671_v6 = vpack.c.bf16 %v1179_v2, %v1179_v2  ;;  %v549_v7 = vadd.f32 %v1745_v5, %v2123_v36  ;;  %v1779_v8 = vpop.f32.mrb[4].mxu1  ;;  %v540_v9 = vpop.f32.mrb[5].mxu0 }
  0xf7   : > { %1341 = vst.msk [vmem:[%s2149_s18 + $0xc] sm:$0xf] %vm811_vm4, %v1673_v3  ;;  %813 = vst.msk [vmem:[%s2142_s20 + $0x4] sm:$0xf] %vm811_vm4, %v1639_v4  ;;  %v1076_v10 = vadd.f32 %v1779_v8, %v2129_v37  ;;  %v541_v11 = vadd.f32 %v2123_v36, %v540_v9  ;;  %v1067_v12 = vpop.f32.mrb[5].mxu1  ;;  %v1746_v13 = vpop.f32.mrb[6].mxu0 }
  0xf8   : > { %1339 = vst.msk [vmem:[%s2149_s18 + $0x4] sm:$0xf] %vm811_vm4, %v1671_v6  ;;  %v657_v14 = vmax.f32 %v549_v7, 0.0  ;;  %v1068_v15 = vadd.f32 %v2129_v37, %v1067_v12  ;;  %v552_v16 = vadd.f32 %v1746_v13, %v2123_v36  ;;  %v1780_v17 = vpop.f32.mrb[6].mxu1  ;;  %v543_v18 = vpop.f32.mrb[7].mxu0 }
  0xf9   : > { %v1184_v19 = vmax.f32 %v1076_v10, 0.0  ;;  %v655_v20 = vmax.f32 %v541_v11, 0.0  ;;  %v1079_v21 = vadd.f32 %v1780_v17, %v2129_v37  ;;  %v544_v22 = vadd.f32 %v2123_v36, %v543_v18  ;;  %v1070_v23 = vpop.f32.mrb[7].mxu1 }
  0xfa   : > { %v1644_v24 = vpack.c.bf16 %v657_v14, %v657_v14  ;;  %v1182_v25 = vmax.f32 %v1068_v15, 0.0  ;;  %v658_v26 = vmax.f32 %v552_v16, 0.0  ;;  %v1071_v27 = vadd.f32 %v2129_v37, %v1070_v23 }
  0xfb   : > { %v1676_v28 = vpack.c.bf16 %v1184_v19, %v1184_v19  ;;  %v1642_v29 = vpack.c.bf16 %v655_v20, %v655_v20  ;;  %v1185_v30 = vmax.f32 %v1079_v21, 0.0  ;;  %v656_v31 = vmax.f32 %v544_v22, 0.0 }
  0xfc   : > { %818 = vst.msk [vmem:[%s2142_s20 + $0x18] sm:$0xf] %vm811_vm4, %v1644_v24  ;;  %v1674_v32 = vpack.c.bf16 %v1182_v25, %v1182_v25  ;;  %v1645_v33 = vpack.c.bf16 %v658_v26, %v658_v26  ;;  %v1183_v34 = vmax.f32 %v1071_v27, 0.0 }
  0xfd   : > { %1344 = vst.msk [vmem:[%s2149_s18 + $0x18] sm:$0xf] %vm811_vm4, %v1676_v28  ;;  %816 = vst.msk [vmem:[%s2142_s20 + $0x10] sm:$0xf] %vm811_vm4, %v1642_v29  ;;  %v1677_v35 = vpack.c.bf16 %v1185_v30, %v1185_v30  ;;  %v1643_v38 = vpack.c.bf16 %v656_v31, %v656_v31  ;;  %v1749_v39 = vpop.f32.mrb[8].mxu0 }
  0xfe   : > { %1342 = vst.msk [vmem:[%s2149_s18 + $0x10] sm:$0xf] %vm811_vm4, %v1674_v32  ;;  %819 = vst.msk [vmem:[%s2142_s20 + $0x1c] sm:$0xf] %vm811_vm4, %v1645_v33  ;;  %v1675_v40 = vpack.c.bf16 %v1183_v34, %v1183_v34  ;;  %v565_v41 = vadd.f32 %v1749_v39, %v2123_v36  ;;  %v1783_v42 = vpop.f32.mrb[8].mxu1  ;;  %v556_v43 = vpop.f32.mrb[9].mxu0 }
  0xff   : > { %1345 = vst.msk [vmem:[%s2149_s18 + $0x1c] sm:$0xf] %vm811_vm4, %v1677_v35  ;;  %817 = vst.msk [vmem:[%s2142_s20 + $0x14] sm:$0xf] %vm811_vm4, %v1643_v38  ;;  %v1092_v44 = vadd.f32 %v1783_v42, %v2129_v37  ;;  %v557_v45 = vadd.f32 %v2123_v36, %v556_v43  ;;  %v1083_v46 = vpop.f32.mrb[9].mxu1  ;;  %v1750_v47 = vpop.f32.mrb[10].mxu0 }
 0x100   : > { %1343 = vst.msk [vmem:[%s2149_s18 + $0x14] sm:$0xf] %vm811_vm4, %v1675_v40  ;;  %v661_v48 = vmax.f32 %v565_v41, 0.0  ;;  %v1084_v49 = vadd.f32 %v2129_v37, %v1083_v46  ;;  %v568_v50 = vadd.f32 %v1750_v47, %v2123_v36  ;;  %v1784_v51 = vpop.f32.mrb[10].mxu1  ;;  %v559_v52 = vpop.f32.mrb[11].mxu0 }
 0x101   : > { %v1188_v53 = vmax.f32 %v1092_v44, 0.0  ;;  %v659_v54 = vmax.f32 %v557_v45, 0.0  ;;  %v1095_v55 = vadd.f32 %v1784_v51, %v2129_v37  ;;  %v560_v56 = vadd.f32 %v2123_v36, %v559_v52  ;;  %v1086_v57 = vpop.f32.mrb[11].mxu1 }
 0x102   : > { %v1648_v58 = vpack.c.bf16 %v661_v48, %v661_v48  ;;  %v1186_v59 = vmax.f32 %v1084_v49, 0.0  ;;  %v662_v60 = vmax.f32 %v568_v50, 0.0  ;;  %v1087_v61 = vadd.f32 %v2129_v37, %v1086_v57 }
 0x103   : > { %v1680_v62 = vpack.c.bf16 %v1188_v53, %v1188_v53  ;;  %v1646_v63 = vpack.c.bf16 %v659_v54, %v659_v54  ;;  %v1189_v0 = vmax.f32 %v1095_v55, 0.0  ;;  %v660_v1 = vmax.f32 %v560_v56, 0.0 }
 0x104   : > { %822 = vst.msk [vmem:[%s2142_s20 + $0x28] sm:$0xf] %vm811_vm4, %v1648_v58  ;;  %v1678_v2 = vpack.c.bf16 %v1186_v59, %v1186_v59  ;;  %v1649_v3 = vpack.c.bf16 %v662_v60, %v662_v60  ;;  %v1187_v4 = vmax.f32 %v1087_v61, 0.0 }
 0x105   : > { %1348 = vst.msk [vmem:[%s2149_s18 + $0x28] sm:$0xf] %vm811_vm4, %v1680_v62  ;;  %820 = vst.msk [vmem:[%s2142_s20 + $0x20] sm:$0xf] %vm811_vm4, %v1646_v63  ;;  %v1681_v5 = vpack.c.bf16 %v1189_v0, %v1189_v0  ;;  %v1647_v6 = vpack.c.bf16 %v660_v1, %v660_v1  ;;  %v1753_v7 = vpop.f32.mrb[12].mxu0 }
 0x106   : > { %1346 = vst.msk [vmem:[%s2149_s18 + $0x20] sm:$0xf] %vm811_vm4, %v1678_v2  ;;  %823 = vst.msk [vmem:[%s2142_s20 + $0x2c] sm:$0xf] %vm811_vm4, %v1649_v3  ;;  %v1679_v8 = vpack.c.bf16 %v1187_v4, %v1187_v4  ;;  %v581_v9 = vadd.f32 %v1753_v7, %v2123_v36  ;;  %v1787_v10 = vpop.f32.mrb[12].mxu1  ;;  %v572_v11 = vpop.f32.mrb[13].mxu0 }
 0x107   : > { %1349 = vst.msk [vmem:[%s2149_s18 + $0x2c] sm:$0xf] %vm811_vm4, %v1681_v5  ;;  %821 = vst.msk [vmem:[%s2142_s20 + $0x24] sm:$0xf] %vm811_vm4, %v1647_v6  ;;  %v1108_v12 = vadd.f32 %v1787_v10, %v2129_v37  ;;  %v573_v13 = vadd.f32 %v2123_v36, %v572_v11  ;;  %v1099_v14 = vpop.f32.mrb[13].mxu1  ;;  %v1754_v15 = vpop.f32.mrb[14].mxu0 }
 0x108   : > { %1347 = vst.msk [vmem:[%s2149_s18 + $0x24] sm:$0xf] %vm811_vm4, %v1679_v8  ;;  %v665_v16 = vmax.f32 %v581_v9, 0.0  ;;  %v1100_v17 = vadd.f32 %v2129_v37, %v1099_v14  ;;  %v584_v18 = vadd.f32 %v1754_v15, %v2123_v36  ;;  %v1788_v19 = vpop.f32.mrb[14].mxu1  ;;  %v575_v20 = vpop.f32.mrb[15].mxu0 }
 0x109   : > { %v1192_v21 = vmax.f32 %v1108_v12, 0.0  ;;  %v663_v22 = vmax.f32 %v573_v13, 0.0  ;;  %v1111_v23 = vadd.f32 %v1788_v19, %v2129_v37  ;;  %v576_v24 = vadd.f32 %v2123_v36, %v575_v20  ;;  %v1102_v25 = vpop.f32.mrb[15].mxu1 }
 0x10a   : > { %v1652_v26 = vpack.c.bf16 %v665_v16, %v665_v16  ;;  %v1190_v27 = vmax.f32 %v1100_v17, 0.0  ;;  %v666_v28 = vmax.f32 %v584_v18, 0.0  ;;  %v1103_v29 = vadd.f32 %v2129_v37, %v1102_v25 }
 0x10b   : > { %v1684_v30 = vpack.c.bf16 %v1192_v21, %v1192_v21  ;;  %v1650_v31 = vpack.c.bf16 %v663_v22, %v663_v22  ;;  %v1193_v32 = vmax.f32 %v1111_v23, 0.0  ;;  %v664_v33 = vmax.f32 %v576_v24, 0.0 }
 0x10c   : > { %826 = vst.msk [vmem:[%s2142_s20 + $0x38] sm:$0xf] %vm811_vm4, %v1652_v26  ;;  %v1682_v34 = vpack.c.bf16 %v1190_v27, %v1190_v27  ;;  %v1653_v35 = vpack.c.bf16 %v666_v28, %v666_v28  ;;  %v1191_v38 = vmax.f32 %v1103_v29, 0.0 }
 0x10d   : > { %1352 = vst.msk [vmem:[%s2149_s18 + $0x38] sm:$0xf] %vm811_vm4, %v1684_v30  ;;  %824 = vst.msk [vmem:[%s2142_s20 + $0x30] sm:$0xf] %vm811_vm4, %v1650_v31  ;;  %v1685_v39 = vpack.c.bf16 %v1193_v32, %v1193_v32  ;;  %v1651_v40 = vpack.c.bf16 %v664_v33, %v664_v33  ;;  %v1757_v41 = vpop.f32.mrb[16].mxu0 }
 0x10e   : > { %1350 = vst.msk [vmem:[%s2149_s18 + $0x30] sm:$0xf] %vm811_vm4, %v1682_v34  ;;  %827 = vst.msk [vmem:[%s2142_s20 + $0x3c] sm:$0xf] %vm811_vm4, %v1653_v35  ;;  %v1683_v42 = vpack.c.bf16 %v1191_v38, %v1191_v38  ;;  %v597_v43 = vadd.f32 %v1757_v41, %v2123_v36  ;;  %v1791_v44 = vpop.f32.mrb[16].mxu1  ;;  %v588_v45 = vpop.f32.mrb[17].mxu0 }
 0x10f   : > { %1353 = vst.msk [vmem:[%s2149_s18 + $0x3c] sm:$0xf] %vm811_vm4, %v1685_v39  ;;  %825 = vst.msk [vmem:[%s2142_s20 + $0x34] sm:$0xf] %vm811_vm4, %v1651_v40  ;;  %v1124_v46 = vadd.f32 %v1791_v44, %v2129_v37  ;;  %v589_v47 = vadd.f32 %v2123_v36, %v588_v45  ;;  %v1115_v48 = vpop.f32.mrb[17].mxu1  ;;  %v1758_v49 = vpop.f32.mrb[18].mxu0 }
 0x110   : > { %1351 = vst.msk [vmem:[%s2149_s18 + $0x34] sm:$0xf] %vm811_vm4, %v1683_v42  ;;  %v669_v50 = vmax.f32 %v597_v43, 0.0  ;;  %v1116_v51 = vadd.f32 %v2129_v37, %v1115_v48  ;;  %v600_v52 = vadd.f32 %v1758_v49, %v2123_v36  ;;  %v1792_v53 = vpop.f32.mrb[18].mxu1  ;;  %v591_v54 = vpop.f32.mrb[19].mxu0 }
 0x111   : > { %v1196_v55 = vmax.f32 %v1124_v46, 0.0  ;;  %v667_v56 = vmax.f32 %v589_v47, 0.0  ;;  %v1127_v57 = vadd.f32 %v1792_v53, %v2129_v37  ;;  %v592_v58 = vadd.f32 %v2123_v36, %v591_v54  ;;  %v1118_v59 = vpop.f32.mrb[19].mxu1 }
 0x112   : > { %v1656_v60 = vpack.c.bf16 %v669_v50, %v669_v50  ;;  %v1194_v61 = vmax.f32 %v1116_v51, 0.0  ;;  %v670_v62 = vmax.f32 %v600_v52, 0.0  ;;  %v1119_v63 = vadd.f32 %v2129_v37, %v1118_v59 }
 0x113   : > { %v1688_v0 = vpack.c.bf16 %v1196_v55, %v1196_v55  ;;  %v1654_v1 = vpack.c.bf16 %v667_v56, %v667_v56  ;;  %v1197_v2 = vmax.f32 %v1127_v57, 0.0  ;;  %v668_v3 = vmax.f32 %v592_v58, 0.0 }
 0x114   : > { %830 = vst.msk [vmem:[%s2142_s20 + $0x48] sm:$0xf] %vm811_vm4, %v1656_v60  ;;  %v1686_v4 = vpack.c.bf16 %v1194_v61, %v1194_v61  ;;  %v1657_v5 = vpack.c.bf16 %v670_v62, %v670_v62  ;;  %v1195_v6 = vmax.f32 %v1119_v63, 0.0 }
 0x115   : > { %1356 = vst.msk [vmem:[%s2149_s18 + $0x48] sm:$0xf] %vm811_vm4, %v1688_v0  ;;  %828 = vst.msk [vmem:[%s2142_s20 + $0x40] sm:$0xf] %vm811_vm4, %v1654_v1  ;;  %v1689_v7 = vpack.c.bf16 %v1197_v2, %v1197_v2  ;;  %v1655_v8 = vpack.c.bf16 %v668_v3, %v668_v3  ;;  %v1761_v9 = vpop.f32.mrb[20].mxu0 }
 0x116   : > { %1354 = vst.msk [vmem:[%s2149_s18 + $0x40] sm:$0xf] %vm811_vm4, %v1686_v4  ;;  %831 = vst.msk [vmem:[%s2142_s20 + $0x4c] sm:$0xf] %vm811_vm4, %v1657_v5  ;;  %v1687_v10 = vpack.c.bf16 %v1195_v6, %v1195_v6  ;;  %v613_v11 = vadd.f32 %v1761_v9, %v2123_v36  ;;  %v1795_v12 = vpop.f32.mrb[20].mxu1  ;;  %v604_v13 = vpop.f32.mrb[21].mxu0 }
 0x117   : > { %1357 = vst.msk [vmem:[%s2149_s18 + $0x4c] sm:$0xf] %vm811_vm4, %v1689_v7  ;;  %829 = vst.msk [vmem:[%s2142_s20 + $0x44] sm:$0xf] %vm811_vm4, %v1655_v8  ;;  %v1140_v14 = vadd.f32 %v1795_v12, %v2129_v37  ;;  %v605_v15 = vadd.f32 %v2123_v36, %v604_v13  ;;  %v1131_v16 = vpop.f32.mrb[21].mxu1  ;;  %v1762_v17 = vpop.f32.mrb[22].mxu0 }
 0x118   : > { %1355 = vst.msk [vmem:[%s2149_s18 + $0x44] sm:$0xf] %vm811_vm4, %v1687_v10  ;;  %v673_v18 = vmax.f32 %v613_v11, 0.0  ;;  %v1132_v19 = vadd.f32 %v2129_v37, %v1131_v16  ;;  %v616_v20 = vadd.f32 %v1762_v17, %v2123_v36  ;;  %v1796_v21 = vpop.f32.mrb[22].mxu1  ;;  %v607_v22 = vpop.f32.mrb[23].mxu0 }
 0x119   : > { %v1200_v23 = vmax.f32 %v1140_v14, 0.0  ;;  %v671_v24 = vmax.f32 %v605_v15, 0.0  ;;  %v1143_v25 = vadd.f32 %v1796_v21, %v2129_v37  ;;  %v608_v26 = vadd.f32 %v2123_v36, %v607_v22  ;;  %v1134_v27 = vpop.f32.mrb[23].mxu1 }
 0x11a   : > { %v1660_v28 = vpack.c.bf16 %v673_v18, %v673_v18  ;;  %v1198_v29 = vmax.f32 %v1132_v19, 0.0  ;;  %v674_v30 = vmax.f32 %v616_v20, 0.0  ;;  %v1135_v31 = vadd.f32 %v2129_v37, %v1134_v27 }
 0x11b   : > { %v1692_v32 = vpack.c.bf16 %v1200_v23, %v1200_v23  ;;  %v1658_v33 = vpack.c.bf16 %v671_v24, %v671_v24  ;;  %v1201_v34 = vmax.f32 %v1143_v25, 0.0  ;;  %v672_v35 = vmax.f32 %v608_v26, 0.0 }
 0x11c   : > { %834 = vst.msk [vmem:[%s2142_s20 + $0x58] sm:$0xf] %vm811_vm4, %v1660_v28  ;;  %v1690_v38 = vpack.c.bf16 %v1198_v29, %v1198_v29  ;;  %v1661_v39 = vpack.c.bf16 %v674_v30, %v674_v30  ;;  %v1199_v40 = vmax.f32 %v1135_v31, 0.0 }
 0x11d   : > { %1360 = vst.msk [vmem:[%s2149_s18 + $0x58] sm:$0xf] %vm811_vm4, %v1692_v32  ;;  %832 = vst.msk [vmem:[%s2142_s20 + $0x50] sm:$0xf] %vm811_vm4, %v1658_v33  ;;  %v1693_v41 = vpack.c.bf16 %v1201_v34, %v1201_v34  ;;  %v1659_v42 = vpack.c.bf16 %v672_v35, %v672_v35  ;;  %v1765_v43 = vpop.f32.mrb[24].mxu0 }
 0x11e   : > { %1358 = vst.msk [vmem:[%s2149_s18 + $0x50] sm:$0xf] %vm811_vm4, %v1690_v38  ;;  %835 = vst.msk [vmem:[%s2142_s20 + $0x5c] sm:$0xf] %vm811_vm4, %v1661_v39  ;;  %v1691_v44 = vpack.c.bf16 %v1199_v40, %v1199_v40  ;;  %v629_v45 = vadd.f32 %v1765_v43, %v2123_v36  ;;  %v1799_v46 = vpop.f32.mrb[24].mxu1  ;;  %v620_v47 = vpop.f32.mrb[25].mxu0 }
 0x11f   : > { %1361 = vst.msk [vmem:[%s2149_s18 + $0x5c] sm:$0xf] %vm811_vm4, %v1693_v41  ;;  %833 = vst.msk [vmem:[%s2142_s20 + $0x54] sm:$0xf] %vm811_vm4, %v1659_v42  ;;  %v1156_v48 = vadd.f32 %v1799_v46, %v2129_v37  ;;  %v621_v49 = vadd.f32 %v2123_v36, %v620_v47  ;;  %v1147_v50 = vpop.f32.mrb[25].mxu1  ;;  %v1766_v51 = vpop.f32.mrb[26].mxu0 }
 0x120   : > { %1359 = vst.msk [vmem:[%s2149_s18 + $0x54] sm:$0xf] %vm811_vm4, %v1691_v44  ;;  %v677_v52 = vmax.f32 %v629_v45, 0.0  ;;  %v1148_v53 = vadd.f32 %v2129_v37, %v1147_v50  ;;  %v632_v54 = vadd.f32 %v1766_v51, %v2123_v36  ;;  %v1800_v55 = vpop.f32.mrb[26].mxu1  ;;  %v623_v56 = vpop.f32.mrb[27].mxu0 }
 0x121   : > { %v1204_v57 = vmax.f32 %v1156_v48, 0.0  ;;  %v675_v58 = vmax.f32 %v621_v49, 0.0  ;;  %v1159_v59 = vadd.f32 %v1800_v55, %v2129_v37  ;;  %v624_v60 = vadd.f32 %v2123_v36, %v623_v56  ;;  %v1150_v61 = vpop.f32.mrb[27].mxu1 }
 0x122   : > { %v1664_v62 = vpack.c.bf16 %v677_v52, %v677_v52  ;;  %v1202_v63 = vmax.f32 %v1148_v53, 0.0  ;;  %v678_v0 = vmax.f32 %v632_v54, 0.0  ;;  %v1151_v1 = vadd.f32 %v2129_v37, %v1150_v61 }
 0x123   : > { %v1696_v2 = vpack.c.bf16 %v1204_v57, %v1204_v57  ;;  %v1662_v3 = vpack.c.bf16 %v675_v58, %v675_v58  ;;  %v1205_v4 = vmax.f32 %v1159_v59, 0.0  ;;  %v676_v5 = vmax.f32 %v624_v60, 0.0 }
 0x124   : > { %838 = vst.msk [vmem:[%s2142_s20 + $0x68] sm:$0xf] %vm811_vm4, %v1664_v62  ;;  %v1694_v6 = vpack.c.bf16 %v1202_v63, %v1202_v63  ;;  %v1665_v7 = vpack.c.bf16 %v678_v0, %v678_v0  ;;  %v1203_v8 = vmax.f32 %v1151_v1, 0.0 }
 0x125   : > { %1364 = vst.msk [vmem:[%s2149_s18 + $0x68] sm:$0xf] %vm811_vm4, %v1696_v2  ;;  %836 = vst.msk [vmem:[%s2142_s20 + $0x60] sm:$0xf] %vm811_vm4, %v1662_v3  ;;  %v1697_v9 = vpack.c.bf16 %v1205_v4, %v1205_v4  ;;  %v1663_v10 = vpack.c.bf16 %v676_v5, %v676_v5  ;;  %v1769_v11 = vpop.f32.mrb[28].mxu0 }
 0x126   : > { %1362 = vst.msk [vmem:[%s2149_s18 + $0x60] sm:$0xf] %vm811_vm4, %v1694_v6  ;;  %839 = vst.msk [vmem:[%s2142_s20 + $0x6c] sm:$0xf] %vm811_vm4, %v1665_v7  ;;  %v1695_v12 = vpack.c.bf16 %v1203_v8, %v1203_v8  ;;  %v645_v13 = vadd.f32 %v1769_v11, %v2123_v36  ;;  %v1803_v14 = vpop.f32.mrb[28].mxu1  ;;  %v636_v15 = vpop.f32.mrb[29].mxu0 }
 0x127   : > { %1365 = vst.msk [vmem:[%s2149_s18 + $0x6c] sm:$0xf] %vm811_vm4, %v1697_v9  ;;  %837 = vst.msk [vmem:[%s2142_s20 + $0x64] sm:$0xf] %vm811_vm4, %v1663_v10  ;;  %v1172_v16 = vadd.f32 %v1803_v14, %v2129_v37  ;;  %v637_v17 = vadd.f32 %v2123_v36, %v636_v15  ;;  %v1163_v18 = vpop.f32.mrb[29].mxu1  ;;  %v1770_v19 = vpop.f32.mrb[30].mxu0 }
 0x128   : > { %1363 = vst.msk [vmem:[%s2149_s18 + $0x64] sm:$0xf] %vm811_vm4, %v1695_v12  ;;  %v681_v20 = vmax.f32 %v645_v13, 0.0  ;;  %v1164_v21 = vadd.f32 %v2129_v37, %v1163_v18  ;;  %v648_v22 = vadd.f32 %v1770_v19, %v2123_v36  ;;  %v1804_v23 = vpop.f32.mrb[30].mxu1  ;;  %v639_v24 = vpop.f32.mrb[31].mxu0 }
 0x129   : > { %v1208_v25 = vmax.f32 %v1172_v16, 0.0  ;;  %v679_v26 = vmax.f32 %v637_v17, 0.0  ;;  %v1175_v27 = vadd.f32 %v1804_v23, %v2129_v37  ;;  %v640_v28 = vadd.f32 %v2123_v36, %v639_v24  ;;  %v1166_v29 = vpop.f32.mrb[31].mxu1 }
 0x12a   : > { %v1668_v30 = vpack.c.bf16 %v681_v20, %v681_v20  ;;  %v1206_v31 = vmax.f32 %v1164_v21, 0.0  ;;  %v682_v32 = vmax.f32 %v648_v22, 0.0  ;;  %v1167_v33 = vadd.f32 %v2129_v37, %v1166_v29 }
 0x12b   : > { %v1700_v34 = vpack.c.bf16 %v1208_v25, %v1208_v25  ;;  %v1666_v35 = vpack.c.bf16 %v679_v26, %v679_v26  ;;  %v1209_v38 = vmax.f32 %v1175_v27, 0.0  ;;  %v680_v39 = vmax.f32 %v640_v28, 0.0 }
 0x12c   : > { %842 = vst.msk [vmem:[%s2142_s20 + $0x78] sm:$0xf] %vm811_vm4, %v1668_v30  ;;  %v1698_v36 = vpack.c.bf16 %v1206_v31, %v1206_v31  ;;  %v1669_v40 = vpack.c.bf16 %v682_v32, %v682_v32  ;;  %v1207_v41 = vmax.f32 %v1167_v33, 0.0 }
 0x12d   : > { %1368 = vst.msk [vmem:[%s2149_s18 + $0x78] sm:$0xf] %vm811_vm4, %v1700_v34  ;;  %840 = vst.msk [vmem:[%s2142_s20 + $0x70] sm:$0xf] %vm811_vm4, %v1666_v35  ;;  %v1701_v37 = vpack.c.bf16 %v1209_v38, %v1209_v38  ;;  %v1667_v42 = vpack.c.bf16 %v680_v39, %v680_v39 }
 0x12e   : > { %1366 = vst.msk [vmem:[%s2149_s18 + $0x70] sm:$0xf] %vm811_vm4, %v1698_v36  ;;  %843 = vst.msk [vmem:[%s2142_s20 + $0x7c] sm:$0xf] %vm811_vm4, %v1669_v40  ;;  %v1699_v43 = vpack.c.bf16 %v1207_v41, %v1207_v41 }
 0x12f   : > { %1369 = vst.msk [vmem:[%s2149_s18 + $0x7c] sm:$0xf] %vm811_vm4, %v1701_v37  ;;  %841 = vst.msk [vmem:[%s2142_s20 + $0x74] sm:$0xf] %vm811_vm4, %v1667_v42 }
 0x130   : > { %1367 = vst.msk [vmem:[%s2149_s18 + $0x74] sm:$0xf] %vm811_vm4, %v1699_v43 }
 0x131   : > { %1893 = shalt.err (!%p1890_p3)
}
 0x132   : > { %s1894_s13 = scalar_lea.hbm %s2328_s29, 2048  ;;  %s1898_s20 = scalar_lea.hbm %s2392_s7, 4096 }
 0x133   : > { %p1895_p4 = scmp.ne.s32.totalorder %s2328_s29, %s1894_s13  ;;  %p1899_p9 = scmp.lt.u32.totalorder %s2328_s29, %s2392_s7 }
 0x134   : > { %p1900_p10 = scmp.lt.u32.totalorder %s1898_s20, %s1894_s13  ;;  %p1902_p12 = scmp.lt.u32.totalorder %s1894_s13, %s2328_s29 }
 0x135   : > { %p1896_p7 = pnand %p1895_p4, %p2025_p5 }
 0x136   : > { %p1901_p11 = por %p1900_p10, %p1899_p9 }
 0x137   : > { %p1897_p8 = pneg %p1896_p7 }
 0x138   : > { %p1903_p13 = por %p1902_p12, %p1901_p11 }
 0x13a   : > { %p1904_p0 = pnand %p1903_p13, %p1897_p8 }
 0x13c   : > { %1907 = shalt.err (!%p1904_p0)
}
 0x13d   : > { %s1945_s28 = smov 64   ;;  %s1946_s23 = smov 4  }
 0x13e   : > { %1807 = dma.vmem_to_hbm [thread:$0]  (%p2025_p5), %s2330_s22, 2048, %s2328_s29, %s2344_s8, %s1945_s28, %s1945_s28, %s1946_s23  }
 0x13f PF: > { %p1813_p1 = scmp.ge.s32.totalorder %s1942_s27, 2  ;;  %s1416_s9 = sand.u32 1, %s1930_s24  }
 0x140   : > { %s1417_s14 = scalar_lea.sflag [#allocation3], %s1416_s9 }
 0x141   : > { %p1810_p2 = pnand %p1813_p1, %p2029_p6 }
 0x143   : > { %1925 = dma.done.wait (!%p1810_p2), %s1417_s14, 2048  }
 0x144   : > { %1927 = vsyncadd (!%p1810_p2), %s1417_s14, 4294965248  ;;  %p18_p3 = scmp.ge.s32.totalorder %s2012_s30, 4   ;;  %s2395_s24 = smov %s1934_s25 }
 0x145   : > { %s2396_s25 = smov %s1938_s26  ;;  %s2397_s26 = smov %s2023_s10 }
 0x146   : > { %s2398_s27 = smov %s2012_s30  ;;  %20 = sbr.rel (!%p18_p3) target bundleno = 3 (0x3), region = 94 }
 0x14d   :  { %1422 = vsyncpa [#allocation3], 1 }
 0x14e   :  { %1424 = vsyncpa [#allocation3 + $0x1], 1 }

// kernel: a_call__.20
= control target key start
LH: loop header
LB: loop body
LE: loop exit
PB: predicated region body
PF: predicated region fallthrough
CT: control target
= control target key end

     0   :  { %s654_s12 = smov 0   ;;  %s737_s0 = inlined_call_operand.vmem [shape: bf16[128,144], index: 0, kind: input, shape index: {}]   ;;  %s738_s1 = inlined_call_operand.vmem [shape: bf16[144,32], index: 1, kind: input, shape index: {}]   ;;  %s739_s2 = inlined_call_operand.vmem [shape: f32[1,32], index: 2, kind: input, shape index: {}]   ;;  %s740_s3 = inlined_call_operand.vmem [shape: bf16[128,16], index: 3, kind: output, shape index: {}]  }
   0x1 LB: > { %s524_s13 = sadd.s32 4294967295, %s630_s12   ;;  %p528_p0 = scmp.ge.s32.totalorder %s630_s12, 1  ;;  %s630_s12 = sphi %s654_s12, %s13_s12  }
   0x2   : > { %p139_p1 = scmp.lt.s32.totalorder %s630_s12, 3 }
   0x4   : > { %p140_p2 = pnand %p528_p0, %p139_p1 }
   0x5   : > { %v603_v0 = vld [vmem:[%s738_s1] sm:$0xff] (!%p140_p2)   ;;  %v632_v1 = vmov (!%p140_p2), 0   ;;  %s529_s16 = sshll.u32 (!%p140_p2), %s524_s13, 3  ;;  %v604_v2 = vld [vmem:[%s738_s1 + $0x8] sm:$0xff] (!%p140_p2)   ;;  %v605_v3 = vld [vmem:[%s738_s1 + $0x10] sm:$0xff] (!%p140_p2)   ;;  %vm301_vm0 = vcmask (!%p140_p2), 130048  }
   0x6   : > { %143 = sbr.rel (%p140_p2) target bundleno = 394 (0x18a), region = 32  ;;  %314 = vmatprep.subr.bf16.mxu0 (!%p140_p2), %v632_v1  ;;  %575 = vmatprep.subr.bf16.mxu1 (!%p140_p2), %v632_v1  ;;  %p165_p3 = scmp.lt.s32.totalorder (!%p140_p2), %s529_s16, 15  ;;  %v606_v4 = vld [vmem:[%s738_s1 + $0x18] sm:$0xff] (!%p140_p2)   ;;  %v607_v7 = vld [vmem:[%s738_s1 + $0x20] sm:$0xff] (!%p140_p2)   ;;  %v608_v8 = vld [vmem:[%s738_s1 + $0x28] sm:$0xff] (!%p140_p2)   ;;  %vm459_vm1 = vcmask (!%p140_p2), 125952  }
   0x7   : > { %315 = vmatpush1.bf16.msra.mxu0 (!%p140_p2), %v603_v0  ;;  %584 = vmatpush1.bf16.msra.mxu1 (!%p140_p2), %v603_v0  ;;  %v609_v9 = vld [vmem:[%s738_s1 + $0x30] sm:$0xff] (!%p140_p2)   ;;  %v610_v10 = vld [vmem:[%s738_s1 + $0x38] sm:$0xff] (!%p140_p2)   ;;  %v611_v11 = vld [vmem:[%s738_s1 + $0x40] sm:$0xff] (!%p140_p2)   ;;  %s633_s13 = smov (!%p140_p2), 112  }
   0x8   : > { %316 = vmatprep.subr.bf16.mxu0 (!%p140_p2), %v632_v1  ;;  %576 = vmatprep.subr.bf16.mxu1 (!%p140_p2), %v632_v1  ;;  %v534_v18 = vld [vmem:[%s739_s2] ss:$0 sm:$0xff] (!%p140_p2) }
   0xb   : > { %317 = vmatpush1.bf16.msra.mxu0 (!%p140_p2), %v604_v2  ;;  %585 = vmatpush1.bf16.msra.mxu1 (!%p140_p2), %v604_v2 }
   0xc   : > { %318 = vmatprep.subr.bf16.mxu0 (!%p140_p2), %v632_v1  ;;  %577 = vmatprep.subr.bf16.mxu1 (!%p140_p2), %v632_v1 }
   0xd   : > { %s742_s16 = smov (!%p165_p3, %s529_s16), 15 }
   0xe   : > { %s566_s21 = sshll.u32 %s742_s16, 3  ;;  %s533_s14 = sshll.u32 %s742_s16, 2 }
   0xf   : > { %s677_s24 = scalar_lea.vmem %s737_s0, %s566_s21  ;;  %319 = vmatpush1.bf16.msra.mxu0 %v605_v3  ;;  %586 = vmatpush1.bf16.msra.mxu1 %v605_v3  ;;  %s716_s18 = scalar_lea.vmem %s740_s3, %s533_s14 }
  0x10   : > { %v614_v5 = vld [vmem:[%s677_s24 + $0x4] ss:$8 sps:$4 sm:$0xff]   ;;  %320 = vmatprep.subr.bf16.mxu0 %v632_v1  ;;  %578 = vmatprep.subr.bf16.mxu1 %v632_v1  ;;  %v612_v12 = vld [vmem:[%s677_s24] ss:$8 sps:$4 sm:$0xff]   ;;  %v618_v14 = vld [vmem:[%s677_s24 + $0x14] ss:$8 sps:$4 sm:$0xff]  }
  0x11   : > { %v617_v6 = vld [vmem:[%s677_s24 + $0x24] ss:$8 sps:$4 sm:$0xff]   ;;  %552 = vmatprep.mubr.msk.bf16.mxu0 %vm301_vm0, %v614_v5  ;;  %v615_v13 = vld [vmem:[%s677_s24 + $0x20] ss:$8 sps:$4 sm:$0xff]   ;;  %v621_v15 = vld [vmem:[%s677_s24 + $0x34] ss:$8 sps:$4 sm:$0xff]  }
  0x12   : > { %554 = vmatprep.mubr.msk.bf16.mxu1 %vm301_vm0, %v617_v6  ;;  %v620_v16 = vld [vmem:[%s677_s24 + $0x10] ss:$8 sps:$4 sm:$0xff]  }
  0x13   : > { %321 = vmatpush1.bf16.msra.mxu0 %v606_v4  ;;  %587 = vmatpush1.bf16.msra.mxu1 %v606_v4  ;;  %v623_v17 = vld [vmem:[%s677_s24 + $0x30] ss:$8 sps:$4 sm:$0xff]  }
  0x14   : > { %322 = vmatprep.subr.bf16.mxu0 %v632_v1  ;;  %579 = vmatprep.subr.bf16.mxu1 %v632_v1 }
  0x17   : > { %323 = vmatpush1.bf16.msra.mxu0 %v607_v7  ;;  %588 = vmatpush1.bf16.msra.mxu1 %v607_v7 }
  0x18   : > { %324 = vmatprep.subr.bf16.mxu0 %v632_v1  ;;  %580 = vmatprep.subr.bf16.mxu1 %v632_v1 }
  0x1b   : > { %325 = vmatpush1.bf16.msra.mxu0 %v608_v8  ;;  %589 = vmatpush1.bf16.msra.mxu1 %v608_v8 }
  0x1c   : > { %326 = vmatprep.subr.bf16.mxu0 %v632_v1  ;;  %581 = vmatprep.subr.bf16.mxu1 %v632_v1 }
  0x1f   : > { %327 = vmatpush1.bf16.msra.mxu0 %v609_v9  ;;  %590 = vmatpush1.bf16.msra.mxu1 %v609_v9 }
  0x20   : > { %328 = vmatprep.subr.bf16.mxu0 %v632_v1  ;;  %582 = vmatprep.subr.bf16.mxu1 %v632_v1 }
  0x23   : > { %329 = vmatpush1.bf16.msra.mxu0 %v610_v10  ;;  %591 = vmatpush1.bf16.msra.mxu1 %v610_v10 }
  0x24   : > { %330 = vmatprep.subr.bf16.mxu0 %v632_v1  ;;  %583 = vmatprep.subr.bf16.mxu1 %v632_v1 }
  0x27   : > { %331 = vmatpush1.bf16.msra.mxu0 %v611_v11  ;;  %592 = vmatpush1.bf16.msra.mxu1 %v611_v11 }
  0x2a   : > { %347 = vmatmul.mubr.bf16.vlgmr.msra.gmra.mrb[0].mxu0 %v612_v12  ;;  %363 = vmatmul.mubr.bf16.vlgmr.msra.gmra.mrb[0].mxu1 %v615_v13 }
  0x2b   : > { %553 = vmatprep.mubr.msk.bf16.mxu0 %vm301_vm0, %v618_v14  ;;  %555 = vmatprep.mubr.msk.bf16.mxu1 %vm301_vm0, %v621_v15 }
  0x32   : > { %355 = vmatmul.mubr.bf16.gmra.mrb[4].mxu0 %v620_v16  ;;  %371 = vmatmul.mubr.bf16.gmra.mrb[4].mxu1 %v623_v17 }
  0xfd   : > { %v348_v19 = vpop.f32.mrb[0].mxu0  ;;  %v364_v20 = vpop.f32.mrb[0].mxu1 }
  0xfe   : > { %v349_v21 = vadd.f32 %v534_v18, %v348_v19  ;;  %v350_v22 = vpop.f32.mrb[1].mxu0  ;;  %v366_v23 = vpop.f32.mrb[1].mxu1  ;;  %v365_v27 = vadd.f32 %v534_v18, %v364_v20 }
  0xff   : > { %v351_v24 = vpop.f32.mrb[2].mxu0  ;;  %v367_v25 = vpop.f32.mrb[2].mxu1 }
 0x100   : > { %v379_v26 = vmax.f32 %v349_v21, 0.0  ;;  %v368_v28 = vadd.f32 %v534_v18, %v367_v25  ;;  %v353_v29 = vpop.f32.mrb[3].mxu0  ;;  %v369_v30 = vpop.f32.mrb[3].mxu1  ;;  %v383_v32 = vmax.f32 %v365_v27, 0.0  ;;  %v352_v33 = vadd.f32 %v534_v18, %v351_v24 }
 0x102   : > { %v384_v31 = vmax.f32 %v368_v28, 0.0  ;;  %395 = vrot.lane.b32.xlu0 %v379_v26, %s633_s13  ;;  %v380_v42 = vmax.f32 %v352_v33, 0.0 }
 0x104   : > { %405 = vrot.lane.b32.xlu1 %v384_v31, %s633_s13 }
 0x105   : > { %v356_v34 = vpop.f32.mrb[4].mxu0  ;;  %v372_v35 = vpop.f32.mrb[4].mxu1 }
 0x106   : > { %v357_v36 = vadd.f32 %v534_v18, %v356_v34  ;;  %v358_v37 = vpop.f32.mrb[5].mxu0  ;;  %403 = vrot.lane.b32.xlu0 %v383_v32, %s633_s13  ;;  %v373_v38 = vadd.f32 %v534_v18, %v372_v35  ;;  %v374_v39 = vpop.f32.mrb[5].mxu1 }
 0x107   : > { %v359_v40 = vpop.f32.mrb[6].mxu0  ;;  %v375_v41 = vpop.f32.mrb[6].mxu1 }
 0x108   : > { %v381_v43 = vmax.f32 %v357_v36, 0.0  ;;  %v360_v44 = vadd.f32 %v534_v18, %v359_v40  ;;  %v361_v45 = vpop.f32.mrb[7].mxu0  ;;  %v377_v46 = vpop.f32.mrb[7].mxu1  ;;  %v385_v47 = vmax.f32 %v373_v38, 0.0  ;;  %v376_v49 = vadd.f32 %v534_v18, %v375_v41 }
 0x10a   : > { %399 = vrot.lane.b32.xlu1 %v381_v43, %s633_s13  ;;  %397 = vrot.lane.b32.xlu0 %v380_v42, %s633_s13  ;;  %v382_v48 = vmax.f32 %v360_v44, 0.0  ;;  %v386_v50 = vmax.f32 %v376_v49, 0.0 }
 0x10e   : > { %401 = vrot.lane.b32.xlu1 %v382_v48, %s633_s13  ;;  %407 = vrot.lane.b32.xlu0 %v385_v47, %s633_s13 }
 0x112   : > { %409 = vrot.lane.b32.xlu1 %v386_v50, %s633_s13 }
 0x174   : > { %v396_v51 = vpop.permute.xlu0 %395 }
 0x175   : > { %v419_v52 = vadd.f32 %v396_v51, %v379_v26 }
 0x176   : > { %v406_v53 = vpop.permute.xlu1 %405 }
 0x177   : > { %v567_v54 = vpack.c.bf16 %v419_v52, %v419_v52  ;;  %v424_v55 = vadd.f32 %v406_v53, %v384_v31 }
 0x178   : > { %v404_v56 = vpop.permute.xlu0 %403 }
 0x179   : > { %460 = vst.msk [vmem:[%s716_s18] sm:$0xf] %vm459_vm1, %v567_v54  ;;  %v572_v57 = vpack.c.bf16 %v424_v55, %v424_v55  ;;  %v423_v58 = vadd.f32 %v404_v56, %v383_v32 }
 0x17b   : > { %465 = vst.msk [vmem:[%s716_s18 + $0x14] sm:$0xf] %vm459_vm1, %v572_v57  ;;  %v571_v59 = vpack.c.bf16 %v423_v58, %v423_v58 }
 0x17c   : > { %v400_v60 = vpop.permute.xlu1 %399  ;;  %v398_v61 = vpop.permute.xlu0 %397 }
 0x17d   : > { %464 = vst.msk [vmem:[%s716_s18 + $0x10] sm:$0xf] %vm459_vm1, %v571_v59  ;;  %v421_v62 = vadd.f32 %v400_v60, %v381_v43  ;;  %v420_v63 = vadd.f32 %v398_v61, %v380_v42 }
 0x17f   : > { %v569_v0 = vpack.c.bf16 %v421_v62, %v421_v62  ;;  %v568_v1 = vpack.c.bf16 %v420_v63, %v420_v63 }
 0x180   : > { %v402_v2 = vpop.permute.xlu1 %401  ;;  %v408_v3 = vpop.permute.xlu0 %407 }
 0x181   : > { %462 = vst.msk [vmem:[%s716_s18 + $0x8] sm:$0xf] %vm459_vm1, %v569_v0  ;;  %461 = vst.msk [vmem:[%s716_s18 + $0x4] sm:$0xf] %vm459_vm1, %v568_v1  ;;  %v422_v4 = vadd.f32 %v402_v2, %v382_v48  ;;  %v425_v5 = vadd.f32 %v408_v3, %v385_v47 }
 0x183   : > { %v570_v6 = vpack.c.bf16 %v422_v4, %v422_v4  ;;  %v573_v7 = vpack.c.bf16 %v425_v5, %v425_v5 }
 0x184   : > { %v410_v8 = vpop.permute.xlu1 %409 }
 0x185   : > { %463 = vst.msk [vmem:[%s716_s18 + $0xc] sm:$0xf] %vm459_vm1, %v570_v6  ;;  %466 = vst.msk [vmem:[%s716_s18 + $0x18] sm:$0xf] %vm459_vm1, %v573_v7  ;;  %v426_v9 = vadd.f32 %v410_v8, %v386_v50 }
 0x187   : > { %v574_v10 = vpack.c.bf16 %v426_v9, %v426_v9 }
 0x189   : > { %467 = vst.msk [vmem:[%s716_s18 + $0x1c] sm:$0xf] %vm459_vm1, %v574_v10 }
 0x18a PF: > { %s13_s12 = sadd.s32 1, %s630_s12  }
 0x18b   : > { %p10_p4 = scmp.ge.s32.totalorder %s13_s12, 4  }
 0x18d   :  { %12 = sbr.rel (!%p10_p4) target bundleno = 1 (0x1), region = 62 }

// kernel: a_call__.25
= control target key start
LH: loop header
LB: loop body
LE: loop exit
PB: predicated region body
PF: predicated region fallthrough
CT: control target
= control target key end

     0   :  { %13 = vsyncpa [#allocation3], 0  ;;  %s1228_s0 = inlined_call_operand.vmem [shape: bf16[128,16], index: 0, kind: input, shape index: {}]   ;;  %s1229_s1 = inlined_call_operand.vmem [shape: bf16[128,16], index: 1, kind: input, shape index: {}]   ;;  %s1230_s2 = inlined_call_operand.vmem [shape: bf16[16,32], index: 2, kind: input, shape index: {}]   ;;  %s1231_s3 = inlined_call_operand.vmem [shape: bf16[16,32], index: 3, kind: input, shape index: {}]   ;;  %s1232_s4 = inlined_call_operand.vmem [shape: f32[1,32], index: 4, kind: input, shape index: {}, may-alias: {4,5}]   ;;  %s1233_s5 = inlined_call_operand.vmem [shape: f32[1,32], index: 5, kind: input, shape index: {}, may-alias: {4,5}]   ;;  %s1234_s6 = inlined_call_operand.vmem [shape: bf16[128,32], index: 6, kind: output, shape index: {0}]   ;;  %s1235_s7 = inlined_call_operand.hbm [shape: bf16[128,32], index: 7, kind: output, shape index: {1}]  }
   0x1   :  { %15 = vsyncpa [#allocation3 + $0x1], 0  ;;  %s1034_s24 = smov 0   ;;  %s1036_s25 = smov 0  }
   0x2   :  { %s1038_s26 = smov 0   ;;  %s1040_s27 = smov 0  }
   0x3 LB: > { %s1055_s28 = sadd.s32 4294967295, %s989_s27   ;;  %s777_s29 = sadd.s32 4294967294, %s989_s27   ;;  %s989_s27 = sphi %s1040_s27, %s1241_s27   ;;  %s985_s26 = sphi %s1038_s26, %s1240_s26   ;;  %s981_s25 = sphi %s1036_s25, %s1239_s25   ;;  %s977_s24 = sphi %s1034_s24, %s1238_s24  }
   0x4   : > { %s1059_s30 = sadd.s32 1, %s989_s27   ;;  %s190_s8 = sadd.s32 1, %s985_s26 }
   0x5   : > { %s187_s9 = ssub.s32 %s989_s27, %s1059_s30  ;;  %p200_p0 = scmp.ne.s32.totalorder %s985_s26, %s981_s25 }
   0x6   : > { %p188_p1 = scmp.eq.s32.totalorder %s187_s9, 0  ;;  %p201_p2 = scmp.eq.s32.totalorder %s1055_s28, 1 }
   0x7   : > { %p206_p3 = scmp.ne.s32.totalorder %s981_s25, %s977_s24  ;;  %p207_p4 = scmp.eq.s32.totalorder %s777_s29, 1 }
   0x8   : > { %s1070_s10 = scalar_select %p188_p1, %s985_s26, %s190_s8  }
   0x9   : > { %p1072_p5 = por %p201_p2, %p200_p0  ;;  %p1076_p6 = por %p207_p4, %p206_p3 }
   0xa   : > { %p780_p7 = scmp.ge.s32.totalorder %s989_s27, 1  ;;  %p255_p8 = scmp.lt.s32.totalorder %s989_s27, 3 }
   0xc   : > { %p256_p9 = pnand %p780_p7, %p255_p8 }
   0xd   : > { %v917_v0 = vld [vmem:[%s1230_s2] sm:$0xff] (!%p256_p9)   ;;  %s782_s15 = sshll.u32 (!%p256_p9), %s1055_s28, 3  ;;  %vm360_vm0 = vcmask (!%p256_p9), 130048   ;;  %s294_s13 = sand.u32 (!%p256_p9), 1, %s981_s25   ;;  %vm478_vm1 = vcmask (!%p256_p9), 257024  }
   0xe   : > { %259 = sbr.rel (%p256_p9) target bundleno = 271 (0x10f), region = 44  ;;  %v918_v1 = vld [vmem:[%s1231_s3] sm:$0xff] (!%p256_p9)   ;;  %p298_p10 = scmp.lt.s32.totalorder (!%p256_p9), %s782_s15, 15  ;;  %856 = vmatprep.subr.bf16.mxu0 (!%p256_p9), %v917_v0 }
   0xf   : > { %866 = vmatprep.subr.bf16.mxu1 (!%p256_p9), %v918_v1  ;;  %857 = vmatpush3.bf16.msra.mxu0 (!%p256_p9), %v917_v0  ;;  %v1110_v10 = vld [vmem:[%s1232_s4] ss:$0 sm:$0xff] (!%p256_p9)  ;;  %s781_s16 = sshll.u32 (!%p256_p9), %s294_s13, 5  ;;  %s1187_s8 = scalar_lea.sflag (!%p256_p9), [#allocation3], %s294_s13 }
  0x10   : > { %867 = vmatpush3.bf16.msra.mxu1 (!%p256_p9), %v918_v1  ;;  %v1116_v11 = vld [vmem:[%s1233_s5] ss:$0 sm:$0xff] (!%p256_p9)  ;;  %s991_s14 = smov (!%p256_p9), [#allocation2]  }
  0x15   : > { %s1243_s15 = smov (!%p298_p10, %s782_s15), 15 }
  0x16   : > { %s1089_s18 = sshll.u32 %s1243_s15, 2  ;;  %s931_s15 = sshll.u32 %s991_s14, 4  ;;  %s932_s15 = int_to_ptr.vmem [resolvable:$false] %s931_s15 }
  0x17   : > { %s301_s21 = scalar_lea.vmem %s1228_s0, %s1089_s18  ;;  %s307_s29 = scalar_lea.vmem %s1229_s1, %s1089_s18 }
  0x18   : > { %v919_v2 = vld [vmem:[%s301_s21] sm:$0xff]   ;;  %v921_v4 = vld [vmem:[%s301_s21 + $0x8] sm:$0xff]   ;;  %v923_v6 = vld [vmem:[%s301_s21 + $0x10] sm:$0xff]   ;;  %s1129_s20 = scalar_lea.vmem %s1234_s6, %s1089_s18  ;;  %s1136_s18 = scalar_lea.vmem [#allocation2], %s781_s16 }
  0x19   : > { %v920_v3 = vld [vmem:[%s307_s29] sm:$0xff]   ;;  %858 = vmatprep.mubr.msk.bf16.mxu0 %vm360_vm0, %v919_v2  ;;  %v922_v5 = vld [vmem:[%s307_s29 + $0x8] sm:$0xff]   ;;  %v924_v7 = vld [vmem:[%s307_s29 + $0x10] sm:$0xff]   ;;  %s678_s22 = sshll.u32 %s1136_s18, 4  ;;  %s933_s16 = scalar_lea.vmem %s932_s15, 1024  ;;  %s1173_s22 = int_to_ptr.vmem [resolvable:$true] %s678_s22 }
  0x1a   : > { %868 = vmatprep.mubr.msk.bf16.mxu1 %vm360_vm0, %v920_v3  ;;  %859 = vmatmul.mubr.msk.bf16.vlgmr.msra.gmra.mrb[0].mxu0 %vm360_vm0, %v921_v4  ;;  %v925_v8 = vld [vmem:[%s301_s21 + $0x18] sm:$0xff]   ;;  %s845_s21 = sshll.u32 %s1055_s28, 9  ;;  %s927_s9 = scalar_lea.vmem %s1173_s22, 512 }
  0x1b   : > { %869 = vmatmul.mubr.msk.bf16.vlgmr.msra.gmra.mrb[0].mxu1 %vm360_vm0, %v922_v5  ;;  %862 = vmatprep.mubr.msk.bf16.mxu0 %vm360_vm0, %v923_v6  ;;  %v926_v9 = vld [vmem:[%s307_s29 + $0x18] sm:$0xff]   ;;  %s1171_s29 = scalar_lea.hbm %s1235_s7, %s845_s21  ;;  %p928_p11 = scmp.ne.s32.totalorder %s1173_s22, %s927_s9 }
  0x1c   : > { %872 = vmatprep.mubr.msk.bf16.mxu1 %vm360_vm0, %v924_v7  ;;  %p934_p0 = scmp.lt.s32.totalorder %s1173_s22, %s932_s15  ;;  %p935_p1 = scmp.lt.s32.totalorder %s933_s16, %s927_s9 }
  0x1d   : > { %p929_p12 = pnand %p928_p11, %p1072_p5 }
  0x1e   : > { %p936_p2 = por %p935_p1, %p934_p0 }
  0x1f   : > { %p930_p13 = pneg %p929_p12 }
  0x21   : > { %p937_p3 = pnand %p936_p2, %p930_p13 }
  0x22   : > { %863 = vmatmul.mubr.msk.bf16.gmra.mrb[4].mxu0 %vm360_vm0, %v925_v8 }
  0x23   : > { %873 = vmatmul.mubr.msk.bf16.gmra.mrb[4].mxu1 %vm360_vm0, %v926_v9 }
  0xed   : > { %v860_v12 = vpop.f32.mrb[0].mxu0 }
  0xee   : > { %v416_v13 = vadd.f32 %v860_v12, %v1110_v10  ;;  %v870_v14 = vpop.f32.mrb[0].mxu1  ;;  %v407_v15 = vpop.f32.mrb[1].mxu0 }
  0xef   : > { %v585_v16 = vadd.f32 %v870_v14, %v1116_v11  ;;  %v408_v17 = vadd.f32 %v1110_v10, %v407_v15  ;;  %v576_v18 = vpop.f32.mrb[1].mxu1  ;;  %v861_v19 = vpop.f32.mrb[2].mxu0 }
  0xf0   : > { %v440_v20 = vmax.f32 %v416_v13, 0.0  ;;  %v577_v21 = vadd.f32 %v1116_v11, %v576_v18  ;;  %v419_v22 = vadd.f32 %v861_v19, %v1110_v10  ;;  %v871_v23 = vpop.f32.mrb[2].mxu1  ;;  %v410_v24 = vpop.f32.mrb[3].mxu0 }
  0xf1   : > { %v609_v25 = vmax.f32 %v585_v16, 0.0  ;;  %v438_v26 = vmax.f32 %v408_v17, 0.0  ;;  %v588_v27 = vadd.f32 %v871_v23, %v1116_v11  ;;  %v411_v28 = vadd.f32 %v1110_v10, %v410_v24  ;;  %v579_v29 = vpop.f32.mrb[3].mxu1 }
  0xf2   : > { %v831_v30 = vpack.c.bf16 %v440_v20, %v440_v20  ;;  %v607_v31 = vmax.f32 %v577_v21, 0.0  ;;  %v441_v32 = vmax.f32 %v419_v22, 0.0  ;;  %v580_v33 = vadd.f32 %v1116_v11, %v579_v29 }
  0xf3   : > { %v839_v34 = vpack.c.bf16 %v609_v25, %v609_v25  ;;  %v829_v35 = vpack.c.bf16 %v438_v26, %v438_v26  ;;  %v610_v36 = vmax.f32 %v588_v27, 0.0  ;;  %v439_v37 = vmax.f32 %v411_v28, 0.0 }
  0xf4   : > { %481 = vst.msk [vmem:[%s1129_s20 + $0x8] sm:$0xf] %vm478_vm1, %v831_v30  ;;  %v837_v38 = vpack.c.bf16 %v607_v31, %v607_v31  ;;  %v832_v39 = vpack.c.bf16 %v441_v32, %v441_v32  ;;  %v608_v40 = vmax.f32 %v580_v33, 0.0 }
  0xf5   : > { %649 = vst.msk [vmem:[%s1136_s18 + $0x8] sm:$0xf] %vm478_vm1, %v839_v34  ;;  %479 = vst.msk [vmem:[%s1129_s20] sm:$0xf] %vm478_vm1, %v829_v35  ;;  %v840_v41 = vpack.c.bf16 %v610_v36, %v610_v36  ;;  %v830_v42 = vpack.c.bf16 %v439_v37, %v439_v37  ;;  %v864_v43 = vpop.f32.mrb[4].mxu0 }
  0xf6   : > { %647 = vst.msk [vmem:[%s1136_s18] sm:$0xf] %vm478_vm1, %v837_v38  ;;  %482 = vst.msk [vmem:[%s1129_s20 + $0xc] sm:$0xf] %vm478_vm1, %v832_v39  ;;  %v838_v44 = vpack.c.bf16 %v608_v40, %v608_v40  ;;  %v432_v45 = vadd.f32 %v864_v43, %v1110_v10  ;;  %v874_v46 = vpop.f32.mrb[4].mxu1  ;;  %v423_v47 = vpop.f32.mrb[5].mxu0 }
  0xf7   : > { %650 = vst.msk [vmem:[%s1136_s18 + $0xc] sm:$0xf] %vm478_vm1, %v840_v41  ;;  %480 = vst.msk [vmem:[%s1129_s20 + $0x4] sm:$0xf] %vm478_vm1, %v830_v42  ;;  %v601_v48 = vadd.f32 %v874_v46, %v1116_v11  ;;  %v424_v49 = vadd.f32 %v1110_v10, %v423_v47  ;;  %v592_v50 = vpop.f32.mrb[5].mxu1  ;;  %v865_v51 = vpop.f32.mrb[6].mxu0 }
  0xf8   : > { %648 = vst.msk [vmem:[%s1136_s18 + $0x4] sm:$0xf] %vm478_vm1, %v838_v44  ;;  %v444_v52 = vmax.f32 %v432_v45, 0.0  ;;  %v593_v53 = vadd.f32 %v1116_v11, %v592_v50  ;;  %v435_v54 = vadd.f32 %v865_v51, %v1110_v10  ;;  %v875_v55 = vpop.f32.mrb[6].mxu1  ;;  %v426_v56 = vpop.f32.mrb[7].mxu0 }
  0xf9   : > { %v613_v57 = vmax.f32 %v601_v48, 0.0  ;;  %v442_v58 = vmax.f32 %v424_v49, 0.0  ;;  %v604_v59 = vadd.f32 %v875_v55, %v1116_v11  ;;  %v427_v60 = vadd.f32 %v1110_v10, %v426_v56  ;;  %v595_v61 = vpop.f32.mrb[7].mxu1 }
  0xfa   : > { %v835_v62 = vpack.c.bf16 %v444_v52, %v444_v52  ;;  %v611_v63 = vmax.f32 %v593_v53, 0.0  ;;  %v445_v0 = vmax.f32 %v435_v54, 0.0  ;;  %v596_v1 = vadd.f32 %v1116_v11, %v595_v61 }
  0xfb   : > { %v843_v2 = vpack.c.bf16 %v613_v57, %v613_v57  ;;  %v833_v3 = vpack.c.bf16 %v442_v58, %v442_v58  ;;  %v614_v4 = vmax.f32 %v604_v59, 0.0  ;;  %v443_v5 = vmax.f32 %v427_v60, 0.0 }
  0xfc   : > { %485 = vst.msk [vmem:[%s1129_s20 + $0x18] sm:$0xf] %vm478_vm1, %v835_v62  ;;  %v841_v6 = vpack.c.bf16 %v611_v63, %v611_v63  ;;  %v836_v7 = vpack.c.bf16 %v445_v0, %v445_v0  ;;  %v612_v8 = vmax.f32 %v596_v1, 0.0 }
  0xfd   : > { %653 = vst.msk [vmem:[%s1136_s18 + $0x18] sm:$0xf] %vm478_vm1, %v843_v2  ;;  %483 = vst.msk [vmem:[%s1129_s20 + $0x10] sm:$0xf] %vm478_vm1, %v833_v3  ;;  %v844_v9 = vpack.c.bf16 %v614_v4, %v614_v4  ;;  %v834_v10 = vpack.c.bf16 %v443_v5, %v443_v5 }
  0xfe   : > { %651 = vst.msk [vmem:[%s1136_s18 + $0x10] sm:$0xf] %vm478_vm1, %v841_v6  ;;  %486 = vst.msk [vmem:[%s1129_s20 + $0x1c] sm:$0xf] %vm478_vm1, %v836_v7  ;;  %v842_v11 = vpack.c.bf16 %v612_v8, %v612_v8 }
  0xff   : > { %654 = vst.msk [vmem:[%s1136_s18 + $0x1c] sm:$0xf] %vm478_vm1, %v844_v9  ;;  %484 = vst.msk [vmem:[%s1129_s20 + $0x14] sm:$0xf] %vm478_vm1, %v834_v10 }
 0x100   : > { %652 = vst.msk [vmem:[%s1136_s18 + $0x14] sm:$0xf] %vm478_vm1, %v842_v11 }
 0x101   : > { %940 = shalt.err (!%p937_p3)
}
 0x102   : > { %s941_s13 = scalar_lea.hbm %s1171_s29, 512  ;;  %s945_s20 = scalar_lea.hbm %s1235_s7, 1024 }
 0x103   : > { %p942_p4 = scmp.ne.s32.totalorder %s1171_s29, %s941_s13  ;;  %p946_p9 = scmp.lt.u32.totalorder %s1171_s29, %s1235_s7 }
 0x104   : > { %p947_p10 = scmp.lt.u32.totalorder %s945_s20, %s941_s13  ;;  %p949_p12 = scmp.lt.u32.totalorder %s941_s13, %s1171_s29 }
 0x105   : > { %p943_p7 = pnand %p942_p4, %p1072_p5 }
 0x106   : > { %p948_p11 = por %p947_p10, %p946_p9 }
 0x107   : > { %p944_p8 = pneg %p943_p7 }
 0x108   : > { %p950_p13 = por %p949_p12, %p948_p11 }
 0x10a   : > { %p951_p0 = pnand %p950_p13, %p944_p8 }
 0x10c   : > { %954 = shalt.err (!%p951_p0)
}
 0x10d   : > { %s992_s28 = smov 64   ;;  %s993_s23 = smov 4  }
 0x10e   : > { %876 = dma.vmem_to_hbm [thread:$0]  (%p1072_p5), %s1173_s22, 512, %s1171_s29, %s1187_s8, %s992_s28, %s992_s28, %s993_s23  }
 0x10f PF: > { %p882_p1 = scmp.ge.s32.totalorder %s989_s27, 2  ;;  %s701_s9 = sand.u32 1, %s977_s24  }
 0x110   : > { %s702_s14 = scalar_lea.sflag [#allocation3], %s701_s9 }
 0x111   : > { %p879_p2 = pnand %p882_p1, %p1076_p6 }
 0x113   : > { %972 = dma.done.wait (!%p879_p2), %s702_s14, 512  }
 0x114   : > { %974 = vsyncadd (!%p879_p2), %s702_s14, 4294966784  ;;  %p18_p3 = scmp.ge.s32.totalorder %s1059_s30, 4   ;;  %s1238_s24 = smov %s981_s25 }
 0x115   : > { %s1239_s25 = smov %s985_s26  ;;  %s1240_s26 = smov %s1070_s10 }
 0x116   : > { %s1241_s27 = smov %s1059_s30  ;;  %20 = sbr.rel (!%p18_p3) target bundleno = 3 (0x3), region = 94 }
 0x11d   :  { %707 = vsyncpa [#allocation3], 1 }
 0x11e   :  { %709 = vsyncpa [#allocation3 + $0x1], 1 }

// kernel: a_call__.19
= control target key start
LH: loop header
LB: loop body
LE: loop exit
PB: predicated region body
PF: predicated region fallthrough
CT: control target
= control target key end

     0   :  { %11 = vsyncpa [#allocation3], 0  ;;  %s1269_s0 = inlined_call_operand.vmem [shape: bf16[128,144], index: 0, kind: input, shape index: {}]   ;;  %s1270_s1 = inlined_call_operand.vmem [shape: bf16[144,80], index: 1, kind: input, shape index: {}]   ;;  %s1271_s2 = inlined_call_operand.vmem [shape: f32[1,80], index: 2, kind: input, shape index: {}]   ;;  %s1272_s3 = inlined_call_operand.vmem [shape: bf16[128,16], index: 3, kind: output, shape index: {0}]   ;;  %s1273_s4 = inlined_call_operand.hbm [shape: bf16[128,16], index: 4, kind: output, shape index: {1}]   ;;  %s1274_s5 = inlined_call_operand.vmem [shape: bf16[128,16], index: 5, kind: output, shape index: {2}]  }
   0x1   :  { %13 = vsyncpa [#allocation3 + $0x1], 0  ;;  %s1035_s18 = smov 0   ;;  %s1037_s19 = smov 0  }
   0x2   :  { %s1039_s20 = smov 0   ;;  %s1041_s21 = smov 0  }
   0x3 LB: > { %s1056_s22 = sadd.s32 4294967295, %s997_s21   ;;  %s779_s23 = sadd.s32 4294967294, %s997_s21   ;;  %s997_s21 = sphi %s1041_s21, %s1280_s21   ;;  %s993_s20 = sphi %s1039_s20, %s1279_s20   ;;  %s989_s19 = sphi %s1037_s19, %s1278_s19   ;;  %s985_s18 = sphi %s1035_s18, %s1277_s18  }
   0x4   : > { %s1060_s24 = sadd.s32 1, %s997_s21   ;;  %s120_s25 = sadd.s32 1, %s993_s20 }
   0x5   : > { %s117_s26 = ssub.s32 %s997_s21, %s1060_s24  ;;  %p130_p0 = scmp.ne.s32.totalorder %s993_s20, %s989_s19 }
   0x6   : > { %p118_p1 = scmp.eq.s32.totalorder %s117_s26, 0  ;;  %p131_p2 = scmp.eq.s32.totalorder %s1056_s22, 1 }
   0x7   : > { %p136_p3 = scmp.ne.s32.totalorder %s989_s19, %s985_s18  ;;  %p137_p4 = scmp.eq.s32.totalorder %s779_s23, 1 }
   0x8   : > { %s1071_s27 = scalar_select %p118_p1, %s993_s20, %s120_s25  }
   0x9   : > { %p1073_p5 = por %p131_p2, %p130_p0  ;;  %p1077_p6 = por %p137_p4, %p136_p3 }
   0xa   : > { %p782_p7 = scmp.ge.s32.totalorder %s997_s21, 1  ;;  %p197_p8 = scmp.lt.s32.totalorder %s997_s21, 3 }
   0xc   : > { %p198_p9 = pnand %p782_p7, %p197_p8 }
   0xd   : > { %v914_v0 = vld [vmem:[%s1270_s1] sm:$0xff] (!%p198_p9)   ;;  %v999_v1 = vmov (!%p198_p9), 0   ;;  %s784_s7 = sshll.u32 (!%p198_p9), %s1056_s22, 3  ;;  %v915_v2 = vld [vmem:[%s1270_s1 + $0x8] sm:$0xff] (!%p198_p9)   ;;  %v916_v3 = vld [vmem:[%s1270_s1 + $0x10] sm:$0xff] (!%p198_p9)   ;;  %vm380_vm0 = vcmask (!%p198_p9), 130048  }
   0xe   : > { %201 = sbr.rel (%p198_p9) target bundleno = 536 (0x218), region = 32  ;;  %393 = vmatprep.subr.bf16.mxu0 (!%p198_p9), %v999_v1  ;;  %852 = vmatprep.subr.bf16.mxu1 (!%p198_p9), %v999_v1  ;;  %p237_p10 = scmp.lt.s32.totalorder (!%p198_p9), %s784_s7, 15  ;;  %v917_v4 = vld [vmem:[%s1270_s1 + $0x18] sm:$0xff] (!%p198_p9)   ;;  %v918_v7 = vld [vmem:[%s1270_s1 + $0x20] sm:$0xff] (!%p198_p9)   ;;  %v919_v8 = vld [vmem:[%s1270_s1 + $0x28] sm:$0xff] (!%p198_p9)   ;;  %vm538_vm1 = vcmask (!%p198_p9), 125952  }
   0xf   : > { %394 = vmatpush1.bf16.msra.mxu0 (!%p198_p9), %v914_v0  ;;  %861 = vmatpush1.bf16.msra.mxu1 (!%p198_p9), %v914_v0  ;;  %v920_v9 = vld [vmem:[%s1270_s1 + $0x30] sm:$0xff] (!%p198_p9)   ;;  %v921_v10 = vld [vmem:[%s1270_s1 + $0x38] sm:$0xff] (!%p198_p9)   ;;  %v922_v11 = vld [vmem:[%s1270_s1 + $0x40] sm:$0xff] (!%p198_p9)   ;;  %s1001_s16 = smov (!%p198_p9), 64   ;;  %s1002_s30 = smov (!%p198_p9), 96  }
  0x10   : > { %395 = vmatprep.subr.bf16.mxu0 (!%p198_p9), %v999_v1  ;;  %853 = vmatprep.subr.bf16.mxu1 (!%p198_p9), %v999_v1  ;;  %v791_v18 = vld [vmem:[%s1271_s2] ss:$0 sm:$0xff] (!%p198_p9)  ;;  %s1003_s25 = smov (!%p198_p9), [#allocation2]  }
  0x13   : > { %396 = vmatpush1.bf16.msra.mxu0 (!%p198_p9), %v915_v2  ;;  %862 = vmatpush1.bf16.msra.mxu1 (!%p198_p9), %v915_v2 }
  0x14   : > { %397 = vmatprep.subr.bf16.mxu0 (!%p198_p9), %v999_v1  ;;  %854 = vmatprep.subr.bf16.mxu1 (!%p198_p9), %v999_v1 }
  0x15   : > { %s1282_s7 = smov (!%p237_p10, %s784_s7), 15 }
  0x16   : > { %s834_s12 = sshll.u32 %s1282_s7, 3  ;;  %s788_s17 = sshll.u32 %s1282_s7, 2 }
  0x17   : > { %s1099_s15 = scalar_lea.vmem %s1269_s0, %s834_s12  ;;  %398 = vmatpush1.bf16.msra.mxu0 %v916_v3  ;;  %863 = vmatpush1.bf16.msra.mxu1 %v916_v3  ;;  %s1152_s26 = scalar_lea.vmem %s1272_s3, %s788_s17 }
  0x18   : > { %v925_v5 = vld [vmem:[%s1099_s15 + $0x4] ss:$8 sps:$4 sm:$0xff]   ;;  %399 = vmatprep.subr.bf16.mxu0 %v999_v1  ;;  %855 = vmatprep.subr.bf16.mxu1 %v999_v1  ;;  %v923_v12 = vld [vmem:[%s1099_s15] ss:$8 sps:$4 sm:$0xff]   ;;  %v929_v14 = vld [vmem:[%s1099_s15 + $0x14] ss:$8 sps:$4 sm:$0xff]   ;;  %s1174_s9 = scalar_lea.vmem %s1274_s5, %s788_s17 }
  0x19   : > { %v928_v6 = vld [vmem:[%s1099_s15 + $0x24] ss:$8 sps:$4 sm:$0xff]   ;;  %809 = vmatprep.mubr.msk.bf16.mxu0 %vm380_vm0, %v925_v5  ;;  %v926_v13 = vld [vmem:[%s1099_s15 + $0x20] ss:$8 sps:$4 sm:$0xff]   ;;  %v932_v15 = vld [vmem:[%s1099_s15 + $0x34] ss:$8 sps:$4 sm:$0xff]  }
  0x1a   : > { %811 = vmatprep.mubr.msk.bf16.mxu1 %vm380_vm0, %v928_v6  ;;  %v931_v16 = vld [vmem:[%s1099_s15 + $0x10] ss:$8 sps:$4 sm:$0xff]   ;;  %s226_s7 = sand.u32 1, %s989_s19   ;;  %s851_s12 = sshll.u32 %s1056_s22, 9 }
  0x1b   : > { %400 = vmatpush1.bf16.msra.mxu0 %v917_v4  ;;  %864 = vmatpush1.bf16.msra.mxu1 %v917_v4  ;;  %v934_v17 = vld [vmem:[%s1099_s15 + $0x30] ss:$8 sps:$4 sm:$0xff]   ;;  %s1000_s15 = smov 112   ;;  %s783_s10 = sshll.u32 %s226_s7, 5 }
  0x1c   : > { %401 = vmatprep.subr.bf16.mxu0 %v999_v1  ;;  %856 = vmatprep.subr.bf16.mxu1 %v999_v1  ;;  %s228_s11 = scalar_lea.vmem [#allocation2], %s783_s10  ;;  %s1219_s17 = scalar_lea.hbm %s1273_s4, %s851_s12 }
  0x1d   : > { %s663_s13 = sshll.u32 %s228_s11, 4  ;;  %s1224_s22 = scalar_lea.sflag [#allocation3], %s226_s7  ;;  %s1221_s13 = int_to_ptr.vmem [resolvable:$true] %s663_s13 }
  0x1e   : > { %s935_s23 = scalar_lea.vmem %s1221_s13, 512 }
  0x1f   : > { %402 = vmatpush1.bf16.msra.mxu0 %v918_v7  ;;  %865 = vmatpush1.bf16.msra.mxu1 %v918_v7  ;;  %p936_p11 = scmp.ne.s32.totalorder %s1221_s13, %s935_s23 }
  0x20   : > { %403 = vmatprep.subr.bf16.mxu0 %v999_v1  ;;  %857 = vmatprep.subr.bf16.mxu1 %v999_v1 }
  0x21   : > { %p937_p12 = pnand %p936_p11, %p1073_p5 }
  0x23   : > { %404 = vmatpush1.bf16.msra.mxu0 %v919_v8  ;;  %866 = vmatpush1.bf16.msra.mxu1 %v919_v8  ;;  %p938_p13 = pneg %p937_p12 }
  0x24   : > { %405 = vmatprep.subr.bf16.mxu0 %v999_v1  ;;  %858 = vmatprep.subr.bf16.mxu1 %v999_v1 }
  0x27   : > { %406 = vmatpush1.bf16.msra.mxu0 %v920_v9  ;;  %867 = vmatpush1.bf16.msra.mxu1 %v920_v9 }
  0x28   : > { %407 = vmatprep.subr.bf16.mxu0 %v999_v1  ;;  %859 = vmatprep.subr.bf16.mxu1 %v999_v1 }
  0x2b   : > { %408 = vmatpush1.bf16.msra.mxu0 %v921_v10  ;;  %868 = vmatpush1.bf16.msra.mxu1 %v921_v10 }
  0x2c   : > { %409 = vmatprep.subr.bf16.mxu0 %v999_v1  ;;  %860 = vmatprep.subr.bf16.mxu1 %v999_v1 }
  0x2f   : > { %410 = vmatpush1.bf16.msra.mxu0 %v922_v11  ;;  %869 = vmatpush1.bf16.msra.mxu1 %v922_v11 }
  0x32   : > { %426 = vmatmul.mubr.bf16.vlgmr.msra.gmra.mrb[0].mxu0 %v923_v12  ;;  %442 = vmatmul.mubr.bf16.vlgmr.msra.gmra.mrb[0].mxu1 %v926_v13 }
  0x33   : > { %810 = vmatprep.mubr.msk.bf16.mxu0 %vm380_vm0, %v929_v14  ;;  %812 = vmatprep.mubr.msk.bf16.mxu1 %vm380_vm0, %v932_v15 }
  0x3a   : > { %434 = vmatmul.mubr.bf16.gmra.mrb[4].mxu0 %v931_v16  ;;  %450 = vmatmul.mubr.bf16.gmra.mrb[4].mxu1 %v934_v17 }
 0x105   : > { %v427_v19 = vpop.f32.mrb[0].mxu0  ;;  %v443_v20 = vpop.f32.mrb[0].mxu1 }
 0x106   : > { %v428_v21 = vadd.f32 %v791_v18, %v427_v19  ;;  %v444_v22 = vadd.f32 %v791_v18, %v443_v20  ;;  %v429_v23 = vpop.f32.mrb[1].mxu0  ;;  %v445_v24 = vpop.f32.mrb[1].mxu1 }
 0x107   : > { %v430_v25 = vpop.f32.mrb[2].mxu0  ;;  %v446_v26 = vpop.f32.mrb[2].mxu1 }
 0x108   : > { %v458_v27 = vmax.f32 %v428_v21, 0.0  ;;  %v447_v28 = vadd.f32 %v791_v18, %v446_v26  ;;  %v432_v29 = vpop.f32.mrb[3].mxu0  ;;  %v448_v30 = vpop.f32.mrb[3].mxu1  ;;  %v462_v31 = vmax.f32 %v444_v22, 0.0  ;;  %v431_v33 = vadd.f32 %v791_v18, %v430_v25 }
 0x10a   : > { %v463_v32 = vmax.f32 %v447_v28, 0.0  ;;  %474 = vrot.lane.b32.xlu0 %v458_v27, %s1000_s15  ;;  %v459_v42 = vmax.f32 %v431_v33, 0.0  ;;  %v843_v51 = vpack.c.bf16 %v458_v27, %v458_v27  ;;  %v847_v53 = vpack.c.bf16 %v462_v31, %v462_v31 }
 0x10c   : > { %484 = vrot.lane.b32.xlu1 %v463_v32, %s1000_s15  ;;  %v844_v52 = vpack.c.bf16 %v459_v42, %v459_v42  ;;  %v848_v54 = vpack.c.bf16 %v463_v32, %v463_v32 }
 0x10d   : > { %v435_v34 = vpop.f32.mrb[4].mxu0  ;;  %v451_v35 = vpop.f32.mrb[4].mxu1 }
 0x10e   : > { %v436_v36 = vadd.f32 %v791_v18, %v435_v34  ;;  %482 = vrot.lane.b32.xlu0 %v462_v31, %s1000_s15  ;;  %v437_v37 = vpop.f32.mrb[5].mxu0  ;;  %v452_v38 = vadd.f32 %v791_v18, %v451_v35  ;;  %v453_v39 = vpop.f32.mrb[5].mxu1 }
 0x10f   : > { %v438_v40 = vpop.f32.mrb[6].mxu0  ;;  %v454_v41 = vpop.f32.mrb[6].mxu1 }
 0x110   : > { %v460_v43 = vmax.f32 %v436_v36, 0.0  ;;  %v439_v44 = vadd.f32 %v791_v18, %v438_v40  ;;  %v440_v45 = vpop.f32.mrb[7].mxu0  ;;  %v456_v46 = vpop.f32.mrb[7].mxu1  ;;  %v1134_v48 = vmax.f32 %v452_v38, 0.0  ;;  %v455_v49 = vadd.f32 %v791_v18, %v454_v41 }
 0x112   : > { %v461_v47 = vmax.f32 %v439_v44, 0.0  ;;  %478 = vrot.lane.b32.xlu1 %v460_v43, %s1000_s15  ;;  %476 = vrot.lane.b32.xlu0 %v459_v42, %s1000_s15  ;;  %v1136_v50 = vmax.f32 %v455_v49, 0.0  ;;  %v845_v55 = vpack.c.bf16 %v460_v43, %v460_v43  ;;  %v849_v18 = vpack.c.bf16 %v1134_v48, %v1134_v48 }
 0x114   : > { %v846_v56 = vpack.c.bf16 %v461_v47, %v461_v47  ;;  %v850_v23 = vpack.c.bf16 %v1136_v50, %v1136_v50 }
 0x116   : > { %480 = vrot.lane.b32.xlu1 %v461_v47, %s1000_s15  ;;  %486 = vrot.lane.b32.xlu0 %v1134_v48, %s1000_s15 }
 0x11a   : > { %488 = vrot.lane.b32.xlu1 %v1136_v50, %s1000_s15  ;;  %603 = vrot.lane.b32.xlu0 %v843_v51, %s1001_s16 }
 0x11e   : > { %605 = vrot.lane.b32.xlu1 %v844_v52, %s1001_s16  ;;  %611 = vrot.lane.b32.xlu0 %v847_v53, %s1001_s16 }
 0x122   : > { %613 = vrot.lane.b32.xlu1 %v848_v54, %s1001_s16  ;;  %607 = vrot.lane.b32.xlu0 %v845_v55, %s1001_s16 }
 0x126   : > { %609 = vrot.lane.b32.xlu1 %v846_v56, %s1001_s16 }
 0x17c   : > { %v475_v57 = vpop.permute.xlu0 %474 }
 0x17d   : > { %v498_v58 = vadd.f32 %v475_v57, %v458_v27 }
 0x17e   : > { %v485_v59 = vpop.permute.xlu1 %484 }
 0x17f   : > { %v835_v60 = vpack.c.bf16 %v498_v58, %v498_v58  ;;  %v503_v61 = vadd.f32 %v485_v59, %v463_v32 }
 0x180   : > { %v483_v62 = vpop.permute.xlu0 %482 }
 0x181   : > { %539 = vst.msk [vmem:[%s1152_s26] sm:$0xf] %vm538_vm1, %v835_v60  ;;  %v840_v63 = vpack.c.bf16 %v503_v61, %v503_v61  ;;  %v502_v0 = vadd.f32 %v483_v62, %v462_v31  ;;  %547 = vrot.lane.b32.xlu0 %v835_v60, %s1002_s30 }
 0x183   : > { %544 = vst.msk [vmem:[%s1152_s26 + $0x14] sm:$0xf] %vm538_vm1, %v840_v63  ;;  %v839_v1 = vpack.c.bf16 %v502_v0, %v502_v0 }
 0x184   : > { %v479_v2 = vpop.permute.xlu1 %478  ;;  %v477_v3 = vpop.permute.xlu0 %476 }
 0x185   : > { %543 = vst.msk [vmem:[%s1152_s26 + $0x10] sm:$0xf] %vm538_vm1, %v839_v1  ;;  %v500_v4 = vadd.f32 %v479_v2, %v460_v43  ;;  %v499_v5 = vadd.f32 %v477_v3, %v459_v42  ;;  %555 = vrot.lane.b32.xlu0 %v839_v1, %s1002_s30 }
 0x187   : > { %v837_v6 = vpack.c.bf16 %v500_v4, %v500_v4  ;;  %v836_v7 = vpack.c.bf16 %v499_v5, %v499_v5 }
 0x188   : > { %v481_v8 = vpop.permute.xlu1 %480  ;;  %v487_v9 = vpop.permute.xlu0 %486 }
 0x189   : > { %541 = vst.msk [vmem:[%s1152_s26 + $0x8] sm:$0xf] %vm538_vm1, %v837_v6  ;;  %540 = vst.msk [vmem:[%s1152_s26 + $0x4] sm:$0xf] %vm538_vm1, %v836_v7  ;;  %v501_v10 = vadd.f32 %v481_v8, %v461_v47  ;;  %v504_v11 = vadd.f32 %v487_v9, %v1134_v48  ;;  %549 = vrot.lane.b32.xlu1 %v836_v7, %s1002_s30  ;;  %551 = vrot.lane.b32.xlu0 %v837_v6, %s1002_s30 }
 0x18b   : > { %v838_v12 = vpack.c.bf16 %v501_v10, %v501_v10  ;;  %v841_v13 = vpack.c.bf16 %v504_v11, %v504_v11 }
 0x18c   : > { %v489_v14 = vpop.permute.xlu1 %488  ;;  %v604_v15 = vpop.permute.xlu0 %603 }
 0x18d   : > { %542 = vst.msk [vmem:[%s1152_s26 + $0xc] sm:$0xf] %vm538_vm1, %v838_v12  ;;  %545 = vst.msk [vmem:[%s1152_s26 + $0x18] sm:$0xf] %vm538_vm1, %v841_v13  ;;  %v505_v16 = vadd.f32 %v489_v14, %v1136_v50  ;;  %557 = vrot.lane.b32.xlu1 %v840_v63, %s1002_s30  ;;  %559 = vrot.lane.b32.xlu0 %v841_v13, %s1002_s30 }
 0x18e   : > { %627 = vst.msk [vmem:[%s1174_s9] sm:$0xf] %vm538_vm1, %v604_v15 }
 0x18f   : > { %v842_v17 = vpack.c.bf16 %v505_v16, %v505_v16 }
 0x190   : > { %v606_v19 = vpop.permute.xlu1 %605  ;;  %v612_v20 = vpop.permute.xlu0 %611 }
 0x191   : > { %546 = vst.msk [vmem:[%s1152_s26 + $0x1c] sm:$0xf] %vm538_vm1, %v842_v17  ;;  %628 = vst.msk [vmem:[%s1174_s9 + $0x4] sm:$0xf] %vm538_vm1, %v606_v19  ;;  %553 = vrot.lane.b32.xlu1 %v838_v12, %s1002_s30  ;;  %615 = vrot.lane.b32.xlu0 %v849_v18, %s1001_s16  ;;  %s939_s26 = sshll.u32 %s1003_s25, 4  ;;  %s940_s26 = int_to_ptr.vmem [resolvable:$false] %s939_s26 }
 0x192   : > { %631 = vst.msk [vmem:[%s1174_s9 + $0x10] sm:$0xf] %vm538_vm1, %v612_v20  ;;  %p942_p0 = scmp.lt.s32.totalorder %s1221_s13, %s940_s26 }
 0x194   : > { %v614_v21 = vpop.permute.xlu1 %613  ;;  %v608_v22 = vpop.permute.xlu0 %607 }
 0x195   : > { %632 = vst.msk [vmem:[%s1174_s9 + $0x14] sm:$0xf] %vm538_vm1, %v614_v21  ;;  %629 = vst.msk [vmem:[%s1174_s9 + $0x8] sm:$0xf] %vm538_vm1, %v608_v22  ;;  %561 = vrot.lane.b32.xlu1 %v842_v17, %s1002_s30  ;;  %s941_s30 = scalar_lea.vmem %s940_s26, 1024 }
 0x196   : > { %p943_p1 = scmp.lt.s32.totalorder %s941_s30, %s935_s23 }
 0x198   : > { %v610_v24 = vpop.permute.xlu1 %609  ;;  %p944_p2 = por %p943_p1, %p942_p0 }
 0x199   : > { %630 = vst.msk [vmem:[%s1174_s9 + $0xc] sm:$0xf] %vm538_vm1, %v610_v24  ;;  %617 = vrot.lane.b32.xlu1 %v850_v23, %s1001_s16 }
 0x19a   : > { %p945_p3 = pnand %p944_p2, %p938_p13 }
 0x1f3   : > { %v548_v25 = vpop.permute.xlu0 %547 }
 0x1f4   : > { %571 = vst.msk [vmem:[%s228_s11] sm:$0xf] %vm538_vm1, %v548_v25 }
 0x1f7   : > { %v556_v26 = vpop.permute.xlu0 %555 }
 0x1f8   : > { %575 = vst.msk [vmem:[%s228_s11 + $0x10] sm:$0xf] %vm538_vm1, %v556_v26 }
 0x1fb   : > { %v550_v27 = vpop.permute.xlu1 %549  ;;  %v552_v28 = vpop.permute.xlu0 %551 }
 0x1fc   : > { %572 = vst.msk [vmem:[%s228_s11 + $0x4] sm:$0xf] %vm538_vm1, %v550_v27  ;;  %573 = vst.msk [vmem:[%s228_s11 + $0x8] sm:$0xf] %vm538_vm1, %v552_v28 }
 0x1ff   : > { %v558_v29 = vpop.permute.xlu1 %557  ;;  %v560_v30 = vpop.permute.xlu0 %559 }
 0x200   : > { %576 = vst.msk [vmem:[%s228_s11 + $0x14] sm:$0xf] %vm538_vm1, %v558_v29  ;;  %577 = vst.msk [vmem:[%s228_s11 + $0x18] sm:$0xf] %vm538_vm1, %v560_v30 }
 0x203   : > { %v554_v31 = vpop.permute.xlu1 %553  ;;  %v616_v32 = vpop.permute.xlu0 %615 }
 0x204   : > { %574 = vst.msk [vmem:[%s228_s11 + $0xc] sm:$0xf] %vm538_vm1, %v554_v31  ;;  %633 = vst.msk [vmem:[%s1174_s9 + $0x18] sm:$0xf] %vm538_vm1, %v616_v32 }
 0x207   : > { %v562_v33 = vpop.permute.xlu1 %561 }
 0x208   : > { %578 = vst.msk [vmem:[%s228_s11 + $0x1c] sm:$0xf] %vm538_vm1, %v562_v33 }
 0x209   : > { %948 = shalt.err (!%p945_p3)
}
 0x20a   : > { %s949_s6 = scalar_lea.hbm %s1219_s17, 512  ;;  %s953_s10 = scalar_lea.hbm %s1273_s4, 1024 }
 0x20b   : > { %p950_p4 = scmp.ne.s32.totalorder %s1219_s17, %s949_s6  ;;  %p954_p9 = scmp.lt.u32.totalorder %s1219_s17, %s1273_s4 }
 0x20c   : > { %p955_p10 = scmp.lt.u32.totalorder %s953_s10, %s949_s6  ;;  %p957_p12 = scmp.lt.u32.totalorder %s949_s6, %s1219_s17 }
 0x20d   : > { %p951_p7 = pnand %p950_p4, %p1073_p5 }
 0x20e   : > { %p956_p11 = por %p955_p10, %p954_p9 }
 0x20f   : > { %p952_p8 = pneg %p951_p7 }
 0x210   : > { %p958_p13 = por %p957_p12, %p956_p11 }
 0x212   : > { %p959_p0 = pnand %p958_p13, %p952_p8 }
 0x214   : > { %962 = shalt.err (!%p959_p0)
}
 0x215   : > { %s1004_s14 = smov 4   ;;  %v618_v34 = vpop.permute.xlu1 %617 }
 0x216   : > { %870 = dma.vmem_to_hbm [thread:$0]  (%p1073_p5), %s1221_s13, 512, %s1219_s17, %s1224_s22, %s1001_s16, %s1001_s16, %s1004_s14  }
 0x217   : > { %634 = vst.msk [vmem:[%s1174_s9 + $0x1c] sm:$0xf] %vm538_vm1, %v618_v34 }
 0x218 PF: > { %p876_p1 = scmp.ge.s32.totalorder %s997_s21, 2  ;;  %s690_s15 = sand.u32 1, %s985_s18  }
 0x219   : > { %s691_s23 = scalar_lea.sflag [#allocation3], %s690_s15 }
 0x21a   : > { %p873_p2 = pnand %p876_p1, %p1077_p6 }
 0x21c   : > { %980 = dma.done.wait (!%p873_p2), %s691_s23, 512  }
 0x21d   : > { %982 = vsyncadd (!%p873_p2), %s691_s23, 4294966784  ;;  %p16_p5 = scmp.ge.s32.totalorder %s1060_s24, 4   ;;  %s1277_s18 = smov %s989_s19 }
 0x21e   : > { %s1278_s19 = smov %s993_s20  ;;  %s1279_s20 = smov %s1071_s27 }
 0x21f   : > { %s1280_s21 = smov %s1060_s24  ;;  %18 = sbr.rel (!%p16_p5) target bundleno = 3 (0x3), region = 91 }
 0x226   :  { %704 = vsyncpa [#allocation3], 1 }
 0x227   :  { %706 = vsyncpa [#allocation3 + $0x1], 1 }

// kernel: a_call__.26
= control target key start
LH: loop header
LB: loop body
LE: loop exit
PB: predicated region body
PF: predicated region fallthrough
CT: control target
= control target key end

     0   :  { %v674_v2 = vmov 0   ;;  %vm285_vm0 = vcmask 261120   ;;  %s894_s0 = inlined_call_operand.vmem [shape: bf16[32,288], index: 0, kind: input, shape index: {}]   ;;  %s895_s1 = inlined_call_operand.vmem [shape: bf16[288,160], index: 1, kind: input, shape index: {}]   ;;  %s896_s2 = inlined_call_operand.vmem [shape: f32[1,160], index: 2, kind: input, shape index: {}]   ;;  %s897_s3 = inlined_call_operand.vmem [shape: bf16[32,32], index: 3, kind: output, shape index: {0}]   ;;  %s898_s4 = inlined_call_operand.hbm [shape: bf16[32,32], index: 4, kind: output, shape index: {1}]   ;;  %s899_s5 = inlined_call_operand.vmem [shape: bf16[32,32], index: 5, kind: output, shape index: {2}]  }
   0x1   :  { %v588_v0 = vld [vmem:[%s895_s1 + $0x4] ss:$8 sps:$4 sm:$0xff]   ;;  %v590_v1 = vld [vmem:[%s895_s1] ss:$8 sps:$4 sm:$0xff]   ;;  %377 = vmatprep.mubr.bf16.mxu0 %v674_v2  ;;  %v591_v3 = vld [vmem:[%s895_s1 + $0x14] ss:$8 sps:$4 sm:$0xff]  }
   0x2   :  { %292 = vmatprep.subr.bf16.mxu1 %v588_v0  ;;  %v593_v4 = vld [vmem:[%s895_s1 + $0x10] ss:$8 sps:$4 sm:$0xff]   ;;  %v594_v5 = vld [vmem:[%s895_s1 + $0x24] ss:$8 sps:$4 sm:$0xff]   ;;  %v596_v6 = vld [vmem:[%s895_s1 + $0x20] ss:$8 sps:$4 sm:$0xff]  }
   0x3   :  { %293 = vmatpush1.bf16.msra.mxu1 %v590_v1  ;;  %v597_v7 = vld [vmem:[%s895_s1 + $0x34] ss:$8 sps:$4 sm:$0xff]   ;;  %v599_v8 = vld [vmem:[%s895_s1 + $0x30] ss:$8 sps:$4 sm:$0xff]   ;;  %v600_v9 = vld [vmem:[%s895_s1 + $0x44] ss:$8 sps:$4 sm:$0xff]  }
   0x4   :  { %294 = vmatprep.subr.bf16.mxu1 %v591_v3  ;;  %v602_v10 = vld [vmem:[%s895_s1 + $0x40] ss:$8 sps:$4 sm:$0xff]   ;;  %v603_v11 = vld [vmem:[%s895_s1 + $0x54] ss:$8 sps:$4 sm:$0xff]   ;;  %v605_v12 = vld [vmem:[%s895_s1 + $0x50] ss:$8 sps:$4 sm:$0xff]  }
   0x5   :  { %v630_v13 = vld [vmem:[%s895_s1 + $0x104] ss:$8 sps:$4 sm:$0xff]   ;;  %v634_v15 = vld [vmem:[%s895_s1 + $0x100] ss:$8 sps:$4 sm:$0xff]   ;;  %v636_v16 = vld [vmem:[%s895_s1 + $0x114] ss:$8 sps:$4 sm:$0xff]  }
   0x6   :  { %v606_v14 = vld [vmem:[%s895_s1 + $0x64] ss:$8 sps:$4 sm:$0xff]   ;;  %345 = vmatprep.subr.bf16.mxu0 %v630_v13  ;;  %v608_v17 = vld [vmem:[%s895_s1 + $0x60] ss:$8 sps:$4 sm:$0xff]   ;;  %v640_v18 = vld [vmem:[%s895_s1 + $0x110] ss:$8 sps:$4 sm:$0xff]  }
   0x7   :  { %295 = vmatpush1.bf16.msra.mxu1 %v593_v4  ;;  %346 = vmatpush1.bf16.msra.mxu0 %v634_v15  ;;  %v609_v19 = vld [vmem:[%s895_s1 + $0x74] ss:$8 sps:$4 sm:$0xff]   ;;  %v644_v20 = vld [vmem:[%s894_s0 + $0x4] ss:$12 sps:$4 sm:$0xff]  }
   0x8   :  { %296 = vmatprep.subr.bf16.mxu1 %v594_v5  ;;  %347 = vmatprep.subr.bf16.mxu0 %v636_v16  ;;  %v645_v21 = vld [vmem:[%s894_s0 + $0x8] ss:$12 sps:$4 sm:$0xff]   ;;  %v611_v22 = vld [vmem:[%s895_s1 + $0x70] ss:$8 sps:$4 sm:$0xff]   ;;  %v612_v23 = vld [vmem:[%s895_s1 + $0x84] ss:$8 sps:$4 sm:$0xff]  }
   0x9   :  { %324 = vmatprep.mubr.bf16.mxu1 %v644_v20 }
   0xb   :  { %297 = vmatpush1.bf16.msra.mxu1 %v596_v6  ;;  %348 = vmatpush1.bf16.msra.mxu0 %v640_v18 }
   0xc   :  { %298 = vmatprep.subr.bf16.mxu1 %v597_v7 }
   0xf   :  { %299 = vmatpush1.bf16.msra.mxu1 %v599_v8 }
  0x10   :  { %300 = vmatprep.subr.bf16.mxu1 %v600_v9 }
  0x13   :  { %301 = vmatpush1.bf16.msra.mxu1 %v602_v10 }
  0x14   :  { %302 = vmatprep.subr.bf16.mxu1 %v603_v11 }
  0x17   :  { %303 = vmatpush1.bf16.msra.mxu1 %v605_v12 }
  0x18   :  { %304 = vmatprep.subr.bf16.mxu1 %v606_v14 }
  0x1b   :  { %305 = vmatpush1.bf16.msra.mxu1 %v608_v17 }
  0x1c   :  { %306 = vmatprep.subr.bf16.mxu1 %v609_v19 }
  0x1d   :  { %11 = vsyncpa [#allocation3], 0  ;;  %549 = vmatmul.mubr.msk.bf16.vlgmr.msra.gmra.mrb[0].mxu0 %vm285_vm0, %v645_v21  ;;  %v614_v24 = vld [vmem:[%s895_s1 + $0x80] ss:$8 sps:$4 sm:$0xff]   ;;  %v615_v25 = vld [vmem:[%s895_s1 + $0x94] ss:$8 sps:$4 sm:$0xff]   ;;  %v65_v51 = vlaneseq }
  0x1e   :  { %387 = vmatprep.mubr.bf16.mxu0 %v674_v2  ;;  %v648_v26 = vld [vmem:[%s894_s0 + $0x20] ss:$12 sps:$4 sm:$0xff]   ;;  %v617_v27 = vld [vmem:[%s895_s1 + $0x90] ss:$8 sps:$4 sm:$0xff]   ;;  %v621_v30 = vld [vmem:[%s895_s1 + $0xb4] ss:$8 sps:$4 sm:$0xff]  }
  0x1f   :  { %307 = vmatpush1.bf16.msra.mxu1 %v611_v22  ;;  %v618_v28 = vld [vmem:[%s895_s1 + $0xa4] ss:$8 sps:$4 sm:$0xff]   ;;  %v620_v29 = vld [vmem:[%s895_s1 + $0xa0] ss:$8 sps:$4 sm:$0xff]   ;;  %v623_v31 = vld [vmem:[%s895_s1 + $0xb0] ss:$8 sps:$4 sm:$0xff]  }
  0x20   :  { %308 = vmatprep.subr.bf16.mxu1 %v612_v23  ;;  %v624_v32 = vld [vmem:[%s895_s1 + $0xc4] ss:$8 sps:$4 sm:$0xff]   ;;  %v626_v33 = vld [vmem:[%s895_s1 + $0xc0] ss:$8 sps:$4 sm:$0xff]   ;;  %v627_v34 = vld [vmem:[%s895_s1 + $0xd4] ss:$8 sps:$4 sm:$0xff]  }
  0x21   :  { %v629_v35 = vld [vmem:[%s895_s1 + $0xd0] ss:$8 sps:$4 sm:$0xff]   ;;  %v632_v36 = vld [vmem:[%s895_s1 + $0xe4] ss:$8 sps:$4 sm:$0xff]   ;;  %v635_v37 = vld [vmem:[%s895_s1 + $0xe0] ss:$8 sps:$4 sm:$0xff]  }
  0x22   :  { %v638_v38 = vld [vmem:[%s895_s1 + $0xf4] ss:$8 sps:$4 sm:$0xff]   ;;  %v641_v39 = vld [vmem:[%s895_s1 + $0xf0] ss:$8 sps:$4 sm:$0xff]   ;;  %v642_v40 = vld [vmem:[%s894_s0] ss:$12 sps:$4 sm:$0xff]  }
  0x23   :  { %309 = vmatpush1.bf16.msra.mxu1 %v614_v24  ;;  %v646_v41 = vld [vmem:[%s894_s0 + $0x1c] ss:$12 sps:$4 sm:$0xff]   ;;  %v649_v42 = vld [vmem:[%s894_s0 + $0x18] ss:$12 sps:$4 sm:$0xff]   ;;  %v66_v52 = vshrl.u32 %v65_v51, 7  ;;  %vm442_vm1 = vcmask 257024  }
  0x24   :  { %310 = vmatprep.subr.bf16.mxu1 %v615_v25  ;;  %v63_v54 = vld [vmem:[%s896_s2] sm:$0x3]  ;;  %s675_s0 = smov 96   ;;  %s676_s12 = smov 64  }
  0x25   :  { %550 = vmatmul.mubr.msk.bf16.gmra.mrb[4].mxu0 %vm285_vm0, %v648_v26  ;;  %v67_v53 = vsub.s32 0, %v66_v52  ;;  %v71_v55 = vsub.s32 1, %v66_v52  ;;  %s677_s18 = smov [#allocation2]  }
  0x26   :  { %s490_s19 = sshll.u32 %s677_s18, 4  ;;  %s491_s19 = int_to_ptr.vmem [resolvable:$true] %s490_s19 }
  0x27   :  { %311 = vmatpush1.bf16.msra.mxu1 %v617_v27  ;;  %v68_v56 = vrot.slane %v63_v54, %v67_v53  ;;  %v72_v57 = vrot.slane %v63_v54, %v71_v55  ;;  %s650_s20 = scalar_lea.vmem %s491_s19, 256  ;;  %p655_p1 = scmp.lt.s32.totalorder %s491_s19, %s491_s19 }
  0x28   :  { %312 = vmatprep.subr.bf16.mxu1 %v618_v28  ;;  %p651_p0 = scmp.ne.s32.totalorder %s491_s19, %s650_s20  ;;  %p656_p2 = scmp.lt.s32.totalorder %s650_s20, %s650_s20 }
  0x2a   :  { %p657_p3 = por %p656_p2, %p655_p1 }
  0x2b   :  { %313 = vmatpush1.bf16.msra.mxu1 %v620_v29 }
  0x2c   :  { %314 = vmatprep.subr.bf16.mxu1 %v621_v30  ;;  %p658_p4 = pnand %p657_p3, %p651_p0 }
  0x2f   :  { %315 = vmatpush1.bf16.msra.mxu1 %v623_v31 }
  0x30   :  { %316 = vmatprep.subr.bf16.mxu1 %v624_v32 }
  0x33   :  { %317 = vmatpush1.bf16.msra.mxu1 %v626_v33 }
  0x34   :  { %318 = vmatprep.subr.bf16.mxu1 %v627_v34 }
  0x37   :  { %319 = vmatpush1.bf16.msra.mxu1 %v629_v35 }
  0x38   :  { %320 = vmatprep.subr.bf16.mxu1 %v632_v36 }
  0x3b   :  { %321 = vmatpush1.bf16.msra.mxu1 %v635_v37 }
  0x3c   :  { %322 = vmatprep.subr.bf16.mxu1 %v638_v38 }
  0x3f   :  { %323 = vmatpush1.bf16.msra.mxu1 %v641_v39 }
  0x42   :  { %325 = vmatmul.mubr.bf16.vlgmr.msra.gmra.mrb[0].mxu1 %v642_v40 }
  0x43   :  { %334 = vmatprep.mubr.bf16.mxu1 %v646_v41 }
  0x4a   :  { %335 = vmatmul.mubr.bf16.gmra.mrb[4].mxu1 %v649_v42 }
  0xf0   :  { %v379_v43 = vpop.f32.mrb[0].mxu0 }
  0xf1   :  { %v381_v44 = vpop.f32.mrb[1].mxu0 }
  0xf2   :  { %v383_v45 = vpop.f32.mrb[2].mxu0 }
  0xf3   :  { %v385_v46 = vpop.f32.mrb[3].mxu0 }
  0xf8   :  { %v389_v47 = vpop.f32.mrb[4].mxu0 }
  0xf9   :  { %v391_v48 = vpop.f32.mrb[5].mxu0 }
  0xfa   :  { %v393_v49 = vpop.f32.mrb[6].mxu0 }
  0xfb   :  { %v395_v50 = vpop.f32.mrb[7].mxu0 }
 0x115   :  { %v326_v58 = vpop.f32.mrb[0].mxu1 }
 0x116   :  { %v327_v59 = vadd.f32 %v326_v58, %v68_v56  ;;  %v328_v60 = vpop.f32.mrb[1].mxu1 }
 0x117   :  { %v329_v61 = vadd.f32 %v328_v60, %v72_v57  ;;  %v330_v62 = vpop.f32.mrb[2].mxu1 }
 0x118   :  { %v331_v63 = vadd.f32 %v330_v62, %v68_v56  ;;  %v332_v0 = vpop.f32.mrb[3].mxu1  ;;  %v380_v1 = vadd.f32 %v379_v43, %v327_v59 }
 0x119   :  { %v382_v2 = vadd.f32 %v381_v44, %v329_v61  ;;  %v333_v3 = vadd.f32 %v332_v0, %v72_v57 }
 0x11a   :  { %v384_v4 = vadd.f32 %v383_v45, %v331_v63  ;;  %v398_v5 = vmax.f32 %v380_v1, 0.0 }
 0x11b   :  { %v399_v6 = vmax.f32 %v382_v2, 0.0  ;;  %v386_v7 = vadd.f32 %v385_v46, %v333_v3 }
 0x11c   :  { %410 = vrot.lane.b32.xlu0 %v398_v5, %s675_s0  ;;  %v400_v11 = vmax.f32 %v384_v4, 0.0 }
 0x11d   :  { %v563_v8 = vpack.c.bf16 %v399_v6, %v399_v6  ;;  %v401_v9 = vmax.f32 %v386_v7, 0.0  ;;  %v336_v10 = vpop.f32.mrb[4].mxu1 }
 0x11e   :  { %v337_v12 = vadd.f32 %v336_v10, %v68_v56  ;;  %v338_v13 = vpop.f32.mrb[5].mxu1 }
 0x11f   :  { %479 = vst.msk [vmem:[%s899_s5] sm:$0xf] %vm442_vm1, %v563_v8  ;;  %v564_v14 = vpack.c.bf16 %v401_v9, %v401_v9  ;;  %v339_v15 = vadd.f32 %v338_v13, %v72_v57  ;;  %v340_v16 = vpop.f32.mrb[6].mxu1 }
 0x120   :  { %v341_v17 = vadd.f32 %v340_v16, %v68_v56  ;;  %v342_v18 = vpop.f32.mrb[7].mxu1  ;;  %412 = vrot.lane.b32.xlu0 %v400_v11, %s675_s0  ;;  %v390_v19 = vadd.f32 %v389_v47, %v337_v12 }
 0x121   :  { %480 = vst.msk [vmem:[%s899_s5 + $0x4] sm:$0xf] %vm442_vm1, %v564_v14  ;;  %v392_v20 = vadd.f32 %v391_v48, %v339_v15  ;;  %v343_v21 = vadd.f32 %v342_v18, %v72_v57 }
 0x122   :  { %v394_v22 = vadd.f32 %v393_v49, %v341_v17  ;;  %v402_v23 = vmax.f32 %v390_v19, 0.0 }
 0x123   :  { %v403_v24 = vmax.f32 %v392_v20, 0.0  ;;  %v396_v25 = vadd.f32 %v395_v50, %v343_v21 }
 0x124   :  { %414 = vrot.lane.b32.xlu1 %v402_v23, %s675_s0  ;;  %v404_v28 = vmax.f32 %v394_v22, 0.0 }
 0x125   :  { %v565_v26 = vpack.c.bf16 %v403_v24, %v403_v24  ;;  %v405_v27 = vmax.f32 %v396_v25, 0.0 }
 0x127   :  { %481 = vst.msk [vmem:[%s899_s5 + $0x8] sm:$0xf] %vm442_vm1, %v565_v26  ;;  %v566_v29 = vpack.c.bf16 %v405_v27, %v405_v27 }
 0x128   :  { %416 = vrot.lane.b32.xlu1 %v404_v28, %s675_s0 }
 0x129   :  { %482 = vst.msk [vmem:[%s899_s5 + $0xc] sm:$0xf] %vm442_vm1, %v566_v29 }
 0x18e   :  { %v411_v30 = vpop.permute.xlu0 %410 }
 0x18f   :  { %v422_v31 = vadd.f32 %v411_v30, %v398_v5 }
 0x191   :  { %v559_v32 = vpack.c.bf16 %v422_v31, %v422_v31 }
 0x192   :  { %v413_v33 = vpop.permute.xlu0 %412 }
 0x193   :  { %443 = vst.msk [vmem:[%s897_s3] sm:$0xf] %vm442_vm1, %v559_v32  ;;  %v423_v34 = vadd.f32 %v413_v33, %v400_v11  ;;  %447 = vrot.lane.b32.xlu0 %v559_v32, %s676_s12 }
 0x195   :  { %v560_v35 = vpack.c.bf16 %v423_v34, %v423_v34 }
 0x196   :  { %v415_v36 = vpop.permute.xlu1 %414 }
 0x197   :  { %444 = vst.msk [vmem:[%s897_s3 + $0x4] sm:$0xf] %vm442_vm1, %v560_v35  ;;  %v424_v37 = vadd.f32 %v415_v36, %v402_v23  ;;  %449 = vrot.lane.b32.xlu1 %v560_v35, %s676_s12 }
 0x199   :  { %v561_v38 = vpack.c.bf16 %v424_v37, %v424_v37 }
 0x19a   :  { %v417_v39 = vpop.permute.xlu1 %416 }
 0x19b   :  { %445 = vst.msk [vmem:[%s897_s3 + $0x8] sm:$0xf] %vm442_vm1, %v561_v38  ;;  %v425_v40 = vadd.f32 %v417_v39, %v404_v28  ;;  %451 = vrot.lane.b32.xlu0 %v561_v38, %s676_s12 }
 0x19d   :  { %v562_v41 = vpack.c.bf16 %v425_v40, %v425_v40 }
 0x19f   :  { %446 = vst.msk [vmem:[%s897_s3 + $0xc] sm:$0xf] %vm442_vm1, %v562_v41  ;;  %453 = vrot.lane.b32.xlu1 %v562_v41, %s676_s12 }
 0x205   :  { %v448_v42 = vpop.permute.xlu0 %447 }
 0x206   :  { %459 = vst.msk [vmem:[#allocation2] sm:$0xf] %vm442_vm1, %v448_v42 }
 0x209   :  { %v450_v43 = vpop.permute.xlu1 %449 }
 0x20a   :  { %460 = vst.msk [vmem:[#allocation2 + $0x4] sm:$0xf] %vm442_vm1, %v450_v43 }
 0x20d   :  { %v452_v44 = vpop.permute.xlu0 %451 }
 0x20e   :  { %461 = vst.msk [vmem:[#allocation2 + $0x8] sm:$0xf] %vm442_vm1, %v452_v44 }
 0x211   :  { %v454_v45 = vpop.permute.xlu1 %453 }
 0x212   :  { %462 = vst.msk [vmem:[#allocation2 + $0xc] sm:$0xf] %vm442_vm1, %v454_v45 }
 0x213   :  { %661 = shalt.err (!%p658_p4)
}
 0x214   :  { %s662_s22 = scalar_lea.hbm %s898_s4, 256 }
 0x215   :  { %p663_p5 = scmp.ne.s32.totalorder %s898_s4, %s662_s22  ;;  %p666_p6 = scmp.lt.u32.totalorder %s662_s22, %s898_s4 }
 0x217   :  { %p668_p7 = pnand %p666_p6, %p663_p5 }
 0x219   :  { %671 = shalt.err (!%p668_p7)
}
 0x21a   :  { %s678_s1 = smov 4  }
 0x21b   :  { %496 = dma.vmem_to_hbm [thread:$0]  %s491_s19, 256, %s898_s4, [#allocation3], %s676_s12, %s676_s12, %s678_s1  }
 0x21c   :  { %672 = dma.done.wait [#allocation3], 256  }
 0x21d   :  { %673 = vsyncadd [#allocation3], 4294967040 }
 0x21e   :  { %506 = vsyncpa [#allocation3], 1 }

// kernel: a_call__.29
= control target key start
LH: loop header
LB: loop body
LE: loop exit
PB: predicated region body
PF: predicated region fallthrough
CT: control target
= control target key end

     0   :  { %v209_v3 = vmov 0.0|0.0   ;;  %vm210_vm0 = vmmov 0   ;;  %v211_v6 = vmov 0.0   ;;  %vm23_vm1 = vcmask 261120   ;;  %s271_s0 = inlined_call_operand.vmem [shape: bf16[2,16,32], index: 0, kind: input, shape index: {}]   ;;  %s272_s1 = inlined_call_operand.vmem [shape: f32[32,10], index: 1, kind: input, shape index: {}]   ;;  %s273_s2 = inlined_call_operand.vmem [shape: f32[1,10], index: 2, kind: input, shape index: {}]   ;;  %s274_s3 = inlined_call_operand.hbm [shape: f32[2,10], index: 3, kind: output, shape index: {}]  }
   0x1   :  { %v45_v0 = vld [vmem:[%s272_s1] sm:$0xff]  ;;  %v46_v1 = vld [vmem:[%s272_s1 + $0x8] sm:$0xff]  ;;  %v47_v2 = vld [vmem:[%s272_s1 + $0x10] sm:$0xff]  ;;  %175 = vmatprep.subr.bf16.mxu0 %v209_v3  ;;  %172 = vmatprep.mubr.msk.f32.mxu0 %vm210_vm0, %v211_v6 }
   0x2   :  { %v176_v4 = vpack.c.bf16 %v46_v1, %v45_v0  ;;  %v48_v5 = vld [vmem:[%s272_s1 + $0x18] sm:$0xff]  ;;  %v151_v7 = vld [vmem:[%s271_s0] sm:$0xff]   ;;  %v158_v8 = vld [vmem:[%s271_s0 + $0x8] sm:$0xff]  }
   0x3   :  { %v152_v9 = vunpack.c.l.bf16 %v151_v7  ;;  %v153_v10 = vunpack.c.h.bf16 %v151_v7  ;;  %v156_v11 = vunpack.c.l.bf16 %v158_v8 }
   0x4   :  { %8 = vsyncpa [#allocation3], 0  ;;  %177 = vmatpush3.bf16.msra.mxu0 %v176_v4  ;;  %v179_v12 = vpack.c.bf16 %v48_v5, %v47_v2  ;;  %v157_v13 = vunpack.c.h.bf16 %v158_v8  ;;  %vm58_vm2 = vcmask 1041409   ;;  %v148_v35 = vld [vmem:[%s273_s2] ss:$0 sm:$0xff]  ;;  %s212_s24 = smov [#allocation2]  }
   0x5   :  { %178 = vmatprep.subr.bf16.mxu0 %v209_v3  ;;  %v24_v14 = vsel %vm23_vm1, %v152_v9, 0.0  ;;  %v25_v15 = vsel %vm23_vm1, %v153_v10, 0.0  ;;  %v33_v16 = vsel %vm23_vm1, %v156_v11, 0.0  ;;  %s140_s25 = sshll.u32 %s212_s24, 4  ;;  %vm132_vm3 = vcmask 74752   ;;  %s141_s25 = int_to_ptr.vmem [resolvable:$true] %s140_s25 }
   0x6   :  { %v26_v17 = vadd.f32 %v25_v15, %v24_v14  ;;  %v34_v18 = vsel %vm23_vm1, %v157_v13, 0.0  ;;  %s185_s26 = scalar_lea.vmem %s141_s25, 32  ;;  %p190_p1 = scmp.lt.s32.totalorder %s141_s25, %s141_s25 }
   0x7   :  { %v35_v19 = vadd.f32 %v34_v18, %v33_v16  ;;  %p186_p0 = scmp.ne.s32.totalorder %s141_s25, %s185_s26  ;;  %p191_p2 = scmp.lt.s32.totalorder %s185_s26, %s185_s26 }
   0x8   :  { %180 = vmatpush3.bf16.msra.mxu0 %v179_v12  ;;  %v27_v20 = vrot.slane %v26_v17, 4 }
   0x9   :  { %v36_v21 = vrot.slane %v35_v19, 4  ;;  %p192_p3 = por %p191_p2, %p190_p1 }
   0xa   :  { %v28_v22 = vadd.f32 %v27_v20, %v26_v17 }
   0xb   :  { %v37_v23 = vadd.f32 %v36_v21, %v35_v19  ;;  %p193_p4 = pnand %p192_p3, %p186_p0 }
   0xc   :  { %v29_v24 = vrot.slane %v28_v22, 2 }
   0xd   :  { %v38_v25 = vrot.slane %v37_v23, 2 }
   0xe   :  { %v30_v26 = vadd.f32 %v29_v24, %v28_v22 }
   0xf   :  { %v39_v27 = vadd.f32 %v38_v25, %v37_v23 }
  0x10   :  { %v31_v28 = vrot.slane %v30_v26, 1 }
  0x11   :  { %v40_v29 = vrot.slane %v39_v27, 1 }
  0x12   :  { %v32_v30 = vadd.f32 %v31_v28, %v30_v26 }
  0x13   :  { %v41_v31 = vadd.f32 %v40_v29, %v39_v27 }
  0x14   :  { %v43_v32 = vmul.f32 0.0625, %v32_v30 }
  0x15   :  { %v44_v33 = vmul.f32 0.0625, %v41_v31 }
  0x17   :  { %v59_v34 = vsel %vm58_vm2, %v44_v33, %v43_v32 }
  0x18   :  { %173 = vmatmul.mubr.msk.f32.vlgmr.msra.gmra.mrb[0].mxu0 %vm23_vm1, %v59_v34 }
  0xeb   :  { %v128_v36 = vpop.f32.mrb[0].mxu0 }
  0xec   :  { %v129_v37 = vadd.f32 %v148_v35, %v128_v36  ;;  %v174_v38 = vpop.f32.mrb[1].mxu0 }
  0xee   :  { %133 = vst.msk [vmem:[#allocation2] sm:$0x3] %vm132_vm3, %v129_v37 }
  0xef   :  { %196 = shalt.err (!%p193_p4)
}
  0xf0   :  { %s197_s29 = scalar_lea.hbm %s274_s3, 32 }
  0xf1   :  { %p198_p5 = scmp.ne.s32.totalorder %s274_s3, %s197_s29  ;;  %p201_p6 = scmp.lt.u32.totalorder %s197_s29, %s274_s3 }
  0xf3   :  { %p203_p7 = pnand %p201_p6, %p198_p5 }
  0xf5   :  { %206 = shalt.err (!%p203_p7)
}
  0xf6   :  { %143 = dma.vmem_to_hbm [thread:$0]  %s141_s25, 32, %s274_s3, [#allocation3]  }
  0xf7   :  { %207 = dma.done.wait [#allocation3], 32  }
  0xf8   :  { %208 = vsyncadd [#allocation3], 4294967264 }
  0xf9   :  { %147 = vsyncpa [#allocation3], 1 }

// kernel: a_call__.27
= control target key start
LH: loop header
LB: loop body
LE: loop exit
PB: predicated region body
PF: predicated region fallthrough
CT: control target
= control target key end

     0   :  { %vm204_vm0 = vcmask 261120   ;;  %vm349_vm1 = vcmask 257024   ;;  %s568_s1 = inlined_call_operand.vmem [shape: bf16[288,64], index: 1, kind: input, shape index: {}]   ;;  %s569_s0 = inlined_call_operand.vmem [shape: bf16[32,288], index: 0, kind: input, shape index: {}]   ;;  %s570_s2 = inlined_call_operand.vmem [shape: f32[1,64], index: 2, kind: input, shape index: {}]   ;;  %s571_s3 = inlined_call_operand.vmem [shape: bf16[32,32], index: 3, kind: output, shape index: {}]  }
   0x1   :  { %v434_v0 = vld [vmem:[%s568_s1 + $0x40] sm:$0xff]   ;;  %v436_v2 = vld [vmem:[%s568_s1 + $0x48] sm:$0xff]   ;;  %v438_v4 = vld [vmem:[%s568_s1 + $0x50] sm:$0xff]  }
   0x2   :  { %v435_v1 = vld [vmem:[%s568_s1] sm:$0xff]   ;;  %393 = vmatprep.subr.bf16.mxu0 %v434_v0  ;;  %v437_v3 = vld [vmem:[%s568_s1 + $0x8] sm:$0xff]   ;;  %v439_v5 = vld [vmem:[%s568_s1 + $0x10] sm:$0xff]  }
   0x3   :  { %394 = vmatpush3.bf16.msra.mxu0 %v435_v1  ;;  %v440_v6 = vld [vmem:[%s568_s1 + $0x58] sm:$0xff]   ;;  %v442_v8 = vld [vmem:[%s568_s1 + $0x60] sm:$0xff]   ;;  %v444_v11 = vld [vmem:[%s568_s1 + $0x68] sm:$0xff]  }
   0x4   :  { %395 = vmatprep.subr.bf16.mxu0 %v436_v2  ;;  %v441_v7 = vld [vmem:[%s568_s1 + $0x18] sm:$0xff]   ;;  %v443_v9 = vld [vmem:[%s568_s1 + $0x20] sm:$0xff]   ;;  %v445_v12 = vld [vmem:[%s568_s1 + $0x28] sm:$0xff]  }
   0x5   :  { %v449_v10 = vld [vmem:[%s568_s1 + $0x80] sm:$0xff]   ;;  %v446_v13 = vld [vmem:[%s568_s1 + $0x70] sm:$0xff]   ;;  %v454_v15 = vld [vmem:[%s568_s1 + $0x88] sm:$0xff]  }
   0x6   :  { %425 = vmatprep.subr.bf16.mxu1 %v449_v10  ;;  %v453_v14 = vld [vmem:[%s569_s0 + $0x4] ss:$12 sps:$4 sm:$0xff]   ;;  %v455_v16 = vld [vmem:[%s569_s0 + $0x8] ss:$12 sps:$4 sm:$0xff]   ;;  %v456_v17 = vld [vmem:[%s569_s0 + $0x20] ss:$12 sps:$4 sm:$0xff]  }
   0x7   :  { %396 = vmatpush3.bf16.msra.mxu0 %v437_v3  ;;  %426 = vmatpush3.bf16.msra.mxu1 %v449_v10  ;;  %v447_v18 = vld [vmem:[%s568_s1 + $0x30] sm:$0xff]   ;;  %v448_v19 = vld [vmem:[%s568_s1 + $0x78] sm:$0xff]   ;;  %v451_v21 = vld [vmem:[%s569_s0] ss:$12 sps:$4 sm:$0xff]  }
   0x8   :  { %397 = vmatprep.subr.bf16.mxu0 %v438_v4  ;;  %243 = vmatprep.mubr.bf16.mxu0 %v453_v14  ;;  %v450_v20 = vld [vmem:[%s568_s1 + $0x38] sm:$0xff]   ;;  %v358_v30 = vld [vmem:[%s570_s2] ss:$0 sm:$0xff] }
   0x9   :  { %427 = vmatprep.subr.bf16.mxu1 %v454_v15  ;;  %429 = vmatprep.mubr.msk.bf16.mxu1 %vm204_vm0, %v455_v16  ;;  %v457_v22 = vld [vmem:[%s569_s0 + $0x1c] ss:$12 sps:$4 sm:$0xff]   ;;  %v459_v23 = vld [vmem:[%s569_s0 + $0x18] ss:$12 sps:$4 sm:$0xff]   ;;  %s460_s0 = smov 96  }
   0xb   :  { %398 = vmatpush3.bf16.msra.mxu0 %v439_v5  ;;  %428 = vmatpush3.bf16.msra.mxu1 %v454_v15 }
   0xc   :  { %399 = vmatprep.subr.bf16.mxu0 %v440_v6 }
   0xe   :  { %430 = vmatmul.mubr.msk.bf16.vlgmr.msra.gmra.mrb[0].mxu1 %vm204_vm0, %v456_v17 }
   0xf   :  { %400 = vmatpush3.bf16.msra.mxu0 %v441_v7 }
  0x10   :  { %401 = vmatprep.subr.bf16.mxu0 %v442_v8 }
  0x13   :  { %402 = vmatpush3.bf16.msra.mxu0 %v443_v9 }
  0x14   :  { %403 = vmatprep.subr.bf16.mxu0 %v444_v11 }
  0x17   :  { %404 = vmatpush3.bf16.msra.mxu0 %v445_v12 }
  0x18   :  { %405 = vmatprep.subr.bf16.mxu0 %v446_v13 }
  0x1b   :  { %406 = vmatpush3.bf16.msra.mxu0 %v447_v18 }
  0x1c   :  { %407 = vmatprep.subr.bf16.mxu0 %v448_v19 }
  0x1f   :  { %408 = vmatpush3.bf16.msra.mxu0 %v450_v20 }
  0x22   :  { %244 = vmatmul.mubr.bf16.vlgmr.msra.gmra.mrb[0].mxu0 %v451_v21 }
  0x23   :  { %251 = vmatprep.mubr.bf16.mxu0 %v457_v22 }
  0x2a   :  { %252 = vmatmul.mubr.bf16.gmra.mrb[4].mxu0 %v459_v23 }
  0xe1   :  { %v431_v24 = vpop.f32.mrb[0].mxu1 }
  0xe2   :  { %v294_v25 = vpop.f32.mrb[1].mxu1 }
  0xe3   :  { %v432_v26 = vpop.f32.mrb[2].mxu1 }
  0xe4   :  { %v297_v27 = vpop.f32.mrb[3].mxu1 }
  0xf5   :  { %v409_v28 = vpop.f32.mrb[0].mxu0 }
  0xf6   :  { %v410_v29 = vpop.f32.mrb[1].mxu0 }
  0xf7   :  { %v411_v31 = vadd.f32 %v410_v29, %v409_v28  ;;  %v412_v32 = vpop.f32.mrb[2].mxu0 }
  0xf8   :  { %v413_v33 = vpop.f32.mrb[3].mxu0 }
  0xf9   :  { %v414_v34 = vadd.f32 %v413_v33, %v412_v32  ;;  %v246_v35 = vadd.f32 %v411_v31, %v358_v30 }
  0xfb   :  { %v295_v36 = vadd.f32 %v294_v25, %v246_v35  ;;  %v249_v37 = vadd.f32 %v414_v34, %v358_v30 }
  0xfd   :  { %v309_v38 = vmax.f32 %v295_v36, 0.0  ;;  %v298_v39 = vadd.f32 %v297_v27, %v249_v37  ;;  %v415_v40 = vpop.f32.mrb[4].mxu0 }
  0xfe   :  { %v416_v41 = vpop.f32.mrb[5].mxu0 }
  0xff   :  { %v417_v42 = vadd.f32 %v416_v41, %v415_v40  ;;  %v418_v43 = vpop.f32.mrb[6].mxu0  ;;  %317 = vrot.lane.b32.xlu0 %v309_v38, %s460_s0  ;;  %v310_v45 = vmax.f32 %v298_v39, 0.0 }
 0x100   :  { %v419_v44 = vpop.f32.mrb[7].mxu0 }
 0x101   :  { %v254_v46 = vadd.f32 %v417_v42, %v358_v30  ;;  %v420_v47 = vadd.f32 %v419_v44, %v418_v43 }
 0x103   :  { %v257_v48 = vadd.f32 %v420_v47, %v358_v30  ;;  %319 = vrot.lane.b32.xlu0 %v310_v45, %s460_s0  ;;  %v303_v49 = vadd.f32 %v431_v24, %v254_v46 }
 0x105   :  { %v311_v50 = vmax.f32 %v303_v49, 0.0  ;;  %v306_v51 = vadd.f32 %v432_v26, %v257_v48 }
 0x107   :  { %321 = vrot.lane.b32.xlu1 %v311_v50, %s460_s0  ;;  %v312_v52 = vmax.f32 %v306_v51, 0.0 }
 0x10b   :  { %323 = vrot.lane.b32.xlu1 %v312_v52, %s460_s0 }
 0x171   :  { %v318_v53 = vpop.permute.xlu0 %317 }
 0x172   :  { %v329_v54 = vadd.f32 %v318_v53, %v309_v38 }
 0x174   :  { %v389_v55 = vpack.c.bf16 %v329_v54, %v329_v54 }
 0x175   :  { %v320_v56 = vpop.permute.xlu0 %319 }
 0x176   :  { %350 = vst.msk [vmem:[%s571_s3] sm:$0xf] %vm349_vm1, %v389_v55  ;;  %v330_v57 = vadd.f32 %v320_v56, %v310_v45 }
 0x178   :  { %v390_v58 = vpack.c.bf16 %v330_v57, %v330_v57 }
 0x179   :  { %v322_v59 = vpop.permute.xlu1 %321 }
 0x17a   :  { %351 = vst.msk [vmem:[%s571_s3 + $0x4] sm:$0xf] %vm349_vm1, %v390_v58  ;;  %v331_v60 = vadd.f32 %v322_v59, %v311_v50 }
 0x17c   :  { %v391_v61 = vpack.c.bf16 %v331_v60, %v331_v60 }
 0x17d   :  { %v324_v62 = vpop.permute.xlu1 %323 }
 0x17e   :  { %352 = vst.msk [vmem:[%s571_s3 + $0x8] sm:$0xf] %vm349_vm1, %v391_v61  ;;  %v332_v63 = vadd.f32 %v324_v62, %v312_v52 }
 0x180   :  { %v392_v0 = vpack.c.bf16 %v332_v63, %v332_v63 }
 0x182   :  { %353 = vst.msk [vmem:[%s571_s3 + $0xc] sm:$0xf] %vm349_vm1, %v392_v0 }

// kernel: a_call__.28
= control target key start
LH: loop header
LB: loop body
LE: loop exit
PB: predicated region body
PF: predicated region fallthrough
CT: control target
= control target key end

     0   :  { %vm210_vm0 = vcmask 261120   ;;  %s753_s0 = inlined_call_operand.vmem [shape: bf16[32,288], index: 0, kind: input, shape index: {}]   ;;  %s754_s1 = inlined_call_operand.vmem [shape: bf16[288,96], index: 1, kind: input, shape index: {}]   ;;  %s755_s2 = inlined_call_operand.vmem [shape: f32[1,96], index: 2, kind: input, shape index: {}]   ;;  %s756_s3 = inlined_call_operand.vmem [shape: bf16[32,32], index: 3, kind: input, shape index: {}]   ;;  %s757_s4 = inlined_call_operand.hbm [shape: bf16[32,32], index: 4, kind: output, shape index: {0}]   ;;  %s758_s5 = inlined_call_operand.vmem [shape: bf16[32,32], index: 5, kind: output, shape index: {1}]  }
   0x1   :  { %v542_v0 = vld [vmem:[%s754_s1 + $0x40] sm:$0xff]   ;;  %v544_v2 = vld [vmem:[%s754_s1 + $0x48] sm:$0xff]   ;;  %v546_v4 = vld [vmem:[%s754_s1 + $0x50] sm:$0xff]  }
   0x2   :  { %v543_v1 = vld [vmem:[%s754_s1] sm:$0xff]   ;;  %488 = vmatprep.subr.bf16.mxu0 %v542_v0  ;;  %v545_v3 = vld [vmem:[%s754_s1 + $0x8] sm:$0xff]   ;;  %v547_v5 = vld [vmem:[%s754_s1 + $0x10] sm:$0xff]  }
   0x3   :  { %489 = vmatpush3.bf16.msra.mxu0 %v543_v1  ;;  %v548_v6 = vld [vmem:[%s754_s1 + $0x58] sm:$0xff]   ;;  %v550_v8 = vld [vmem:[%s754_s1 + $0x60] sm:$0xff]   ;;  %v552_v11 = vld [vmem:[%s754_s1 + $0x68] sm:$0xff]  }
   0x4   :  { %490 = vmatprep.subr.bf16.mxu0 %v544_v2  ;;  %v549_v7 = vld [vmem:[%s754_s1 + $0x18] sm:$0xff]   ;;  %v556_v9 = vld [vmem:[%s754_s1 + $0x80] sm:$0xff]   ;;  %v553_v12 = vld [vmem:[%s754_s1 + $0x28] sm:$0xff]  }
   0x5   :  { %v551_v10 = vld [vmem:[%s754_s1 + $0x20] sm:$0xff]   ;;  %520 = vmatprep.subr.bf16.mxu1 %v556_v9  ;;  %v554_v13 = vld [vmem:[%s754_s1 + $0x70] sm:$0xff]   ;;  %v562_v15 = vld [vmem:[%s754_s1 + $0x88] sm:$0xff]  }
   0x6   :  { %521 = vmatpush3.bf16.msra.mxu1 %v556_v9  ;;  %v561_v14 = vld [vmem:[%s753_s0 + $0x4] ss:$12 sps:$4 sm:$0xff]   ;;  %v563_v16 = vld [vmem:[%s753_s0 + $0x8] ss:$12 sps:$4 sm:$0xff]   ;;  %v564_v17 = vld [vmem:[%s753_s0 + $0x20] ss:$12 sps:$4 sm:$0xff]  }
   0x7   :  { %491 = vmatpush3.bf16.msra.mxu0 %v545_v3  ;;  %249 = vmatprep.mubr.bf16.mxu0 %v561_v14  ;;  %v480_v18 = vld [vmem:[%s756_s3] sm:$0xff]   ;;  %v555_v19 = vld [vmem:[%s754_s1 + $0x30] sm:$0xff]   ;;  %v487_v22 = vld [vmem:[%s756_s3 + $0x8] sm:$0xff]  }
   0x8   :  { %492 = vmatprep.subr.bf16.mxu0 %v546_v4  ;;  %522 = vmatprep.subr.bf16.mxu1 %v562_v15  ;;  %v481_v20 = vunpack.c.l.bf16 %v480_v18  ;;  %v482_v21 = vunpack.c.h.bf16 %v480_v18 }
   0x9   :  { %524 = vmatprep.mubr.msk.bf16.mxu1 %vm210_vm0, %v563_v16 }
   0xa   :  { %523 = vmatpush3.bf16.msra.mxu1 %v562_v15 }
   0xb   :  { %493 = vmatpush3.bf16.msra.mxu0 %v547_v5 }
   0xc   :  { %494 = vmatprep.subr.bf16.mxu0 %v548_v6 }
   0xf   :  { %495 = vmatpush3.bf16.msra.mxu0 %v549_v7 }
  0x10   :  { %496 = vmatprep.subr.bf16.mxu0 %v550_v8 }
  0x13   :  { %497 = vmatpush3.bf16.msra.mxu0 %v551_v10 }
  0x14   :  { %498 = vmatprep.subr.bf16.mxu0 %v552_v11 }
  0x17   :  { %499 = vmatpush3.bf16.msra.mxu0 %v553_v12 }
  0x18   :  { %11 = vsyncpa [#allocation3], 0  ;;  %500 = vmatprep.subr.bf16.mxu0 %v554_v13  ;;  %v557_v23 = vld [vmem:[%s754_s1 + $0x78] sm:$0xff]   ;;  %v485_v24 = vunpack.c.l.bf16 %v487_v22  ;;  %v486_v25 = vunpack.c.h.bf16 %v487_v22  ;;  %525 = vmatmul.mubr.msk.bf16.vlgmr.msra.gmra.mrb[0].mxu1 %vm210_vm0, %v564_v17  ;;  %v532_v26 = vpack.i.bf16 %v482_v21, %v481_v20  ;;  %s596_s14 = smov 64   ;;  %v559_v29 = vld [vmem:[%s753_s0] ss:$12 sps:$4 sm:$0xff]  }
  0x19   :  { %v558_v27 = vld [vmem:[%s754_s1 + $0x38] sm:$0xff]   ;;  %v436_v38 = vld [vmem:[%s755_s2] ss:$0 sm:$0xff]  ;;  %vm355_vm1 = vcmask 257024   ;;  %s598_s2 = smov [#allocation2]  }
  0x1a   :  { %533 = vrot.lane.b32.xlu0 %v532_v26, %s596_s14  ;;  %v537_v28 = vpack.i.bf16 %v486_v25, %v485_v24  ;;  %v565_v30 = vld [vmem:[%s753_s0 + $0x1c] ss:$12 sps:$4 sm:$0xff]   ;;  %v567_v31 = vld [vmem:[%s753_s0 + $0x18] ss:$12 sps:$4 sm:$0xff]   ;;  %s597_s0 = smov 96   ;;  %s421_s21 = sshll.u32 %s598_s2, 4  ;;  %s422_s21 = int_to_ptr.vmem [resolvable:$true] %s421_s21 }
  0x1b   :  { %501 = vmatpush3.bf16.msra.mxu0 %v555_v19  ;;  %s572_s26 = scalar_lea.vmem %s422_s21, 256  ;;  %p577_p1 = scmp.lt.s32.totalorder %s422_s21, %s422_s21 }
  0x1c   :  { %502 = vmatprep.subr.bf16.mxu0 %v557_v23  ;;  %p573_p0 = scmp.ne.s32.totalorder %s422_s21, %s572_s26  ;;  %p578_p2 = scmp.lt.s32.totalorder %s572_s26, %s572_s26 }
  0x1e   :  { %538 = vrot.lane.b32.xlu0 %v537_v28, %s596_s14  ;;  %p579_p3 = por %p578_p2, %p577_p1 }
  0x1f   :  { %503 = vmatpush3.bf16.msra.mxu0 %v558_v27 }
  0x20   :  { %p580_p4 = pnand %p579_p3, %p573_p0 }
  0x22   :  { %250 = vmatmul.mubr.bf16.vlgmr.msra.gmra.mrb[0].mxu0 %v559_v29 }
  0x23   :  { %257 = vmatprep.mubr.bf16.mxu0 %v565_v30 }
  0x2a   :  { %258 = vmatmul.mubr.bf16.gmra.mrb[4].mxu0 %v567_v31 }
  0x8c   :  { %v534_v49 = vpop.permute.xlu0 %533 }
  0x90   :  { %v539_v57 = vpop.permute.xlu0 %538 }
  0xeb   :  { %v526_v32 = vpop.f32.mrb[0].mxu1 }
  0xec   :  { %v300_v33 = vpop.f32.mrb[1].mxu1 }
  0xed   :  { %v527_v34 = vpop.f32.mrb[2].mxu1 }
  0xee   :  { %v303_v35 = vpop.f32.mrb[3].mxu1 }
  0xf5   :  { %v504_v36 = vpop.f32.mrb[0].mxu0 }
  0xf6   :  { %v505_v37 = vpop.f32.mrb[1].mxu0 }
  0xf7   :  { %v506_v39 = vadd.f32 %v505_v37, %v504_v36  ;;  %v507_v40 = vpop.f32.mrb[2].mxu0 }
  0xf8   :  { %v508_v41 = vpop.f32.mrb[3].mxu0 }
  0xf9   :  { %v509_v42 = vadd.f32 %v508_v41, %v507_v40  ;;  %v252_v43 = vadd.f32 %v506_v39, %v436_v38 }
  0xfb   :  { %v301_v44 = vadd.f32 %v300_v33, %v252_v43  ;;  %v255_v45 = vadd.f32 %v509_v42, %v436_v38 }
  0xfd   :  { %v315_v46 = vmax.f32 %v301_v44, 0.0  ;;  %v304_v47 = vadd.f32 %v303_v35, %v255_v45  ;;  %v510_v48 = vpop.f32.mrb[4].mxu0 }
  0xfe   :  { %v511_v50 = vpop.f32.mrb[5].mxu0 }
  0xff   :  { %v512_v51 = vadd.f32 %v511_v50, %v510_v48  ;;  %v513_v52 = vpop.f32.mrb[6].mxu0  ;;  %323 = vrot.lane.b32.xlu1 %v315_v46, %s597_s0  ;;  %v316_v54 = vmax.f32 %v304_v47, 0.0  ;;  %v568_v60 = vadd.low.f32.bf16 %v315_v46, %v534_v49 }
 0x100   :  { %v514_v53 = vpop.f32.mrb[7].mxu0 }
 0x101   :  { %v260_v55 = vadd.f32 %v512_v51, %v436_v38  ;;  %v515_v56 = vadd.f32 %v514_v53, %v513_v52  ;;  %v569_v63 = vadd.high.f32.bf16 %v316_v54, %v534_v49  ;;  %v475_v2 = vpack.c.bf16 %v568_v60, %v568_v60 }
 0x103   :  { %v309_v58 = vadd.f32 %v526_v32, %v260_v55  ;;  %v263_v59 = vadd.f32 %v515_v56, %v436_v38  ;;  %325 = vrot.lane.b32.xlu1 %v316_v54, %s597_s0  ;;  %v476_v4 = vpack.c.bf16 %v569_v63, %v569_v63 }
 0x105   :  { %v317_v61 = vmax.f32 %v309_v58, 0.0  ;;  %v312_v62 = vadd.f32 %v527_v34, %v263_v59 }
 0x107   :  { %v318_v0 = vmax.f32 %v312_v62, 0.0  ;;  %327 = vrot.lane.b32.xlu0 %v317_v61, %s597_s0  ;;  %v570_v1 = vadd.low.f32.bf16 %v317_v61, %v539_v57 }
 0x109   :  { %329 = vrot.lane.b32.xlu1 %v318_v0, %s597_s0  ;;  %v571_v3 = vadd.high.f32.bf16 %v318_v0, %v539_v57  ;;  %v477_v5 = vpack.c.bf16 %v570_v1, %v570_v1 }
 0x10b   :  { %400 = vrot.lane.b32.xlu0 %v475_v2, %s596_s14  ;;  %v478_v6 = vpack.c.bf16 %v571_v3, %v571_v3 }
 0x10d   :  { %402 = vrot.lane.b32.xlu1 %v476_v4, %s596_s14 }
 0x10f   :  { %404 = vrot.lane.b32.xlu0 %v477_v5, %s596_s14 }
 0x111   :  { %406 = vrot.lane.b32.xlu1 %v478_v6, %s596_s14 }
 0x171   :  { %v324_v7 = vpop.permute.xlu1 %323 }
 0x172   :  { %v335_v8 = vadd.f32 %v324_v7, %v315_v46 }
 0x174   :  { %v471_v9 = vpack.c.bf16 %v335_v8, %v335_v8 }
 0x175   :  { %v326_v10 = vpop.permute.xlu1 %325 }
 0x176   :  { %356 = vst.msk [vmem:[#allocation2] sm:$0xf] %vm355_vm1, %v471_v9  ;;  %v336_v11 = vadd.f32 %v326_v10, %v316_v54 }
 0x178   :  { %v472_v12 = vpack.c.bf16 %v336_v11, %v336_v11 }
 0x179   :  { %v328_v13 = vpop.permute.xlu0 %327 }
 0x17a   :  { %357 = vst.msk [vmem:[#allocation2 + $0x4] sm:$0xf] %vm355_vm1, %v472_v12  ;;  %v337_v14 = vadd.f32 %v328_v13, %v317_v61 }
 0x17b   :  { %v330_v15 = vpop.permute.xlu1 %329 }
 0x17c   :  { %v473_v16 = vpack.c.bf16 %v337_v14, %v337_v14  ;;  %v338_v17 = vadd.f32 %v330_v15, %v318_v0 }
 0x17d   :  { %v401_v18 = vpop.permute.xlu0 %400 }
 0x17e   :  { %358 = vst.msk [vmem:[#allocation2 + $0x8] sm:$0xf] %vm355_vm1, %v473_v16  ;;  %v474_v19 = vpack.c.bf16 %v338_v17, %v338_v17  ;;  %412 = vst.msk [vmem:[%s758_s5] sm:$0xf] %vm355_vm1, %v401_v18 }
 0x17f   :  { %v403_v20 = vpop.permute.xlu1 %402 }
 0x180   :  { %359 = vst.msk [vmem:[#allocation2 + $0xc] sm:$0xf] %vm355_vm1, %v474_v19  ;;  %413 = vst.msk [vmem:[%s758_s5 + $0x4] sm:$0xf] %vm355_vm1, %v403_v20 }
 0x181   :  { %v405_v21 = vpop.permute.xlu0 %404 }
 0x182   :  { %583 = shalt.err (!%p580_p4)
}
 0x183   :  { %s584_s29 = scalar_lea.hbm %s757_s4, 256 }
 0x184   :  { %p585_p5 = scmp.ne.s32.totalorder %s757_s4, %s584_s29  ;;  %p588_p6 = scmp.lt.u32.totalorder %s584_s29, %s757_s4 }
 0x186   :  { %p590_p7 = pnand %p588_p6, %p585_p5 }
 0x188   :  { %593 = shalt.err (!%p590_p7)
}
 0x189   :  { %s599_s9 = smov 4   ;;  %414 = vst.msk [vmem:[%s758_s5 + $0x8] sm:$0xf] %vm355_vm1, %v405_v21  ;;  %v407_v22 = vpop.permute.xlu1 %406 }
 0x18a   :  { %427 = dma.vmem_to_hbm [thread:$0]  %s422_s21, 256, %s757_s4, [#allocation3], %s596_s14, %s596_s14, %s599_s9  }
 0x18b   :  { %415 = vst.msk [vmem:[%s758_s5 + $0xc] sm:$0xf] %vm355_vm1, %v407_v22 }
 0x18c   :  { %594 = dma.done.wait [#allocation3], 256  }
 0x18d   :  { %595 = vsyncadd [#allocation3], 4294967040 }
 0x18e   :  { %435 = vsyncpa [#allocation3], 1 }

</bundles_post_ra>
